<compile_context>
chip_gen: v5e
topology: v5e:2x2
jax: 0.10.0
libtpu: 0.0.40
codegen_flags: <defaults>
</compile_context>

<pallas_src>
import math

import jax
import jax.numpy as jnp
from jax import lax
from jax.experimental import pallas as pl
from jax.experimental.pallas import tpu as pltpu

_LANE = 128
_SUBLANE = 8


def _round_up(x, m):
    return ((x + m - 1) // m) * m


# ----------------------------------------------------------------------------
# In-kernel helpers
# ----------------------------------------------------------------------------
def _project_inputs(x_ref, wih_ref, bx_ref, gx_ref):
    """gx = reshape(x, (T*B, D)) @ W_ih + bx   (ONE lane-dense matmul).

    x_ref  : (T, B, D)    B is a multiple of 8 -> the reshape is a free relayout
    wih_ref: (D, 3H)      gate-stacked along lanes (r | z | n), H padded to 128
    bx_ref : (1, 3H)      combined bias (b_ir+b_hr | b_iz+b_hz | b_in)
    gx_ref : (T, B, 3H)   VMEM scratch
    """
    T, B, D = x_ref.shape
    H3 = gx_ref.shape[-1]
    x2d = x_ref[...].reshape(T * B, D)
    gx_ref[...] = (
        jnp.dot(x2d, wih_ref[...], preferred_element_type=jnp.float32)
        + bx_ref[...]
    ).reshape(T, B, H3)


def _gru_cell(h_prev, gx_t, w_hh, b_hn, H):
    """One GRU step: a single fused (H, 3H) recurrent matmul on the serial path."""
    gh = jnp.dot(h_prev, w_hh, preferred_element_type=jnp.float32)
    r = jax.nn.sigmoid(gx_t[:, :H] + gh[:, :H])
    z = jax.nn.sigmoid(gx_t[:, H:2 * H] + gh[:, H:2 * H])
    n = jnp.tanh(gx_t[:, 2 * H:] + r * (gh[:, 2 * H:] + b_hn))
    return (1.0 - z) * n + z * h_prev


# ----------------------------------------------------------------------------
# Kernels
# ----------------------------------------------------------------------------
def _gru_layer_kernel(x_ref, wih_ref, whh_ref, bx_ref, bhn_ref, out_ref, gx_ref):
    """One bidirectional GRU layer.  Grid axis 0 = direction (0 fwd, 1 bwd).

    out_ref is this direction's lane-adjacent half of the (T, B, 2H) layer
    output; both directions write in forward time order (bwd writes its state
    straight at the reversed position), so no concat / reverse is needed.
    """
    T, B, _ = x_ref.shape
    H = whh_ref.shape[0]
    d = pl.program_id(0)

    _project_inputs(x_ref, wih_ref, bx_ref, gx_ref)

    # Hoisted loop invariants.
    w_hh = whh_ref[...]
    b_hn = jnp.broadcast_to(bhn_ref[...], (B, H))
    h0 = jnp.zeros((B, H), jnp.float32)

    @pl.when(d == 0)
    def _fwd():
        h = h0
        for t in range(T):            # static t -> static addresses, unmasked stores
            h = _gru_cell(h, gx_ref[t], w_hh, b_hn, H)
            out_ref[t] = h

    @pl.when(d == 1)
    def _bwd():
        h = h0
        for s in range(T):
            t = T - 1 - s             # static reversed position
            h = _gru_cell(h, gx_ref[t], w_hh, b_hn, H)
            out_ref[t] = h


def _gru_head_kernel(x_ref, wih_ref, whh_ref, bx_ref, bhn_ref, wlin_ref,
                     head_ref, gx_ref):
    """Last bidirectional GRU layer fused with the Linear head.

    Only out[:, -1, :] feeds the head, so no per-timestep output is written.
    fwd: head hidden = final loop carry.  bwd: head hidden = hidden after its
    FIRST step (time T-1) -> a single GRU step, no hoisted projection at all.
    """
    T, B, _ = x_ref.shape
    H = whh_ref.shape[0]
    d = pl.program_id(0)

    w_hh = whh_ref[...]
    b_hn = jnp.broadcast_to(bhn_ref[...], (B, H))
    h0 = jnp.zeros((B, H), jnp.float32)

    @pl.when(d == 0)
    def _fwd():
        _project_inputs(x_ref, wih_ref, bx_ref, gx_ref)
        h = h0
        for t in range(T):
            h = _gru_cell(h, gx_ref[t], w_hh, b_hn, H)
        head_ref[...] = jnp.dot(h, wlin_ref[...],
                                preferred_element_type=jnp.float32)

    @pl.when(d == 1)
    def _bwd():
        gx_last = (jnp.dot(x_ref[T - 1], wih_ref[...],
                           preferred_element_type=jnp.float32) + bx_ref[...])
        h = _gru_cell(h0, gx_last, w_hh, b_hn, H)
        head_ref[...] = jnp.dot(h, wlin_ref[...],
                                preferred_element_type=jnp.float32)


# ----------------------------------------------------------------------------
# pallas_call wrappers
# ----------------------------------------------------------------------------
def _compiler_params():
    try:
        vmem = pltpu.get_tpu_info().vmem_capacity_bytes
        limit = int(vmem * 0.5)       # headroom for double-buffered in/out blocks
    except Exception:                 # older jax / query unavailable
        limit = 32 * 1024 * 1024
    return pltpu.CompilerParams(
        dimension_semantics=("parallel",),   # direction axis -> both TCs on v7x
        vmem_limit_bytes=limit,
    )


def _gru_layer(x_tm, w_ih, w_hh, b_x, b_hn):
    """x_tm: (T, B, D) time-major.  Returns (T, B, 2H): fwd lanes [0:H], bwd [H:2H]."""
    T, B, D = x_tm.shape
    H = w_hh.shape[1]
    H3 = w_hh.shape[2]
    grid_spec = pltpu.PrefetchScalarGridSpec(
        num_scalar_prefetch=0,
        grid=(2,),
        in_specs=[
            pl.BlockSpec((T, B, D), lambda d: (0, 0, 0)),
            pl.BlockSpec((None, D, H3), lambda d: (d, 0, 0)),
            pl.BlockSpec((None, H, H3), lambda d: (d, 0, 0)),
            pl.BlockSpec((None, 1, H3), lambda d: (d, 0, 0)),
            pl.BlockSpec((None, 1, H), lambda d: (d, 0, 0)),
        ],
        # Each direction writes its lane-adjacent half of the (T, B, 2H) output:
        # no inter-layer jnp.concatenate / extra HBM round trip.
        out_specs=pl.BlockSpec((T, B, H), lambda d: (0, 0, d)),
        scratch_shapes=[pltpu.VMEM((T, B, H3), jnp.float32)],
    )
    return pl.pallas_call(
        _gru_layer_kernel,
        out_shape=jax.ShapeDtypeStruct((T, B, 2 * H), jnp.float32),
        grid_spec=grid_spec,
        compiler_params=_compiler_params(),
    )(x_tm, w_ih, w_hh, b_x, b_hn)


def _gru_head(x_tm, w_ih, w_hh, b_x, b_hn, w_lin_split):
    """Last layer + fused linear head.  Returns (2, B, F_out) direction partials."""
    T, B, D = x_tm.shape
    H = w_hh.shape[1]
    H3 = w_hh.shape[2]
    F = w_lin_split.shape[-1]
    grid_spec = pltpu.PrefetchScalarGridSpec(
        num_scalar_prefetch=0,
        grid=(2,),
        in_specs=[
            pl.BlockSpec((T, B, D), lambda d: (0, 0, 0)),
            pl.BlockSpec((None, D, H3), lambda d: (d, 0, 0)),
            pl.BlockSpec((None, H, H3), lambda d: (d, 0, 0)),
            pl.BlockSpec((None, 1, H3), lambda d: (d, 0, 0)),
            pl.BlockSpec((None, 1, H), lambda d: (d, 0, 0)),
            pl.BlockSpec((None, H, F), lambda d: (d, 0, 0)),
        ],
        out_specs=pl.BlockSpec((None, B, F), lambda d: (d, 0, 0)),
        scratch_shapes=[pltpu.VMEM((T, B, H3), jnp.float32)],
    )
    return pl.pallas_call(
        _gru_head_kernel,
        out_shape=jax.ShapeDtypeStruct((2, B, F), jnp.float32),
        grid_spec=grid_spec,
        compiler_params=_compiler_params(),
    )(x_tm, w_ih, w_hh, b_x, b_hn, w_lin_split)


# ----------------------------------------------------------------------------
# Forward pass (matches PyTorch BiGRU.forward in eval mode)
# ----------------------------------------------------------------------------
@jax.jit
def bigru_forward(x, params):
    """x: (B, T, features) batch-first.  Returns (B, forecast_length)."""
    B, T, _ = x.shape
    B_pad = _round_up(max(B, _SUBLANE), _SUBLANE)
    if B_pad != B:
        x = jnp.pad(x, ((0, B_pad - B), (0, 0), (0, 0)))
    h = jnp.transpose(x, (1, 0, 2))            # single batch-first -> time-major relayout

    gru_layers = params["gru"]
    for layer_params in gru_layers[:-1]:
        h = _gru_layer(h, *layer_params)       # (T, B_pad, 2H), lane-adjacent halves

    w_lin_split, b_lin = params["linear"]
    head = _gru_head(h, *gru_layers[-1], w_lin_split)   # (2, B_pad, F_out)
    y = head[0] + head[1] + b_lin                        # combine dir partials + bias
    return y[:B]


# ----------------------------------------------------------------------------
# Parameters: PyTorch-style init, then conversion to the padded kernel layout
# ----------------------------------------------------------------------------
def init_torch_style_params(key, features_count, hidden_size, n_layers, forecast_length):
    """PyTorch nn.GRU / nn.Linear layout, uniform(-1/sqrt(fan), 1/sqrt(fan))."""
    k = 1.0 / math.sqrt(hidden_size)
    params = {"gru": [], "linear": None}
    for layer in range(n_layers):
        d_in = features_count if layer == 0 else 2 * hidden_size
        dirs = []
        for _direction in range(2):
            key, k1, k2, k3, k4 = jax.random.split(key, 5)
            w_ih = jax.random.uniform(k1, (3 * hidden_size, d_in), jnp.float32, -k, k)
            w_hh = jax.random.uniform(k2, (3 * hidden_size, hidden_size), jnp.float32, -k, k)
            b_ih = jax.random.uniform(k3, (3 * hidden_size,), jnp.float32, -k, k)
            b_hh = jax.random.uniform(k4, (3 * hidden_size,), jnp.float32, -k, k)
            dirs.append((w_ih, w_hh, b_ih, b_hh))
        params["gru"].append(dirs)
    key, k5, k6 = jax.random.split(key, 3)
    kl = 1.0 / math.sqrt(2 * hidden_size)
    w_lin = jax.random.uniform(k5, (forecast_length, 2 * hidden_size), jnp.float32, -kl, kl)
    b_lin = jax.random.uniform(k6, (forecast_length,), jnp.float32, -kl, kl)
    params["linear"] = (w_lin, b_lin)
    return params


def prepare_params(torch_params, hidden_size):
    """Convert PyTorch-layout weights to the padded, gate-stacked kernel layout.

    H is padded to a 128-lane multiple (Hp); gates stacked along lanes (r|z|n).
    Padded rows/cols/bias entries are zero, so padded hidden lanes stay exactly 0.
    """
    H = hidden_size
    Hp = _round_up(H, _LANE)
    layers = []
    for layer_idx, dirs in enumerate(torch_params["gru"]):
        d_in_raw = dirs[0][0].shape[1]
        d_in_pad = d_in_raw if layer_idx == 0 else 2 * Hp
        wih_s, whh_s, bx_s, bhn_s = [], [], [], []
        for (w_ih, w_hh, b_ih, b_hh) in dirs:
            wih_g = jnp.zeros((d_in_pad, 3 * Hp), jnp.float32)
            whh_g = jnp.zeros((Hp, 3 * Hp), jnp.float32)
            bx_g = jnp.zeros((3 * Hp,), jnp.float32)
            for g in range(3):
                w_ih_gate = w_ih[g * H:(g + 1) * H, :].T        # (d_in_raw, H)
                w_hh_gate = w_hh[g * H:(g + 1) * H, :].T        # (H, H)
                if layer_idx == 0:
                    wih_g = wih_g.at[:, g * Hp:g * Hp + H].set(w_ih_gate)
                else:
                    # input lanes: fwd hidden at rows [0:H], bwd at [Hp:Hp+H]
                    wih_g = wih_g.at[0:H, g * Hp:g * Hp + H].set(w_ih_gate[:H])
                    wih_g = wih_g.at[Hp:Hp + H, g * Hp:g * Hp + H].set(w_ih_gate[H:])
                whh_g = whh_g.at[0:H, g * Hp:g * Hp + H].set(w_hh_gate)
                if g < 2:   # fold b_h{r,z} into the hoisted projection
                    bx_g = bx_g.at[g * Hp:g * Hp + H].set(
                        b_ih[g * H:(g + 1) * H] + b_hh[g * H:(g + 1) * H])
                else:       # keep only b_hn in-loop (inside r * (.))
                    bx_g = bx_g.at[g * Hp:g * Hp + H].set(b_ih[g * H:(g + 1) * H])
            bhn_g = jnp.zeros((Hp,), jnp.float32).at[0:H].set(b_hh[2 * H:3 * H])
            wih_s.append(wih_g)
            whh_s.append(whh_g)
            bx_s.append(bx_g.reshape(1, 3 * Hp))
            bhn_s.append(bhn_g.reshape(1, Hp))
        layers.append((jnp.stack(wih_s), jnp.stack(whh_s),
                       jnp.stack(bx_s), jnp.stack(bhn_s)))
    w_lin, b_lin = torch_params["linear"]                   # (F, 2H), (F,)
    F = w_lin.shape[0]
    w_lin_split = jnp.zeros((2, Hp, F), jnp.float32)
    w_lin_split = w_lin_split.at[0, :H, :].set(w_lin[:, :H].T)   # fwd half
    w_lin_split = w_lin_split.at[1, :H, :].set(w_lin[:, H:].T)   # bwd half
    return {"gru": layers, "linear": (w_lin_split, b_lin.reshape(1, F))}


# ----------------------------------------------------------------------------
# Pure-JAX reference (PyTorch eval-mode BiGRU semantics)
# ----------------------------------------------------------------------------
def bigru_reference(x, torch_params, hidden_size):
    HIGH = jax.lax.Precision.HIGHEST
    H = hidden_size
    out = x
    for dirs in torch_params["gru"]:
        per_dir = []
        for d, (w_ih, w_hh, b_ih, b_hh) in enumerate(dirs):
            seq = out if d == 0 else out[:, ::-1]
            B, T, _ = seq.shape
            h = jnp.zeros((B, H), jnp.float32)
            hs = []
            for t in range(T):
                gi = jnp.dot(seq[:, t], w_ih.T, precision=HIGH) + b_ih
                gh = jnp.dot(h, w_hh.T, precision=HIGH) + b_hh
                i_r, i_z, i_n = jnp.split(gi, 3, axis=1)
                h_r, h_z, h_n = jnp.split(gh, 3, axis=1)
                r = jax.nn.sigmoid(i_r + h_r)
                z = jax.nn.sigmoid(i_z + h_z)
                n = jnp.tanh(i_n + r * h_n)
                h = (1.0 - z) * n + z * h
                hs.append(h)
            hs = jnp.stack(hs, axis=1)
            if d == 1:
                hs = hs[:, ::-1]
            per_dir.append(hs)
        out = jnp.concatenate(per_dir, axis=-1)
    w_lin, b_lin = torch_params["linear"]
    return jnp.dot(out[:, -1], w_lin.T, precision=HIGH) + b_lin


# ----------------------------------------------------------------------------
# Main
# ----------------------------------------------------------------------------
if __name__ == "__main__":
    BATCH = 2
    SEQ = 8
    FEATURES = 8
    HIDDEN = 16
    N_LAYERS = 2
    FORECAST = 1

    key = jax.random.PRNGKey(0)
    key, xkey = jax.random.split(key)
    x = jax.random.normal(xkey, (BATCH, SEQ, FEATURES), dtype=jnp.float32)

    torch_params = init_torch_style_params(key, FEATURES, HIDDEN, N_LAYERS, FORECAST)
    params = prepare_params(torch_params, HIDDEN)

    out = jax.block_until_ready(bigru_forward(x, params))

    assert out.shape == (BATCH, FORECAST), out.shape
    assert out.dtype == jnp.float32
    assert bool(jnp.all(jnp.isfinite(out)))

    ref = bigru_reference(x, torch_params, HIDDEN)
    assert bool(jnp.allclose(out, ref, atol=1e-2, rtol=1e-2)), (out, ref)

    print("KERNEL_OK")
</pallas_src>

<mosaic_0001>
module attributes {stable_mosaic.version = 11 : i64} {
  func.func @_gru_layer_kernel(%arg0: i32, %arg1: memref<8x8x8xf32, #tpu.memory_space<vmem>>, %arg2: memref<1x8x384xf32, #tpu.memory_space<vmem>>, %arg3: memref<1x128x384xf32, #tpu.memory_space<vmem>>, %arg4: memref<1x1x384xf32, #tpu.memory_space<vmem>>, %arg5: memref<1x1x128xf32, #tpu.memory_space<vmem>>, %arg6: memref<8x8x128xf32, #tpu.memory_space<vmem>>, %arg7: memref<8x8x384xf32, #tpu.memory_space<vmem>>) attributes {dimension_semantics = [#tpu.dimension_semantics<parallel>], iteration_bounds = array<i64: 2>, scalar_prefetch = 0 : i64, scratch_operands = 1 : i64, tpu.core_type = #tpu.core_type<tc>, window_params = [{pipeline_mode = #tpu.pipeline_mode<synchronous>, transform_indices = @transform_0, window_bounds = array<i64: 8, 8, 8>}, {transform_indices = @transform_1, window_bounds = array<i64: 1, 8, 384>}, {transform_indices = @transform_2, window_bounds = array<i64: 1, 128, 384>}, {transform_indices = @transform_3, window_bounds = array<i64: 1, 1, 384>}, {transform_indices = @transform_4, window_bounds = array<i64: 1, 1, 128>}, {transform_indices = @transform_5, window_bounds = array<i64: 8, 8, 128>}]} {
    %c0 = arith.constant 0 : index
    %c0_0 = arith.constant 0 : index
    %c0_1 = arith.constant 0 : index
    %0 = vector.load %arg1[%c0, %c0_0, %c0_1] : memref<8x8x8xf32, #tpu.memory_space<vmem>>, vector<8x8x8xf32>
    %1 = vector.shape_cast %0 : vector<8x8x8xf32> to vector<64x8xf32>
    %c0_2 = arith.constant 0 : index
    %c0_3 = arith.constant 0 : index
    %c0_4 = arith.constant 0 : index
    %2 = vector.load %arg2[%c0_2, %c0_3, %c0_4] : memref<1x8x384xf32, #tpu.memory_space<vmem>>, vector<1x8x384xf32>
    %3 = vector.shape_cast %2 : vector<1x8x384xf32> to vector<8x384xf32>
    %cst = arith.constant dense<0.000000e+00> : vector<64x384xf32>
    %4 = tpu.matmul %1, %3, %cst {dimension_numbers = #tpu.dot_dimension_numbers<[1], [0], [0], [1], [0, 0, 1, 1], [], []>} : vector<64x8xf32>, vector<8x384xf32>, vector<64x384xf32> -> vector<64x384xf32>
    %c0_5 = arith.constant 0 : index
    %c0_6 = arith.constant 0 : index
    %c0_7 = arith.constant 0 : index
    %5 = vector.load %arg4[%c0_5, %c0_6, %c0_7] : memref<1x1x384xf32, #tpu.memory_space<vmem>>, vector<1x1x384xf32>
    %6 = vector.shape_cast %5 : vector<1x1x384xf32> to vector<1x384xf32>
    %7 = vector.broadcast %6 : vector<1x384xf32> to vector<64x384xf32>
    %8 = arith.addf %4, %7 : vector<64x384xf32>
    %9 = vector.shape_cast %8 : vector<64x384xf32> to vector<8x8x384xf32>
    %c0_8 = arith.constant 0 : index
    %c0_9 = arith.constant 0 : index
    %c0_10 = arith.constant 0 : index
    %10 = vector.load %arg7[%c0_8, %c0_9, %c0_10] : memref<8x8x384xf32, #tpu.memory_space<vmem>>, vector<8x8x384xf32>
    tpu.vector_store %arg7[%c0_8, %c0_9, %c0_10], %9 {strides = array<i32>} : memref<8x8x384xf32, #tpu.memory_space<vmem>>, vector<8x8x384xf32>,
    %c0_11 = arith.constant 0 : index
    %c0_12 = arith.constant 0 : index
    %c0_13 = arith.constant 0 : index
    %11 = vector.load %arg3[%c0_11, %c0_12, %c0_13] : memref<1x128x384xf32, #tpu.memory_space<vmem>>, vector<1x128x384xf32>
    %12 = vector.shape_cast %11 : vector<1x128x384xf32> to vector<128x384xf32>
    %c0_14 = arith.constant 0 : index
    %c0_15 = arith.constant 0 : index
    %c0_16 = arith.constant 0 : index
    %13 = vector.load %arg5[%c0_14, %c0_15, %c0_16] : memref<1x1x128xf32, #tpu.memory_space<vmem>>, vector<1x1x128xf32>
    %14 = vector.shape_cast %13 : vector<1x1x128xf32> to vector<1x128xf32>
    %15 = vector.shape_cast %14 : vector<1x128xf32> to vector<1x128xf32>
    %16 = vector.broadcast %15 : vector<1x128xf32> to vector<8x128xf32>
    %cst_17 = arith.constant 0.000000e+00 : f32
    %17 = vector.broadcast %cst_17 : f32 to vector<8x128xf32>
    %c0_i32 = arith.constant 0 : i32
    %18 = arith.cmpi eq, %arg0, %c0_i32 : i32
    %19 = arith.extui %18 : i1 to i32
    %c0_i32_18 = arith.constant 0 : i32
    %20 = arith.cmpi ne, %19, %c0_i32_18 : i32
    scf.if %20 {
      %c0_20 = arith.constant 0 : index
      %c0_21 = arith.constant 0 : index
      %c0_22 = arith.constant 0 : index
      %24 = vector.load %arg7[%c0_20, %c0_21, %c0_22] : memref<8x8x384xf32, #tpu.memory_space<vmem>>, vector<1x8x384xf32>
      %25 = vector.shape_cast %24 : vector<1x8x384xf32> to vector<8x384xf32>
      %cst_23 = arith.constant dense<0.000000e+00> : vector<8x384xf32>
      %26 = tpu.matmul %17, %12, %cst_23 {dimension_numbers = #tpu.dot_dimension_numbers<[1], [0], [0], [1], [0, 0, 1, 1], [], []>} : vector<8x128xf32>, vector<128x384xf32>, vector<8x384xf32> -> vector<8x384xf32>
      %27 = vector.extract_strided_slice %25 {offsets = [0, 0], sizes = [8, 128], strides = [1, 1]} : vector<8x384xf32> to vector<8x128xf32>
      %28 = vector.extract_strided_slice %26 {offsets = [0, 0], sizes = [8, 128], strides = [1, 1]} : vector<8x384xf32> to vector<8x128xf32>
      %29 = arith.addf %27, %28 : vector<8x128xf32>
      %30 = arith.negf %29 : vector<8x128xf32>
      %31 = math.exp %30 : vector<8x128xf32>
      %cst_24 = arith.constant 1.000000e+00 : f32
      %32 = vector.broadcast %cst_24 : f32 to vector<8x128xf32>
      %33 = arith.addf %32, %31 : vector<8x128xf32>
      %34 = arith.divf %32, %33 : vector<8x128xf32>
      %35 = vector.extract_strided_slice %25 {offsets = [0, 128], sizes = [8, 128], strides = [1, 1]} : vector<8x384xf32> to vector<8x128xf32>
      %36 = vector.extract_strided_slice %26 {offsets = [0, 128], sizes = [8, 128], strides = [1, 1]} : vector<8x384xf32> to vector<8x128xf32>
      %37 = arith.addf %35, %36 : vector<8x128xf32>
      %38 = arith.negf %37 : vector<8x128xf32>
      %39 = math.exp %38 : vector<8x128xf32>
      %cst_25 = arith.constant 1.000000e+00 : f32
      %40 = vector.broadcast %cst_25 : f32 to vector<8x128xf32>
      %41 = arith.addf %40, %39 : vector<8x128xf32>
      %42 = arith.divf %40, %41 : vector<8x128xf32>
      %43 = vector.extract_strided_slice %25 {offsets = [0, 256], sizes = [8, 128], strides = [1, 1]} : vector<8x384xf32> to vector<8x128xf32>
      %44 = vector.extract_strided_slice %26 {offsets = [0, 256], sizes = [8, 128], strides = [1, 1]} : vector<8x384xf32> to vector<8x128xf32>
      %45 = arith.addf %44, %16 : vector<8x128xf32>
      %46 = arith.mulf %34, %45 : vector<8x128xf32>
      %47 = arith.addf %43, %46 : vector<8x128xf32>
      %48 = math.tanh %47 : vector<8x128xf32>
      %cst_26 = arith.constant 1.000000e+00 : f32
      %49 = vector.broadcast %cst_26 : f32 to vector<8x128xf32>
      %50 = arith.subf %49, %42 : vector<8x128xf32>
      %51 = arith.mulf %50, %48 : vector<8x128xf32>
      %52 = arith.mulf %42, %17 : vector<8x128xf32>
      %53 = arith.addf %51, %52 : vector<8x128xf32>
      %c0_27 = arith.constant 0 : index
      %c0_28 = arith.constant 0 : index
      %c0_29 = arith.constant 0 : index
      %54 = vector.load %arg6[%c0_27, %c0_28, %c0_29] : memref<8x8x128xf32, #tpu.memory_space<vmem>>, vector<1x8x128xf32>
      %55 = vector.shape_cast %54 : vector<1x8x128xf32> to vector<8x128xf32>
      %56 = vector.shape_cast %53 : vector<8x128xf32> to vector<1x8x128xf32>
      tpu.vector_store %arg6[%c0_27, %c0_28, %c0_29], %56 {strides = array<i32>} : memref<8x8x128xf32, #tpu.memory_space<vmem>>, vector<1x8x128xf32>,
      %c1 = arith.constant 1 : index
      %c0_30 = arith.constant 0 : index
      %c0_31 = arith.constant 0 : index
      %57 = vector.load %arg7[%c1, %c0_30, %c0_31] : memref<8x8x384xf32, #tpu.memory_space<vmem>>, vector<1x8x384xf32>
      %58 = vector.shape_cast %57 : vector<1x8x384xf32> to vector<8x384xf32>
      %cst_32 = arith.constant dense<0.000000e+00> : vector<8x384xf32>
      %59 = tpu.matmul %53, %12, %cst_32 {dimension_numbers = #tpu.dot_dimension_numbers<[1], [0], [0], [1], [0, 0, 1, 1], [], []>} : vector<8x128xf32>, vector<128x384xf32>, vector<8x384xf32> -> vector<8x384xf32>
      %60 = vector.extract_strided_slice %58 {offsets = [0, 0], sizes = [8, 128], strides = [1, 1]} : vector<8x384xf32> to vector<8x128xf32>
      %61 = vector.extract_strided_slice %59 {offsets = [0, 0], sizes = [8, 128], strides = [1, 1]} : vector<8x384xf32> to vector<8x128xf32>
      %62 = arith.addf %60, %61 : vector<8x128xf32>
      %63 = arith.negf %62 : vector<8x128xf32>
      %64 = math.exp %63 : vector<8x128xf32>
      %cst_33 = arith.constant 1.000000e+00 : f32
      %65 = vector.broadcast %cst_33 : f32 to vector<8x128xf32>
      %66 = arith.addf %65, %64 : vector<8x128xf32>
      %67 = arith.divf %65, %66 : vector<8x128xf32>
      %68 = vector.extract_strided_slice %58 {offsets = [0, 128], sizes = [8, 128], strides = [1, 1]} : vector<8x384xf32> to vector<8x128xf32>
      %69 = vector.extract_strided_slice %59 {offsets = [0, 128], sizes = [8, 128], strides = [1, 1]} : vector<8x384xf32> to vector<8x128xf32>
      %70 = arith.addf %68, %69 : vector<8x128xf32>
      %71 = arith.negf %70 : vector<8x128xf32>
      %72 = math.exp %71 : vector<8x128xf32>
      %cst_34 = arith.constant 1.000000e+00 : f32
      %73 = vector.broadcast %cst_34 : f32 to vector<8x128xf32>
      %74 = arith.addf %73, %72 : vector<8x128xf32>
      %75 = arith.divf %73, %74 : vector<8x128xf32>
      %76 = vector.extract_strided_slice %58 {offsets = [0, 256], sizes = [8, 128], strides = [1, 1]} : vector<8x384xf32> to vector<8x128xf32>
      %77 = vector.extract_strided_slice %59 {offsets = [0, 256], sizes = [8, 128], strides = [1, 1]} : vector<8x384xf32> to vector<8x128xf32>
      %78 = arith.addf %77, %16 : vector<8x128xf32>
      %79 = arith.mulf %67, %78 : vector<8x128xf32>
      %80 = arith.addf %76, %79 : vector<8x128xf32>
      %81 = math.tanh %80 : vector<8x128xf32>
      %cst_35 = arith.constant 1.000000e+00 : f32
      %82 = vector.broadcast %cst_35 : f32 to vector<8x128xf32>
      %83 = arith.subf %82, %75 : vector<8x128xf32>
      %84 = arith.mulf %83, %81 : vector<8x128xf32>
      %85 = arith.mulf %75, %53 : vector<8x128xf32>
      %86 = arith.addf %84, %85 : vector<8x128xf32>
      %c1_36 = arith.constant 1 : index
      %c0_37 = arith.constant 0 : index
      %c0_38 = arith.constant 0 : index
      %87 = vector.load %arg6[%c1_36, %c0_37, %c0_38] : memref<8x8x128xf32, #tpu.memory_space<vmem>>, vector<1x8x128xf32>
      %88 = vector.shape_cast %87 : vector<1x8x128xf32> to vector<8x128xf32>
      %89 = vector.shape_cast %86 : vector<8x128xf32> to vector<1x8x128xf32>
      tpu.vector_store %arg6[%c1_36, %c0_37, %c0_38], %89 {strides = array<i32>} : memref<8x8x128xf32, #tpu.memory_space<vmem>>, vector<1x8x128xf32>,
      %c2 = arith.constant 2 : index
      %c0_39 = arith.constant 0 : index
      %c0_40 = arith.constant 0 : index
      %90 = vector.load %arg7[%c2, %c0_39, %c0_40] : memref<8x8x384xf32, #tpu.memory_space<vmem>>, vector<1x8x384xf32>
      %91 = vector.shape_cast %90 : vector<1x8x384xf32> to vector<8x384xf32>
      %cst_41 = arith.constant dense<0.000000e+00> : vector<8x384xf32>
      %92 = tpu.matmul %86, %12, %cst_41 {dimension_numbers = #tpu.dot_dimension_numbers<[1], [0], [0], [1], [0, 0, 1, 1], [], []>} : vector<8x128xf32>, vector<128x384xf32>, vector<8x384xf32> -> vector<8x384xf32>
      %93 = vector.extract_strided_slice %91 {offsets = [0, 0], sizes = [8, 128], strides = [1, 1]} : vector<8x384xf32> to vector<8x128xf32>
      %94 = vector.extract_strided_slice %92 {offsets = [0, 0], sizes = [8, 128], strides = [1, 1]} : vector<8x384xf32> to vector<8x128xf32>
      %95 = arith.addf %93, %94 : vector<8x128xf32>
      %96 = arith.negf %95 : vector<8x128xf32>
      %97 = math.exp %96 : vector<8x128xf32>
      %cst_42 = arith.constant 1.000000e+00 : f32
      %98 = vector.broadcast %cst_42 : f32 to vector<8x128xf32>
      %99 = arith.addf %98, %97 : vector<8x128xf32>
      %100 = arith.divf %98, %99 : vector<8x128xf32>
      %101 = vector.extract_strided_slice %91 {offsets = [0, 128], sizes = [8, 128], strides = [1, 1]} : vector<8x384xf32> to vector<8x128xf32>
      %102 = vector.extract_strided_slice %92 {offsets = [0, 128], sizes = [8, 128], strides = [1, 1]} : vector<8x384xf32> to vector<8x128xf32>
      %103 = arith.addf %101, %102 : vector<8x128xf32>
      %104 = arith.negf %103 : vector<8x128xf32>
      %105 = math.exp %104 : vector<8x128xf32>
      %cst_43 = arith.constant 1.000000e+00 : f32
      %106 = vector.broadcast %cst_43 : f32 to vector<8x128xf32>
      %107 = arith.addf %106, %105 : vector<8x128xf32>
      %108 = arith.divf %106, %107 : vector<8x128xf32>
      %109 = vector.extract_strided_slice %91 {offsets = [0, 256], sizes = [8, 128], strides = [1, 1]} : vector<8x384xf32> to vector<8x128xf32>
      %110 = vector.extract_strided_slice %92 {offsets = [0, 256], sizes = [8, 128], strides = [1, 1]} : vector<8x384xf32> to vector<8x128xf32>
      %111 = arith.addf %110, %16 : vector<8x128xf32>
      %112 = arith.mulf %100, %111 : vector<8x128xf32>
      %113 = arith.addf %109, %112 : vector<8x128xf32>
      %114 = math.tanh %113 : vector<8x128xf32>
      %cst_44 = arith.constant 1.000000e+00 : f32
      %115 = vector.broadcast %cst_44 : f32 to vector<8x128xf32>
      %116 = arith.subf %115, %108 : vector<8x128xf32>
      %117 = arith.mulf %116, %114 : vector<8x128xf32>
      %118 = arith.mulf %108, %86 : vector<8x128xf32>
      %119 = arith.addf %117, %118 : vector<8x128xf32>
      %c2_45 = arith.constant 2 : index
      %c0_46 = arith.constant 0 : index
      %c0_47 = arith.constant 0 : index
      %120 = vector.load %arg6[%c2_45, %c0_46, %c0_47] : memref<8x8x128xf32, #tpu.memory_space<vmem>>, vector<1x8x128xf32>
      %121 = vector.shape_cast %120 : vector<1x8x128xf32> to vector<8x128xf32>
      %122 = vector.shape_cast %119 : vector<8x128xf32> to vector<1x8x128xf32>
      tpu.vector_store %arg6[%c2_45, %c0_46, %c0_47], %122 {strides = array<i32>} : memref<8x8x128xf32, #tpu.memory_space<vmem>>, vector<1x8x128xf32>,
      %c3 = arith.constant 3 : index
      %c0_48 = arith.constant 0 : index
      %c0_49 = arith.constant 0 : index
      %123 = vector.load %arg7[%c3, %c0_48, %c0_49] : memref<8x8x384xf32, #tpu.memory_space<vmem>>, vector<1x8x384xf32>
      %124 = vector.shape_cast %123 : vector<1x8x384xf32> to vector<8x384xf32>
      %cst_50 = arith.constant dense<0.000000e+00> : vector<8x384xf32>
      %125 = tpu.matmul %119, %12, %cst_50 {dimension_numbers = #tpu.dot_dimension_numbers<[1], [0], [0], [1], [0, 0, 1, 1], [], []>} : vector<8x128xf32>, vector<128x384xf32>, vector<8x384xf32> -> vector<8x384xf32>
      %126 = vector.extract_strided_slice %124 {offsets = [0, 0], sizes = [8, 128], strides = [1, 1]} : vector<8x384xf32> to vector<8x128xf32>
      %127 = vector.extract_strided_slice %125 {offsets = [0, 0], sizes = [8, 128], strides = [1, 1]} : vector<8x384xf32> to vector<8x128xf32>
      %128 = arith.addf %126, %127 : vector<8x128xf32>
      %129 = arith.negf %128 : vector<8x128xf32>
      %130 = math.exp %129 : vector<8x128xf32>
      %cst_51 = arith.constant 1.000000e+00 : f32
      %131 = vector.broadcast %cst_51 : f32 to vector<8x128xf32>
      %132 = arith.addf %131, %130 : vector<8x128xf32>
      %133 = arith.divf %131, %132 : vector<8x128xf32>
      %134 = vector.extract_strided_slice %124 {offsets = [0, 128], sizes = [8, 128], strides = [1, 1]} : vector<8x384xf32> to vector<8x128xf32>
      %135 = vector.extract_strided_slice %125 {offsets = [0, 128], sizes = [8, 128], strides = [1, 1]} : vector<8x384xf32> to vector<8x128xf32>
      %136 = arith.addf %134, %135 : vector<8x128xf32>
      %137 = arith.negf %136 : vector<8x128xf32>
      %138 = math.exp %137 : vector<8x128xf32>
      %cst_52 = arith.constant 1.000000e+00 : f32
      %139 = vector.broadcast %cst_52 : f32 to vector<8x128xf32>
      %140 = arith.addf %139, %138 : vector<8x128xf32>
      %141 = arith.divf %139, %140 : vector<8x128xf32>
      %142 = vector.extract_strided_slice %124 {offsets = [0, 256], sizes = [8, 128], strides = [1, 1]} : vector<8x384xf32> to vector<8x128xf32>
      %143 = vector.extract_strided_slice %125 {offsets = [0, 256], sizes = [8, 128], strides = [1, 1]} : vector<8x384xf32> to vector<8x128xf32>
      %144 = arith.addf %143, %16 : vector<8x128xf32>
      %145 = arith.mulf %133, %144 : vector<8x128xf32>
      %146 = arith.addf %142, %145 : vector<8x128xf32>
      %147 = math.tanh %146 : vector<8x128xf32>
      %cst_53 = arith.constant 1.000000e+00 : f32
      %148 = vector.broadcast %cst_53 : f32 to vector<8x128xf32>
      %149 = arith.subf %148, %141 : vector<8x128xf32>
      %150 = arith.mulf %149, %147 : vector<8x128xf32>
      %151 = arith.mulf %141, %119 : vector<8x128xf32>
      %152 = arith.addf %150, %151 : vector<8x128xf32>
      %c3_54 = arith.constant 3 : index
      %c0_55 = arith.constant 0 : index
      %c0_56 = arith.constant 0 : index
      %153 = vector.load %arg6[%c3_54, %c0_55, %c0_56] : memref<8x8x128xf32, #tpu.memory_space<vmem>>, vector<1x8x128xf32>
      %154 = vector.shape_cast %153 : vector<1x8x128xf32> to vector<8x128xf32>
      %155 = vector.shape_cast %152 : vector<8x128xf32> to vector<1x8x128xf32>
      tpu.vector_store %arg6[%c3_54, %c0_55, %c0_56], %155 {strides = array<i32>} : memref<8x8x128xf32, #tpu.memory_space<vmem>>, vector<1x8x128xf32>,
      %c4 = arith.constant 4 : index
      %c0_57 = arith.constant 0 : index
      %c0_58 = arith.constant 0 : index
      %156 = vector.load %arg7[%c4, %c0_57, %c0_58] : memref<8x8x384xf32, #tpu.memory_space<vmem>>, vector<1x8x384xf32>
      %157 = vector.shape_cast %156 : vector<1x8x384xf32> to vector<8x384xf32>
      %cst_59 = arith.constant dense<0.000000e+00> : vector<8x384xf32>
      %158 = tpu.matmul %152, %12, %cst_59 {dimension_numbers = #tpu.dot_dimension_numbers<[1], [0], [0], [1], [0, 0, 1, 1], [], []>} : vector<8x128xf32>, vector<128x384xf32>, vector<8x384xf32> -> vector<8x384xf32>
      %159 = vector.extract_strided_slice %157 {offsets = [0, 0], sizes = [8, 128], strides = [1, 1]} : vector<8x384xf32> to vector<8x128xf32>
      %160 = vector.extract_strided_slice %158 {offsets = [0, 0], sizes = [8, 128], strides = [1, 1]} : vector<8x384xf32> to vector<8x128xf32>
      %161 = arith.addf %159, %160 : vector<8x128xf32>
      %162 = arith.negf %161 : vector<8x128xf32>
      %163 = math.exp %162 : vector<8x128xf32>
      %cst_60 = arith.constant 1.000000e+00 : f32
      %164 = vector.broadcast %cst_60 : f32 to vector<8x128xf32>
      %165 = arith.addf %164, %163 : vector<8x128xf32>
      %166 = arith.divf %164, %165 : vector<8x128xf32>
      %167 = vector.extract_strided_slice %157 {offsets = [0, 128], sizes = [8, 128], strides = [1, 1]} : vector<8x384xf32> to vector<8x128xf32>
      %168 = vector.extract_strided_slice %158 {offsets = [0, 128], sizes = [8, 128], strides = [1, 1]} : vector<8x384xf32> to vector<8x128xf32>
      %169 = arith.addf %167, %168 : vector<8x128xf32>
      %170 = arith.negf %169 : vector<8x128xf32>
      %171 = math.exp %170 : vector<8x128xf32>
      %cst_61 = arith.constant 1.000000e+00 : f32
      %172 = vector.broadcast %cst_61 : f32 to vector<8x128xf32>
      %173 = arith.addf %172, %171 : vector<8x128xf32>
      %174 = arith.divf %172, %173 : vector<8x128xf32>
      %175 = vector.extract_strided_slice %157 {offsets = [0, 256], sizes = [8, 128], strides = [1, 1]} : vector<8x384xf32> to vector<8x128xf32>
      %176 = vector.extract_strided_slice %158 {offsets = [0, 256], sizes = [8, 128], strides = [1, 1]} : vector<8x384xf32> to vector<8x128xf32>
      %177 = arith.addf %176, %16 : vector<8x128xf32>
      %178 = arith.mulf %166, %177 : vector<8x128xf32>
      %179 = arith.addf %175, %178 : vector<8x128xf32>
      %180 = math.tanh %179 : vector<8x128xf32>
      %cst_62 = arith.constant 1.000000e+00 : f32
      %181 = vector.broadcast %cst_62 : f32 to vector<8x128xf32>
      %182 = arith.subf %181, %174 : vector<8x128xf32>
      %183 = arith.mulf %182, %180 : vector<8x128xf32>
      %184 = arith.mulf %174, %152 : vector<8x128xf32>
      %185 = arith.addf %183, %184 : vector<8x128xf32>
      %c4_63 = arith.constant 4 : index
      %c0_64 = arith.constant 0 : index
      %c0_65 = arith.constant 0 : index
      %186 = vector.load %arg6[%c4_63, %c0_64, %c0_65] : memref<8x8x128xf32, #tpu.memory_space<vmem>>, vector<1x8x128xf32>
      %187 = vector.shape_cast %186 : vector<1x8x128xf32> to vector<8x128xf32>
      %188 = vector.shape_cast %185 : vector<8x128xf32> to vector<1x8x128xf32>
      tpu.vector_store %arg6[%c4_63, %c0_64, %c0_65], %188 {strides = array<i32>} : memref<8x8x128xf32, #tpu.memory_space<vmem>>, vector<1x8x128xf32>,
      %c5 = arith.constant 5 : index
      %c0_66 = arith.constant 0 : index
      %c0_67 = arith.constant 0 : index
      %189 = vector.load %arg7[%c5, %c0_66, %c0_67] : memref<8x8x384xf32, #tpu.memory_space<vmem>>, vector<1x8x384xf32>
      %190 = vector.shape_cast %189 : vector<1x8x384xf32> to vector<8x384xf32>
      %cst_68 = arith.constant dense<0.000000e+00> : vector<8x384xf32>
      %191 = tpu.matmul %185, %12, %cst_68 {dimension_numbers = #tpu.dot_dimension_numbers<[1], [0], [0], [1], [0, 0, 1, 1], [], []>} : vector<8x128xf32>, vector<128x384xf32>, vector<8x384xf32> -> vector<8x384xf32>
      %192 = vector.extract_strided_slice %190 {offsets = [0, 0], sizes = [8, 128], strides = [1, 1]} : vector<8x384xf32> to vector<8x128xf32>
      %193 = vector.extract_strided_slice %191 {offsets = [0, 0], sizes = [8, 128], strides = [1, 1]} : vector<8x384xf32> to vector<8x128xf32>
      %194 = arith.addf %192, %193 : vector<8x128xf32>
      %195 = arith.negf %194 : vector<8x128xf32>
      %196 = math.exp %195 : vector<8x128xf32>
      %cst_69 = arith.constant 1.000000e+00 : f32
      %197 = vector.broadcast %cst_69 : f32 to vector<8x128xf32>
      %198 = arith.addf %197, %196 : vector<8x128xf32>
      %199 = arith.divf %197, %198 : vector<8x128xf32>
      %200 = vector.extract_strided_slice %190 {offsets = [0, 128], sizes = [8, 128], strides = [1, 1]} : vector<8x384xf32> to vector<8x128xf32>
      %201 = vector.extract_strided_slice %191 {offsets = [0, 128], sizes = [8, 128], strides = [1, 1]} : vector<8x384xf32> to vector<8x128xf32>
      %202 = arith.addf %200, %201 : vector<8x128xf32>
      %203 = arith.negf %202 : vector<8x128xf32>
      %204 = math.exp %203 : vector<8x128xf32>
      %cst_70 = arith.constant 1.000000e+00 : f32
      %205 = vector.broadcast %cst_70 : f32 to vector<8x128xf32>
      %206 = arith.addf %205, %204 : vector<8x128xf32>
      %207 = arith.divf %205, %206 : vector<8x128xf32>
      %208 = vector.extract_strided_slice %190 {offsets = [0, 256], sizes = [8, 128], strides = [1, 1]} : vector<8x384xf32> to vector<8x128xf32>
      %209 = vector.extract_strided_slice %191 {offsets = [0, 256], sizes = [8, 128], strides = [1, 1]} : vector<8x384xf32> to vector<8x128xf32>
      %210 = arith.addf %209, %16 : vector<8x128xf32>
      %211 = arith.mulf %199, %210 : vector<8x128xf32>
      %212 = arith.addf %208, %211 : vector<8x128xf32>
      %213 = math.tanh %212 : vector<8x128xf32>
      %cst_71 = arith.constant 1.000000e+00 : f32
      %214 = vector.broadcast %cst_71 : f32 to vector<8x128xf32>
      %215 = arith.subf %214, %207 : vector<8x128xf32>
      %216 = arith.mulf %215, %213 : vector<8x128xf32>
      %217 = arith.mulf %207, %185 : vector<8x128xf32>
      %218 = arith.addf %216, %217 : vector<8x128xf32>
      %c5_72 = arith.constant 5 : index
      %c0_73 = arith.constant 0 : index
      %c0_74 = arith.constant 0 : index
      %219 = vector.load %arg6[%c5_72, %c0_73, %c0_74] : memref<8x8x128xf32, #tpu.memory_space<vmem>>, vector<1x8x128xf32>
      %220 = vector.shape_cast %219 : vector<1x8x128xf32> to vector<8x128xf32>
      %221 = vector.shape_cast %218 : vector<8x128xf32> to vector<1x8x128xf32>
      tpu.vector_store %arg6[%c5_72, %c0_73, %c0_74], %221 {strides = array<i32>} : memref<8x8x128xf32, #tpu.memory_space<vmem>>, vector<1x8x128xf32>,
      %c6 = arith.constant 6 : index
      %c0_75 = arith.constant 0 : index
      %c0_76 = arith.constant 0 : index
      %222 = vector.load %arg7[%c6, %c0_75, %c0_76] : memref<8x8x384xf32, #tpu.memory_space<vmem>>, vector<1x8x384xf32>
      %223 = vector.shape_cast %222 : vector<1x8x384xf32> to vector<8x384xf32>
      %cst_77 = arith.constant dense<0.000000e+00> : vector<8x384xf32>
      %224 = tpu.matmul %218, %12, %cst_77 {dimension_numbers = #tpu.dot_dimension_numbers<[1], [0], [0], [1], [0, 0, 1, 1], [], []>} : vector<8x128xf32>, vector<128x384xf32>, vector<8x384xf32> -> vector<8x384xf32>
      %225 = vector.extract_strided_slice %223 {offsets = [0, 0], sizes = [8, 128], strides = [1, 1]} : vector<8x384xf32> to vector<8x128xf32>
      %226 = vector.extract_strided_slice %224 {offsets = [0, 0], sizes = [8, 128], strides = [1, 1]} : vector<8x384xf32> to vector<8x128xf32>
      %227 = arith.addf %225, %226 : vector<8x128xf32>
      %228 = arith.negf %227 : vector<8x128xf32>
      %229 = math.exp %228 : vector<8x128xf32>
      %cst_78 = arith.constant 1.000000e+00 : f32
      %230 = vector.broadcast %cst_78 : f32 to vector<8x128xf32>
      %231 = arith.addf %230, %229 : vector<8x128xf32>
      %232 = arith.divf %230, %231 : vector<8x128xf32>
      %233 = vector.extract_strided_slice %223 {offsets = [0, 128], sizes = [8, 128], strides = [1, 1]} : vector<8x384xf32> to vector<8x128xf32>
      %234 = vector.extract_strided_slice %224 {offsets = [0, 128], sizes = [8, 128], strides = [1, 1]} : vector<8x384xf32> to vector<8x128xf32>
      %235 = arith.addf %233, %234 : vector<8x128xf32>
      %236 = arith.negf %235 : vector<8x128xf32>
      %237 = math.exp %236 : vector<8x128xf32>
      %cst_79 = arith.constant 1.000000e+00 : f32
      %238 = vector.broadcast %cst_79 : f32 to vector<8x128xf32>
      %239 = arith.addf %238, %237 : vector<8x128xf32>
      %240 = arith.divf %238, %239 : vector<8x128xf32>
      %241 = vector.extract_strided_slice %223 {offsets = [0, 256], sizes = [8, 128], strides = [1, 1]} : vector<8x384xf32> to vector<8x128xf32>
      %242 = vector.extract_strided_slice %224 {offsets = [0, 256], sizes = [8, 128], strides = [1, 1]} : vector<8x384xf32> to vector<8x128xf32>
      %243 = arith.addf %242, %16 : vector<8x128xf32>
      %244 = arith.mulf %232, %243 : vector<8x128xf32>
      %245 = arith.addf %241, %244 : vector<8x128xf32>
      %246 = math.tanh %245 : vector<8x128xf32>
      %cst_80 = arith.constant 1.000000e+00 : f32
      %247 = vector.broadcast %cst_80 : f32 to vector<8x128xf32>
      %248 = arith.subf %247, %240 : vector<8x128xf32>
      %249 = arith.mulf %248, %246 : vector<8x128xf32>
      %250 = arith.mulf %240, %218 : vector<8x128xf32>
      %251 = arith.addf %249, %250 : vector<8x128xf32>
      %c6_81 = arith.constant 6 : index
      %c0_82 = arith.constant 0 : index
      %c0_83 = arith.constant 0 : index
      %252 = vector.load %arg6[%c6_81, %c0_82, %c0_83] : memref<8x8x128xf32, #tpu.memory_space<vmem>>, vector<1x8x128xf32>
      %253 = vector.shape_cast %252 : vector<1x8x128xf32> to vector<8x128xf32>
      %254 = vector.shape_cast %251 : vector<8x128xf32> to vector<1x8x128xf32>
      tpu.vector_store %arg6[%c6_81, %c0_82, %c0_83], %254 {strides = array<i32>} : memref<8x8x128xf32, #tpu.memory_space<vmem>>, vector<1x8x128xf32>,
      %c7 = arith.constant 7 : index
      %c0_84 = arith.constant 0 : index
      %c0_85 = arith.constant 0 : index
      %255 = vector.load %arg7[%c7, %c0_84, %c0_85] : memref<8x8x384xf32, #tpu.memory_space<vmem>>, vector<1x8x384xf32>
      %256 = vector.shape_cast %255 : vector<1x8x384xf32> to vector<8x384xf32>
      %cst_86 = arith.constant dense<0.000000e+00> : vector<8x384xf32>
      %257 = tpu.matmul %251, %12, %cst_86 {dimension_numbers = #tpu.dot_dimension_numbers<[1], [0], [0], [1], [0, 0, 1, 1], [], []>} : vector<8x128xf32>, vector<128x384xf32>, vector<8x384xf32> -> vector<8x384xf32>
      %258 = vector.extract_strided_slice %256 {offsets = [0, 0], sizes = [8, 128], strides = [1, 1]} : vector<8x384xf32> to vector<8x128xf32>
      %259 = vector.extract_strided_slice %257 {offsets = [0, 0], sizes = [8, 128], strides = [1, 1]} : vector<8x384xf32> to vector<8x128xf32>
      %260 = arith.addf %258, %259 : vector<8x128xf32>
      %261 = arith.negf %260 : vector<8x128xf32>
      %262 = math.exp %261 : vector<8x128xf32>
      %cst_87 = arith.constant 1.000000e+00 : f32
      %263 = vector.broadcast %cst_87 : f32 to vector<8x128xf32>
      %264 = arith.addf %263, %262 : vector<8x128xf32>
      %265 = arith.divf %263, %264 : vector<8x128xf32>
      %266 = vector.extract_strided_slice %256 {offsets = [0, 128], sizes = [8, 128], strides = [1, 1]} : vector<8x384xf32> to vector<8x128xf32>
      %267 = vector.extract_strided_slice %257 {offsets = [0, 128], sizes = [8, 128], strides = [1, 1]} : vector<8x384xf32> to vector<8x128xf32>
      %268 = arith.addf %266, %267 : vector<8x128xf32>
      %269 = arith.negf %268 : vector<8x128xf32>
      %270 = math.exp %269 : vector<8x128xf32>
      %cst_88 = arith.constant 1.000000e+00 : f32
      %271 = vector.broadcast %cst_88 : f32 to vector<8x128xf32>
      %272 = arith.addf %271, %270 : vector<8x128xf32>
      %273 = arith.divf %271, %272 : vector<8x128xf32>
      %274 = vector.extract_strided_slice %256 {offsets = [0, 256], sizes = [8, 128], strides = [1, 1]} : vector<8x384xf32> to vector<8x128xf32>
      %275 = vector.extract_strided_slice %257 {offsets = [0, 256], sizes = [8, 128], strides = [1, 1]} : vector<8x384xf32> to vector<8x128xf32>
      %276 = arith.addf %275, %16 : vector<8x128xf32>
      %277 = arith.mulf %265, %276 : vector<8x128xf32>
      %278 = arith.addf %274, %277 : vector<8x128xf32>
      %279 = math.tanh %278 : vector<8x128xf32>
      %cst_89 = arith.constant 1.000000e+00 : f32
      %280 = vector.broadcast %cst_89 : f32 to vector<8x128xf32>
      %281 = arith.subf %280, %273 : vector<8x128xf32>
      %282 = arith.mulf %281, %279 : vector<8x128xf32>
      %283 = arith.mulf %273, %251 : vector<8x128xf32>
      %284 = arith.addf %282, %283 : vector<8x128xf32>
      %c7_90 = arith.constant 7 : index
      %c0_91 = arith.constant 0 : index
      %c0_92 = arith.constant 0 : index
      %285 = vector.load %arg6[%c7_90, %c0_91, %c0_92] : memref<8x8x128xf32, #tpu.memory_space<vmem>>, vector<1x8x128xf32>
      %286 = vector.shape_cast %285 : vector<1x8x128xf32> to vector<8x128xf32>
      %287 = vector.shape_cast %284 : vector<8x128xf32> to vector<1x8x128xf32>
      tpu.vector_store %arg6[%c7_90, %c0_91, %c0_92], %287 {strides = array<i32>} : memref<8x8x128xf32, #tpu.memory_space<vmem>>, vector<1x8x128xf32>,
    } else {
    }
    %c1_i32 = arith.constant 1 : i32
    %21 = arith.cmpi eq, %arg0, %c1_i32 : i32
    %22 = arith.extui %21 : i1 to i32
    %c0_i32_19 = arith.constant 0 : i32
    %23 = arith.cmpi ne, %22, %c0_i32_19 : i32
    scf.if %23 {
      %c7 = arith.constant 7 : index
      %c0_20 = arith.constant 0 : index
      %c0_21 = arith.constant 0 : index
      %24 = vector.load %arg7[%c7, %c0_20, %c0_21] : memref<8x8x384xf32, #tpu.memory_space<vmem>>, vector<1x8x384xf32>
      %25 = vector.shape_cast %24 : vector<1x8x384xf32> to vector<8x384xf32>
      %cst_22 = arith.constant dense<0.000000e+00> : vector<8x384xf32>
      %26 = tpu.matmul %17, %12, %cst_22 {dimension_numbers = #tpu.dot_dimension_numbers<[1], [0], [0], [1], [0, 0, 1, 1], [], []>} : vector<8x128xf32>, vector<128x384xf32>, vector<8x384xf32> -> vector<8x384xf32>
      %27 = vector.extract_strided_slice %25 {offsets = [0, 0], sizes = [8, 128], strides = [1, 1]} : vector<8x384xf32> to vector<8x128xf32>
      %28 = vector.extract_strided_slice %26 {offsets = [0, 0], sizes = [8, 128], strides = [1, 1]} : vector<8x384xf32> to vector<8x128xf32>
      %29 = arith.addf %27, %28 : vector<8x128xf32>
      %30 = arith.negf %29 : vector<8x128xf32>
      %31 = math.exp %30 : vector<8x128xf32>
      %cst_23 = arith.constant 1.000000e+00 : f32
      %32 = vector.broadcast %cst_23 : f32 to vector<8x128xf32>
      %33 = arith.addf %32, %31 : vector<8x128xf32>
      %34 = arith.divf %32, %33 : vector<8x128xf32>
      %35 = vector.extract_strided_slice %25 {offsets = [0, 128], sizes = [8, 128], strides = [1, 1]} : vector<8x384xf32> to vector<8x128xf32>
      %36 = vector.extract_strided_slice %26 {offsets = [0, 128], sizes = [8, 128], strides = [1, 1]} : vector<8x384xf32> to vector<8x128xf32>
      %37 = arith.addf %35, %36 : vector<8x128xf32>
      %38 = arith.negf %37 : vector<8x128xf32>
      %39 = math.exp %38 : vector<8x128xf32>
      %cst_24 = arith.constant 1.000000e+00 : f32
      %40 = vector.broadcast %cst_24 : f32 to vector<8x128xf32>
      %41 = arith.addf %40, %39 : vector<8x128xf32>
      %42 = arith.divf %40, %41 : vector<8x128xf32>
      %43 = vector.extract_strided_slice %25 {offsets = [0, 256], sizes = [8, 128], strides = [1, 1]} : vector<8x384xf32> to vector<8x128xf32>
      %44 = vector.extract_strided_slice %26 {offsets = [0, 256], sizes = [8, 128], strides = [1, 1]} : vector<8x384xf32> to vector<8x128xf32>
      %45 = arith.addf %44, %16 : vector<8x128xf32>
      %46 = arith.mulf %34, %45 : vector<8x128xf32>
      %47 = arith.addf %43, %46 : vector<8x128xf32>
      %48 = math.tanh %47 : vector<8x128xf32>
      %cst_25 = arith.constant 1.000000e+00 : f32
      %49 = vector.broadcast %cst_25 : f32 to vector<8x128xf32>
      %50 = arith.subf %49, %42 : vector<8x128xf32>
      %51 = arith.mulf %50, %48 : vector<8x128xf32>
      %52 = arith.mulf %42, %17 : vector<8x128xf32>
      %53 = arith.addf %51, %52 : vector<8x128xf32>
      %c7_26 = arith.constant 7 : index
      %c0_27 = arith.constant 0 : index
      %c0_28 = arith.constant 0 : index
      %54 = vector.load %arg6[%c7_26, %c0_27, %c0_28] : memref<8x8x128xf32, #tpu.memory_space<vmem>>, vector<1x8x128xf32>
      %55 = vector.shape_cast %54 : vector<1x8x128xf32> to vector<8x128xf32>
      %56 = vector.shape_cast %53 : vector<8x128xf32> to vector<1x8x128xf32>
      tpu.vector_store %arg6[%c7_26, %c0_27, %c0_28], %56 {strides = array<i32>} : memref<8x8x128xf32, #tpu.memory_space<vmem>>, vector<1x8x128xf32>,
      %c6 = arith.constant 6 : index
      %c0_29 = arith.constant 0 : index
      %c0_30 = arith.constant 0 : index
      %57 = vector.load %arg7[%c6, %c0_29, %c0_30] : memref<8x8x384xf32, #tpu.memory_space<vmem>>, vector<1x8x384xf32>
      %58 = vector.shape_cast %57 : vector<1x8x384xf32> to vector<8x384xf32>
      %cst_31 = arith.constant dense<0.000000e+00> : vector<8x384xf32>
      %59 = tpu.matmul %53, %12, %cst_31 {dimension_numbers = #tpu.dot_dimension_numbers<[1], [0], [0], [1], [0, 0, 1, 1], [], []>} : vector<8x128xf32>, vector<128x384xf32>, vector<8x384xf32> -> vector<8x384xf32>
      %60 = vector.extract_strided_slice %58 {offsets = [0, 0], sizes = [8, 128], strides = [1, 1]} : vector<8x384xf32> to vector<8x128xf32>
      %61 = vector.extract_strided_slice %59 {offsets = [0, 0], sizes = [8, 128], strides = [1, 1]} : vector<8x384xf32> to vector<8x128xf32>
      %62 = arith.addf %60, %61 : vector<8x128xf32>
      %63 = arith.negf %62 : vector<8x128xf32>
      %64 = math.exp %63 : vector<8x128xf32>
      %cst_32 = arith.constant 1.000000e+00 : f32
      %65 = vector.broadcast %cst_32 : f32 to vector<8x128xf32>
      %66 = arith.addf %65, %64 : vector<8x128xf32>
      %67 = arith.divf %65, %66 : vector<8x128xf32>
      %68 = vector.extract_strided_slice %58 {offsets = [0, 128], sizes = [8, 128], strides = [1, 1]} : vector<8x384xf32> to vector<8x128xf32>
      %69 = vector.extract_strided_slice %59 {offsets = [0, 128], sizes = [8, 128], strides = [1, 1]} : vector<8x384xf32> to vector<8x128xf32>
      %70 = arith.addf %68, %69 : vector<8x128xf32>
      %71 = arith.negf %70 : vector<8x128xf32>
      %72 = math.exp %71 : vector<8x128xf32>
      %cst_33 = arith.constant 1.000000e+00 : f32
      %73 = vector.broadcast %cst_33 : f32 to vector<8x128xf32>
      %74 = arith.addf %73, %72 : vector<8x128xf32>
      %75 = arith.divf %73, %74 : vector<8x128xf32>
      %76 = vector.extract_strided_slice %58 {offsets = [0, 256], sizes = [8, 128], strides = [1, 1]} : vector<8x384xf32> to vector<8x128xf32>
      %77 = vector.extract_strided_slice %59 {offsets = [0, 256], sizes = [8, 128], strides = [1, 1]} : vector<8x384xf32> to vector<8x128xf32>
      %78 = arith.addf %77, %16 : vector<8x128xf32>
      %79 = arith.mulf %67, %78 : vector<8x128xf32>
      %80 = arith.addf %76, %79 : vector<8x128xf32>
      %81 = math.tanh %80 : vector<8x128xf32>
      %cst_34 = arith.constant 1.000000e+00 : f32
      %82 = vector.broadcast %cst_34 : f32 to vector<8x128xf32>
      %83 = arith.subf %82, %75 : vector<8x128xf32>
      %84 = arith.mulf %83, %81 : vector<8x128xf32>
      %85 = arith.mulf %75, %53 : vector<8x128xf32>
      %86 = arith.addf %84, %85 : vector<8x128xf32>
      %c6_35 = arith.constant 6 : index
      %c0_36 = arith.constant 0 : index
      %c0_37 = arith.constant 0 : index
      %87 = vector.load %arg6[%c6_35, %c0_36, %c0_37] : memref<8x8x128xf32, #tpu.memory_space<vmem>>, vector<1x8x128xf32>
      %88 = vector.shape_cast %87 : vector<1x8x128xf32> to vector<8x128xf32>
      %89 = vector.shape_cast %86 : vector<8x128xf32> to vector<1x8x128xf32>
      tpu.vector_store %arg6[%c6_35, %c0_36, %c0_37], %89 {strides = array<i32>} : memref<8x8x128xf32, #tpu.memory_space<vmem>>, vector<1x8x128xf32>,
      %c5 = arith.constant 5 : index
      %c0_38 = arith.constant 0 : index
      %c0_39 = arith.constant 0 : index
      %90 = vector.load %arg7[%c5, %c0_38, %c0_39] : memref<8x8x384xf32, #tpu.memory_space<vmem>>, vector<1x8x384xf32>
      %91 = vector.shape_cast %90 : vector<1x8x384xf32> to vector<8x384xf32>
      %cst_40 = arith.constant dense<0.000000e+00> : vector<8x384xf32>
      %92 = tpu.matmul %86, %12, %cst_40 {dimension_numbers = #tpu.dot_dimension_numbers<[1], [0], [0], [1], [0, 0, 1, 1], [], []>} : vector<8x128xf32>, vector<128x384xf32>, vector<8x384xf32> -> vector<8x384xf32>
      %93 = vector.extract_strided_slice %91 {offsets = [0, 0], sizes = [8, 128], strides = [1, 1]} : vector<8x384xf32> to vector<8x128xf32>
      %94 = vector.extract_strided_slice %92 {offsets = [0, 0], sizes = [8, 128], strides = [1, 1]} : vector<8x384xf32> to vector<8x128xf32>
      %95 = arith.addf %93, %94 : vector<8x128xf32>
      %96 = arith.negf %95 : vector<8x128xf32>
      %97 = math.exp %96 : vector<8x128xf32>
      %cst_41 = arith.constant 1.000000e+00 : f32
      %98 = vector.broadcast %cst_41 : f32 to vector<8x128xf32>
      %99 = arith.addf %98, %97 : vector<8x128xf32>
      %100 = arith.divf %98, %99 : vector<8x128xf32>
      %101 = vector.extract_strided_slice %91 {offsets = [0, 128], sizes = [8, 128], strides = [1, 1]} : vector<8x384xf32> to vector<8x128xf32>
      %102 = vector.extract_strided_slice %92 {offsets = [0, 128], sizes = [8, 128], strides = [1, 1]} : vector<8x384xf32> to vector<8x128xf32>
      %103 = arith.addf %101, %102 : vector<8x128xf32>
      %104 = arith.negf %103 : vector<8x128xf32>
      %105 = math.exp %104 : vector<8x128xf32>
      %cst_42 = arith.constant 1.000000e+00 : f32
      %106 = vector.broadcast %cst_42 : f32 to vector<8x128xf32>
      %107 = arith.addf %106, %105 : vector<8x128xf32>
      %108 = arith.divf %106, %107 : vector<8x128xf32>
      %109 = vector.extract_strided_slice %91 {offsets = [0, 256], sizes = [8, 128], strides = [1, 1]} : vector<8x384xf32> to vector<8x128xf32>
      %110 = vector.extract_strided_slice %92 {offsets = [0, 256], sizes = [8, 128], strides = [1, 1]} : vector<8x384xf32> to vector<8x128xf32>
      %111 = arith.addf %110, %16 : vector<8x128xf32>
      %112 = arith.mulf %100, %111 : vector<8x128xf32>
      %113 = arith.addf %109, %112 : vector<8x128xf32>
      %114 = math.tanh %113 : vector<8x128xf32>
      %cst_43 = arith.constant 1.000000e+00 : f32
      %115 = vector.broadcast %cst_43 : f32 to vector<8x128xf32>
      %116 = arith.subf %115, %108 : vector<8x128xf32>
      %117 = arith.mulf %116, %114 : vector<8x128xf32>
      %118 = arith.mulf %108, %86 : vector<8x128xf32>
      %119 = arith.addf %117, %118 : vector<8x128xf32>
      %c5_44 = arith.constant 5 : index
      %c0_45 = arith.constant 0 : index
      %c0_46 = arith.constant 0 : index
      %120 = vector.load %arg6[%c5_44, %c0_45, %c0_46] : memref<8x8x128xf32, #tpu.memory_space<vmem>>, vector<1x8x128xf32>
      %121 = vector.shape_cast %120 : vector<1x8x128xf32> to vector<8x128xf32>
      %122 = vector.shape_cast %119 : vector<8x128xf32> to vector<1x8x128xf32>
      tpu.vector_store %arg6[%c5_44, %c0_45, %c0_46], %122 {strides = array<i32>} : memref<8x8x128xf32, #tpu.memory_space<vmem>>, vector<1x8x128xf32>,
      %c4 = arith.constant 4 : index
      %c0_47 = arith.constant 0 : index
      %c0_48 = arith.constant 0 : index
      %123 = vector.load %arg7[%c4, %c0_47, %c0_48] : memref<8x8x384xf32, #tpu.memory_space<vmem>>, vector<1x8x384xf32>
      %124 = vector.shape_cast %123 : vector<1x8x384xf32> to vector<8x384xf32>
      %cst_49 = arith.constant dense<0.000000e+00> : vector<8x384xf32>
      %125 = tpu.matmul %119, %12, %cst_49 {dimension_numbers = #tpu.dot_dimension_numbers<[1], [0], [0], [1], [0, 0, 1, 1], [], []>} : vector<8x128xf32>, vector<128x384xf32>, vector<8x384xf32> -> vector<8x384xf32>
      %126 = vector.extract_strided_slice %124 {offsets = [0, 0], sizes = [8, 128], strides = [1, 1]} : vector<8x384xf32> to vector<8x128xf32>
      %127 = vector.extract_strided_slice %125 {offsets = [0, 0], sizes = [8, 128], strides = [1, 1]} : vector<8x384xf32> to vector<8x128xf32>
      %128 = arith.addf %126, %127 : vector<8x128xf32>
      %129 = arith.negf %128 : vector<8x128xf32>
      %130 = math.exp %129 : vector<8x128xf32>
      %cst_50 = arith.constant 1.000000e+00 : f32
      %131 = vector.broadcast %cst_50 : f32 to vector<8x128xf32>
      %132 = arith.addf %131, %130 : vector<8x128xf32>
      %133 = arith.divf %131, %132 : vector<8x128xf32>
      %134 = vector.extract_strided_slice %124 {offsets = [0, 128], sizes = [8, 128], strides = [1, 1]} : vector<8x384xf32> to vector<8x128xf32>
      %135 = vector.extract_strided_slice %125 {offsets = [0, 128], sizes = [8, 128], strides = [1, 1]} : vector<8x384xf32> to vector<8x128xf32>
      %136 = arith.addf %134, %135 : vector<8x128xf32>
      %137 = arith.negf %136 : vector<8x128xf32>
      %138 = math.exp %137 : vector<8x128xf32>
      %cst_51 = arith.constant 1.000000e+00 : f32
      %139 = vector.broadcast %cst_51 : f32 to vector<8x128xf32>
      %140 = arith.addf %139, %138 : vector<8x128xf32>
      %141 = arith.divf %139, %140 : vector<8x128xf32>
      %142 = vector.extract_strided_slice %124 {offsets = [0, 256], sizes = [8, 128], strides = [1, 1]} : vector<8x384xf32> to vector<8x128xf32>
      %143 = vector.extract_strided_slice %125 {offsets = [0, 256], sizes = [8, 128], strides = [1, 1]} : vector<8x384xf32> to vector<8x128xf32>
      %144 = arith.addf %143, %16 : vector<8x128xf32>
      %145 = arith.mulf %133, %144 : vector<8x128xf32>
      %146 = arith.addf %142, %145 : vector<8x128xf32>
      %147 = math.tanh %146 : vector<8x128xf32>
      %cst_52 = arith.constant 1.000000e+00 : f32
      %148 = vector.broadcast %cst_52 : f32 to vector<8x128xf32>
      %149 = arith.subf %148, %141 : vector<8x128xf32>
      %150 = arith.mulf %149, %147 : vector<8x128xf32>
      %151 = arith.mulf %141, %119 : vector<8x128xf32>
      %152 = arith.addf %150, %151 : vector<8x128xf32>
      %c4_53 = arith.constant 4 : index
      %c0_54 = arith.constant 0 : index
      %c0_55 = arith.constant 0 : index
      %153 = vector.load %arg6[%c4_53, %c0_54, %c0_55] : memref<8x8x128xf32, #tpu.memory_space<vmem>>, vector<1x8x128xf32>
      %154 = vector.shape_cast %153 : vector<1x8x128xf32> to vector<8x128xf32>
      %155 = vector.shape_cast %152 : vector<8x128xf32> to vector<1x8x128xf32>
      tpu.vector_store %arg6[%c4_53, %c0_54, %c0_55], %155 {strides = array<i32>} : memref<8x8x128xf32, #tpu.memory_space<vmem>>, vector<1x8x128xf32>,
      %c3 = arith.constant 3 : index
      %c0_56 = arith.constant 0 : index
      %c0_57 = arith.constant 0 : index
      %156 = vector.load %arg7[%c3, %c0_56, %c0_57] : memref<8x8x384xf32, #tpu.memory_space<vmem>>, vector<1x8x384xf32>
      %157 = vector.shape_cast %156 : vector<1x8x384xf32> to vector<8x384xf32>
      %cst_58 = arith.constant dense<0.000000e+00> : vector<8x384xf32>
      %158 = tpu.matmul %152, %12, %cst_58 {dimension_numbers = #tpu.dot_dimension_numbers<[1], [0], [0], [1], [0, 0, 1, 1], [], []>} : vector<8x128xf32>, vector<128x384xf32>, vector<8x384xf32> -> vector<8x384xf32>
      %159 = vector.extract_strided_slice %157 {offsets = [0, 0], sizes = [8, 128], strides = [1, 1]} : vector<8x384xf32> to vector<8x128xf32>
      %160 = vector.extract_strided_slice %158 {offsets = [0, 0], sizes = [8, 128], strides = [1, 1]} : vector<8x384xf32> to vector<8x128xf32>
      %161 = arith.addf %159, %160 : vector<8x128xf32>
      %162 = arith.negf %161 : vector<8x128xf32>
      %163 = math.exp %162 : vector<8x128xf32>
      %cst_59 = arith.constant 1.000000e+00 : f32
      %164 = vector.broadcast %cst_59 : f32 to vector<8x128xf32>
      %165 = arith.addf %164, %163 : vector<8x128xf32>
      %166 = arith.divf %164, %165 : vector<8x128xf32>
      %167 = vector.extract_strided_slice %157 {offsets = [0, 128], sizes = [8, 128], strides = [1, 1]} : vector<8x384xf32> to vector<8x128xf32>
      %168 = vector.extract_strided_slice %158 {offsets = [0, 128], sizes = [8, 128], strides = [1, 1]} : vector<8x384xf32> to vector<8x128xf32>
      %169 = arith.addf %167, %168 : vector<8x128xf32>
      %170 = arith.negf %169 : vector<8x128xf32>
      %171 = math.exp %170 : vector<8x128xf32>
      %cst_60 = arith.constant 1.000000e+00 : f32
      %172 = vector.broadcast %cst_60 : f32 to vector<8x128xf32>
      %173 = arith.addf %172, %171 : vector<8x128xf32>
      %174 = arith.divf %172, %173 : vector<8x128xf32>
      %175 = vector.extract_strided_slice %157 {offsets = [0, 256], sizes = [8, 128], strides = [1, 1]} : vector<8x384xf32> to vector<8x128xf32>
      %176 = vector.extract_strided_slice %158 {offsets = [0, 256], sizes = [8, 128], strides = [1, 1]} : vector<8x384xf32> to vector<8x128xf32>
      %177 = arith.addf %176, %16 : vector<8x128xf32>
      %178 = arith.mulf %166, %177 : vector<8x128xf32>
      %179 = arith.addf %175, %178 : vector<8x128xf32>
      %180 = math.tanh %179 : vector<8x128xf32>
      %cst_61 = arith.constant 1.000000e+00 : f32
      %181 = vector.broadcast %cst_61 : f32 to vector<8x128xf32>
      %182 = arith.subf %181, %174 : vector<8x128xf32>
      %183 = arith.mulf %182, %180 : vector<8x128xf32>
      %184 = arith.mulf %174, %152 : vector<8x128xf32>
      %185 = arith.addf %183, %184 : vector<8x128xf32>
      %c3_62 = arith.constant 3 : index
      %c0_63 = arith.constant 0 : index
      %c0_64 = arith.constant 0 : index
      %186 = vector.load %arg6[%c3_62, %c0_63, %c0_64] : memref<8x8x128xf32, #tpu.memory_space<vmem>>, vector<1x8x128xf32>
      %187 = vector.shape_cast %186 : vector<1x8x128xf32> to vector<8x128xf32>
      %188 = vector.shape_cast %185 : vector<8x128xf32> to vector<1x8x128xf32>
      tpu.vector_store %arg6[%c3_62, %c0_63, %c0_64], %188 {strides = array<i32>} : memref<8x8x128xf32, #tpu.memory_space<vmem>>, vector<1x8x128xf32>,
      %c2 = arith.constant 2 : index
      %c0_65 = arith.constant 0 : index
      %c0_66 = arith.constant 0 : index
      %189 = vector.load %arg7[%c2, %c0_65, %c0_66] : memref<8x8x384xf32, #tpu.memory_space<vmem>>, vector<1x8x384xf32>
      %190 = vector.shape_cast %189 : vector<1x8x384xf32> to vector<8x384xf32>
      %cst_67 = arith.constant dense<0.000000e+00> : vector<8x384xf32>
      %191 = tpu.matmul %185, %12, %cst_67 {dimension_numbers = #tpu.dot_dimension_numbers<[1], [0], [0], [1], [0, 0, 1, 1], [], []>} : vector<8x128xf32>, vector<128x384xf32>, vector<8x384xf32> -> vector<8x384xf32>
      %192 = vector.extract_strided_slice %190 {offsets = [0, 0], sizes = [8, 128], strides = [1, 1]} : vector<8x384xf32> to vector<8x128xf32>
      %193 = vector.extract_strided_slice %191 {offsets = [0, 0], sizes = [8, 128], strides = [1, 1]} : vector<8x384xf32> to vector<8x128xf32>
      %194 = arith.addf %192, %193 : vector<8x128xf32>
      %195 = arith.negf %194 : vector<8x128xf32>
      %196 = math.exp %195 : vector<8x128xf32>
      %cst_68 = arith.constant 1.000000e+00 : f32
      %197 = vector.broadcast %cst_68 : f32 to vector<8x128xf32>
      %198 = arith.addf %197, %196 : vector<8x128xf32>
      %199 = arith.divf %197, %198 : vector<8x128xf32>
      %200 = vector.extract_strided_slice %190 {offsets = [0, 128], sizes = [8, 128], strides = [1, 1]} : vector<8x384xf32> to vector<8x128xf32>
      %201 = vector.extract_strided_slice %191 {offsets = [0, 128], sizes = [8, 128], strides = [1, 1]} : vector<8x384xf32> to vector<8x128xf32>
      %202 = arith.addf %200, %201 : vector<8x128xf32>
      %203 = arith.negf %202 : vector<8x128xf32>
      %204 = math.exp %203 : vector<8x128xf32>
      %cst_69 = arith.constant 1.000000e+00 : f32
      %205 = vector.broadcast %cst_69 : f32 to vector<8x128xf32>
      %206 = arith.addf %205, %204 : vector<8x128xf32>
      %207 = arith.divf %205, %206 : vector<8x128xf32>
      %208 = vector.extract_strided_slice %190 {offsets = [0, 256], sizes = [8, 128], strides = [1, 1]} : vector<8x384xf32> to vector<8x128xf32>
      %209 = vector.extract_strided_slice %191 {offsets = [0, 256], sizes = [8, 128], strides = [1, 1]} : vector<8x384xf32> to vector<8x128xf32>
      %210 = arith.addf %209, %16 : vector<8x128xf32>
      %211 = arith.mulf %199, %210 : vector<8x128xf32>
      %212 = arith.addf %208, %211 : vector<8x128xf32>
      %213 = math.tanh %212 : vector<8x128xf32>
      %cst_70 = arith.constant 1.000000e+00 : f32
      %214 = vector.broadcast %cst_70 : f32 to vector<8x128xf32>
      %215 = arith.subf %214, %207 : vector<8x128xf32>
      %216 = arith.mulf %215, %213 : vector<8x128xf32>
      %217 = arith.mulf %207, %185 : vector<8x128xf32>
      %218 = arith.addf %216, %217 : vector<8x128xf32>
      %c2_71 = arith.constant 2 : index
      %c0_72 = arith.constant 0 : index
      %c0_73 = arith.constant 0 : index
      %219 = vector.load %arg6[%c2_71, %c0_72, %c0_73] : memref<8x8x128xf32, #tpu.memory_space<vmem>>, vector<1x8x128xf32>
      %220 = vector.shape_cast %219 : vector<1x8x128xf32> to vector<8x128xf32>
      %221 = vector.shape_cast %218 : vector<8x128xf32> to vector<1x8x128xf32>
      tpu.vector_store %arg6[%c2_71, %c0_72, %c0_73], %221 {strides = array<i32>} : memref<8x8x128xf32, #tpu.memory_space<vmem>>, vector<1x8x128xf32>,
      %c1 = arith.constant 1 : index
      %c0_74 = arith.constant 0 : index
      %c0_75 = arith.constant 0 : index
      %222 = vector.load %arg7[%c1, %c0_74, %c0_75] : memref<8x8x384xf32, #tpu.memory_space<vmem>>, vector<1x8x384xf32>
      %223 = vector.shape_cast %222 : vector<1x8x384xf32> to vector<8x384xf32>
      %cst_76 = arith.constant dense<0.000000e+00> : vector<8x384xf32>
      %224 = tpu.matmul %218, %12, %cst_76 {dimension_numbers = #tpu.dot_dimension_numbers<[1], [0], [0], [1], [0, 0, 1, 1], [], []>} : vector<8x128xf32>, vector<128x384xf32>, vector<8x384xf32> -> vector<8x384xf32>
      %225 = vector.extract_strided_slice %223 {offsets = [0, 0], sizes = [8, 128], strides = [1, 1]} : vector<8x384xf32> to vector<8x128xf32>
      %226 = vector.extract_strided_slice %224 {offsets = [0, 0], sizes = [8, 128], strides = [1, 1]} : vector<8x384xf32> to vector<8x128xf32>
      %227 = arith.addf %225, %226 : vector<8x128xf32>
      %228 = arith.negf %227 : vector<8x128xf32>
      %229 = math.exp %228 : vector<8x128xf32>
      %cst_77 = arith.constant 1.000000e+00 : f32
      %230 = vector.broadcast %cst_77 : f32 to vector<8x128xf32>
      %231 = arith.addf %230, %229 : vector<8x128xf32>
      %232 = arith.divf %230, %231 : vector<8x128xf32>
      %233 = vector.extract_strided_slice %223 {offsets = [0, 128], sizes = [8, 128], strides = [1, 1]} : vector<8x384xf32> to vector<8x128xf32>
      %234 = vector.extract_strided_slice %224 {offsets = [0, 128], sizes = [8, 128], strides = [1, 1]} : vector<8x384xf32> to vector<8x128xf32>
      %235 = arith.addf %233, %234 : vector<8x128xf32>
      %236 = arith.negf %235 : vector<8x128xf32>
      %237 = math.exp %236 : vector<8x128xf32>
      %cst_78 = arith.constant 1.000000e+00 : f32
      %238 = vector.broadcast %cst_78 : f32 to vector<8x128xf32>
      %239 = arith.addf %238, %237 : vector<8x128xf32>
      %240 = arith.divf %238, %239 : vector<8x128xf32>
      %241 = vector.extract_strided_slice %223 {offsets = [0, 256], sizes = [8, 128], strides = [1, 1]} : vector<8x384xf32> to vector<8x128xf32>
      %242 = vector.extract_strided_slice %224 {offsets = [0, 256], sizes = [8, 128], strides = [1, 1]} : vector<8x384xf32> to vector<8x128xf32>
      %243 = arith.addf %242, %16 : vector<8x128xf32>
      %244 = arith.mulf %232, %243 : vector<8x128xf32>
      %245 = arith.addf %241, %244 : vector<8x128xf32>
      %246 = math.tanh %245 : vector<8x128xf32>
      %cst_79 = arith.constant 1.000000e+00 : f32
      %247 = vector.broadcast %cst_79 : f32 to vector<8x128xf32>
      %248 = arith.subf %247, %240 : vector<8x128xf32>
      %249 = arith.mulf %248, %246 : vector<8x128xf32>
      %250 = arith.mulf %240, %218 : vector<8x128xf32>
      %251 = arith.addf %249, %250 : vector<8x128xf32>
      %c1_80 = arith.constant 1 : index
      %c0_81 = arith.constant 0 : index
      %c0_82 = arith.constant 0 : index
      %252 = vector.load %arg6[%c1_80, %c0_81, %c0_82] : memref<8x8x128xf32, #tpu.memory_space<vmem>>, vector<1x8x128xf32>
      %253 = vector.shape_cast %252 : vector<1x8x128xf32> to vector<8x128xf32>
      %254 = vector.shape_cast %251 : vector<8x128xf32> to vector<1x8x128xf32>
      tpu.vector_store %arg6[%c1_80, %c0_81, %c0_82], %254 {strides = array<i32>} : memref<8x8x128xf32, #tpu.memory_space<vmem>>, vector<1x8x128xf32>,
      %c0_83 = arith.constant 0 : index
      %c0_84 = arith.constant 0 : index
      %c0_85 = arith.constant 0 : index
      %255 = vector.load %arg7[%c0_83, %c0_84, %c0_85] : memref<8x8x384xf32, #tpu.memory_space<vmem>>, vector<1x8x384xf32>
      %256 = vector.shape_cast %255 : vector<1x8x384xf32> to vector<8x384xf32>
      %cst_86 = arith.constant dense<0.000000e+00> : vector<8x384xf32>
      %257 = tpu.matmul %251, %12, %cst_86 {dimension_numbers = #tpu.dot_dimension_numbers<[1], [0], [0], [1], [0, 0, 1, 1], [], []>} : vector<8x128xf32>, vector<128x384xf32>, vector<8x384xf32> -> vector<8x384xf32>
      %258 = vector.extract_strided_slice %256 {offsets = [0, 0], sizes = [8, 128], strides = [1, 1]} : vector<8x384xf32> to vector<8x128xf32>
      %259 = vector.extract_strided_slice %257 {offsets = [0, 0], sizes = [8, 128], strides = [1, 1]} : vector<8x384xf32> to vector<8x128xf32>
      %260 = arith.addf %258, %259 : vector<8x128xf32>
      %261 = arith.negf %260 : vector<8x128xf32>
      %262 = math.exp %261 : vector<8x128xf32>
      %cst_87 = arith.constant 1.000000e+00 : f32
      %263 = vector.broadcast %cst_87 : f32 to vector<8x128xf32>
      %264 = arith.addf %263, %262 : vector<8x128xf32>
      %265 = arith.divf %263, %264 : vector<8x128xf32>
      %266 = vector.extract_strided_slice %256 {offsets = [0, 128], sizes = [8, 128], strides = [1, 1]} : vector<8x384xf32> to vector<8x128xf32>
      %267 = vector.extract_strided_slice %257 {offsets = [0, 128], sizes = [8, 128], strides = [1, 1]} : vector<8x384xf32> to vector<8x128xf32>
      %268 = arith.addf %266, %267 : vector<8x128xf32>
      %269 = arith.negf %268 : vector<8x128xf32>
      %270 = math.exp %269 : vector<8x128xf32>
      %cst_88 = arith.constant 1.000000e+00 : f32
      %271 = vector.broadcast %cst_88 : f32 to vector<8x128xf32>
      %272 = arith.addf %271, %270 : vector<8x128xf32>
      %273 = arith.divf %271, %272 : vector<8x128xf32>
      %274 = vector.extract_strided_slice %256 {offsets = [0, 256], sizes = [8, 128], strides = [1, 1]} : vector<8x384xf32> to vector<8x128xf32>
      %275 = vector.extract_strided_slice %257 {offsets = [0, 256], sizes = [8, 128], strides = [1, 1]} : vector<8x384xf32> to vector<8x128xf32>
      %276 = arith.addf %275, %16 : vector<8x128xf32>
      %277 = arith.mulf %265, %276 : vector<8x128xf32>
      %278 = arith.addf %274, %277 : vector<8x128xf32>
      %279 = math.tanh %278 : vector<8x128xf32>
      %cst_89 = arith.constant 1.000000e+00 : f32
      %280 = vector.broadcast %cst_89 : f32 to vector<8x128xf32>
      %281 = arith.subf %280, %273 : vector<8x128xf32>
      %282 = arith.mulf %281, %279 : vector<8x128xf32>
      %283 = arith.mulf %273, %251 : vector<8x128xf32>
      %284 = arith.addf %282, %283 : vector<8x128xf32>
      %c0_90 = arith.constant 0 : index
      %c0_91 = arith.constant 0 : index
      %c0_92 = arith.constant 0 : index
      %285 = vector.load %arg6[%c0_90, %c0_91, %c0_92] : memref<8x8x128xf32, #tpu.memory_space<vmem>>, vector<1x8x128xf32>
      %286 = vector.shape_cast %285 : vector<1x8x128xf32> to vector<8x128xf32>
      %287 = vector.shape_cast %284 : vector<8x128xf32> to vector<1x8x128xf32>
      tpu.vector_store %arg6[%c0_90, %c0_91, %c0_92], %287 {strides = array<i32>} : memref<8x8x128xf32, #tpu.memory_space<vmem>>, vector<1x8x128xf32>,
    } else {
    }
    return
  }
  func.func @transform_0(%arg0: i32) -> (i32, i32, i32) {
    %c0_i32 = arith.constant 0 : i32
    %c0_i32_0 = arith.constant 0 : i32
    %c0_i32_1 = arith.constant 0 : i32
    %c0_i32_2 = arith.constant 0 : i32
    return %c0_i32, %c0_i32_0, %c0_i32_1 : i32, i32, i32
  }
  func.func @transform_1(%arg0: i32) -> (i32, i32, i32) {
    %c0_i32 = arith.constant 0 : i32
    %c0_i32_0 = arith.constant 0 : i32
    %c0_i32_1 = arith.constant 0 : i32
    return %arg0, %c0_i32, %c0_i32_0 : i32, i32, i32
  }
  func.func @transform_2(%arg0: i32) -> (i32, i32, i32) {
    %c0_i32 = arith.constant 0 : i32
    %c0_i32_0 = arith.constant 0 : i32
    %c0_i32_1 = arith.constant 0 : i32
    return %arg0, %c0_i32, %c0_i32_0 : i32, i32, i32
  }
  func.func @transform_3(%arg0: i32) -> (i32, i32, i32) {
    %c0_i32 = arith.constant 0 : i32
    %c0_i32_0 = arith.constant 0 : i32
    %c0_i32_1 = arith.constant 0 : i32
    return %arg0, %c0_i32, %c0_i32_0 : i32, i32, i32
  }
  func.func @transform_4(%arg0: i32) -> (i32, i32, i32) {
    %c0_i32 = arith.constant 0 : i32
    %c0_i32_0 = arith.constant 0 : i32
    %c0_i32_1 = arith.constant 0 : i32
    return %arg0, %c0_i32, %c0_i32_0 : i32, i32, i32
  }
  func.func @transform_5(%arg0: i32) -> (i32, i32, i32) {
    %c0_i32 = arith.constant 0 : i32
    %c0_i32_0 = arith.constant 0 : i32
    %c0_i32_1 = arith.constant 0 : i32
    return %c0_i32, %c0_i32_0, %arg0 : i32, i32, i32
  }
}

module attributes {stable_mosaic.version = 11 : i64} {
  func.func @_gru_head_kernel(%arg0: i32, %arg1: memref<8x8x256xf32, #tpu.memory_space<vmem>>, %arg2: memref<1x256x384xf32, #tpu.memory_space<vmem>>, %arg3: memref<1x128x384xf32, #tpu.memory_space<vmem>>, %arg4: memref<1x1x384xf32, #tpu.memory_space<vmem>>, %arg5: memref<1x1x128xf32, #tpu.memory_space<vmem>>, %arg6: memref<1x128x1xf32, #tpu.memory_space<vmem>>, %arg7: memref<1x8x1xf32, #tpu.memory_space<vmem>>, %arg8: memref<8x8x384xf32, #tpu.memory_space<vmem>>) attributes {dimension_semantics = [#tpu.dimension_semantics<parallel>], iteration_bounds = array<i64: 2>, scalar_prefetch = 0 : i64, scratch_operands = 1 : i64, tpu.core_type = #tpu.core_type<tc>, window_params = [{pipeline_mode = #tpu.pipeline_mode<synchronous>, transform_indices = @transform_0, window_bounds = array<i64: 8, 8, 256>}, {transform_indices = @transform_1, window_bounds = array<i64: 1, 256, 384>}, {transform_indices = @transform_2, window_bounds = array<i64: 1, 128, 384>}, {transform_indices = @transform_3, window_bounds = array<i64: 1, 1, 384>}, {transform_indices = @transform_4, window_bounds = array<i64: 1, 1, 128>}, {transform_indices = @transform_5, window_bounds = array<i64: 1, 128, 1>}, {transform_indices = @transform_6, window_bounds = array<i64: 1, 8, 1>}]} {
    %c0 = arith.constant 0 : index
    %c0_0 = arith.constant 0 : index
    %c0_1 = arith.constant 0 : index
    %0 = vector.load %arg3[%c0, %c0_0, %c0_1] : memref<1x128x384xf32, #tpu.memory_space<vmem>>, vector<1x128x384xf32>
    %1 = vector.shape_cast %0 : vector<1x128x384xf32> to vector<128x384xf32>
    %c0_2 = arith.constant 0 : index
    %c0_3 = arith.constant 0 : index
    %c0_4 = arith.constant 0 : index
    %2 = vector.load %arg5[%c0_2, %c0_3, %c0_4] : memref<1x1x128xf32, #tpu.memory_space<vmem>>, vector<1x1x128xf32>
    %3 = vector.shape_cast %2 : vector<1x1x128xf32> to vector<1x128xf32>
    %4 = vector.shape_cast %3 : vector<1x128xf32> to vector<1x128xf32>
    %5 = vector.broadcast %4 : vector<1x128xf32> to vector<8x128xf32>
    %cst = arith.constant 0.000000e+00 : f32
    %6 = vector.broadcast %cst : f32 to vector<8x128xf32>
    %c0_i32 = arith.constant 0 : i32
    %7 = arith.cmpi eq, %arg0, %c0_i32 : i32
    %8 = arith.extui %7 : i1 to i32
    %c0_i32_5 = arith.constant 0 : i32
    %9 = arith.cmpi ne, %8, %c0_i32_5 : i32
    scf.if %9 {
      %c0_7 = arith.constant 0 : index
      %c0_8 = arith.constant 0 : index
      %c0_9 = arith.constant 0 : index
      %13 = vector.load %arg1[%c0_7, %c0_8, %c0_9] : memref<8x8x256xf32, #tpu.memory_space<vmem>>, vector<8x8x256xf32>
      %14 = vector.shape_cast %13 : vector<8x8x256xf32> to vector<64x256xf32>
      %c0_10 = arith.constant 0 : index
      %c0_11 = arith.constant 0 : index
      %c0_12 = arith.constant 0 : index
      %15 = vector.load %arg2[%c0_10, %c0_11, %c0_12] : memref<1x256x384xf32, #tpu.memory_space<vmem>>, vector<1x256x384xf32>
      %16 = vector.shape_cast %15 : vector<1x256x384xf32> to vector<256x384xf32>
      %cst_13 = arith.constant dense<0.000000e+00> : vector<64x384xf32>
      %17 = tpu.matmul %14, %16, %cst_13 {dimension_numbers = #tpu.dot_dimension_numbers<[1], [0], [0], [1], [0, 0, 1, 1], [], []>} : vector<64x256xf32>, vector<256x384xf32>, vector<64x384xf32> -> vector<64x384xf32>
      %c0_14 = arith.constant 0 : index
      %c0_15 = arith.constant 0 : index
      %c0_16 = arith.constant 0 : index
      %18 = vector.load %arg4[%c0_14, %c0_15, %c0_16] : memref<1x1x384xf32, #tpu.memory_space<vmem>>, vector<1x1x384xf32>
      %19 = vector.shape_cast %18 : vector<1x1x384xf32> to vector<1x384xf32>
      %20 = vector.broadcast %19 : vector<1x384xf32> to vector<64x384xf32>
      %21 = arith.addf %17, %20 : vector<64x384xf32>
      %22 = vector.shape_cast %21 : vector<64x384xf32> to vector<8x8x384xf32>
      %c0_17 = arith.constant 0 : index
      %c0_18 = arith.constant 0 : index
      %c0_19 = arith.constant 0 : index
      %23 = vector.load %arg8[%c0_17, %c0_18, %c0_19] : memref<8x8x384xf32, #tpu.memory_space<vmem>>, vector<8x8x384xf32>
      tpu.vector_store %arg8[%c0_17, %c0_18, %c0_19], %22 {strides = array<i32>} : memref<8x8x384xf32, #tpu.memory_space<vmem>>, vector<8x8x384xf32>,
      %c0_20 = arith.constant 0 : index
      %c0_21 = arith.constant 0 : index
      %c0_22 = arith.constant 0 : index
      %24 = vector.load %arg8[%c0_20, %c0_21, %c0_22] : memref<8x8x384xf32, #tpu.memory_space<vmem>>, vector<1x8x384xf32>
      %25 = vector.shape_cast %24 : vector<1x8x384xf32> to vector<8x384xf32>
      %cst_23 = arith.constant dense<0.000000e+00> : vector<8x384xf32>
      %26 = tpu.matmul %6, %1, %cst_23 {dimension_numbers = #tpu.dot_dimension_numbers<[1], [0], [0], [1], [0, 0, 1, 1], [], []>} : vector<8x128xf32>, vector<128x384xf32>, vector<8x384xf32> -> vector<8x384xf32>
      %27 = vector.extract_strided_slice %25 {offsets = [0, 0], sizes = [8, 128], strides = [1, 1]} : vector<8x384xf32> to vector<8x128xf32>
      %28 = vector.extract_strided_slice %26 {offsets = [0, 0], sizes = [8, 128], strides = [1, 1]} : vector<8x384xf32> to vector<8x128xf32>
      %29 = arith.addf %27, %28 : vector<8x128xf32>
      %30 = arith.negf %29 : vector<8x128xf32>
      %31 = math.exp %30 : vector<8x128xf32>
      %cst_24 = arith.constant 1.000000e+00 : f32
      %32 = vector.broadcast %cst_24 : f32 to vector<8x128xf32>
      %33 = arith.addf %32, %31 : vector<8x128xf32>
      %34 = arith.divf %32, %33 : vector<8x128xf32>
      %35 = vector.extract_strided_slice %25 {offsets = [0, 128], sizes = [8, 128], strides = [1, 1]} : vector<8x384xf32> to vector<8x128xf32>
      %36 = vector.extract_strided_slice %26 {offsets = [0, 128], sizes = [8, 128], strides = [1, 1]} : vector<8x384xf32> to vector<8x128xf32>
      %37 = arith.addf %35, %36 : vector<8x128xf32>
      %38 = arith.negf %37 : vector<8x128xf32>
      %39 = math.exp %38 : vector<8x128xf32>
      %cst_25 = arith.constant 1.000000e+00 : f32
      %40 = vector.broadcast %cst_25 : f32 to vector<8x128xf32>
      %41 = arith.addf %40, %39 : vector<8x128xf32>
      %42 = arith.divf %40, %41 : vector<8x128xf32>
      %43 = vector.extract_strided_slice %25 {offsets = [0, 256], sizes = [8, 128], strides = [1, 1]} : vector<8x384xf32> to vector<8x128xf32>
      %44 = vector.extract_strided_slice %26 {offsets = [0, 256], sizes = [8, 128], strides = [1, 1]} : vector<8x384xf32> to vector<8x128xf32>
      %45 = arith.addf %44, %5 : vector<8x128xf32>
      %46 = arith.mulf %34, %45 : vector<8x128xf32>
      %47 = arith.addf %43, %46 : vector<8x128xf32>
      %48 = math.tanh %47 : vector<8x128xf32>
      %cst_26 = arith.constant 1.000000e+00 : f32
      %49 = vector.broadcast %cst_26 : f32 to vector<8x128xf32>
      %50 = arith.subf %49, %42 : vector<8x128xf32>
      %51 = arith.mulf %50, %48 : vector<8x128xf32>
      %52 = arith.mulf %42, %6 : vector<8x128xf32>
      %53 = arith.addf %51, %52 : vector<8x128xf32>
      %c1 = arith.constant 1 : index
      %c0_27 = arith.constant 0 : index
      %c0_28 = arith.constant 0 : index
      %54 = vector.load %arg8[%c1, %c0_27, %c0_28] : memref<8x8x384xf32, #tpu.memory_space<vmem>>, vector<1x8x384xf32>
      %55 = vector.shape_cast %54 : vector<1x8x384xf32> to vector<8x384xf32>
      %cst_29 = arith.constant dense<0.000000e+00> : vector<8x384xf32>
      %56 = tpu.matmul %53, %1, %cst_29 {dimension_numbers = #tpu.dot_dimension_numbers<[1], [0], [0], [1], [0, 0, 1, 1], [], []>} : vector<8x128xf32>, vector<128x384xf32>, vector<8x384xf32> -> vector<8x384xf32>
      %57 = vector.extract_strided_slice %55 {offsets = [0, 0], sizes = [8, 128], strides = [1, 1]} : vector<8x384xf32> to vector<8x128xf32>
      %58 = vector.extract_strided_slice %56 {offsets = [0, 0], sizes = [8, 128], strides = [1, 1]} : vector<8x384xf32> to vector<8x128xf32>
      %59 = arith.addf %57, %58 : vector<8x128xf32>
      %60 = arith.negf %59 : vector<8x128xf32>
      %61 = math.exp %60 : vector<8x128xf32>
      %cst_30 = arith.constant 1.000000e+00 : f32
      %62 = vector.broadcast %cst_30 : f32 to vector<8x128xf32>
      %63 = arith.addf %62, %61 : vector<8x128xf32>
      %64 = arith.divf %62, %63 : vector<8x128xf32>
      %65 = vector.extract_strided_slice %55 {offsets = [0, 128], sizes = [8, 128], strides = [1, 1]} : vector<8x384xf32> to vector<8x128xf32>
      %66 = vector.extract_strided_slice %56 {offsets = [0, 128], sizes = [8, 128], strides = [1, 1]} : vector<8x384xf32> to vector<8x128xf32>
      %67 = arith.addf %65, %66 : vector<8x128xf32>
      %68 = arith.negf %67 : vector<8x128xf32>
      %69 = math.exp %68 : vector<8x128xf32>
      %cst_31 = arith.constant 1.000000e+00 : f32
      %70 = vector.broadcast %cst_31 : f32 to vector<8x128xf32>
      %71 = arith.addf %70, %69 : vector<8x128xf32>
      %72 = arith.divf %70, %71 : vector<8x128xf32>
      %73 = vector.extract_strided_slice %55 {offsets = [0, 256], sizes = [8, 128], strides = [1, 1]} : vector<8x384xf32> to vector<8x128xf32>
      %74 = vector.extract_strided_slice %56 {offsets = [0, 256], sizes = [8, 128], strides = [1, 1]} : vector<8x384xf32> to vector<8x128xf32>
      %75 = arith.addf %74, %5 : vector<8x128xf32>
      %76 = arith.mulf %64, %75 : vector<8x128xf32>
      %77 = arith.addf %73, %76 : vector<8x128xf32>
      %78 = math.tanh %77 : vector<8x128xf32>
      %cst_32 = arith.constant 1.000000e+00 : f32
      %79 = vector.broadcast %cst_32 : f32 to vector<8x128xf32>
      %80 = arith.subf %79, %72 : vector<8x128xf32>
      %81 = arith.mulf %80, %78 : vector<8x128xf32>
      %82 = arith.mulf %72, %53 : vector<8x128xf32>
      %83 = arith.addf %81, %82 : vector<8x128xf32>
      %c2 = arith.constant 2 : index
      %c0_33 = arith.constant 0 : index
      %c0_34 = arith.constant 0 : index
      %84 = vector.load %arg8[%c2, %c0_33, %c0_34] : memref<8x8x384xf32, #tpu.memory_space<vmem>>, vector<1x8x384xf32>
      %85 = vector.shape_cast %84 : vector<1x8x384xf32> to vector<8x384xf32>
      %cst_35 = arith.constant dense<0.000000e+00> : vector<8x384xf32>
      %86 = tpu.matmul %83, %1, %cst_35 {dimension_numbers = #tpu.dot_dimension_numbers<[1], [0], [0], [1], [0, 0, 1, 1], [], []>} : vector<8x128xf32>, vector<128x384xf32>, vector<8x384xf32> -> vector<8x384xf32>
      %87 = vector.extract_strided_slice %85 {offsets = [0, 0], sizes = [8, 128], strides = [1, 1]} : vector<8x384xf32> to vector<8x128xf32>
      %88 = vector.extract_strided_slice %86 {offsets = [0, 0], sizes = [8, 128], strides = [1, 1]} : vector<8x384xf32> to vector<8x128xf32>
      %89 = arith.addf %87, %88 : vector<8x128xf32>
      %90 = arith.negf %89 : vector<8x128xf32>
      %91 = math.exp %90 : vector<8x128xf32>
      %cst_36 = arith.constant 1.000000e+00 : f32
      %92 = vector.broadcast %cst_36 : f32 to vector<8x128xf32>
      %93 = arith.addf %92, %91 : vector<8x128xf32>
      %94 = arith.divf %92, %93 : vector<8x128xf32>
      %95 = vector.extract_strided_slice %85 {offsets = [0, 128], sizes = [8, 128], strides = [1, 1]} : vector<8x384xf32> to vector<8x128xf32>
      %96 = vector.extract_strided_slice %86 {offsets = [0, 128], sizes = [8, 128], strides = [1, 1]} : vector<8x384xf32> to vector<8x128xf32>
      %97 = arith.addf %95, %96 : vector<8x128xf32>
      %98 = arith.negf %97 : vector<8x128xf32>
      %99 = math.exp %98 : vector<8x128xf32>
      %cst_37 = arith.constant 1.000000e+00 : f32
      %100 = vector.broadcast %cst_37 : f32 to vector<8x128xf32>
      %101 = arith.addf %100, %99 : vector<8x128xf32>
      %102 = arith.divf %100, %101 : vector<8x128xf32>
      %103 = vector.extract_strided_slice %85 {offsets = [0, 256], sizes = [8, 128], strides = [1, 1]} : vector<8x384xf32> to vector<8x128xf32>
      %104 = vector.extract_strided_slice %86 {offsets = [0, 256], sizes = [8, 128], strides = [1, 1]} : vector<8x384xf32> to vector<8x128xf32>
      %105 = arith.addf %104, %5 : vector<8x128xf32>
      %106 = arith.mulf %94, %105 : vector<8x128xf32>
      %107 = arith.addf %103, %106 : vector<8x128xf32>
      %108 = math.tanh %107 : vector<8x128xf32>
      %cst_38 = arith.constant 1.000000e+00 : f32
      %109 = vector.broadcast %cst_38 : f32 to vector<8x128xf32>
      %110 = arith.subf %109, %102 : vector<8x128xf32>
      %111 = arith.mulf %110, %108 : vector<8x128xf32>
      %112 = arith.mulf %102, %83 : vector<8x128xf32>
      %113 = arith.addf %111, %112 : vector<8x128xf32>
      %c3 = arith.constant 3 : index
      %c0_39 = arith.constant 0 : index
      %c0_40 = arith.constant 0 : index
      %114 = vector.load %arg8[%c3, %c0_39, %c0_40] : memref<8x8x384xf32, #tpu.memory_space<vmem>>, vector<1x8x384xf32>
      %115 = vector.shape_cast %114 : vector<1x8x384xf32> to vector<8x384xf32>
      %cst_41 = arith.constant dense<0.000000e+00> : vector<8x384xf32>
      %116 = tpu.matmul %113, %1, %cst_41 {dimension_numbers = #tpu.dot_dimension_numbers<[1], [0], [0], [1], [0, 0, 1, 1], [], []>} : vector<8x128xf32>, vector<128x384xf32>, vector<8x384xf32> -> vector<8x384xf32>
      %117 = vector.extract_strided_slice %115 {offsets = [0, 0], sizes = [8, 128], strides = [1, 1]} : vector<8x384xf32> to vector<8x128xf32>
      %118 = vector.extract_strided_slice %116 {offsets = [0, 0], sizes = [8, 128], strides = [1, 1]} : vector<8x384xf32> to vector<8x128xf32>
      %119 = arith.addf %117, %118 : vector<8x128xf32>
      %120 = arith.negf %119 : vector<8x128xf32>
      %121 = math.exp %120 : vector<8x128xf32>
      %cst_42 = arith.constant 1.000000e+00 : f32
      %122 = vector.broadcast %cst_42 : f32 to vector<8x128xf32>
      %123 = arith.addf %122, %121 : vector<8x128xf32>
      %124 = arith.divf %122, %123 : vector<8x128xf32>
      %125 = vector.extract_strided_slice %115 {offsets = [0, 128], sizes = [8, 128], strides = [1, 1]} : vector<8x384xf32> to vector<8x128xf32>
      %126 = vector.extract_strided_slice %116 {offsets = [0, 128], sizes = [8, 128], strides = [1, 1]} : vector<8x384xf32> to vector<8x128xf32>
      %127 = arith.addf %125, %126 : vector<8x128xf32>
      %128 = arith.negf %127 : vector<8x128xf32>
      %129 = math.exp %128 : vector<8x128xf32>
      %cst_43 = arith.constant 1.000000e+00 : f32
      %130 = vector.broadcast %cst_43 : f32 to vector<8x128xf32>
      %131 = arith.addf %130, %129 : vector<8x128xf32>
      %132 = arith.divf %130, %131 : vector<8x128xf32>
      %133 = vector.extract_strided_slice %115 {offsets = [0, 256], sizes = [8, 128], strides = [1, 1]} : vector<8x384xf32> to vector<8x128xf32>
      %134 = vector.extract_strided_slice %116 {offsets = [0, 256], sizes = [8, 128], strides = [1, 1]} : vector<8x384xf32> to vector<8x128xf32>
      %135 = arith.addf %134, %5 : vector<8x128xf32>
      %136 = arith.mulf %124, %135 : vector<8x128xf32>
      %137 = arith.addf %133, %136 : vector<8x128xf32>
      %138 = math.tanh %137 : vector<8x128xf32>
      %cst_44 = arith.constant 1.000000e+00 : f32
      %139 = vector.broadcast %cst_44 : f32 to vector<8x128xf32>
      %140 = arith.subf %139, %132 : vector<8x128xf32>
      %141 = arith.mulf %140, %138 : vector<8x128xf32>
      %142 = arith.mulf %132, %113 : vector<8x128xf32>
      %143 = arith.addf %141, %142 : vector<8x128xf32>
      %c4 = arith.constant 4 : index
      %c0_45 = arith.constant 0 : index
      %c0_46 = arith.constant 0 : index
      %144 = vector.load %arg8[%c4, %c0_45, %c0_46] : memref<8x8x384xf32, #tpu.memory_space<vmem>>, vector<1x8x384xf32>
      %145 = vector.shape_cast %144 : vector<1x8x384xf32> to vector<8x384xf32>
      %cst_47 = arith.constant dense<0.000000e+00> : vector<8x384xf32>
      %146 = tpu.matmul %143, %1, %cst_47 {dimension_numbers = #tpu.dot_dimension_numbers<[1], [0], [0], [1], [0, 0, 1, 1], [], []>} : vector<8x128xf32>, vector<128x384xf32>, vector<8x384xf32> -> vector<8x384xf32>
      %147 = vector.extract_strided_slice %145 {offsets = [0, 0], sizes = [8, 128], strides = [1, 1]} : vector<8x384xf32> to vector<8x128xf32>
      %148 = vector.extract_strided_slice %146 {offsets = [0, 0], sizes = [8, 128], strides = [1, 1]} : vector<8x384xf32> to vector<8x128xf32>
      %149 = arith.addf %147, %148 : vector<8x128xf32>
      %150 = arith.negf %149 : vector<8x128xf32>
      %151 = math.exp %150 : vector<8x128xf32>
      %cst_48 = arith.constant 1.000000e+00 : f32
      %152 = vector.broadcast %cst_48 : f32 to vector<8x128xf32>
      %153 = arith.addf %152, %151 : vector<8x128xf32>
      %154 = arith.divf %152, %153 : vector<8x128xf32>
      %155 = vector.extract_strided_slice %145 {offsets = [0, 128], sizes = [8, 128], strides = [1, 1]} : vector<8x384xf32> to vector<8x128xf32>
      %156 = vector.extract_strided_slice %146 {offsets = [0, 128], sizes = [8, 128], strides = [1, 1]} : vector<8x384xf32> to vector<8x128xf32>
      %157 = arith.addf %155, %156 : vector<8x128xf32>
      %158 = arith.negf %157 : vector<8x128xf32>
      %159 = math.exp %158 : vector<8x128xf32>
      %cst_49 = arith.constant 1.000000e+00 : f32
      %160 = vector.broadcast %cst_49 : f32 to vector<8x128xf32>
      %161 = arith.addf %160, %159 : vector<8x128xf32>
      %162 = arith.divf %160, %161 : vector<8x128xf32>
      %163 = vector.extract_strided_slice %145 {offsets = [0, 256], sizes = [8, 128], strides = [1, 1]} : vector<8x384xf32> to vector<8x128xf32>
      %164 = vector.extract_strided_slice %146 {offsets = [0, 256], sizes = [8, 128], strides = [1, 1]} : vector<8x384xf32> to vector<8x128xf32>
      %165 = arith.addf %164, %5 : vector<8x128xf32>
      %166 = arith.mulf %154, %165 : vector<8x128xf32>
      %167 = arith.addf %163, %166 : vector<8x128xf32>
      %168 = math.tanh %167 : vector<8x128xf32>
      %cst_50 = arith.constant 1.000000e+00 : f32
      %169 = vector.broadcast %cst_50 : f32 to vector<8x128xf32>
      %170 = arith.subf %169, %162 : vector<8x128xf32>
      %171 = arith.mulf %170, %168 : vector<8x128xf32>
      %172 = arith.mulf %162, %143 : vector<8x128xf32>
      %173 = arith.addf %171, %172 : vector<8x128xf32>
      %c5 = arith.constant 5 : index
      %c0_51 = arith.constant 0 : index
      %c0_52 = arith.constant 0 : index
      %174 = vector.load %arg8[%c5, %c0_51, %c0_52] : memref<8x8x384xf32, #tpu.memory_space<vmem>>, vector<1x8x384xf32>
      %175 = vector.shape_cast %174 : vector<1x8x384xf32> to vector<8x384xf32>
      %cst_53 = arith.constant dense<0.000000e+00> : vector<8x384xf32>
      %176 = tpu.matmul %173, %1, %cst_53 {dimension_numbers = #tpu.dot_dimension_numbers<[1], [0], [0], [1], [0, 0, 1, 1], [], []>} : vector<8x128xf32>, vector<128x384xf32>, vector<8x384xf32> -> vector<8x384xf32>
      %177 = vector.extract_strided_slice %175 {offsets = [0, 0], sizes = [8, 128], strides = [1, 1]} : vector<8x384xf32> to vector<8x128xf32>
      %178 = vector.extract_strided_slice %176 {offsets = [0, 0], sizes = [8, 128], strides = [1, 1]} : vector<8x384xf32> to vector<8x128xf32>
      %179 = arith.addf %177, %178 : vector<8x128xf32>
      %180 = arith.negf %179 : vector<8x128xf32>
      %181 = math.exp %180 : vector<8x128xf32>
      %cst_54 = arith.constant 1.000000e+00 : f32
      %182 = vector.broadcast %cst_54 : f32 to vector<8x128xf32>
      %183 = arith.addf %182, %181 : vector<8x128xf32>
      %184 = arith.divf %182, %183 : vector<8x128xf32>
      %185 = vector.extract_strided_slice %175 {offsets = [0, 128], sizes = [8, 128], strides = [1, 1]} : vector<8x384xf32> to vector<8x128xf32>
      %186 = vector.extract_strided_slice %176 {offsets = [0, 128], sizes = [8, 128], strides = [1, 1]} : vector<8x384xf32> to vector<8x128xf32>
      %187 = arith.addf %185, %186 : vector<8x128xf32>
      %188 = arith.negf %187 : vector<8x128xf32>
      %189 = math.exp %188 : vector<8x128xf32>
      %cst_55 = arith.constant 1.000000e+00 : f32
      %190 = vector.broadcast %cst_55 : f32 to vector<8x128xf32>
      %191 = arith.addf %190, %189 : vector<8x128xf32>
      %192 = arith.divf %190, %191 : vector<8x128xf32>
      %193 = vector.extract_strided_slice %175 {offsets = [0, 256], sizes = [8, 128], strides = [1, 1]} : vector<8x384xf32> to vector<8x128xf32>
      %194 = vector.extract_strided_slice %176 {offsets = [0, 256], sizes = [8, 128], strides = [1, 1]} : vector<8x384xf32> to vector<8x128xf32>
      %195 = arith.addf %194, %5 : vector<8x128xf32>
      %196 = arith.mulf %184, %195 : vector<8x128xf32>
      %197 = arith.addf %193, %196 : vector<8x128xf32>
      %198 = math.tanh %197 : vector<8x128xf32>
      %cst_56 = arith.constant 1.000000e+00 : f32
      %199 = vector.broadcast %cst_56 : f32 to vector<8x128xf32>
      %200 = arith.subf %199, %192 : vector<8x128xf32>
      %201 = arith.mulf %200, %198 : vector<8x128xf32>
      %202 = arith.mulf %192, %173 : vector<8x128xf32>
      %203 = arith.addf %201, %202 : vector<8x128xf32>
      %c6 = arith.constant 6 : index
      %c0_57 = arith.constant 0 : index
      %c0_58 = arith.constant 0 : index
      %204 = vector.load %arg8[%c6, %c0_57, %c0_58] : memref<8x8x384xf32, #tpu.memory_space<vmem>>, vector<1x8x384xf32>
      %205 = vector.shape_cast %204 : vector<1x8x384xf32> to vector<8x384xf32>
      %cst_59 = arith.constant dense<0.000000e+00> : vector<8x384xf32>
      %206 = tpu.matmul %203, %1, %cst_59 {dimension_numbers = #tpu.dot_dimension_numbers<[1], [0], [0], [1], [0, 0, 1, 1], [], []>} : vector<8x128xf32>, vector<128x384xf32>, vector<8x384xf32> -> vector<8x384xf32>
      %207 = vector.extract_strided_slice %205 {offsets = [0, 0], sizes = [8, 128], strides = [1, 1]} : vector<8x384xf32> to vector<8x128xf32>
      %208 = vector.extract_strided_slice %206 {offsets = [0, 0], sizes = [8, 128], strides = [1, 1]} : vector<8x384xf32> to vector<8x128xf32>
      %209 = arith.addf %207, %208 : vector<8x128xf32>
      %210 = arith.negf %209 : vector<8x128xf32>
      %211 = math.exp %210 : vector<8x128xf32>
      %cst_60 = arith.constant 1.000000e+00 : f32
      %212 = vector.broadcast %cst_60 : f32 to vector<8x128xf32>
      %213 = arith.addf %212, %211 : vector<8x128xf32>
      %214 = arith.divf %212, %213 : vector<8x128xf32>
      %215 = vector.extract_strided_slice %205 {offsets = [0, 128], sizes = [8, 128], strides = [1, 1]} : vector<8x384xf32> to vector<8x128xf32>
      %216 = vector.extract_strided_slice %206 {offsets = [0, 128], sizes = [8, 128], strides = [1, 1]} : vector<8x384xf32> to vector<8x128xf32>
      %217 = arith.addf %215, %216 : vector<8x128xf32>
      %218 = arith.negf %217 : vector<8x128xf32>
      %219 = math.exp %218 : vector<8x128xf32>
      %cst_61 = arith.constant 1.000000e+00 : f32
      %220 = vector.broadcast %cst_61 : f32 to vector<8x128xf32>
      %221 = arith.addf %220, %219 : vector<8x128xf32>
      %222 = arith.divf %220, %221 : vector<8x128xf32>
      %223 = vector.extract_strided_slice %205 {offsets = [0, 256], sizes = [8, 128], strides = [1, 1]} : vector<8x384xf32> to vector<8x128xf32>
      %224 = vector.extract_strided_slice %206 {offsets = [0, 256], sizes = [8, 128], strides = [1, 1]} : vector<8x384xf32> to vector<8x128xf32>
      %225 = arith.addf %224, %5 : vector<8x128xf32>
      %226 = arith.mulf %214, %225 : vector<8x128xf32>
      %227 = arith.addf %223, %226 : vector<8x128xf32>
      %228 = math.tanh %227 : vector<8x128xf32>
      %cst_62 = arith.constant 1.000000e+00 : f32
      %229 = vector.broadcast %cst_62 : f32 to vector<8x128xf32>
      %230 = arith.subf %229, %222 : vector<8x128xf32>
      %231 = arith.mulf %230, %228 : vector<8x128xf32>
      %232 = arith.mulf %222, %203 : vector<8x128xf32>
      %233 = arith.addf %231, %232 : vector<8x128xf32>
      %c7 = arith.constant 7 : index
      %c0_63 = arith.constant 0 : index
      %c0_64 = arith.constant 0 : index
      %234 = vector.load %arg8[%c7, %c0_63, %c0_64] : memref<8x8x384xf32, #tpu.memory_space<vmem>>, vector<1x8x384xf32>
      %235 = vector.shape_cast %234 : vector<1x8x384xf32> to vector<8x384xf32>
      %cst_65 = arith.constant dense<0.000000e+00> : vector<8x384xf32>
      %236 = tpu.matmul %233, %1, %cst_65 {dimension_numbers = #tpu.dot_dimension_numbers<[1], [0], [0], [1], [0, 0, 1, 1], [], []>} : vector<8x128xf32>, vector<128x384xf32>, vector<8x384xf32> -> vector<8x384xf32>
      %237 = vector.extract_strided_slice %235 {offsets = [0, 0], sizes = [8, 128], strides = [1, 1]} : vector<8x384xf32> to vector<8x128xf32>
      %238 = vector.extract_strided_slice %236 {offsets = [0, 0], sizes = [8, 128], strides = [1, 1]} : vector<8x384xf32> to vector<8x128xf32>
      %239 = arith.addf %237, %238 : vector<8x128xf32>
      %240 = arith.negf %239 : vector<8x128xf32>
      %241 = math.exp %240 : vector<8x128xf32>
      %cst_66 = arith.constant 1.000000e+00 : f32
      %242 = vector.broadcast %cst_66 : f32 to vector<8x128xf32>
      %243 = arith.addf %242, %241 : vector<8x128xf32>
      %244 = arith.divf %242, %243 : vector<8x128xf32>
      %245 = vector.extract_strided_slice %235 {offsets = [0, 128], sizes = [8, 128], strides = [1, 1]} : vector<8x384xf32> to vector<8x128xf32>
      %246 = vector.extract_strided_slice %236 {offsets = [0, 128], sizes = [8, 128], strides = [1, 1]} : vector<8x384xf32> to vector<8x128xf32>
      %247 = arith.addf %245, %246 : vector<8x128xf32>
      %248 = arith.negf %247 : vector<8x128xf32>
      %249 = math.exp %248 : vector<8x128xf32>
      %cst_67 = arith.constant 1.000000e+00 : f32
      %250 = vector.broadcast %cst_67 : f32 to vector<8x128xf32>
      %251 = arith.addf %250, %249 : vector<8x128xf32>
      %252 = arith.divf %250, %251 : vector<8x128xf32>
      %253 = vector.extract_strided_slice %235 {offsets = [0, 256], sizes = [8, 128], strides = [1, 1]} : vector<8x384xf32> to vector<8x128xf32>
      %254 = vector.extract_strided_slice %236 {offsets = [0, 256], sizes = [8, 128], strides = [1, 1]} : vector<8x384xf32> to vector<8x128xf32>
      %255 = arith.addf %254, %5 : vector<8x128xf32>
      %256 = arith.mulf %244, %255 : vector<8x128xf32>
      %257 = arith.addf %253, %256 : vector<8x128xf32>
      %258 = math.tanh %257 : vector<8x128xf32>
      %cst_68 = arith.constant 1.000000e+00 : f32
      %259 = vector.broadcast %cst_68 : f32 to vector<8x128xf32>
      %260 = arith.subf %259, %252 : vector<8x128xf32>
      %261 = arith.mulf %260, %258 : vector<8x128xf32>
      %262 = arith.mulf %252, %233 : vector<8x128xf32>
      %263 = arith.addf %261, %262 : vector<8x128xf32>
      %c0_69 = arith.constant 0 : index
      %c0_70 = arith.constant 0 : index
      %c0_71 = arith.constant 0 : index
      %264 = vector.load %arg6[%c0_69, %c0_70, %c0_71] : memref<1x128x1xf32, #tpu.memory_space<vmem>>, vector<1x128x1xf32>
      %265 = vector.shape_cast %264 : vector<1x128x1xf32> to vector<128x1xf32>
      %cst_72 = arith.constant dense<0.000000e+00> : vector<8x1xf32>
      %266 = tpu.matmul %263, %265, %cst_72 {dimension_numbers = #tpu.dot_dimension_numbers<[1], [0], [0], [1], [0, 0, 1, 1], [], []>} : vector<8x128xf32>, vector<128x1xf32>, vector<8x1xf32> -> vector<8x1xf32>
      %c0_73 = arith.constant 0 : index
      %c0_74 = arith.constant 0 : index
      %c0_75 = arith.constant 0 : index
      %267 = vector.load %arg7[%c0_73, %c0_74, %c0_75] : memref<1x8x1xf32, #tpu.memory_space<vmem>>, vector<1x8x1xf32>
      %268 = vector.shape_cast %267 : vector<1x8x1xf32> to vector<8x1xf32>
      %269 = vector.shape_cast %266 : vector<8x1xf32> to vector<1x8x1xf32>
      tpu.vector_store %arg7[%c0_73, %c0_74, %c0_75], %269 {strides = array<i32>} : memref<1x8x1xf32, #tpu.memory_space<vmem>>, vector<1x8x1xf32>,
    } else {
    }
    %c1_i32 = arith.constant 1 : i32
    %10 = arith.cmpi eq, %arg0, %c1_i32 : i32
    %11 = arith.extui %10 : i1 to i32
    %c0_i32_6 = arith.constant 0 : i32
    %12 = arith.cmpi ne, %11, %c0_i32_6 : i32
    scf.if %12 {
      %c7 = arith.constant 7 : index
      %c0_7 = arith.constant 0 : index
      %c0_8 = arith.constant 0 : index
      %13 = vector.load %arg1[%c7, %c0_7, %c0_8] : memref<8x8x256xf32, #tpu.memory_space<vmem>>, vector<1x8x256xf32>
      %14 = vector.shape_cast %13 : vector<1x8x256xf32> to vector<8x256xf32>
      %c0_9 = arith.constant 0 : index
      %c0_10 = arith.constant 0 : index
      %c0_11 = arith.constant 0 : index
      %15 = vector.load %arg2[%c0_9, %c0_10, %c0_11] : memref<1x256x384xf32, #tpu.memory_space<vmem>>, vector<1x256x384xf32>
      %16 = vector.shape_cast %15 : vector<1x256x384xf32> to vector<256x384xf32>
      %cst_12 = arith.constant dense<0.000000e+00> : vector<8x384xf32>
      %17 = tpu.matmul %14, %16, %cst_12 {dimension_numbers = #tpu.dot_dimension_numbers<[1], [0], [0], [1], [0, 0, 1, 1], [], []>} : vector<8x256xf32>, vector<256x384xf32>, vector<8x384xf32> -> vector<8x384xf32>
      %c0_13 = arith.constant 0 : index
      %c0_14 = arith.constant 0 : index
      %c0_15 = arith.constant 0 : index
      %18 = vector.load %arg4[%c0_13, %c0_14, %c0_15] : memref<1x1x384xf32, #tpu.memory_space<vmem>>, vector<1x1x384xf32>
      %19 = vector.shape_cast %18 : vector<1x1x384xf32> to vector<1x384xf32>
      %20 = vector.broadcast %19 : vector<1x384xf32> to vector<8x384xf32>
      %21 = arith.addf %17, %20 : vector<8x384xf32>
      %cst_16 = arith.constant dense<0.000000e+00> : vector<8x384xf32>
      %22 = tpu.matmul %6, %1, %cst_16 {dimension_numbers = #tpu.dot_dimension_numbers<[1], [0], [0], [1], [0, 0, 1, 1], [], []>} : vector<8x128xf32>, vector<128x384xf32>, vector<8x384xf32> -> vector<8x384xf32>
      %23 = vector.extract_strided_slice %21 {offsets = [0, 0], sizes = [8, 128], strides = [1, 1]} : vector<8x384xf32> to vector<8x128xf32>
      %24 = vector.extract_strided_slice %22 {offsets = [0, 0], sizes = [8, 128], strides = [1, 1]} : vector<8x384xf32> to vector<8x128xf32>
      %25 = arith.addf %23, %24 : vector<8x128xf32>
      %26 = arith.negf %25 : vector<8x128xf32>
      %27 = math.exp %26 : vector<8x128xf32>
      %cst_17 = arith.constant 1.000000e+00 : f32
      %28 = vector.broadcast %cst_17 : f32 to vector<8x128xf32>
      %29 = arith.addf %28, %27 : vector<8x128xf32>
      %30 = arith.divf %28, %29 : vector<8x128xf32>
      %31 = vector.extract_strided_slice %21 {offsets = [0, 128], sizes = [8, 128], strides = [1, 1]} : vector<8x384xf32> to vector<8x128xf32>
      %32 = vector.extract_strided_slice %22 {offsets = [0, 128], sizes = [8, 128], strides = [1, 1]} : vector<8x384xf32> to vector<8x128xf32>
      %33 = arith.addf %31, %32 : vector<8x128xf32>
      %34 = arith.negf %33 : vector<8x128xf32>
      %35 = math.exp %34 : vector<8x128xf32>
      %cst_18 = arith.constant 1.000000e+00 : f32
      %36 = vector.broadcast %cst_18 : f32 to vector<8x128xf32>
      %37 = arith.addf %36, %35 : vector<8x128xf32>
      %38 = arith.divf %36, %37 : vector<8x128xf32>
      %39 = vector.extract_strided_slice %21 {offsets = [0, 256], sizes = [8, 128], strides = [1, 1]} : vector<8x384xf32> to vector<8x128xf32>
      %40 = vector.extract_strided_slice %22 {offsets = [0, 256], sizes = [8, 128], strides = [1, 1]} : vector<8x384xf32> to vector<8x128xf32>
      %41 = arith.addf %40, %5 : vector<8x128xf32>
      %42 = arith.mulf %30, %41 : vector<8x128xf32>
      %43 = arith.addf %39, %42 : vector<8x128xf32>
      %44 = math.tanh %43 : vector<8x128xf32>
      %cst_19 = arith.constant 1.000000e+00 : f32
      %45 = vector.broadcast %cst_19 : f32 to vector<8x128xf32>
      %46 = arith.subf %45, %38 : vector<8x128xf32>
      %47 = arith.mulf %46, %44 : vector<8x128xf32>
      %48 = arith.mulf %38, %6 : vector<8x128xf32>
      %49 = arith.addf %47, %48 : vector<8x128xf32>
      %c0_20 = arith.constant 0 : index
      %c0_21 = arith.constant 0 : index
      %c0_22 = arith.constant 0 : index
      %50 = vector.load %arg6[%c0_20, %c0_21, %c0_22] : memref<1x128x1xf32, #tpu.memory_space<vmem>>, vector<1x128x1xf32>
      %51 = vector.shape_cast %50 : vector<1x128x1xf32> to vector<128x1xf32>
      %cst_23 = arith.constant dense<0.000000e+00> : vector<8x1xf32>
      %52 = tpu.matmul %49, %51, %cst_23 {dimension_numbers = #tpu.dot_dimension_numbers<[1], [0], [0], [1], [0, 0, 1, 1], [], []>} : vector<8x128xf32>, vector<128x1xf32>, vector<8x1xf32> -> vector<8x1xf32>
      %c0_24 = arith.constant 0 : index
      %c0_25 = arith.constant 0 : index
      %c0_26 = arith.constant 0 : index
      %53 = vector.load %arg7[%c0_24, %c0_25, %c0_26] : memref<1x8x1xf32, #tpu.memory_space<vmem>>, vector<1x8x1xf32>
      %54 = vector.shape_cast %53 : vector<1x8x1xf32> to vector<8x1xf32>
      %55 = vector.shape_cast %52 : vector<8x1xf32> to vector<1x8x1xf32>
      tpu.vector_store %arg7[%c0_24, %c0_25, %c0_26], %55 {strides = array<i32>} : memref<1x8x1xf32, #tpu.memory_space<vmem>>, vector<1x8x1xf32>,
    } else {
    }
    return
  }
  func.func @transform_0(%arg0: i32) -> (i32, i32, i32) {
    %c0_i32 = arith.constant 0 : i32
    %c0_i32_0 = arith.constant 0 : i32
    %c0_i32_1 = arith.constant 0 : i32
    %c0_i32_2 = arith.constant 0 : i32
    return %c0_i32, %c0_i32_0, %c0_i32_1 : i32, i32, i32
  }
  func.func @transform_1(%arg0: i32) -> (i32, i32, i32) {
    %c0_i32 = arith.constant 0 : i32
    %c0_i32_0 = arith.constant 0 : i32
    %c0_i32_1 = arith.constant 0 : i32
    return %arg0, %c0_i32, %c0_i32_0 : i32, i32, i32
  }
  func.func @transform_2(%arg0: i32) -> (i32, i32, i32) {
    %c0_i32 = arith.constant 0 : i32
    %c0_i32_0 = arith.constant 0 : i32
    %c0_i32_1 = arith.constant 0 : i32
    return %arg0, %c0_i32, %c0_i32_0 : i32, i32, i32
  }
  func.func @transform_3(%arg0: i32) -> (i32, i32, i32) {
    %c0_i32 = arith.constant 0 : i32
    %c0_i32_0 = arith.constant 0 : i32
    %c0_i32_1 = arith.constant 0 : i32
    return %arg0, %c0_i32, %c0_i32_0 : i32, i32, i32
  }
  func.func @transform_4(%arg0: i32) -> (i32, i32, i32) {
    %c0_i32 = arith.constant 0 : i32
    %c0_i32_0 = arith.constant 0 : i32
    %c0_i32_1 = arith.constant 0 : i32
    return %arg0, %c0_i32, %c0_i32_0 : i32, i32, i32
  }
  func.func @transform_5(%arg0: i32) -> (i32, i32, i32) {
    %c0_i32 = arith.constant 0 : i32
    %c0_i32_0 = arith.constant 0 : i32
    %c0_i32_1 = arith.constant 0 : i32
    return %arg0, %c0_i32, %c0_i32_0 : i32, i32, i32
  }
  func.func @transform_6(%arg0: i32) -> (i32, i32, i32) {
    %c0_i32 = arith.constant 0 : i32
    %c0_i32_0 = arith.constant 0 : i32
    %c0_i32_1 = arith.constant 0 : i32
    return %arg0, %c0_i32, %c0_i32_0 : i32, i32, i32
  }
}

</mosaic_0001>

<bundles_post_ra>
// kernel: bigru_forward.2
= control target key start
LH: loop header
LB: loop body
LE: loop exit
PB: predicated region body
PF: predicated region fallthrough
CT: control target
= control target key end

     0   :  { %10 = vsyncpa [#allocation4], 0  ;;  %s4146_s0 = inlined_call_operand.vmem [shape: f32[8,8,8], index: 0, kind: input, shape index: {}]   ;;  %s4147_s1 = inlined_call_operand.vmem [shape: f32[2,8,384], index: 1, kind: input, shape index: {}]   ;;  %s4148_s2 = inlined_call_operand.hbm [shape: f32[2,128,384], index: 2, kind: input, shape index: {}]   ;;  %s4149_s3 = inlined_call_operand.vmem [shape: f32[2,1,384], index: 3, kind: input, shape index: {}]   ;;  %s4150_s4 = inlined_call_operand.vmem [shape: f32[2,1,128], index: 4, kind: input, shape index: {}]   ;;  %s4151_s5 = inlined_call_operand.vmem [shape: f32[8,8,256], index: 5, kind: output, shape index: {}]  }
   0x1   :  { %12 = vsyncpa [#allocation4 + $0x1], 0  ;;  %s2923_s18 = smov 0   ;;  %s2925_s19 = smov 0  }
   0x2   :  { %s2927_s20 = smov 0   ;;  %s2929_s21 = smov 0  }
   0x3 LB: > { %s2942_s22 = sadd.s32 4294967295, %s2887_s21   ;;  %s2945_s23 = sadd.s32 1, %s2887_s21   ;;  %s2887_s21 = sphi %s2929_s21, %s4265_s21   ;;  %s2883_s20 = sphi %s2927_s20, %s4264_s20   ;;  %s2879_s19 = sphi %s2925_s19, %s4263_s19   ;;  %s2875_s18 = sphi %s2923_s18, %s4262_s18  }
   0x4   : > { %s69_s24 = ssub.s32 %s2887_s21, %s2945_s23  ;;  %s72_s25 = sadd.s32 1, %s2883_s20 }
   0x5   : > { %p70_p0 = scmp.eq.s32.totalorder %s69_s24, 0  ;;  %p79_p1 = scmp.ne.s32.totalorder %s2883_s20, %s2879_s19 }
   0x6   : > { %p80_p2 = scmp.eq.s32.totalorder %s2887_s21, 0  ;;  %p85_p3 = scmp.ne.s32.totalorder %s2879_s19, %s2875_s18 }
   0x7   : > { %s2955_s26 = scalar_select %p70_p0, %s2883_s20, %s72_s25  }
   0x8   : > { %p81_p4 = por %p80_p2, %p79_p1  ;;  %p86_p5 = scmp.eq.s32.totalorder %s2942_s22, 0 }
   0x9   : > { %p161_p6 = scmp.eq.s32.totalorder %s2942_s22, 1  ;;  %p2625_p8 = scmp.lt.s32.totalorder %s2887_s21, 2 }
   0xa   : > { %p2959_p7 = por %p86_p5, %p85_p3  ;;  %s198_s29 = sand.u32 1, %s2883_s20  }
   0xb   : > { %p2964_p9 = por %p161_p6, %p79_p1  ;;  %s2614_s30 = smul.u32 384, %s198_s29 }
   0xc   : > { %s2615_s6 = smul.u32 384, %s2887_s21  ;;  %p2970_p10 = pnand %p2625_p8, %p81_p4 }
   0xd   : > { %s202_s11 = scalar_lea.vmem [#allocation3], %s2614_s30  ;;  %p2532_p11 = scmp.ge.s32.totalorder %s2887_s21, 1 }
   0xe   : > { %s207_s10 = scalar_lea.hbm %s4148_s2, %s2615_s6  ;;  %s210_s12 = sshll.u32 %s202_s11, 4  ;;  %s211_s12 = int_to_ptr.vmem [resolvable:$true] %s210_s12 }
   0xf   : > { %s208_s13 = sshll.u32 %s207_s10, 4  ;;  %s199_s14 = scalar_lea.sflag [#allocation4], %s198_s29  ;;  %s209_s13 = int_to_ptr.hbm [resolvable:$true] %s208_s13 }
  0x10   : > { %s2823_s15 = sshra.s32 %s209_s13, 4  ;;  %p2827_p13 = pneg %p2970_p10  ;;  %s2824_s15 = int_to_ptr.hbm [resolvable:$true] %s2823_s15 }
  0x11   : > { %s2825_s16 = scalar_lea.hbm %s2824_s15, 384  ;;  %s2830_s24 = scalar_lea.hbm %s4148_s2, 768 }
  0x12   : > { %p2826_p12 = scmp.ne.s32.totalorder %s2824_s15, %s2825_s16  ;;  %p2831_p2 = scmp.lt.s32.totalorder %s2824_s15, %s4148_s2 }
  0x13   : > { %p2832_p3 = scmp.lt.s32.totalorder %s2830_s24, %s2825_s16 }
  0x14   : > { %p2828_p0 = pnand %p2827_p13, %p2826_p12 }
  0x15   : > { %p2833_p4 = por %p2832_p3, %p2831_p2 }
  0x16   : > { %p2829_p1 = pneg %p2828_p0 }
  0x18   : > { %p2834_p5 = pnand %p2833_p4, %p2829_p1 }
  0x1a   : > { %2837 = shalt.err (!%p2834_p5)
}
  0x1b   : > { %s2889_s29 = smov 384   ;;  %s2890_s6 = smov 24  }
  0x1c   : > { %2624 = dma.hbm_to_vmem [thread:$0]  (!%p2970_p10), %s209_s13, 6144, %s211_s12, %s199_s14, %s2889_s29, %s2889_s29, %s2890_s6  }
  0x1d   : > { %p231_p6 = scmp.lt.s32.totalorder %s2887_s21, 3 }
  0x1f   : > { %p232_p8 = pnand %p2532_p11, %p231_p6 }
  0x21   : > { %235 = sbr.rel (%p232_p8) target bundleno = 3102 (0xc1e), region = 40 }
  0x26   : > { %s2992_s8 = sand.u32 1, %s2879_s19  }
  0x27   : > { %s2616_s9 = smul.u32 384, %s2992_s8  ;;  %s238_s10 = scalar_lea.sflag [#allocation4], %s2992_s8 }
  0x29   : > { %s2996_s11 = scalar_lea.vmem [#allocation3], %s2616_s9 }
  0x2a   : > { %2870 = dma.done.wait (%p2959_p7), %s238_s10, 6144  }
  0x2b   : > { %2872 = vsyncadd (%p2959_p7), %s238_s10, 4294961152  ;;  %s2533_s21 = sshll.u32 %s2992_s8, 6  ;;  %v3004_v0 = vld [vmem:[%s2996_s11] sm:$0xff]  ;;  %v3007_v1 = vld [vmem:[%s2996_s11 + $0x8] sm:$0xff]  ;;  %p280_p7 = scmp.lt.s32.totalorder %s2942_s22, 1  ;;  %vm311_vm0 = vcmask 64512  }
  0x2c   : > { %4188 = vst [vmem:[#allocation7_spill] sm:$0xff] %v3004_v0  ;;  %v3010_v2 = vld [vmem:[%s2996_s11 + $0x10] sm:$0xff]  ;;  %v3013_v3 = vld [vmem:[%s2996_s11 + $0x18] sm:$0xff]  ;;  %v3016_v4 = vld [vmem:[%s2996_s11 + $0x20] sm:$0xff]  ;;  %p2559_p10 = scmp.ne.s32.totalorder %s2942_s22, 0 }
  0x2d   : > { %4189 = vst [vmem:[#allocation8_spill] sm:$0xff] %v3007_v1  ;;  %v3019_v5 = vld [vmem:[%s2996_s11 + $0x28] sm:$0xff]  ;;  %v3023_v6 = vld [vmem:[%s2996_s11 + $0x30] sm:$0xff]  ;;  %v3026_v7 = vld [vmem:[%s2996_s11 + $0x38] sm:$0xff]  ;;  %s3059_s27 = scalar_select %p280_p7, %s2942_s22, 1 }
  0x2e   : > { %4190 = vst [vmem:[#allocation9_spill] sm:$0xff] %v3010_v2  ;;  %v3029_v8 = vld [vmem:[%s2996_s11 + $0x40] sm:$0xff]  ;;  %v3032_v9 = vld [vmem:[%s2996_s11 + $0x48] sm:$0xff]  ;;  %v3035_v10 = vld [vmem:[%s2996_s11 + $0x50] sm:$0xff] }
  0x2f   : > { %4191 = vst [vmem:[#allocation10_spill] sm:$0xff] %v3013_v3  ;;  %v3038_v11 = vld [vmem:[%s2996_s11 + $0x58] sm:$0xff]  ;;  %v3041_v12 = vld [vmem:[%s2996_s11 + $0x60] sm:$0xff]  ;;  %v3044_v13 = vld [vmem:[%s2996_s11 + $0x68] sm:$0xff]  ;;  %s2617_s7 = smul.u32 24, %s3059_s27  ;;  %s291_s17 = scalar_lea.vmem %s4150_s4, %s3059_s27 }
  0x30   : > { %4192 = vst [vmem:[#allocation11_spill] sm:$0xff] %v3016_v4  ;;  %v3047_v14 = vld [vmem:[%s2996_s11 + $0x70] sm:$0xff]  ;;  %v3050_v15 = vld [vmem:[%s2996_s11 + $0x78] sm:$0xff]  ;;  %v3053_v16 = vld [vmem:[%s2996_s11 + $0x80] sm:$0xff]  ;;  %s2618_s18 = smul.u32 3, %s3059_s27  ;;  %s3245_s27 = scalar_lea.vmem [#allocation5], %s2533_s21 }
  0x31   : > { %4193 = vst [vmem:[#allocation12_spill] sm:$0xff] %v3019_v5  ;;  %v3056_v17 = vld [vmem:[%s2996_s11 + $0x88] sm:$0xff]  ;;  %v3062_v18 = vld [vmem:[%s2996_s11 + $0x90] sm:$0xff]  ;;  %v3065_v19 = vld [vmem:[%s2996_s11 + $0x98] sm:$0xff]  ;;  %s284_s14 = scalar_lea.vmem %s4147_s1, %s2617_s7 }
  0x32   : > { %4194 = vst [vmem:[#allocation13_spill] sm:$0xff] %v3023_v6  ;;  %v3068_v20 = vld [vmem:[%s2996_s11 + $0xa0] sm:$0xff]  ;;  %v3071_v21 = vld [vmem:[%s2996_s11 + $0xa8] sm:$0xff]  ;;  %v3074_v22 = vld [vmem:[%s2996_s11 + $0xb0] sm:$0xff]  ;;  %s288_s30 = scalar_lea.vmem %s4149_s3, %s2618_s18 }
  0x33   : > { %4195 = vst [vmem:[#allocation14_spill] sm:$0xff] %v3026_v7  ;;  %v3077_v23 = vld [vmem:[%s2996_s11 + $0xb8] sm:$0xff]  ;;  %v3080_v24 = vld [vmem:[%s2996_s11 + $0xc0] sm:$0xff]  ;;  %v3083_v25 = vld [vmem:[%s2996_s11 + $0xc8] sm:$0xff] }
  0x34   : > { %4196 = vst [vmem:[#allocation15_spill] sm:$0xff] %v3035_v10  ;;  %v3086_v26 = vld [vmem:[%s2996_s11 + $0xd0] sm:$0xff]  ;;  %v3089_v27 = vld [vmem:[%s2996_s11 + $0xd8] sm:$0xff]  ;;  %v3092_v28 = vld [vmem:[%s2996_s11 + $0xe0] sm:$0xff] }
  0x35   : > { %v3095_v29 = vld [vmem:[%s2996_s11 + $0xe8] sm:$0xff]  ;;  %v3099_v30 = vld [vmem:[%s2996_s11 + $0xf0] sm:$0xff]  ;;  %v3102_v31 = vld [vmem:[%s2996_s11 + $0xf8] sm:$0xff] }
  0x36   : > { %v3105_v32 = vld [vmem:[%s2996_s11 + $0x100] sm:$0xff]  ;;  %v3108_v33 = vld [vmem:[%s2996_s11 + $0x108] sm:$0xff]  ;;  %v3111_v34 = vld [vmem:[%s2996_s11 + $0x110] sm:$0xff] }
  0x37   : > { %v3114_v35 = vld [vmem:[%s2996_s11 + $0x118] sm:$0xff]  ;;  %v3117_v36 = vld [vmem:[%s2996_s11 + $0x120] sm:$0xff]  ;;  %v3120_v37 = vld [vmem:[%s2996_s11 + $0x128] sm:$0xff] }
  0x38   : > { %v3123_v38 = vld [vmem:[%s2996_s11 + $0x130] sm:$0xff]  ;;  %v3126_v39 = vld [vmem:[%s2996_s11 + $0x138] sm:$0xff]  ;;  %v3129_v40 = vld [vmem:[%s2996_s11 + $0x140] sm:$0xff] }
  0x39   : > { %v3132_v41 = vld [vmem:[%s2996_s11 + $0x148] sm:$0xff]  ;;  %v3142_v42 = vld [vmem:[%s2996_s11 + $0x150] sm:$0xff]  ;;  %v3145_v43 = vld [vmem:[%s2996_s11 + $0x158] sm:$0xff] }
  0x3a   : > { %v3148_v44 = vld [vmem:[%s2996_s11 + $0x160] sm:$0xff]  ;;  %v3151_v45 = vld [vmem:[%s2996_s11 + $0x168] sm:$0xff]  ;;  %v3154_v46 = vld [vmem:[%s2996_s11 + $0x170] sm:$0xff] }
  0x3b   : > { %v3157_v47 = vld [vmem:[%s2996_s11 + $0x178] sm:$0xff]  ;;  %v300_v48 = vld [vmem:[%s284_s14] sm:$0xff]  ;;  %v302_v50 = vld [vmem:[%s284_s14 + $0x10] sm:$0xff] }
  0x3c   : > { %2611 = vmatpush.msra.mxu3 %v300_v48  ;;  %v3159_v49 = vld [vmem:[%s291_s17] ss:$0 sm:$0xff]  ;;  %351 = vmatpush.msra.mxu0 %v300_v48  ;;  %v298_v51 = vld [vmem:[%s4146_s0 + $0x30] sm:$0xff]  ;;  %v301_v52 = vld [vmem:[%s284_s14 + $0x8] sm:$0xff] }
  0x3d   : > { %433 = vmatpush.msra.mxu2 %v302_v50  ;;  %v292_v53 = vld [vmem:[%s4146_s0] sm:$0xff]  ;;  %2541 = vmatmul.msk.f32.vlgmr.msra.gmra.mxu3 %vm311_vm0, %v298_v51  ;;  %v299_v54 = vld [vmem:[%s4146_s0 + $0x38] sm:$0xff]  ;;  %v293_v55 = vld [vmem:[%s4146_s0 + $0x8] sm:$0xff] }
  0x3e   : > { %2551 = vmatmul.msk.f32.vlgmr.msra.gmra.mxu2 %vm311_vm0, %v292_v53  ;;  %2612 = vmatpush.msrb.mxu3 %v301_v52  ;;  %v294_v56 = vld [vmem:[%s4146_s0 + $0x10] sm:$0xff]  ;;  %v295_v57 = vld [vmem:[%s4146_s0 + $0x18] sm:$0xff]  ;;  %v296_v58 = vld [vmem:[%s4146_s0 + $0x20] sm:$0xff] }
  0x3f   : > { %392 = vmatpush.msra.mxu1 %v301_v52  ;;  %2535 = vmatmul.msk.f32.vlgmr.msra.gmra.mxu0 %vm311_vm0, %v292_v53  ;;  %v297_v59 = vld [vmem:[%s4146_s0 + $0x28] sm:$0xff]  ;;  %v303_v60 = vld [vmem:[%s288_s30] sm:$0x7] }
  0x40   : > { %2543 = vmatmul.msk.f32.vlgmr.msra.gmra.mxu1 %vm311_vm0, %v292_v53  ;;  %2613 = vmatpush.msra.mxu3 %v302_v50  ;;  %v3213_v61 = vperm.slane %v303_v60, 0  ;;  %v3215_v62 = vperm.slane %v303_v60, 1  ;;  %v3217_v50 = vperm.slane %v303_v60, 2 }
  0x45   : > { %2542 = vmatmul.msk.f32.gmra.mxu3 %vm311_vm0, %v299_v54 }
  0x46   : > { %2552 = vmatmul.msk.f32.gmra.mxu2 %vm311_vm0, %v293_v55 }
  0x47   : > { %2536 = vmatmul.msk.f32.gmra.mxu0 %vm311_vm0, %v293_v55 }
  0x48   : > { %2544 = vmatmul.msk.f32.gmra.mxu1 %vm311_vm0, %v293_v55 }
  0x4d   : > { %2549 = vmatmul.msk.f32.vlgmr.msrb.gmra.mxu3 %vm311_vm0, %v298_v51 }
  0x4e   : > { %2553 = vmatmul.msk.f32.gmra.mxu2 %vm311_vm0, %v294_v56 }
  0x4f   : > { %2537 = vmatmul.msk.f32.gmra.mxu0 %vm311_vm0, %v294_v56 }
  0x50   : > { %2545 = vmatmul.msk.f32.gmra.mxu1 %vm311_vm0, %v294_v56 }
  0x55   : > { %2550 = vmatmul.msk.f32.gmra.mxu3 %vm311_vm0, %v299_v54 }
  0x56   : > { %2554 = vmatmul.msk.f32.gmra.mxu2 %vm311_vm0, %v295_v57 }
  0x57   : > { %2538 = vmatmul.msk.f32.gmra.mxu0 %vm311_vm0, %v295_v57 }
  0x58   : > { %2546 = vmatmul.msk.f32.gmra.mxu1 %vm311_vm0, %v295_v57 }
  0x5d   : > { %2557 = vmatmul.msk.f32.vlgmr.msra.gmra.mxu3 %vm311_vm0, %v298_v51 }
  0x5e   : > { %2555 = vmatmul.msk.f32.gmra.mxu2 %vm311_vm0, %v296_v58 }
  0x5f   : > { %2539 = vmatmul.msk.f32.gmra.mxu0 %vm311_vm0, %v296_v58 }
  0x60   : > { %2547 = vmatmul.msk.f32.gmra.mxu1 %vm311_vm0, %v296_v58 }
  0x65   : > { %2558 = vmatmul.msk.f32.gmra.mxu3 %vm311_vm0, %v299_v54 }
  0x66   : > { %2556 = vmatmul.msk.f32.gmra.mxu2 %vm311_vm0, %v297_v59 }
  0x67   : > { %2540 = vmatmul.msk.f32.gmra.mxu0 %vm311_vm0, %v297_v59 }
  0x68   : > { %2548 = vmatmul.msk.f32.gmra.mxu1 %vm311_vm0, %v297_v59 }
  0xbc   : > { %v353_v63 = vpop.f32.mrf.mxu0 }
  0xbd   : > { %v394_v48 = vpop.f32.mrf.mxu1  ;;  %v354_v51 = vadd.f32 %v353_v63, %v3213_v61 }
  0xbe   : > { %v395_v52 = vadd.f32 %v394_v48, %v3215_v62 }
  0xbf   : > { %459 = vst [vmem:[#allocation2 + $0xb0] sm:$0xff] %v354_v51 }
  0xc0   : > { %v371_v53 = vpop.f32.mrf.mxu3  ;;  %460 = vst [vmem:[#allocation2] sm:$0xff] %v395_v52 }
  0xc1   : > { %v435_v54 = vpop.f32.mrf.mxu2  ;;  %v372_v55 = vadd.f32 %v371_v53, %v3213_v61 }
  0xc2   : > { %v436_v56 = vadd.f32 %v435_v54, %v3217_v50 }
  0xc3   : > { %477 = vst [vmem:[#allocation2 + $0x30] sm:$0xff] %v372_v55 }
  0xc4   : > { %461 = vst [vmem:[#allocation2 + $0x10] sm:$0xff] %v436_v56  ;;  %v356_v57 = vpop.f32.mrf.mxu0 }
  0xc5   : > { %v397_v58 = vpop.f32.mrf.mxu1  ;;  %v357_v59 = vadd.f32 %v356_v57, %v3213_v61 }
  0xc6   : > { %v398_v60 = vadd.f32 %v397_v58, %v3215_v62 }
  0xc7   : > { %462 = vst [vmem:[#allocation2 + $0x48] sm:$0xff] %v357_v59 }
  0xc8   : > { %v374_v63 = vpop.f32.mrf.mxu3  ;;  %463 = vst [vmem:[#allocation2 + $0x60] sm:$0xff] %v398_v60 }
  0xc9   : > { %v438_v48 = vpop.f32.mrf.mxu2  ;;  %v375_v51 = vadd.f32 %v374_v63, %v3213_v61 }
  0xca   : > { %v439_v52 = vadd.f32 %v438_v48, %v3217_v50 }
  0xcb   : > { %480 = vst [vmem:[#allocation2 + $0xb8] sm:$0xff] %v375_v51 }
  0xcc   : > { %464 = vst [vmem:[#allocation2 + $0x28] sm:$0xff] %v439_v52  ;;  %v359_v53 = vpop.f32.mrf.mxu0 }
  0xcd   : > { %v400_v54 = vpop.f32.mrf.mxu1  ;;  %v360_v55 = vadd.f32 %v359_v53, %v3213_v61 }
  0xce   : > { %v401_v56 = vadd.f32 %v400_v54, %v3215_v62 }
  0xcf   : > { %465 = vst [vmem:[#allocation2 + $0x40] sm:$0xff] %v360_v55 }
  0xd0   : > { %466 = vst [vmem:[#allocation2 + $0x78] sm:$0xff] %v401_v56  ;;  %v412_v57 = vpop.f32.mrf.mxu3 }
  0xd1   : > { %v441_v58 = vpop.f32.mrf.mxu2  ;;  %v413_v59 = vadd.f32 %v412_v57, %v3215_v62 }
  0xd2   : > { %v442_v60 = vadd.f32 %v441_v58, %v3217_v50 }
  0xd3   : > { %478 = vst [vmem:[#allocation2 + $0x58] sm:$0xff] %v413_v59 }
  0xd4   : > { %467 = vst [vmem:[#allocation2 + $0x88] sm:$0xff] %v442_v60  ;;  %v362_v63 = vpop.f32.mrf.mxu0 }
  0xd5   : > { %v403_v48 = vpop.f32.mrf.mxu1  ;;  %v363_v51 = vadd.f32 %v362_v63, %v3213_v61 }
  0xd6   : > { %v404_v52 = vadd.f32 %v403_v48, %v3215_v62 }
  0xd7   : > { %468 = vst [vmem:[#allocation2 + $0x90] sm:$0xff] %v363_v51 }
  0xd8   : > { %469 = vst [vmem:[#allocation2 + $0x18] sm:$0xff] %v404_v52  ;;  %v415_v53 = vpop.f32.mrf.mxu3 }
  0xd9   : > { %v444_v54 = vpop.f32.mrf.mxu2  ;;  %v416_v55 = vadd.f32 %v415_v53, %v3215_v62 }
  0xda   : > { %v445_v56 = vadd.f32 %v444_v54, %v3217_v50 }
  0xdb   : > { %481 = vst [vmem:[#allocation2 + $0x20] sm:$0xff] %v416_v55 }
  0xdc   : > { %470 = vst [vmem:[#allocation2 + $0x98] sm:$0xff] %v445_v56  ;;  %v365_v57 = vpop.f32.mrf.mxu0 }
  0xdd   : > { %v406_v58 = vpop.f32.mrf.mxu1  ;;  %v366_v59 = vadd.f32 %v365_v57, %v3213_v61 }
  0xde   : > { %v407_v60 = vadd.f32 %v406_v58, %v3215_v62 }
  0xdf   : > { %471 = vst [vmem:[#allocation2 + $0x38] sm:$0xff] %v366_v59 }
  0xe0   : > { %472 = vst [vmem:[#allocation2 + $0x50] sm:$0xff] %v407_v60  ;;  %v453_v48 = vpop.f32.mrf.mxu3 }
  0xe1   : > { %v447_v63 = vpop.f32.mrf.mxu2  ;;  %v454_v52 = vadd.f32 %v453_v48, %v3217_v50 }
  0xe2   : > { %v448_v51 = vadd.f32 %v447_v63, %v3217_v50 }
  0xe3   : > { %479 = vst [vmem:[#allocation2 + $0x80] sm:$0xff] %v454_v52 }
  0xe4   : > { %473 = vst [vmem:[#allocation2 + $0x70] sm:$0xff] %v448_v51  ;;  %v368_v53 = vpop.f32.mrf.mxu0 }
  0xe5   : > { %v409_v54 = vpop.f32.mrf.mxu1  ;;  %v369_v55 = vadd.f32 %v368_v53, %v3213_v61 }
  0xe6   : > { %v410_v56 = vadd.f32 %v409_v54, %v3215_v62 }
  0xe7   : > { %474 = vst [vmem:[#allocation2 + $0xa0] sm:$0xff] %v369_v55 }
  0xe8   : > { %475 = vst [vmem:[#allocation2 + $0xa8] sm:$0xff] %v410_v56  ;;  %v456_v58 = vpop.f32.mrf.mxu3  ;;  %538 = sbr.rel (%p2559_p10) target bundleno = 1661 (0x67d), region = 48 }
  0xe9   : > { %v450_v57 = vpop.f32.mrf.mxu2  ;;  %v457_v60 = vadd.f32 %v456_v58, %v3217_v50 }
  0xea   : > { %v451_v59 = vadd.f32 %v450_v57, %v3217_v50 }
  0xeb   : > { %482 = vst [vmem:[#allocation2 + $0x8] sm:$0xff] %v457_v60 }
  0xec   : > { %476 = vst [vmem:[#allocation2 + $0x68] sm:$0xff] %v451_v59 }
  0xed   : > { %542 = vmatpush.msra.mxu0 %v3151_v45  ;;  %562 = vmatpush.msra.mxu1 %v3154_v46  ;;  %v2891_v61 = vmov 0.0   ;;  %v539_v62 = vld [vmem:[#allocation2 + $0xb0] sm:$0xff]  ;;  %v540_v50 = vld [vmem:[#allocation2] sm:$0xff] }
  0xee   : > { %582 = vmatpush.msra.mxu2 %v3157_v47  ;;  %655 = vmatpush.msra.mxu3 %v3151_v45 }
  0xef   : > { %543 = vmatpush.msra.mxu0 %v3142_v42  ;;  %563 = vmatpush.msra.mxu1 %v3145_v43 }
  0xf0   : > { %583 = vmatpush.msra.mxu2 %v3148_v44  ;;  %656 = vmatpush.msra.mxu3 %v3142_v42 }
  0xf1   : > { %544 = vmatpush.msra.mxu0 %v3126_v39  ;;  %564 = vmatpush.msra.mxu1 %v3129_v40 }
  0xf2   : > { %584 = vmatpush.msra.mxu2 %v3132_v41  ;;  %657 = vmatpush.msra.mxu3 %v3126_v39 }
  0xf3   : > { %545 = vmatpush.msra.mxu0 %v3117_v36  ;;  %565 = vmatpush.msra.mxu1 %v3120_v37 }
  0xf4   : > { %585 = vmatpush.msra.mxu2 %v3123_v38  ;;  %658 = vmatpush.msra.mxu3 %v3117_v36 }
  0xf5   : > { %546 = vmatpush.msra.mxu0 %v3108_v33  ;;  %566 = vmatpush.msra.mxu1 %v3111_v34 }
  0xf6   : > { %586 = vmatpush.msra.mxu2 %v3114_v35  ;;  %659 = vmatpush.msra.mxu3 %v3108_v33 }
  0xf7   : > { %547 = vmatpush.msra.mxu0 %v3099_v30  ;;  %567 = vmatpush.msra.mxu1 %v3102_v31 }
  0xf8   : > { %587 = vmatpush.msra.mxu2 %v3105_v32  ;;  %660 = vmatpush.msra.mxu3 %v3099_v30 }
  0xf9   : > { %548 = vmatpush.msra.mxu0 %v3089_v27  ;;  %568 = vmatpush.msra.mxu1 %v3092_v28 }
  0xfa   : > { %588 = vmatpush.msra.mxu2 %v3095_v29  ;;  %661 = vmatpush.msra.mxu3 %v3089_v27 }
  0xfb   : > { %549 = vmatpush.msra.mxu0 %v3080_v24  ;;  %569 = vmatpush.msra.mxu1 %v3083_v25 }
  0xfc   : > { %589 = vmatpush.msra.mxu2 %v3086_v26  ;;  %662 = vmatpush.msra.mxu3 %v3080_v24 }
  0xfd   : > { %550 = vmatpush.msra.mxu0 %v3071_v21  ;;  %570 = vmatpush.msra.mxu1 %v3074_v22 }
  0xfe   : > { %590 = vmatpush.msra.mxu2 %v3077_v23  ;;  %663 = vmatpush.msra.mxu3 %v3071_v21 }
  0xff   : > { %551 = vmatpush.msra.mxu0 %v3062_v18  ;;  %571 = vmatpush.msra.mxu1 %v3065_v19 }
 0x100   : > { %591 = vmatpush.msra.mxu2 %v3068_v20  ;;  %664 = vmatpush.msra.mxu3 %v3062_v18 }
 0x101   : > { %552 = vmatpush.msra.mxu0 %v3050_v15  ;;  %572 = vmatpush.msra.mxu1 %v3053_v16 }
 0x102   : > { %592 = vmatpush.msra.mxu2 %v3056_v17  ;;  %665 = vmatpush.msra.mxu3 %v3050_v15 }
 0x103   : > { %553 = vmatpush.msra.mxu0 %v3041_v12  ;;  %573 = vmatpush.msra.mxu1 %v3044_v13 }
 0x104   : > { %593 = vmatpush.msra.mxu2 %v3047_v14  ;;  %666 = vmatpush.msra.mxu3 %v3041_v12 }
 0x105   : > { %554 = vmatpush.msra.mxu0 %v3032_v9  ;;  %574 = vmatpush.msra.mxu1 %v3035_v10 }
 0x106   : > { %594 = vmatpush.msra.mxu2 %v3038_v11  ;;  %667 = vmatpush.msra.mxu3 %v3032_v9 }
 0x107   : > { %555 = vmatpush.msra.mxu0 %v3023_v6  ;;  %575 = vmatpush.msra.mxu1 %v3026_v7 }
 0x108   : > { %595 = vmatpush.msra.mxu2 %v3029_v8  ;;  %668 = vmatpush.msra.mxu3 %v3023_v6 }
 0x109   : > { %556 = vmatpush.msra.mxu0 %v3013_v3  ;;  %576 = vmatpush.msra.mxu1 %v3016_v4 }
 0x10a   : > { %596 = vmatpush.msra.mxu2 %v3019_v5  ;;  %669 = vmatpush.msra.mxu3 %v3013_v3 }
 0x10b   : > { %557 = vmatpush.msra.mxu0 %v3004_v0  ;;  %577 = vmatpush.msra.mxu1 %v3007_v1 }
 0x10c   : > { %558 = vmatmul.f32.vlgmr.msra.gmra.mxu0 %v2891_v61  ;;  %578 = vmatmul.f32.vlgmr.msra.gmra.mxu1 %v2891_v61 }
 0x10d   : > { %597 = vmatpush.msra.mxu2 %v3010_v2  ;;  %675 = vmatpush.msrb.mxu0 %v3154_v46 }
 0x10e   : > { %598 = vmatmul.f32.vlgmr.msra.gmra.mxu2 %v2891_v61  ;;  %695 = vmatpush.msrb.mxu1 %v3157_v47 }
 0x10f   : > { %676 = vmatpush.msrb.mxu0 %v3145_v43  ;;  %670 = vmatpush.msra.mxu3 %v3004_v0 }
 0x110   : > { %696 = vmatpush.msrb.mxu1 %v3148_v44  ;;  %769 = vmatpush.msrb.mxu2 %v3151_v45 }
 0x111   : > { %677 = vmatpush.msrb.mxu0 %v3129_v40  ;;  %789 = vmatpush.msrb.mxu3 %v3154_v46 }
 0x112   : > { %697 = vmatpush.msrb.mxu1 %v3132_v41  ;;  %770 = vmatpush.msrb.mxu2 %v3142_v42 }
 0x113   : > { %678 = vmatpush.msrb.mxu0 %v3120_v37  ;;  %790 = vmatpush.msrb.mxu3 %v3145_v43 }
 0x114   : > { %698 = vmatpush.msrb.mxu1 %v3123_v38  ;;  %771 = vmatpush.msrb.mxu2 %v3126_v39 }
 0x115   : > { %679 = vmatpush.msrb.mxu0 %v3111_v34  ;;  %791 = vmatpush.msrb.mxu3 %v3129_v40 }
 0x116   : > { %699 = vmatpush.msrb.mxu1 %v3114_v35  ;;  %772 = vmatpush.msrb.mxu2 %v3117_v36 }
 0x117   : > { %680 = vmatpush.msrb.mxu0 %v3102_v31  ;;  %792 = vmatpush.msrb.mxu3 %v3120_v37 }
 0x118   : > { %700 = vmatpush.msrb.mxu1 %v3105_v32  ;;  %773 = vmatpush.msrb.mxu2 %v3108_v33 }
 0x119   : > { %681 = vmatpush.msrb.mxu0 %v3092_v28  ;;  %793 = vmatpush.msrb.mxu3 %v3111_v34 }
 0x11a   : > { %701 = vmatpush.msrb.mxu1 %v3095_v29  ;;  %774 = vmatpush.msrb.mxu2 %v3099_v30 }
 0x11b   : > { %682 = vmatpush.msrb.mxu0 %v3083_v25  ;;  %794 = vmatpush.msrb.mxu3 %v3102_v31 }
 0x11c   : > { %702 = vmatpush.msrb.mxu1 %v3086_v26  ;;  %775 = vmatpush.msrb.mxu2 %v3089_v27 }
 0x11d   : > { %683 = vmatpush.msrb.mxu0 %v3074_v22  ;;  %795 = vmatpush.msrb.mxu3 %v3092_v28 }
 0x11e   : > { %703 = vmatpush.msrb.mxu1 %v3077_v23  ;;  %776 = vmatpush.msrb.mxu2 %v3080_v24 }
 0x11f   : > { %684 = vmatpush.msrb.mxu0 %v3065_v19  ;;  %796 = vmatpush.msrb.mxu3 %v3083_v25 }
 0x120   : > { %704 = vmatpush.msrb.mxu1 %v3068_v20  ;;  %777 = vmatpush.msrb.mxu2 %v3071_v21 }
 0x121   : > { %685 = vmatpush.msrb.mxu0 %v3053_v16  ;;  %797 = vmatpush.msrb.mxu3 %v3074_v22 }
 0x122   : > { %705 = vmatpush.msrb.mxu1 %v3056_v17  ;;  %778 = vmatpush.msrb.mxu2 %v3062_v18 }
 0x123   : > { %686 = vmatpush.msrb.mxu0 %v3044_v13  ;;  %798 = vmatpush.msrb.mxu3 %v3065_v19 }
 0x124   : > { %706 = vmatpush.msrb.mxu1 %v3047_v14  ;;  %779 = vmatpush.msrb.mxu2 %v3050_v15 }
 0x125   : > { %687 = vmatpush.msrb.mxu0 %v3035_v10  ;;  %799 = vmatpush.msrb.mxu3 %v3053_v16 }
 0x126   : > { %707 = vmatpush.msrb.mxu1 %v3038_v11  ;;  %780 = vmatpush.msrb.mxu2 %v3041_v12 }
 0x127   : > { %688 = vmatpush.msrb.mxu0 %v3026_v7  ;;  %800 = vmatpush.msrb.mxu3 %v3044_v13 }
 0x128   : > { %708 = vmatpush.msrb.mxu1 %v3029_v8  ;;  %781 = vmatpush.msrb.mxu2 %v3032_v9 }
 0x129   : > { %689 = vmatpush.msrb.mxu0 %v3016_v4  ;;  %801 = vmatpush.msrb.mxu3 %v3035_v10 }
 0x12a   : > { %709 = vmatpush.msrb.mxu1 %v3019_v5  ;;  %782 = vmatpush.msrb.mxu2 %v3023_v6 }
 0x12b   : > { %690 = vmatpush.msrb.mxu0 %v3007_v1  ;;  %802 = vmatpush.msrb.mxu3 %v3026_v7 }
 0x12c   : > { %710 = vmatpush.msrb.mxu1 %v3010_v2  ;;  %783 = vmatpush.msrb.mxu2 %v3013_v3 }
 0x12d   : > { %809 = vmatpush.msra.mxu0 %v3157_v47  ;;  %803 = vmatpush.msrb.mxu3 %v3016_v4 }
 0x12e   : > { %883 = vmatpush.msra.mxu1 %v3151_v45  ;;  %784 = vmatpush.msrb.mxu2 %v3004_v0 }
 0x12f   : > { %810 = vmatpush.msra.mxu0 %v3148_v44  ;;  %804 = vmatpush.msrb.mxu3 %v3007_v1 }
 0x130   : > { %903 = vmatpush.msra.mxu2 %v3154_v46  ;;  %884 = vmatpush.msra.mxu1 %v3142_v42 }
 0x131   : > { %811 = vmatpush.msra.mxu0 %v3132_v41 }
 0x132   : > { %904 = vmatpush.msra.mxu2 %v3145_v43  ;;  %885 = vmatpush.msra.mxu1 %v3126_v39 }
 0x133   : > { %812 = vmatpush.msra.mxu0 %v3123_v38 }
 0x134   : > { %905 = vmatpush.msra.mxu2 %v3129_v40  ;;  %886 = vmatpush.msra.mxu1 %v3117_v36 }
 0x135   : > { %813 = vmatpush.msra.mxu0 %v3114_v35 }
 0x136   : > { %906 = vmatpush.msra.mxu2 %v3120_v37  ;;  %887 = vmatpush.msra.mxu1 %v3108_v33 }
 0x137   : > { %814 = vmatpush.msra.mxu0 %v3105_v32 }
 0x138   : > { %907 = vmatpush.msra.mxu2 %v3111_v34  ;;  %888 = vmatpush.msra.mxu1 %v3099_v30 }
 0x139   : > { %815 = vmatpush.msra.mxu0 %v3095_v29 }
 0x13a   : > { %908 = vmatpush.msra.mxu2 %v3102_v31  ;;  %889 = vmatpush.msra.mxu1 %v3089_v27 }
 0x13b   : > { %816 = vmatpush.msra.mxu0 %v3086_v26 }
 0x13c   : > { %909 = vmatpush.msra.mxu2 %v3092_v28  ;;  %890 = vmatpush.msra.mxu1 %v3080_v24 }
 0x13d   : > { %817 = vmatpush.msra.mxu0 %v3077_v23 }
 0x13e   : > { %910 = vmatpush.msra.mxu2 %v3083_v25  ;;  %891 = vmatpush.msra.mxu1 %v3071_v21 }
 0x13f   : > { %818 = vmatpush.msra.mxu0 %v3068_v20 }
 0x140   : > { %911 = vmatpush.msra.mxu2 %v3074_v22  ;;  %892 = vmatpush.msra.mxu1 %v3062_v18 }
 0x141   : > { %819 = vmatpush.msra.mxu0 %v3056_v17 }
 0x142   : > { %912 = vmatpush.msra.mxu2 %v3065_v19  ;;  %893 = vmatpush.msra.mxu1 %v3050_v15 }
 0x143   : > { %820 = vmatpush.msra.mxu0 %v3047_v14 }
 0x144   : > { %913 = vmatpush.msra.mxu2 %v3053_v16  ;;  %894 = vmatpush.msra.mxu1 %v3041_v12 }
 0x145   : > { %821 = vmatpush.msra.mxu0 %v3038_v11 }
 0x146   : > { %914 = vmatpush.msra.mxu2 %v3044_v13  ;;  %895 = vmatpush.msra.mxu1 %v3032_v9 }
 0x147   : > { %822 = vmatpush.msra.mxu0 %v3029_v8 }
 0x148   : > { %915 = vmatpush.msra.mxu2 %v3035_v10  ;;  %896 = vmatpush.msra.mxu1 %v3023_v6 }
 0x149   : > { %823 = vmatpush.msra.mxu0 %v3019_v5 }
 0x14a   : > { %916 = vmatpush.msra.mxu2 %v3026_v7  ;;  %897 = vmatpush.msra.mxu1 %v3013_v3 }
 0x14b   : > { %824 = vmatpush.msra.mxu0 %v3010_v2 }
 0x14c   : > { %917 = vmatpush.msra.mxu2 %v3016_v4  ;;  %898 = vmatpush.msra.mxu1 %v3004_v0 }
 0x14e   : > { %918 = vmatpush.msra.mxu2 %v3007_v1 }
 0x189   : > { %v559_v63 = vpop.f32.mrf.mxu0  ;;  %v579_v48 = vpop.f32.mrf.mxu1 }
 0x18a   : > { %v602_v51 = vadd.f32 %v559_v63, %v539_v62  ;;  %v622_v52 = vadd.f32 %v579_v48, %v540_v50 }
 0x18c   : > { %v2560_v53 = vmul.f32 -1.442695, %v602_v51  ;;  %v2561_v54 = vmul.f32 -1.442695, %v622_v52 }
 0x18e   : > { %2663 = vpow2.f32 %v2560_v53 }
 0x18f   : > { %2665 = vpow2.f32 %v2561_v54 }
 0x191   : > { %v599_v4 = vpop.f32.mrf.mxu2 }
 0x192   : > { %v642_v51 = vadd.f32 %v3159_v49, %v599_v4 }
 0x194   : > { %v2664_v55 = vpop.eup %2663 }
 0x195   : > { %v2666_v56 = vpop.eup %2665  ;;  %v606_v57 = vadd.f32 1.0, %v2664_v55  ;;  %v541_v55 = vld [vmem:[#allocation2 + $0x10] sm:$0xff] }
 0x196   : > { %v626_v58 = vadd.f32 1.0, %v2666_v56 }
 0x197   : > { %2667 = vrcp.f32 %v606_v57  ;;  %v618_v3 = vand.u32 2147483648, %v606_v57  ;;  %v616_v50 = vand.u32 2147483647, %v606_v57  ;;  %vm612_vm2 = vweird.f32 %v606_v57 }
 0x198   : > { %2669 = vrcp.f32 %v626_v58  ;;  %vm632_vm5 = vweird.f32 %v626_v58 }
 0x199   : > { %v619_v52 = vor.u32 1.1754944e-38, %v618_v3  ;;  %vm617_vm4 = vcmp.eq.f32.partialorder %v616_v50, 8.507059e+37 }
 0x19d   : > { %v2668_v59 = vpop.eup %2667 }
 0x19e   : > { %v2670_v60 = vpop.eup %2669  ;;  %v608_v61 = vmul.f32 %v2668_v59, %v606_v57  ;;  %vm613_vm1 = vweird.f32 %v2668_v59 }
 0x19f   : > { %v628_v1 = vmul.f32 %v2670_v60, %v626_v58  ;;  %vm614_vm3 = vmor %vm612_vm2, %vm613_vm1  ;;  %vm633_vm6 = vweird.f32 %v2670_v60 }
 0x1a0   : > { %v609_v0 = vsub.f32 1.0, %v608_v61  ;;  %vm634_vm7 = vmor %vm632_vm5, %vm633_vm6 }
 0x1a1   : > { %v629_v2 = vsub.f32 1.0, %v628_v1  ;;  %v638_v1 = vand.u32 2147483648, %v626_v58 }
 0x1a2   : > { %v610_v62 = vmul.f32 %v2668_v59, %v609_v0  ;;  %v636_v0 = vand.u32 2147483647, %v626_v58  ;;  %v4198_v58 = vld [vmem:[#allocation10_spill] sm:$0xff] }
 0x1a3   : > { %v630_v63 = vmul.f32 %v2670_v60, %v629_v2 }
 0x1a4   : > { %v611_v48 = vadd.f32 %v2668_v59, %v610_v62  ;;  %v639_v62 = vor.u32 1.1754944e-38, %v638_v1  ;;  %vm637_vm8 = vcmp.eq.f32.partialorder %v636_v0, 8.507059e+37  ;;  %v652_v1 = vld [vmem:[#allocation2 + $0x48] sm:$0xff] }
 0x1a5   : > { %v631_v54 = vadd.f32 %v2670_v60, %v630_v63 }
 0x1a6   : > { %v615_v53 = vsel %vm614_vm3, %v2668_v59, %v611_v48  ;;  %v4200_v48 = vld [vmem:[#allocation9_spill] sm:$0xff] }
 0x1a7   : > { %v620_v56 = vsel %vm617_vm4, %v619_v52, %v615_v53  ;;  %v635_v2 = vsel %vm634_vm7, %v2670_v60, %v631_v54  ;;  %v4199_v60 = vld [vmem:[#allocation11_spill] sm:$0xff]  ;;  %v4202_v52 = vld [vmem:[#allocation8_spill] sm:$0xff] }
 0x1a8   : > { %v643_v61 = vmul.f32 %v642_v51, %v620_v56  ;;  %v640_v4 = vsel %vm637_vm8, %v639_v62, %v635_v2  ;;  %v4201_v51 = vld [vmem:[#allocation7_spill] sm:$0xff] }
 0x1a9   : > { %v646_v57 = vsub.f32 1.0, %v640_v4  ;;  %v648_v50 = vmul.f32 0.0, %v640_v4  ;;  %v653_v53 = vld [vmem:[#allocation2 + $0x60] sm:$0xff] }
 0x1aa   : > { %v644_v5 = vadd.f32 %v643_v61, %v541_v55 }
 0x1ac   : > { %2671 = vtanh.f32 %v644_v5  ;;  %v4197_v5 = vld [vmem:[#allocation12_spill] sm:$0xff] }
 0x1b2   : > { %v2672_v3 = vpop.eup %2671 }
 0x1b3   : > { %v647_v59 = vmul.f32 %v2672_v3, %v646_v57 }
 0x1b5   : > { %v3425_v63 = vadd.f32 %v648_v50, %v647_v59 }
 0x1b7   : > { %650 = vst [vmem:[%s3245_s27] sm:$0xff] %v3425_v63  ;;  %671 = vmatmul.f32.vlgmr.msra.gmra.mxu3 %v3425_v63  ;;  %691 = vmatmul.f32.vlgmr.msrb.gmra.mxu0 %v3425_v63 }
 0x1b8   : > { %711 = vmatmul.f32.vlgmr.msrb.gmra.mxu1 %v3425_v63  ;;  %923 = vmatpush.msra.mxu3 %v3157_v47 }
 0x1b9   : > { %997 = vmatpush.msrb.mxu0 %v3151_v45  ;;  %1017 = vmatpush.msrb.mxu1 %v3154_v46 }
 0x1ba   : > { %924 = vmatpush.msra.mxu3 %v3148_v44 }
 0x1bb   : > { %998 = vmatpush.msrb.mxu0 %v3142_v42  ;;  %1018 = vmatpush.msrb.mxu1 %v3145_v43 }
 0x1bc   : > { %925 = vmatpush.msra.mxu3 %v3132_v41 }
 0x1bd   : > { %999 = vmatpush.msrb.mxu0 %v3126_v39  ;;  %1019 = vmatpush.msrb.mxu1 %v3129_v40 }
 0x1be   : > { %926 = vmatpush.msra.mxu3 %v3123_v38 }
 0x1bf   : > { %1000 = vmatpush.msrb.mxu0 %v3117_v36  ;;  %1020 = vmatpush.msrb.mxu1 %v3120_v37 }
 0x1c0   : > { %927 = vmatpush.msra.mxu3 %v3114_v35 }
 0x1c1   : > { %1001 = vmatpush.msrb.mxu0 %v3108_v33  ;;  %1021 = vmatpush.msrb.mxu1 %v3111_v34 }
 0x1c2   : > { %928 = vmatpush.msra.mxu3 %v3105_v32 }
 0x1c3   : > { %1002 = vmatpush.msrb.mxu0 %v3099_v30  ;;  %1022 = vmatpush.msrb.mxu1 %v3102_v31 }
 0x1c4   : > { %929 = vmatpush.msra.mxu3 %v3095_v29 }
 0x1c5   : > { %1003 = vmatpush.msrb.mxu0 %v3089_v27  ;;  %1023 = vmatpush.msrb.mxu1 %v3092_v28 }
 0x1c6   : > { %930 = vmatpush.msra.mxu3 %v3086_v26 }
 0x1c7   : > { %1004 = vmatpush.msrb.mxu0 %v3080_v24  ;;  %1024 = vmatpush.msrb.mxu1 %v3083_v25 }
 0x1c8   : > { %931 = vmatpush.msra.mxu3 %v3077_v23 }
 0x1c9   : > { %1005 = vmatpush.msrb.mxu0 %v3071_v21  ;;  %1025 = vmatpush.msrb.mxu1 %v3074_v22 }
 0x1ca   : > { %932 = vmatpush.msra.mxu3 %v3068_v20 }
 0x1cb   : > { %1006 = vmatpush.msrb.mxu0 %v3062_v18  ;;  %1026 = vmatpush.msrb.mxu1 %v3065_v19 }
 0x1cc   : > { %933 = vmatpush.msra.mxu3 %v3056_v17 }
 0x1cd   : > { %1007 = vmatpush.msrb.mxu0 %v3050_v15  ;;  %1027 = vmatpush.msrb.mxu1 %v3053_v16 }
 0x1ce   : > { %934 = vmatpush.msra.mxu3 %v3047_v14 }
 0x1cf   : > { %1008 = vmatpush.msrb.mxu0 %v3041_v12  ;;  %1028 = vmatpush.msrb.mxu1 %v3044_v13 }
 0x1d0   : > { %935 = vmatpush.msra.mxu3 %v3038_v11 }
 0x1d1   : > { %1009 = vmatpush.msrb.mxu0 %v3032_v9  ;;  %1029 = vmatpush.msrb.mxu1 %v3035_v10 }
 0x1d2   : > { %936 = vmatpush.msra.mxu3 %v3029_v8 }
 0x1d3   : > { %1010 = vmatpush.msrb.mxu0 %v3023_v6  ;;  %1030 = vmatpush.msrb.mxu1 %v3026_v7 }
 0x1d4   : > { %937 = vmatpush.msra.mxu3 %v4197_v5  ;;  %v654_v5 = vld [vmem:[#allocation2 + $0x28] sm:$0xff] }
 0x1d5   : > { %1011 = vmatpush.msrb.mxu0 %v4198_v58  ;;  %1031 = vmatpush.msrb.mxu1 %v4199_v60 }
 0x1d6   : > { %938 = vmatpush.msra.mxu3 %v4200_v48 }
 0x1d7   : > { %1012 = vmatpush.msrb.mxu0 %v4201_v51  ;;  %1032 = vmatpush.msrb.mxu1 %v4202_v52 }
 0x234   : > { %v692_v54 = vpop.f32.mrf.mxu0 }
 0x235   : > { %v735_v55 = vadd.f32 %v692_v54, %v653_v53 }
 0x237   : > { %v2563_v56 = vmul.f32 -1.442695, %v735_v55 }
 0x239   : > { %2673 = vpow2.f32 %v2563_v56 }
 0x23a   : > { %v672_v61 = vpop.f32.mrf.mxu3 }
 0x23b   : > { %v715_v0 = vadd.f32 %v672_v61, %v652_v1  ;;  %v712_v1 = vpop.f32.mrf.mxu1 }
 0x23d   : > { %v2562_v2 = vmul.f32 -1.442695, %v715_v0 }
 0x23f   : > { %v2674_v62 = vpop.eup %2673  ;;  %2675 = vpow2.f32 %v2562_v2  ;;  %v755_v2 = vadd.f32 %v3159_v49, %v712_v1 }
 0x240   : > { %v739_v4 = vadd.f32 1.0, %v2674_v62 }
 0x242   : > { %2677 = vrcp.f32 %v739_v4  ;;  %vm745_vm14 = vweird.f32 %v739_v4 }
 0x245   : > { %v2676_v57 = vpop.eup %2675 }
 0x246   : > { %v719_v3 = vadd.f32 1.0, %v2676_v57 }
 0x248   : > { %2679 = vrcp.f32 %v719_v3  ;;  %v2678_v59 = vpop.eup %2677  ;;  %v731_v53 = vand.u32 2147483648, %v719_v3  ;;  %v729_v55 = vand.u32 2147483647, %v719_v3  ;;  %vm725_vm10 = vweird.f32 %v719_v3 }
 0x249   : > { %v741_v50 = vmul.f32 %v2678_v59, %v739_v4  ;;  %vm746_vm13 = vweird.f32 %v2678_v59 }
 0x24a   : > { %v732_v0 = vor.u32 1.1754944e-38, %v731_v53  ;;  %vm730_vm12 = vcmp.eq.f32.partialorder %v729_v55, 8.507059e+37  ;;  %vm747_vm15 = vmor %vm745_vm14, %vm746_vm13 }
 0x24b   : > { %v742_v48 = vsub.f32 1.0, %v741_v50  ;;  %v751_v50 = vand.u32 2147483648, %v739_v4 }
 0x24d   : > { %v743_v56 = vmul.f32 %v2678_v59, %v742_v48 }
 0x24e   : > { %v2680_v51 = vpop.eup %2679 }
 0x24f   : > { %v721_v52 = vmul.f32 %v2680_v51, %v719_v3  ;;  %vm726_vm9 = vweird.f32 %v2680_v51  ;;  %v744_v57 = vadd.f32 %v2678_v59, %v743_v56 }
 0x250   : > { %vm727_vm11 = vmor %vm725_vm10, %vm726_vm9 }
 0x251   : > { %v722_v60 = vsub.f32 1.0, %v721_v52  ;;  %v748_v7 = vsel %vm747_vm15, %v2678_v59, %v744_v57  ;;  %v4208_v59 = vld [vmem:[#allocation7_spill] sm:$0xff] }
 0x253   : > { %v723_v54 = vmul.f32 %v2680_v51, %v722_v60  ;;  %v749_v60 = vand.u32 2147483647, %v739_v4  ;;  %v4207_v4 = vld [vmem:[#allocation9_spill] sm:$0xff] }
 0x255   : > { %v724_v61 = vadd.f32 %v2680_v51, %v723_v54  ;;  %v752_v54 = vor.u32 1.1754944e-38, %v751_v50  ;;  %vm750_vm0 = vcmp.eq.f32.partialorder %v749_v60, 8.507059e+37 }
 0x257   : > { %v728_v62 = vsel %vm727_vm11, %v2680_v51, %v724_v61  ;;  %v753_v3 = vsel %vm750_vm0, %v752_v54, %v748_v7  ;;  %v4203_v7 = vld [vmem:[#allocation14_spill] sm:$0xff]  ;;  %v4209_v61 = vld [vmem:[#allocation8_spill] sm:$0xff] }
 0x258   : > { %v733_v58 = vsel %vm730_vm12, %v732_v0, %v728_v62  ;;  %v759_v53 = vsub.f32 1.0, %v753_v3  ;;  %v761_v55 = vmul.f32 %v753_v3, %v3425_v63  ;;  %v4204_v63 = vld [vmem:[#allocation12_spill] sm:$0xff]  ;;  %v766_v0 = vld [vmem:[#allocation2 + $0x40] sm:$0xff] }
 0x259   : > { %v756_v52 = vmul.f32 %v755_v2, %v733_v58  ;;  %v4206_v58 = vld [vmem:[#allocation11_spill] sm:$0xff]  ;;  %v767_v2 = vld [vmem:[#allocation2 + $0x78] sm:$0xff] }
 0x25b   : > { %v757_v48 = vadd.f32 %v756_v52, %v654_v5  ;;  %v4205_v5 = vld [vmem:[#allocation10_spill] sm:$0xff] }
 0x25d   : > { %2681 = vtanh.f32 %v757_v48 }
 0x263   : > { %v2682_v1 = vpop.eup %2681 }
 0x264   : > { %v760_v51 = vmul.f32 %v2682_v1, %v759_v53 }
 0x266   : > { %v3482_v56 = vadd.f32 %v761_v55, %v760_v51 }
 0x268   : > { %2564 = vst [vmem:[%s3245_s27 + $0x8] sm:$0xff] %v3482_v56  ;;  %785 = vmatmul.f32.vlgmr.msrb.gmra.mxu2 %v3482_v56  ;;  %805 = vmatmul.f32.vlgmr.msrb.gmra.mxu3 %v3482_v56 }
 0x269   : > { %825 = vmatmul.f32.vlgmr.msra.gmra.mxu0 %v3482_v56  ;;  %1037 = vmatpush.msrb.mxu2 %v3157_v47 }
 0x26a   : > { %1111 = vmatpush.msrb.mxu3 %v3151_v45  ;;  %1131 = vmatpush.msra.mxu0 %v3154_v46 }
 0x26b   : > { %1038 = vmatpush.msrb.mxu2 %v3148_v44 }
 0x26c   : > { %1112 = vmatpush.msrb.mxu3 %v3142_v42  ;;  %1132 = vmatpush.msra.mxu0 %v3145_v43 }
 0x26d   : > { %1039 = vmatpush.msrb.mxu2 %v3132_v41 }
 0x26e   : > { %1113 = vmatpush.msrb.mxu3 %v3126_v39  ;;  %1133 = vmatpush.msra.mxu0 %v3129_v40 }
 0x26f   : > { %1040 = vmatpush.msrb.mxu2 %v3123_v38 }
 0x270   : > { %1114 = vmatpush.msrb.mxu3 %v3117_v36  ;;  %1134 = vmatpush.msra.mxu0 %v3120_v37 }
 0x271   : > { %1041 = vmatpush.msrb.mxu2 %v3114_v35 }
 0x272   : > { %1115 = vmatpush.msrb.mxu3 %v3108_v33  ;;  %1135 = vmatpush.msra.mxu0 %v3111_v34 }
 0x273   : > { %1042 = vmatpush.msrb.mxu2 %v3105_v32 }
 0x274   : > { %1116 = vmatpush.msrb.mxu3 %v3099_v30  ;;  %1136 = vmatpush.msra.mxu0 %v3102_v31 }
 0x275   : > { %1043 = vmatpush.msrb.mxu2 %v3095_v29 }
 0x276   : > { %1117 = vmatpush.msrb.mxu3 %v3089_v27  ;;  %1137 = vmatpush.msra.mxu0 %v3092_v28 }
 0x277   : > { %1044 = vmatpush.msrb.mxu2 %v3086_v26 }
 0x278   : > { %1118 = vmatpush.msrb.mxu3 %v3080_v24  ;;  %1138 = vmatpush.msra.mxu0 %v3083_v25 }
 0x279   : > { %1045 = vmatpush.msrb.mxu2 %v3077_v23 }
 0x27a   : > { %1119 = vmatpush.msrb.mxu3 %v3071_v21  ;;  %1139 = vmatpush.msra.mxu0 %v3074_v22 }
 0x27b   : > { %1046 = vmatpush.msrb.mxu2 %v3068_v20 }
 0x27c   : > { %1120 = vmatpush.msrb.mxu3 %v3062_v18  ;;  %1140 = vmatpush.msra.mxu0 %v3065_v19 }
 0x27d   : > { %1047 = vmatpush.msrb.mxu2 %v3056_v17 }
 0x27e   : > { %1121 = vmatpush.msrb.mxu3 %v3050_v15  ;;  %1141 = vmatpush.msra.mxu0 %v3053_v16 }
 0x27f   : > { %1048 = vmatpush.msrb.mxu2 %v3047_v14 }
 0x280   : > { %1122 = vmatpush.msrb.mxu3 %v3041_v12  ;;  %1142 = vmatpush.msra.mxu0 %v3044_v13 }
 0x281   : > { %1049 = vmatpush.msrb.mxu2 %v3038_v11 }
 0x282   : > { %1123 = vmatpush.msrb.mxu3 %v3032_v9  ;;  %1143 = vmatpush.msra.mxu0 %v3035_v10 }
 0x283   : > { %1050 = vmatpush.msrb.mxu2 %v3029_v8 }
 0x284   : > { %1124 = vmatpush.msrb.mxu3 %v3023_v6  ;;  %1144 = vmatpush.msra.mxu0 %v4203_v7 }
 0x285   : > { %1051 = vmatpush.msrb.mxu2 %v4204_v63 }
 0x286   : > { %1125 = vmatpush.msrb.mxu3 %v4205_v5  ;;  %1145 = vmatpush.msra.mxu0 %v4206_v58 }
 0x287   : > { %1052 = vmatpush.msrb.mxu2 %v4207_v4 }
 0x288   : > { %1126 = vmatpush.msrb.mxu3 %v4208_v59  ;;  %1146 = vmatpush.msra.mxu0 %v4209_v61 }
 0x2eb   : > { %v786_v62 = vpop.f32.mrf.mxu2  ;;  %v806_v57 = vpop.f32.mrf.mxu3 }
 0x2ec   : > { %v829_v50 = vadd.f32 %v786_v62, %v766_v0  ;;  %v849_v52 = vadd.f32 %v806_v57, %v767_v2  ;;  %v826_v2 = vpop.f32.mrf.mxu0 }
 0x2ee   : > { %v2565_v60 = vmul.f32 -1.442695, %v829_v50  ;;  %v2566_v48 = vmul.f32 -1.442695, %v849_v52  ;;  %v869_v52 = vadd.f32 %v3159_v49, %v826_v2 }
 0x2f0   : > { %2683 = vpow2.f32 %v2565_v60 }
 0x2f1   : > { %2685 = vpow2.f32 %v2566_v48 }
 0x2f6   : > { %v2684_v54 = vpop.eup %2683 }
 0x2f7   : > { %v2686_v3 = vpop.eup %2685  ;;  %v833_v53 = vadd.f32 1.0, %v2684_v54 }
 0x2f8   : > { %v853_v1 = vadd.f32 1.0, %v2686_v3  ;;  %v768_v3 = vld [vmem:[#allocation2 + $0x88] sm:$0xff] }
 0x2f9   : > { %2687 = vrcp.f32 %v833_v53  ;;  %v845_v58 = vand.u32 2147483648, %v833_v53  ;;  %v843_v0 = vand.u32 2147483647, %v833_v53  ;;  %vm839_vm2 = vweird.f32 %v833_v53 }
 0x2fa   : > { %2689 = vrcp.f32 %v853_v1  ;;  %vm859_vm6 = vweird.f32 %v853_v1 }
 0x2fb   : > { %v846_v50 = vor.u32 1.1754944e-38, %v845_v58  ;;  %vm844_vm4 = vcmp.eq.f32.partialorder %v843_v0, 8.507059e+37 }
 0x2ff   : > { %v2688_v51 = vpop.eup %2687 }
 0x300   : > { %v2690_v55 = vpop.eup %2689  ;;  %v835_v59 = vmul.f32 %v2688_v51, %v833_v53  ;;  %vm840_vm1 = vweird.f32 %v2688_v51 }
 0x301   : > { %v855_v61 = vmul.f32 %v2690_v55, %v853_v1  ;;  %vm841_vm3 = vmor %vm839_vm2, %vm840_vm1  ;;  %vm860_vm5 = vweird.f32 %v2690_v55 }
 0x302   : > { %v836_v4 = vsub.f32 1.0, %v835_v59  ;;  %vm861_vm7 = vmor %vm859_vm6, %vm860_vm5 }
 0x303   : > { %v856_v5 = vsub.f32 1.0, %v855_v61  ;;  %v865_v61 = vand.u32 2147483648, %v853_v1 }
 0x304   : > { %v837_v63 = vmul.f32 %v2688_v51, %v836_v4  ;;  %v863_v4 = vand.u32 2147483647, %v853_v1  ;;  %v4212_v1 = vld [vmem:[#allocation10_spill] sm:$0xff] }
 0x305   : > { %v857_v62 = vmul.f32 %v2690_v55, %v856_v5 }
 0x306   : > { %v838_v57 = vadd.f32 %v2688_v51, %v837_v63  ;;  %v866_v63 = vor.u32 1.1754944e-38, %v865_v61  ;;  %vm864_vm8 = vcmp.eq.f32.partialorder %v863_v4, 8.507059e+37 }
 0x307   : > { %v858_v54 = vadd.f32 %v2690_v55, %v857_v62 }
 0x308   : > { %v842_v60 = vsel %vm841_vm3, %v2688_v51, %v838_v57  ;;  %v4214_v57 = vld [vmem:[#allocation9_spill] sm:$0xff] }
 0x309   : > { %v847_v48 = vsel %vm844_vm4, %v846_v50, %v842_v60  ;;  %v862_v5 = vsel %vm861_vm7, %v2690_v55, %v858_v54  ;;  %v4213_v55 = vld [vmem:[#allocation11_spill] sm:$0xff]  ;;  %v880_v60 = vld [vmem:[#allocation2 + $0x90] sm:$0xff] }
 0x30a   : > { %v870_v59 = vmul.f32 %v869_v52, %v847_v48  ;;  %v867_v58 = vsel %vm864_vm8, %v866_v63, %v862_v5  ;;  %v4215_v50 = vld [vmem:[#allocation7_spill] sm:$0xff]  ;;  %v4216_v52 = vld [vmem:[#allocation8_spill] sm:$0xff] }
 0x30b   : > { %v873_v53 = vsub.f32 1.0, %v867_v58  ;;  %v875_v0 = vmul.f32 %v867_v58, %v3482_v56  ;;  %v4210_v56 = vld [vmem:[#allocation14_spill] sm:$0xff] }
 0x30c   : > { %v871_v7 = vadd.f32 %v870_v59, %v768_v3  ;;  %v881_v59 = vld [vmem:[#allocation2 + $0x18] sm:$0xff] }
 0x30e   : > { %2691 = vtanh.f32 %v871_v7  ;;  %v4211_v7 = vld [vmem:[#allocation12_spill] sm:$0xff] }
 0x314   : > { %v2692_v2 = vpop.eup %2691 }
 0x315   : > { %v874_v51 = vmul.f32 %v2692_v2, %v873_v53 }
 0x317   : > { %v3539_v62 = vadd.f32 %v875_v0, %v874_v51 }
 0x319   : > { %2567 = vst [vmem:[%s3245_s27 + $0x10] sm:$0xff] %v3539_v62  ;;  %899 = vmatmul.f32.vlgmr.msra.gmra.mxu1 %v3539_v62  ;;  %919 = vmatmul.f32.vlgmr.msra.gmra.mxu2 %v3539_v62 }
 0x31a   : > { %939 = vmatmul.f32.vlgmr.msra.gmra.mxu3 %v3539_v62  ;;  %1151 = vmatpush.msra.mxu1 %v3157_v47 }
 0x31b   : > { %1225 = vmatpush.msra.mxu2 %v3151_v45  ;;  %1245 = vmatpush.msra.mxu3 %v3154_v46 }
 0x31c   : > { %1152 = vmatpush.msra.mxu1 %v3148_v44 }
 0x31d   : > { %1226 = vmatpush.msra.mxu2 %v3142_v42  ;;  %1246 = vmatpush.msra.mxu3 %v3145_v43 }
 0x31e   : > { %1153 = vmatpush.msra.mxu1 %v3132_v41 }
 0x31f   : > { %1227 = vmatpush.msra.mxu2 %v3126_v39  ;;  %1247 = vmatpush.msra.mxu3 %v3129_v40 }
 0x320   : > { %1154 = vmatpush.msra.mxu1 %v3123_v38 }
 0x321   : > { %1228 = vmatpush.msra.mxu2 %v3117_v36  ;;  %1248 = vmatpush.msra.mxu3 %v3120_v37 }
 0x322   : > { %1155 = vmatpush.msra.mxu1 %v3114_v35 }
 0x323   : > { %1229 = vmatpush.msra.mxu2 %v3108_v33  ;;  %1249 = vmatpush.msra.mxu3 %v3111_v34 }
 0x324   : > { %1156 = vmatpush.msra.mxu1 %v3105_v32 }
 0x325   : > { %1230 = vmatpush.msra.mxu2 %v3099_v30  ;;  %1250 = vmatpush.msra.mxu3 %v3102_v31 }
 0x326   : > { %1157 = vmatpush.msra.mxu1 %v3095_v29 }
 0x327   : > { %1231 = vmatpush.msra.mxu2 %v3089_v27  ;;  %1251 = vmatpush.msra.mxu3 %v3092_v28 }
 0x328   : > { %1158 = vmatpush.msra.mxu1 %v3086_v26 }
 0x329   : > { %1232 = vmatpush.msra.mxu2 %v3080_v24  ;;  %1252 = vmatpush.msra.mxu3 %v3083_v25 }
 0x32a   : > { %1159 = vmatpush.msra.mxu1 %v3077_v23 }
 0x32b   : > { %1233 = vmatpush.msra.mxu2 %v3071_v21  ;;  %1253 = vmatpush.msra.mxu3 %v3074_v22 }
 0x32c   : > { %1160 = vmatpush.msra.mxu1 %v3068_v20 }
 0x32d   : > { %1234 = vmatpush.msra.mxu2 %v3062_v18  ;;  %1254 = vmatpush.msra.mxu3 %v3065_v19 }
 0x32e   : > { %1161 = vmatpush.msra.mxu1 %v3056_v17 }
 0x32f   : > { %1235 = vmatpush.msra.mxu2 %v3050_v15  ;;  %1255 = vmatpush.msra.mxu3 %v3053_v16 }
 0x330   : > { %1162 = vmatpush.msra.mxu1 %v3047_v14 }
 0x331   : > { %1236 = vmatpush.msra.mxu2 %v3041_v12  ;;  %1256 = vmatpush.msra.mxu3 %v3044_v13 }
 0x332   : > { %1163 = vmatpush.msra.mxu1 %v3038_v11 }
 0x333   : > { %1237 = vmatpush.msra.mxu2 %v3032_v9  ;;  %1257 = vmatpush.msra.mxu3 %v3035_v10 }
 0x334   : > { %1164 = vmatpush.msra.mxu1 %v3029_v8 }
 0x335   : > { %1238 = vmatpush.msra.mxu2 %v3023_v6  ;;  %1258 = vmatpush.msra.mxu3 %v4210_v56 }
 0x336   : > { %1165 = vmatpush.msra.mxu1 %v4211_v7 }
 0x337   : > { %1239 = vmatpush.msra.mxu2 %v4212_v1  ;;  %1259 = vmatpush.msra.mxu3 %v4213_v55 }
 0x338   : > { %1166 = vmatpush.msra.mxu1 %v4214_v57 }
 0x339   : > { %1240 = vmatpush.msra.mxu2 %v4215_v50  ;;  %1260 = vmatpush.msra.mxu3 %v4216_v52 }
 0x396   : > { %v900_v48 = vpop.f32.mrf.mxu1 }
 0x397   : > { %v943_v54 = vadd.f32 %v900_v48, %v880_v60 }
 0x399   : > { %v2568_v3 = vmul.f32 -1.442695, %v943_v54 }
 0x39b   : > { %2693 = vpow2.f32 %v2568_v3 }
 0x39c   : > { %v920_v61 = vpop.f32.mrf.mxu2 }
 0x39d   : > { %v963_v4 = vadd.f32 %v920_v61, %v881_v59  ;;  %v940_v54 = vpop.f32.mrf.mxu3 }
 0x39f   : > { %v2569_v5 = vmul.f32 -1.442695, %v963_v4 }
 0x3a1   : > { %v2694_v63 = vpop.eup %2693  ;;  %2695 = vpow2.f32 %v2569_v5  ;;  %v983_v5 = vadd.f32 %v3159_v49, %v940_v54 }
 0x3a2   : > { %v947_v58 = vadd.f32 1.0, %v2694_v63  ;;  %v882_v63 = vld [vmem:[#allocation2 + $0x98] sm:$0xff] }
 0x3a4   : > { %2697 = vrcp.f32 %v947_v58  ;;  %v959_v52 = vand.u32 2147483648, %v947_v58  ;;  %v957_v60 = vand.u32 2147483647, %v947_v58  ;;  %vm953_vm10 = vweird.f32 %v947_v58 }
 0x3a6   : > { %v960_v59 = vor.u32 1.1754944e-38, %v959_v52  ;;  %vm958_vm12 = vcmp.eq.f32.partialorder %v957_v60, 8.507059e+37 }
 0x3a7   : > { %v2696_v53 = vpop.eup %2695 }
 0x3a8   : > { %v967_v2 = vadd.f32 1.0, %v2696_v53 }
 0x3aa   : > { %v2698_v51 = vpop.eup %2697  ;;  %2699 = vrcp.f32 %v967_v2  ;;  %v977_v7 = vand.u32 2147483647, %v967_v2  ;;  %vm973_vm14 = vweird.f32 %v967_v2 }
 0x3ab   : > { %v949_v0 = vmul.f32 %v2698_v51, %v947_v58  ;;  %vm954_vm9 = vweird.f32 %v2698_v51 }
 0x3ac   : > { %vm955_vm11 = vmor %vm953_vm10, %vm954_vm9  ;;  %vm978_vm0 = vcmp.eq.f32.partialorder %v977_v7, 8.507059e+37  ;;  %v4220_v7 = vld [vmem:[#allocation10_spill] sm:$0xff] }
 0x3ad   : > { %v950_v50 = vsub.f32 1.0, %v949_v0  ;;  %v979_v0 = vand.u32 2147483648, %v967_v2 }
 0x3af   : > { %v951_v57 = vmul.f32 %v2698_v51, %v950_v50 }
 0x3b0   : > { %v2700_v48 = vpop.eup %2699 }
 0x3b1   : > { %v969_v3 = vmul.f32 %v2700_v48, %v967_v2  ;;  %v952_v55 = vadd.f32 %v2698_v51, %v951_v57  ;;  %vm974_vm13 = vweird.f32 %v2700_v48  ;;  %v980_v57 = vor.u32 1.1754944e-38, %v979_v0  ;;  %v4222_v2 = vld [vmem:[#allocation9_spill] sm:$0xff] }
 0x3b2   : > { %vm975_vm15 = vmor %vm973_vm14, %vm974_vm13 }
 0x3b3   : > { %v970_v61 = vsub.f32 1.0, %v969_v3  ;;  %v956_v4 = vsel %vm955_vm11, %v2698_v51, %v952_v55 }
 0x3b4   : > { %v961_v53 = vsel %vm958_vm12, %v960_v59, %v956_v4  ;;  %v4224_v59 = vld [vmem:[#allocation8_spill] sm:$0xff]  ;;  %v995_v4 = vld [vmem:[#allocation2 + $0x50] sm:$0xff] }
 0x3b5   : > { %v971_v1 = vmul.f32 %v2700_v48, %v970_v61  ;;  %v984_v50 = vmul.f32 %v983_v5, %v961_v53  ;;  %v994_v61 = vld [vmem:[#allocation2 + $0x38] sm:$0xff] }
 0x3b7   : > { %v972_v56 = vadd.f32 %v2700_v48, %v971_v1  ;;  %v985_v6 = vadd.f32 %v984_v50, %v882_v63  ;;  %v4221_v1 = vld [vmem:[#allocation11_spill] sm:$0xff] }
 0x3b9   : > { %v976_v58 = vsel %vm975_vm15, %v2700_v48, %v972_v56  ;;  %2701 = vtanh.f32 %v985_v6  ;;  %v4217_v6 = vld [vmem:[#allocation13_spill] sm:$0xff]  ;;  %v4219_v56 = vld [vmem:[#allocation12_spill] sm:$0xff]  ;;  %v4223_v48 = vld [vmem:[#allocation7_spill] sm:$0xff] }
 0x3ba   : > { %v981_v55 = vsel %vm978_vm0, %v980_v57, %v976_v58 }
 0x3bb   : > { %v987_v52 = vsub.f32 1.0, %v981_v55  ;;  %v989_v54 = vmul.f32 %v981_v55, %v3539_v62  ;;  %v4218_v62 = vld [vmem:[#allocation14_spill] sm:$0xff] }
 0x3bf   : > { %v2702_v51 = vpop.eup %2701 }
 0x3c0   : > { %v988_v60 = vmul.f32 %v2702_v51, %v987_v52 }
 0x3c2   : > { %v3596_v3 = vadd.f32 %v989_v54, %v988_v60 }
 0x3c4   : > { %2570 = vst [vmem:[%s3245_s27 + $0x18] sm:$0xff] %v3596_v3  ;;  %1013 = vmatmul.f32.vlgmr.msrb.gmra.mxu0 %v3596_v3  ;;  %1033 = vmatmul.f32.vlgmr.msrb.gmra.mxu1 %v3596_v3 }
 0x3c5   : > { %1053 = vmatmul.f32.vlgmr.msrb.gmra.mxu2 %v3596_v3  ;;  %1265 = vmatpush.msrb.mxu0 %v3157_v47 }
 0x3c6   : > { %1339 = vmatpush.msrb.mxu1 %v3151_v45  ;;  %1359 = vmatpush.msrb.mxu2 %v3154_v46 }
 0x3c7   : > { %1266 = vmatpush.msrb.mxu0 %v3148_v44 }
 0x3c8   : > { %1340 = vmatpush.msrb.mxu1 %v3142_v42  ;;  %1360 = vmatpush.msrb.mxu2 %v3145_v43 }
 0x3c9   : > { %1267 = vmatpush.msrb.mxu0 %v3132_v41 }
 0x3ca   : > { %1341 = vmatpush.msrb.mxu1 %v3126_v39  ;;  %1361 = vmatpush.msrb.mxu2 %v3129_v40 }
 0x3cb   : > { %1268 = vmatpush.msrb.mxu0 %v3123_v38 }
 0x3cc   : > { %1342 = vmatpush.msrb.mxu1 %v3117_v36  ;;  %1362 = vmatpush.msrb.mxu2 %v3120_v37 }
 0x3cd   : > { %1269 = vmatpush.msrb.mxu0 %v3114_v35 }
 0x3ce   : > { %1343 = vmatpush.msrb.mxu1 %v3108_v33  ;;  %1363 = vmatpush.msrb.mxu2 %v3111_v34 }
 0x3cf   : > { %1270 = vmatpush.msrb.mxu0 %v3105_v32 }
 0x3d0   : > { %1344 = vmatpush.msrb.mxu1 %v3099_v30  ;;  %1364 = vmatpush.msrb.mxu2 %v3102_v31 }
 0x3d1   : > { %1271 = vmatpush.msrb.mxu0 %v3095_v29 }
 0x3d2   : > { %1345 = vmatpush.msrb.mxu1 %v3089_v27  ;;  %1365 = vmatpush.msrb.mxu2 %v3092_v28 }
 0x3d3   : > { %1272 = vmatpush.msrb.mxu0 %v3086_v26 }
 0x3d4   : > { %1346 = vmatpush.msrb.mxu1 %v3080_v24  ;;  %1366 = vmatpush.msrb.mxu2 %v3083_v25 }
 0x3d5   : > { %1273 = vmatpush.msrb.mxu0 %v3077_v23 }
 0x3d6   : > { %1347 = vmatpush.msrb.mxu1 %v3071_v21  ;;  %1367 = vmatpush.msrb.mxu2 %v3074_v22 }
 0x3d7   : > { %1274 = vmatpush.msrb.mxu0 %v3068_v20 }
 0x3d8   : > { %1348 = vmatpush.msrb.mxu1 %v3062_v18  ;;  %1368 = vmatpush.msrb.mxu2 %v3065_v19 }
 0x3d9   : > { %1275 = vmatpush.msrb.mxu0 %v3056_v17 }
 0x3da   : > { %1349 = vmatpush.msrb.mxu1 %v3050_v15  ;;  %1369 = vmatpush.msrb.mxu2 %v3053_v16 }
 0x3db   : > { %1276 = vmatpush.msrb.mxu0 %v3047_v14 }
 0x3dc   : > { %1350 = vmatpush.msrb.mxu1 %v3041_v12  ;;  %1370 = vmatpush.msrb.mxu2 %v3044_v13 }
 0x3dd   : > { %1277 = vmatpush.msrb.mxu0 %v3038_v11 }
 0x3de   : > { %1351 = vmatpush.msrb.mxu1 %v3032_v9  ;;  %1371 = vmatpush.msrb.mxu2 %v3035_v10 }
 0x3df   : > { %1278 = vmatpush.msrb.mxu0 %v3029_v8 }
 0x3e0   : > { %1352 = vmatpush.msrb.mxu1 %v4217_v6  ;;  %1372 = vmatpush.msrb.mxu2 %v4218_v62 }
 0x3e1   : > { %1279 = vmatpush.msrb.mxu0 %v4219_v56 }
 0x3e2   : > { %1353 = vmatpush.msrb.mxu1 %v4220_v7  ;;  %1373 = vmatpush.msrb.mxu2 %v4221_v1 }
 0x3e3   : > { %1280 = vmatpush.msrb.mxu0 %v4222_v2 }
 0x3e4   : > { %1354 = vmatpush.msrb.mxu1 %v4223_v48  ;;  %1374 = vmatpush.msrb.mxu2 %v4224_v59 }
 0x441   : > { %v1014_v5 = vpop.f32.mrf.mxu0  ;;  %v1034_v63 = vpop.f32.mrf.mxu1 }
 0x442   : > { %v1057_v53 = vadd.f32 %v1014_v5, %v994_v61  ;;  %v1077_v0 = vadd.f32 %v1034_v63, %v995_v4 }
 0x444   : > { %v2571_v50 = vmul.f32 -1.442695, %v1057_v53  ;;  %v2572_v57 = vmul.f32 -1.442695, %v1077_v0 }
 0x446   : > { %2703 = vpow2.f32 %v2571_v50 }
 0x447   : > { %2705 = vpow2.f32 %v2572_v57 }
 0x448   : > { %v1054_v5 = vpop.f32.mrf.mxu2 }
 0x449   : > { %v1097_v50 = vadd.f32 %v3159_v49, %v1054_v5 }
 0x44c   : > { %v2704_v58 = vpop.eup %2703 }
 0x44d   : > { %v2706_v55 = vpop.eup %2705  ;;  %v1061_v52 = vadd.f32 1.0, %v2704_v58  ;;  %v996_v58 = vld [vmem:[#allocation2 + $0x70] sm:$0xff] }
 0x44e   : > { %v1081_v51 = vadd.f32 1.0, %v2706_v55 }
 0x44f   : > { %2707 = vrcp.f32 %v1061_v52  ;;  %v1073_v48 = vand.u32 2147483648, %v1061_v52  ;;  %v1071_v61 = vand.u32 2147483647, %v1061_v52  ;;  %vm1067_vm2 = vweird.f32 %v1061_v52 }
 0x450   : > { %2709 = vrcp.f32 %v1081_v51  ;;  %vm1087_vm6 = vweird.f32 %v1081_v51 }
 0x451   : > { %v1074_v53 = vor.u32 1.1754944e-38, %v1073_v48  ;;  %vm1072_vm4 = vcmp.eq.f32.partialorder %v1071_v61, 8.507059e+37 }
 0x455   : > { %v2708_v60 = vpop.eup %2707 }
 0x456   : > { %v2710_v54 = vpop.eup %2709  ;;  %v1063_v6 = vmul.f32 %v2708_v60, %v1061_v52  ;;  %vm1068_vm1 = vweird.f32 %v2708_v60 }
 0x457   : > { %v1083_v62 = vmul.f32 %v2710_v54, %v1081_v51  ;;  %vm1069_vm3 = vmor %vm1067_vm2, %vm1068_vm1  ;;  %vm1088_vm5 = vweird.f32 %v2710_v54 }
 0x458   : > { %v1064_v7 = vsub.f32 1.0, %v1063_v6  ;;  %v1093_v6 = vand.u32 2147483648, %v1081_v51  ;;  %vm1089_vm7 = vmor %vm1087_vm6, %vm1088_vm5 }
 0x459   : > { %v1084_v1 = vsub.f32 1.0, %v1083_v62 }
 0x45a   : > { %v1065_v59 = vmul.f32 %v2708_v60, %v1064_v7  ;;  %v1091_v7 = vand.u32 2147483647, %v1081_v51 }
 0x45b   : > { %v1085_v4 = vmul.f32 %v2710_v54, %v1084_v1 }
 0x45c   : > { %v1066_v63 = vadd.f32 %v2708_v60, %v1065_v59  ;;  %v1094_v59 = vor.u32 1.1754944e-38, %v1093_v6  ;;  %vm1092_vm8 = vcmp.eq.f32.partialorder %v1091_v7, 8.507059e+37 }
 0x45d   : > { %v1086_v57 = vadd.f32 %v2710_v54, %v1085_v4 }
 0x45e   : > { %v1070_v0 = vsel %vm1069_vm3, %v2708_v60, %v1066_v63  ;;  %v1108_v63 = vld [vmem:[#allocation2 + $0xa0] sm:$0xff] }
 0x45f   : > { %v1075_v55 = vsel %vm1072_vm4, %v1074_v53, %v1070_v0  ;;  %v1090_v10 = vsel %vm1089_vm7, %v2710_v54, %v1086_v57 }
 0x460   : > { %v1098_v62 = vmul.f32 %v1097_v50, %v1075_v55  ;;  %v1095_v52 = vsel %vm1092_vm8, %v1094_v59, %v1090_v10  ;;  %v1109_v10 = vld [vmem:[#allocation2 + $0xa8] sm:$0xff] }
 0x461   : > { %v1101_v60 = vsub.f32 1.0, %v1095_v52  ;;  %v1103_v4 = vmul.f32 %v1095_v52, %v3596_v3 }
 0x462   : > { %v1099_v1 = vadd.f32 %v1098_v62, %v996_v58 }
 0x464   : > { %2711 = vtanh.f32 %v1099_v1 }
 0x46a   : > { %v2712_v48 = vpop.eup %2711 }
 0x46b   : > { %v1102_v61 = vmul.f32 %v2712_v48, %v1101_v60 }
 0x46d   : > { %v3653_v5 = vadd.f32 %v1103_v4, %v1102_v61 }
 0x46f   : > { %2573 = vst [vmem:[%s3245_s27 + $0x20] sm:$0xff] %v3653_v5  ;;  %1127 = vmatmul.f32.vlgmr.msrb.gmra.mxu3 %v3653_v5  ;;  %1147 = vmatmul.f32.vlgmr.msra.gmra.mxu0 %v3653_v5 }
 0x470   : > { %1167 = vmatmul.f32.vlgmr.msra.gmra.mxu1 %v3653_v5  ;;  %1379 = vmatpush.msrb.mxu3 %v3157_v47 }
 0x472   : > { %1380 = vmatpush.msrb.mxu3 %v3148_v44 }
 0x474   : > { %1381 = vmatpush.msrb.mxu3 %v3132_v41 }
 0x476   : > { %1382 = vmatpush.msrb.mxu3 %v3123_v38 }
 0x478   : > { %1383 = vmatpush.msrb.mxu3 %v3114_v35 }
 0x47a   : > { %1384 = vmatpush.msrb.mxu3 %v3105_v32 }
 0x47c   : > { %1385 = vmatpush.msrb.mxu3 %v3095_v29 }
 0x47e   : > { %1386 = vmatpush.msrb.mxu3 %v3086_v26 }
 0x480   : > { %1387 = vmatpush.msrb.mxu3 %v3077_v23 }
 0x482   : > { %1388 = vmatpush.msrb.mxu3 %v3068_v20 }
 0x484   : > { %1389 = vmatpush.msrb.mxu3 %v3056_v17 }
 0x486   : > { %1390 = vmatpush.msrb.mxu3 %v3047_v14 }
 0x488   : > { %1391 = vmatpush.msrb.mxu3 %v3038_v11 }
 0x48a   : > { %1392 = vmatpush.msrb.mxu3 %v3029_v8 }
 0x48c   : > { %1393 = vmatpush.msrb.mxu3 %v4219_v56 }
 0x48e   : > { %1394 = vmatpush.msrb.mxu3 %v4222_v2 }
 0x4ec   : > { %v1148_v3 = vpop.f32.mrf.mxu0 }
 0x4ed   : > { %v1191_v51 = vadd.f32 %v1148_v3, %v1109_v10  ;;  %v1168_v4 = vpop.f32.mrf.mxu1 }
 0x4ef   : > { %v2575_v54 = vmul.f32 -1.442695, %v1191_v51  ;;  %v1211_v51 = vadd.f32 %v3159_v49, %v1168_v4  ;;  %v1223_v4 = vld [vmem:[#allocation2 + $0x58] sm:$0xff] }
 0x4f1   : > { %2713 = vpow2.f32 %v2575_v54 }
 0x4f2   : > { %v1128_v53 = vpop.f32.mrf.mxu3 }
 0x4f3   : > { %v1171_v0 = vadd.f32 %v1128_v53, %v1108_v63 }
 0x4f5   : > { %v2574_v50 = vmul.f32 -1.442695, %v1171_v0  ;;  %v1110_v0 = vld [vmem:[#allocation2 + $0x68] sm:$0xff] }
 0x4f7   : > { %v2714_v57 = vpop.eup %2713  ;;  %2715 = vpow2.f32 %v2574_v50 }
 0x4f8   : > { %v1195_v58 = vadd.f32 1.0, %v2714_v57 }
 0x4fa   : > { %2717 = vrcp.f32 %v1195_v58  ;;  %v1207_v50 = vand.u32 2147483648, %v1195_v58  ;;  %vm1201_vm14 = vweird.f32 %v1195_v58 }
 0x4fd   : > { %v2716_v55 = vpop.eup %2715 }
 0x4fe   : > { %v1175_v6 = vadd.f32 1.0, %v2716_v55  ;;  %v1205_v55 = vand.u32 2147483647, %v1195_v58 }
 0x500   : > { %2719 = vrcp.f32 %v1175_v6  ;;  %v2718_v62 = vpop.eup %2717  ;;  %v1187_v52 = vand.u32 2147483648, %v1175_v6  ;;  %v1185_v48 = vand.u32 2147483647, %v1175_v6  ;;  %vm1181_vm10 = vweird.f32 %v1175_v6 }
 0x501   : > { %v1197_v56 = vmul.f32 %v2718_v62, %v1195_v58  ;;  %vm1202_vm13 = vweird.f32 %v2718_v62  ;;  %vm1206_vm0 = vcmp.eq.f32.partialorder %v1205_v55, 8.507059e+37 }
 0x502   : > { %v1188_v3 = vor.u32 1.1754944e-38, %v1187_v52  ;;  %vm1186_vm12 = vcmp.eq.f32.partialorder %v1185_v48, 8.507059e+37  ;;  %vm1203_vm15 = vmor %vm1201_vm14, %vm1202_vm13 }
 0x503   : > { %v1198_v1 = vsub.f32 1.0, %v1197_v56 }
 0x505   : > { %v1199_v61 = vmul.f32 %v2718_v62, %v1198_v1  ;;  %v1208_v1 = vor.u32 1.1754944e-38, %v1207_v50 }
 0x506   : > { %v2720_v7 = vpop.eup %2719 }
 0x507   : > { %v1177_v2 = vmul.f32 %v2720_v7, %v1175_v6  ;;  %vm1182_vm9 = vweird.f32 %v2720_v7  ;;  %v1200_v63 = vadd.f32 %v2718_v62, %v1199_v61  ;;  %v1222_v61 = vld [vmem:[#allocation2 + $0x30] sm:$0xff] }
 0x508   : > { %vm1183_vm11 = vmor %vm1181_vm10, %vm1182_vm9 }
 0x509   : > { %v1178_v59 = vsub.f32 1.0, %v1177_v2  ;;  %v1204_v2 = vsel %vm1203_vm15, %v2718_v62, %v1200_v63 }
 0x50a   : > { %v1209_v6 = vsel %vm1206_vm0, %v1208_v1, %v1204_v2 }
 0x50b   : > { %v1179_v60 = vmul.f32 %v2720_v7, %v1178_v59  ;;  %v1215_v59 = vsub.f32 1.0, %v1209_v6 }
 0x50d   : > { %v1180_v10 = vadd.f32 %v2720_v7, %v1179_v60  ;;  %v1217_v60 = vmul.f32 %v1209_v6, %v3653_v5 }
 0x50f   : > { %v1184_v54 = vsel %vm1183_vm11, %v2720_v7, %v1180_v10 }
 0x510   : > { %v1189_v53 = vsel %vm1186_vm12, %v1188_v3, %v1184_v54 }
 0x511   : > { %v1212_v57 = vmul.f32 %v1211_v51, %v1189_v53 }
 0x513   : > { %v1213_v56 = vadd.f32 %v1212_v57, %v1110_v0 }
 0x515   : > { %2721 = vtanh.f32 %v1213_v56 }
 0x51b   : > { %v2722_v52 = vpop.eup %2721 }
 0x51c   : > { %v1216_v7 = vmul.f32 %v2722_v52, %v1215_v59 }
 0x51e   : > { %v1218_v48 = vadd.f32 %v1217_v60, %v1216_v7 }
 0x520   : > { %2576 = vst [vmem:[%s3245_s27 + $0x28] sm:$0xff] %v1218_v48  ;;  %1241 = vmatmul.f32.vlgmr.msra.gmra.mxu2 %v1218_v48  ;;  %1261 = vmatmul.f32.vlgmr.msra.gmra.mxu3 %v1218_v48 }
 0x521   : > { %1281 = vmatmul.f32.vlgmr.msrb.gmra.mxu0 %v1218_v48 }
 0x59e   : > { %v1282_v7 = vpop.f32.mrf.mxu0 }
 0x5a3   : > { %v1242_v58 = vpop.f32.mrf.mxu2  ;;  %v1262_v10 = vpop.f32.mrf.mxu3 }
 0x5a4   : > { %v1285_v3 = vadd.f32 %v1242_v58, %v1222_v61  ;;  %v1305_v62 = vadd.f32 %v1262_v10, %v1223_v4  ;;  %v1325_v58 = vadd.f32 %v3159_v49, %v1282_v7  ;;  %v1336_v7 = vld [vmem:[#allocation2 + $0xb8] sm:$0xff] }
 0x5a6   : > { %v2577_v51 = vmul.f32 -1.442695, %v1285_v3  ;;  %v2578_v54 = vmul.f32 -1.442695, %v1305_v62 }
 0x5a8   : > { %2723 = vpow2.f32 %v2577_v51  ;;  %v1224_v51 = vld [vmem:[#allocation2 + $0x80] sm:$0xff] }
 0x5a9   : > { %2725 = vpow2.f32 %v2578_v54 }
 0x5ae   : > { %v2724_v63 = vpop.eup %2723 }
 0x5af   : > { %v2726_v53 = vpop.eup %2725  ;;  %v1289_v0 = vadd.f32 1.0, %v2724_v63 }
 0x5b0   : > { %v1309_v50 = vadd.f32 1.0, %v2726_v53 }
 0x5b1   : > { %2727 = vrcp.f32 %v1289_v0  ;;  %v1301_v1 = vand.u32 2147483648, %v1289_v0  ;;  %v1299_v52 = vand.u32 2147483647, %v1289_v0  ;;  %vm1295_vm2 = vweird.f32 %v1289_v0 }
 0x5b2   : > { %2729 = vrcp.f32 %v1309_v50  ;;  %v1321_v63 = vand.u32 2147483648, %v1309_v50  ;;  %vm1315_vm6 = vweird.f32 %v1309_v50  ;;  %v1319_v53 = vand.u32 2147483647, %v1309_v50 }
 0x5b3   : > { %v1302_v4 = vor.u32 1.1754944e-38, %v1301_v1  ;;  %vm1300_vm4 = vcmp.eq.f32.partialorder %v1299_v52, 8.507059e+37 }
 0x5b4   : > { %vm1320_vm8 = vcmp.eq.f32.partialorder %v1319_v53, 8.507059e+37 }
 0x5b7   : > { %v2728_v5 = vpop.eup %2727 }
 0x5b8   : > { %v2730_v57 = vpop.eup %2729  ;;  %v1291_v55 = vmul.f32 %v2728_v5, %v1289_v0  ;;  %vm1296_vm1 = vweird.f32 %v2728_v5 }
 0x5b9   : > { %v1311_v56 = vmul.f32 %v2730_v57, %v1309_v50  ;;  %vm1297_vm3 = vmor %vm1295_vm2, %vm1296_vm1  ;;  %vm1316_vm5 = vweird.f32 %v2730_v57 }
 0x5ba   : > { %v1292_v2 = vsub.f32 1.0, %v1291_v55  ;;  %vm1317_vm7 = vmor %vm1315_vm6, %vm1316_vm5 }
 0x5bb   : > { %v1312_v6 = vsub.f32 1.0, %v1311_v56 }
 0x5bc   : > { %v1293_v59 = vmul.f32 %v2728_v5, %v1292_v2  ;;  %v1322_v2 = vor.u32 1.1754944e-38, %v1321_v63 }
 0x5bd   : > { %v1313_v60 = vmul.f32 %v2730_v57, %v1312_v6 }
 0x5be   : > { %v1294_v61 = vadd.f32 %v2728_v5, %v1293_v59 }
 0x5bf   : > { %v1314_v62 = vadd.f32 %v2730_v57, %v1313_v60 }
 0x5c0   : > { %v1298_v10 = vsel %vm1297_vm3, %v2728_v5, %v1294_v61 }
 0x5c1   : > { %v1303_v3 = vsel %vm1300_vm4, %v1302_v4, %v1298_v10  ;;  %v1318_v56 = vsel %vm1317_vm7, %v2730_v57, %v1314_v62  ;;  %v1337_v4 = vld [vmem:[#allocation2 + $0x20] sm:$0xff] }
 0x5c2   : > { %v1326_v54 = vmul.f32 %v1325_v58, %v1303_v3  ;;  %v1323_v0 = vsel %vm1320_vm8, %v1322_v2, %v1318_v56 }
 0x5c3   : > { %v1329_v1 = vsub.f32 1.0, %v1323_v0  ;;  %v1331_v59 = vmul.f32 %v1323_v0, %v1218_v48 }
 0x5c4   : > { %v1327_v55 = vadd.f32 %v1326_v54, %v1224_v51 }
 0x5c6   : > { %2731 = vtanh.f32 %v1327_v55 }
 0x5cc   : > { %v2732_v6 = vpop.eup %2731 }
 0x5cd   : > { %v1330_v5 = vmul.f32 %v2732_v6, %v1329_v1 }
 0x5cf   : > { %v1332_v52 = vadd.f32 %v1331_v59, %v1330_v5 }
 0x5d1   : > { %2579 = vst [vmem:[%s3245_s27 + $0x30] sm:$0xff] %v1332_v52  ;;  %1355 = vmatmul.f32.vlgmr.msrb.gmra.mxu1 %v1332_v52  ;;  %1375 = vmatmul.f32.vlgmr.msrb.gmra.mxu2 %v1332_v52 }
 0x5d2   : > { %1395 = vmatmul.f32.vlgmr.msrb.gmra.mxu3 %v1332_v52 }
 0x64e   : > { %v1356_v60 = vpop.f32.mrf.mxu1 }
 0x64f   : > { %v1399_v61 = vadd.f32 %v1356_v60, %v1336_v7 }
 0x651   : > { %v2580_v50 = vmul.f32 -1.442695, %v1399_v61 }
 0x653   : > { %2733 = vpow2.f32 %v2580_v50  ;;  %v1338_v50 = vld [vmem:[#allocation2 + $0x8] sm:$0xff] }
 0x654   : > { %v1376_v57 = vpop.f32.mrf.mxu2 }
 0x655   : > { %v1419_v58 = vadd.f32 %v1376_v57, %v1337_v4  ;;  %v1396_v1 = vpop.f32.mrf.mxu3 }
 0x656   : > { %v1439_v61 = vadd.f32 %v3159_v49, %v1396_v1 }
 0x657   : > { %v2581_v10 = vmul.f32 -1.442695, %v1419_v58 }
 0x659   : > { %v2734_v3 = vpop.eup %2733  ;;  %2735 = vpow2.f32 %v2581_v10 }
 0x65a   : > { %v1403_v62 = vadd.f32 1.0, %v2734_v3 }
 0x65c   : > { %2737 = vrcp.f32 %v1403_v62  ;;  %v1415_v55 = vand.u32 2147483648, %v1403_v62  ;;  %v1413_v2 = vand.u32 2147483647, %v1403_v62  ;;  %vm1409_vm10 = vweird.f32 %v1403_v62 }
 0x65e   : > { %v1416_v59 = vor.u32 1.1754944e-38, %v1415_v55  ;;  %vm1414_vm12 = vcmp.eq.f32.partialorder %v1413_v2, 8.507059e+37 }
 0x65f   : > { %v2736_v51 = vpop.eup %2735 }
 0x660   : > { %v1423_v48 = vadd.f32 1.0, %v2736_v51 }
 0x662   : > { %v2738_v54 = vpop.eup %2737  ;;  %2739 = vrcp.f32 %v1423_v48  ;;  %v1435_v58 = vand.u32 2147483648, %v1423_v48  ;;  %v1433_v3 = vand.u32 2147483647, %v1423_v48  ;;  %vm1429_vm14 = vweird.f32 %v1423_v48 }
 0x663   : > { %v1405_v63 = vmul.f32 %v2738_v54, %v1403_v62  ;;  %vm1410_vm9 = vweird.f32 %v2738_v54 }
 0x664   : > { %vm1411_vm11 = vmor %vm1409_vm10, %vm1410_vm9  ;;  %v1436_v62 = vor.u32 1.1754944e-38, %v1435_v58  ;;  %vm1434_vm0 = vcmp.eq.f32.partialorder %v1433_v3, 8.507059e+37 }
 0x665   : > { %v1406_v53 = vsub.f32 1.0, %v1405_v63 }
 0x667   : > { %v1407_v56 = vmul.f32 %v2738_v54, %v1406_v53 }
 0x668   : > { %v2740_v0 = vpop.eup %2739 }
 0x669   : > { %v1425_v6 = vmul.f32 %v2740_v0, %v1423_v48  ;;  %v1408_v5 = vadd.f32 %v2738_v54, %v1407_v56  ;;  %vm1430_vm13 = vweird.f32 %v2740_v0 }
 0x66a   : > { %vm1431_vm15 = vmor %vm1429_vm14, %vm1430_vm13 }
 0x66b   : > { %v1426_v7 = vsub.f32 1.0, %v1425_v6  ;;  %v1412_v60 = vsel %vm1411_vm11, %v2738_v54, %v1408_v5 }
 0x66c   : > { %v1417_v4 = vsel %vm1414_vm12, %v1416_v59, %v1412_v60 }
 0x66d   : > { %v1427_v57 = vmul.f32 %v2740_v0, %v1426_v7  ;;  %v1440_v10 = vmul.f32 %v1439_v61, %v1417_v4 }
 0x66f   : > { %v1428_v51 = vadd.f32 %v2740_v0, %v1427_v57  ;;  %v1441_v63 = vadd.f32 %v1440_v10, %v1338_v50 }
 0x671   : > { %v1432_v53 = vsel %vm1431_vm15, %v2740_v0, %v1428_v51  ;;  %2741 = vtanh.f32 %v1441_v63 }
 0x672   : > { %v1437_v54 = vsel %vm1434_vm0, %v1436_v62, %v1432_v53 }
 0x673   : > { %v1443_v55 = vsub.f32 1.0, %v1437_v54  ;;  %v1445_v1 = vmul.f32 %v1437_v54, %v1332_v52 }
 0x677   : > { %v2742_v56 = vpop.eup %2741 }
 0x678   : > { %v1444_v2 = vmul.f32 %v2742_v56, %v1443_v55 }
 0x67a   : > { %v1446_v6 = vadd.f32 %v1445_v1, %v1444_v2 }
 0x67c   : > { %2582 = vst [vmem:[%s3245_s27 + $0x38] sm:$0xff] %v1446_v6 }
 0x67d PF: > { %p2583_p11 = scmp.ne.s32.totalorder %s2942_s22, 1 }
 0x67f   : > { %1452 = sbr.rel (%p2583_p11) target bundleno = 3092 (0xc14), region = 52 }
 0x684   : > { %1457 = vmatpush.msra.mxu0 %v3151_v45  ;;  %1477 = vmatpush.msra.mxu1 %v3154_v46  ;;  %v4225_v52 = vld [vmem:[#allocation15_spill] sm:$0xff]  ;;  %v4226_v48 = vld [vmem:[#allocation13_spill] sm:$0xff]  ;;  %v4227_v0 = vld [vmem:[#allocation14_spill] sm:$0xff]  ;;  %v2892_v50 = vmov 0.0  }
 0x685   : > { %1497 = vmatpush.msra.mxu2 %v3157_v47  ;;  %1571 = vmatpush.msra.mxu3 %v3151_v45  ;;  %v4228_v5 = vld [vmem:[#allocation10_spill] sm:$0xff]  ;;  %v4229_v59 = vld [vmem:[#allocation11_spill] sm:$0xff]  ;;  %v4230_v7 = vld [vmem:[#allocation12_spill] sm:$0xff] }
 0x686   : > { %1458 = vmatpush.msra.mxu0 %v3142_v42  ;;  %1478 = vmatpush.msra.mxu1 %v3145_v43  ;;  %v4231_v60 = vld [vmem:[#allocation7_spill] sm:$0xff]  ;;  %v4232_v61 = vld [vmem:[#allocation8_spill] sm:$0xff]  ;;  %v4233_v4 = vld [vmem:[#allocation9_spill] sm:$0xff] }
 0x687   : > { %1498 = vmatpush.msra.mxu2 %v3148_v44  ;;  %1572 = vmatpush.msra.mxu3 %v3142_v42  ;;  %v1454_v57 = vld [vmem:[#allocation2 + $0xb8] sm:$0xff]  ;;  %v1455_v58 = vld [vmem:[#allocation2 + $0x20] sm:$0xff] }
 0x688   : > { %1459 = vmatpush.msra.mxu0 %v3126_v39  ;;  %1479 = vmatpush.msra.mxu1 %v3129_v40 }
 0x689   : > { %1499 = vmatpush.msra.mxu2 %v3132_v41  ;;  %1573 = vmatpush.msra.mxu3 %v3126_v39 }
 0x68a   : > { %1460 = vmatpush.msra.mxu0 %v3117_v36  ;;  %1480 = vmatpush.msra.mxu1 %v3120_v37 }
 0x68b   : > { %1500 = vmatpush.msra.mxu2 %v3123_v38  ;;  %1574 = vmatpush.msra.mxu3 %v3117_v36 }
 0x68c   : > { %1461 = vmatpush.msra.mxu0 %v3108_v33  ;;  %1481 = vmatpush.msra.mxu1 %v3111_v34 }
 0x68d   : > { %1501 = vmatpush.msra.mxu2 %v3114_v35  ;;  %1575 = vmatpush.msra.mxu3 %v3108_v33 }
 0x68e   : > { %1462 = vmatpush.msra.mxu0 %v3099_v30  ;;  %1482 = vmatpush.msra.mxu1 %v3102_v31 }
 0x68f   : > { %1502 = vmatpush.msra.mxu2 %v3105_v32  ;;  %1576 = vmatpush.msra.mxu3 %v3099_v30 }
 0x690   : > { %1463 = vmatpush.msra.mxu0 %v3089_v27  ;;  %1483 = vmatpush.msra.mxu1 %v3092_v28 }
 0x691   : > { %1503 = vmatpush.msra.mxu2 %v3095_v29  ;;  %1577 = vmatpush.msra.mxu3 %v3089_v27 }
 0x692   : > { %1464 = vmatpush.msra.mxu0 %v3080_v24  ;;  %1484 = vmatpush.msra.mxu1 %v3083_v25 }
 0x693   : > { %1504 = vmatpush.msra.mxu2 %v3086_v26  ;;  %1578 = vmatpush.msra.mxu3 %v3080_v24 }
 0x694   : > { %1465 = vmatpush.msra.mxu0 %v3071_v21  ;;  %1485 = vmatpush.msra.mxu1 %v3074_v22 }
 0x695   : > { %1505 = vmatpush.msra.mxu2 %v3077_v23  ;;  %1579 = vmatpush.msra.mxu3 %v3071_v21 }
 0x696   : > { %1466 = vmatpush.msra.mxu0 %v3062_v18  ;;  %1486 = vmatpush.msra.mxu1 %v3065_v19 }
 0x697   : > { %1506 = vmatpush.msra.mxu2 %v3068_v20  ;;  %1580 = vmatpush.msra.mxu3 %v3062_v18 }
 0x698   : > { %1467 = vmatpush.msra.mxu0 %v3050_v15  ;;  %1487 = vmatpush.msra.mxu1 %v3053_v16 }
 0x699   : > { %1507 = vmatpush.msra.mxu2 %v3056_v17  ;;  %1581 = vmatpush.msra.mxu3 %v3050_v15 }
 0x69a   : > { %1468 = vmatpush.msra.mxu0 %v3041_v12  ;;  %1488 = vmatpush.msra.mxu1 %v3044_v13 }
 0x69b   : > { %1508 = vmatpush.msra.mxu2 %v3047_v14  ;;  %1582 = vmatpush.msra.mxu3 %v3041_v12 }
 0x69c   : > { %1469 = vmatpush.msra.mxu0 %v3032_v9  ;;  %1489 = vmatpush.msra.mxu1 %v4225_v52 }
 0x69d   : > { %1509 = vmatpush.msra.mxu2 %v3038_v11  ;;  %1583 = vmatpush.msra.mxu3 %v3032_v9 }
 0x69e   : > { %1470 = vmatpush.msra.mxu0 %v4226_v48  ;;  %1490 = vmatpush.msra.mxu1 %v4227_v0 }
 0x69f   : > { %1510 = vmatpush.msra.mxu2 %v3029_v8  ;;  %1584 = vmatpush.msra.mxu3 %v4226_v48 }
 0x6a0   : > { %1471 = vmatpush.msra.mxu0 %v4228_v5  ;;  %1491 = vmatpush.msra.mxu1 %v4229_v59 }
 0x6a1   : > { %1511 = vmatpush.msra.mxu2 %v4230_v7  ;;  %1585 = vmatpush.msra.mxu3 %v4228_v5 }
 0x6a2   : > { %1472 = vmatpush.msra.mxu0 %v4231_v60  ;;  %1492 = vmatpush.msra.mxu1 %v4232_v61 }
 0x6a3   : > { %1473 = vmatmul.f32.vlgmr.msra.gmra.mxu0 %v2892_v50  ;;  %1493 = vmatmul.f32.vlgmr.msra.gmra.mxu1 %v2892_v50 }
 0x6a4   : > { %1512 = vmatpush.msra.mxu2 %v4233_v4  ;;  %1591 = vmatpush.msrb.mxu0 %v3154_v46 }
 0x6a5   : > { %1513 = vmatmul.f32.vlgmr.msra.gmra.mxu2 %v2892_v50  ;;  %1611 = vmatpush.msrb.mxu1 %v3157_v47 }
 0x6a6   : > { %1592 = vmatpush.msrb.mxu0 %v3145_v43  ;;  %1586 = vmatpush.msra.mxu3 %v4231_v60 }
 0x6a7   : > { %1612 = vmatpush.msrb.mxu1 %v3148_v44  ;;  %1685 = vmatpush.msrb.mxu2 %v3151_v45 }
 0x6a8   : > { %1593 = vmatpush.msrb.mxu0 %v3129_v40  ;;  %1705 = vmatpush.msrb.mxu3 %v3154_v46 }
 0x6a9   : > { %1613 = vmatpush.msrb.mxu1 %v3132_v41  ;;  %1686 = vmatpush.msrb.mxu2 %v3142_v42 }
 0x6aa   : > { %1594 = vmatpush.msrb.mxu0 %v3120_v37  ;;  %1706 = vmatpush.msrb.mxu3 %v3145_v43 }
 0x6ab   : > { %1614 = vmatpush.msrb.mxu1 %v3123_v38  ;;  %1687 = vmatpush.msrb.mxu2 %v3126_v39 }
 0x6ac   : > { %1595 = vmatpush.msrb.mxu0 %v3111_v34  ;;  %1707 = vmatpush.msrb.mxu3 %v3129_v40 }
 0x6ad   : > { %1615 = vmatpush.msrb.mxu1 %v3114_v35  ;;  %1688 = vmatpush.msrb.mxu2 %v3117_v36 }
 0x6ae   : > { %1596 = vmatpush.msrb.mxu0 %v3102_v31  ;;  %1708 = vmatpush.msrb.mxu3 %v3120_v37 }
 0x6af   : > { %1616 = vmatpush.msrb.mxu1 %v3105_v32  ;;  %1689 = vmatpush.msrb.mxu2 %v3108_v33 }
 0x6b0   : > { %1597 = vmatpush.msrb.mxu0 %v3092_v28  ;;  %1709 = vmatpush.msrb.mxu3 %v3111_v34 }
 0x6b1   : > { %1617 = vmatpush.msrb.mxu1 %v3095_v29  ;;  %1690 = vmatpush.msrb.mxu2 %v3099_v30 }
 0x6b2   : > { %1598 = vmatpush.msrb.mxu0 %v3083_v25  ;;  %1710 = vmatpush.msrb.mxu3 %v3102_v31 }
 0x6b3   : > { %1618 = vmatpush.msrb.mxu1 %v3086_v26  ;;  %1691 = vmatpush.msrb.mxu2 %v3089_v27 }
 0x6b4   : > { %1599 = vmatpush.msrb.mxu0 %v3074_v22  ;;  %1711 = vmatpush.msrb.mxu3 %v3092_v28 }
 0x6b5   : > { %1619 = vmatpush.msrb.mxu1 %v3077_v23  ;;  %1692 = vmatpush.msrb.mxu2 %v3080_v24 }
 0x6b6   : > { %1600 = vmatpush.msrb.mxu0 %v3065_v19  ;;  %1712 = vmatpush.msrb.mxu3 %v3083_v25 }
 0x6b7   : > { %1620 = vmatpush.msrb.mxu1 %v3068_v20  ;;  %1693 = vmatpush.msrb.mxu2 %v3071_v21 }
 0x6b8   : > { %1601 = vmatpush.msrb.mxu0 %v3053_v16  ;;  %1713 = vmatpush.msrb.mxu3 %v3074_v22 }
 0x6b9   : > { %1621 = vmatpush.msrb.mxu1 %v3056_v17  ;;  %1694 = vmatpush.msrb.mxu2 %v3062_v18 }
 0x6ba   : > { %1602 = vmatpush.msrb.mxu0 %v3044_v13  ;;  %1714 = vmatpush.msrb.mxu3 %v3065_v19 }
 0x6bb   : > { %1622 = vmatpush.msrb.mxu1 %v3047_v14  ;;  %1695 = vmatpush.msrb.mxu2 %v3050_v15 }
 0x6bc   : > { %1603 = vmatpush.msrb.mxu0 %v4225_v52  ;;  %1715 = vmatpush.msrb.mxu3 %v3053_v16 }
 0x6bd   : > { %1623 = vmatpush.msrb.mxu1 %v3038_v11  ;;  %1696 = vmatpush.msrb.mxu2 %v3041_v12 }
 0x6be   : > { %1604 = vmatpush.msrb.mxu0 %v4227_v0  ;;  %1716 = vmatpush.msrb.mxu3 %v3044_v13 }
 0x6bf   : > { %1624 = vmatpush.msrb.mxu1 %v3029_v8  ;;  %1697 = vmatpush.msrb.mxu2 %v3032_v9 }
 0x6c0   : > { %1605 = vmatpush.msrb.mxu0 %v4229_v59  ;;  %1717 = vmatpush.msrb.mxu3 %v4225_v52 }
 0x6c1   : > { %1625 = vmatpush.msrb.mxu1 %v4230_v7  ;;  %1698 = vmatpush.msrb.mxu2 %v4226_v48 }
 0x6c2   : > { %1606 = vmatpush.msrb.mxu0 %v4232_v61  ;;  %1718 = vmatpush.msrb.mxu3 %v4227_v0 }
 0x6c3   : > { %1626 = vmatpush.msrb.mxu1 %v4233_v4  ;;  %1699 = vmatpush.msrb.mxu2 %v4228_v5 }
 0x6c4   : > { %1725 = vmatpush.msra.mxu0 %v3157_v47  ;;  %1719 = vmatpush.msrb.mxu3 %v4229_v59 }
 0x6c5   : > { %1799 = vmatpush.msra.mxu1 %v3151_v45  ;;  %1700 = vmatpush.msrb.mxu2 %v4231_v60 }
 0x6c6   : > { %1726 = vmatpush.msra.mxu0 %v3148_v44  ;;  %1720 = vmatpush.msrb.mxu3 %v4232_v61 }
 0x6c7   : > { %1819 = vmatpush.msra.mxu2 %v3154_v46  ;;  %1800 = vmatpush.msra.mxu1 %v3142_v42 }
 0x6c8   : > { %1727 = vmatpush.msra.mxu0 %v3132_v41 }
 0x6c9   : > { %1820 = vmatpush.msra.mxu2 %v3145_v43  ;;  %1801 = vmatpush.msra.mxu1 %v3126_v39 }
 0x6ca   : > { %1728 = vmatpush.msra.mxu0 %v3123_v38 }
 0x6cb   : > { %1821 = vmatpush.msra.mxu2 %v3129_v40  ;;  %1802 = vmatpush.msra.mxu1 %v3117_v36 }
 0x6cc   : > { %1729 = vmatpush.msra.mxu0 %v3114_v35 }
 0x6cd   : > { %1822 = vmatpush.msra.mxu2 %v3120_v37  ;;  %1803 = vmatpush.msra.mxu1 %v3108_v33 }
 0x6ce   : > { %1730 = vmatpush.msra.mxu0 %v3105_v32 }
 0x6cf   : > { %1823 = vmatpush.msra.mxu2 %v3111_v34  ;;  %1804 = vmatpush.msra.mxu1 %v3099_v30 }
 0x6d0   : > { %1731 = vmatpush.msra.mxu0 %v3095_v29 }
 0x6d1   : > { %1824 = vmatpush.msra.mxu2 %v3102_v31  ;;  %1805 = vmatpush.msra.mxu1 %v3089_v27 }
 0x6d2   : > { %1732 = vmatpush.msra.mxu0 %v3086_v26 }
 0x6d3   : > { %1825 = vmatpush.msra.mxu2 %v3092_v28  ;;  %1806 = vmatpush.msra.mxu1 %v3080_v24 }
 0x6d4   : > { %1733 = vmatpush.msra.mxu0 %v3077_v23 }
 0x6d5   : > { %1826 = vmatpush.msra.mxu2 %v3083_v25  ;;  %1807 = vmatpush.msra.mxu1 %v3071_v21 }
 0x6d6   : > { %1734 = vmatpush.msra.mxu0 %v3068_v20 }
 0x6d7   : > { %1827 = vmatpush.msra.mxu2 %v3074_v22  ;;  %1808 = vmatpush.msra.mxu1 %v3062_v18 }
 0x6d8   : > { %1735 = vmatpush.msra.mxu0 %v3056_v17 }
 0x6d9   : > { %1828 = vmatpush.msra.mxu2 %v3065_v19  ;;  %1809 = vmatpush.msra.mxu1 %v3050_v15 }
 0x6da   : > { %1736 = vmatpush.msra.mxu0 %v3047_v14 }
 0x6db   : > { %1829 = vmatpush.msra.mxu2 %v3053_v16  ;;  %1810 = vmatpush.msra.mxu1 %v3041_v12 }
 0x6dc   : > { %1737 = vmatpush.msra.mxu0 %v3038_v11 }
 0x6dd   : > { %1830 = vmatpush.msra.mxu2 %v3044_v13  ;;  %1811 = vmatpush.msra.mxu1 %v3032_v9 }
 0x6de   : > { %1738 = vmatpush.msra.mxu0 %v3029_v8 }
 0x6df   : > { %1831 = vmatpush.msra.mxu2 %v4225_v52  ;;  %1812 = vmatpush.msra.mxu1 %v4226_v48 }
 0x6e0   : > { %1739 = vmatpush.msra.mxu0 %v4230_v7 }
 0x6e1   : > { %1832 = vmatpush.msra.mxu2 %v4227_v0  ;;  %1813 = vmatpush.msra.mxu1 %v4228_v5 }
 0x6e2   : > { %1740 = vmatpush.msra.mxu0 %v4233_v4 }
 0x6e3   : > { %1833 = vmatpush.msra.mxu2 %v4229_v59  ;;  %1814 = vmatpush.msra.mxu1 %v4231_v60 }
 0x6e5   : > { %1834 = vmatpush.msra.mxu2 %v4232_v61 }
 0x720   : > { %v1474_v10 = vpop.f32.mrf.mxu0  ;;  %v1494_v3 = vpop.f32.mrf.mxu1 }
 0x721   : > { %v1517_v51 = vadd.f32 %v1474_v10, %v1454_v57  ;;  %v1537_v63 = vadd.f32 %v1494_v3, %v1455_v58 }
 0x723   : > { %v2584_v62 = vmul.f32 -1.442695, %v1517_v51  ;;  %v2585_v53 = vmul.f32 -1.442695, %v1537_v63 }
 0x725   : > { %2743 = vpow2.f32 %v2584_v62 }
 0x726   : > { %2745 = vpow2.f32 %v2585_v53 }
 0x728   : > { %v1514_v59 = vpop.f32.mrf.mxu2 }
 0x729   : > { %v1557_v51 = vadd.f32 %v3159_v49, %v1514_v59 }
 0x72b   : > { %v2744_v54 = vpop.eup %2743 }
 0x72c   : > { %v2746_v55 = vpop.eup %2745  ;;  %v1521_v56 = vadd.f32 1.0, %v2744_v54  ;;  %v1456_v54 = vld [vmem:[#allocation2 + $0x8] sm:$0xff] }
 0x72d   : > { %v1541_v2 = vadd.f32 1.0, %v2746_v55 }
 0x72e   : > { %2747 = vrcp.f32 %v1521_v56  ;;  %v1533_v5 = vand.u32 2147483648, %v1521_v56  ;;  %v1531_v58 = vand.u32 2147483647, %v1521_v56  ;;  %vm1527_vm2 = vweird.f32 %v1521_v56 }
 0x72f   : > { %2749 = vrcp.f32 %v1541_v2  ;;  %vm1547_vm5 = vweird.f32 %v1541_v2 }
 0x730   : > { %v1534_v63 = vor.u32 1.1754944e-38, %v1533_v5  ;;  %vm1532_vm4 = vcmp.eq.f32.partialorder %v1531_v58, 8.507059e+37 }
 0x734   : > { %v2748_v1 = vpop.eup %2747 }
 0x735   : > { %v2750_v6 = vpop.eup %2749  ;;  %v1523_v50 = vmul.f32 %v2748_v1, %v1521_v56  ;;  %vm1528_vm1 = vweird.f32 %v2748_v1 }
 0x736   : > { %v1543_v61 = vmul.f32 %v2750_v6, %v1541_v2  ;;  %vm1529_vm3 = vmor %vm1527_vm2, %vm1528_vm1  ;;  %vm1548_vm6 = vweird.f32 %v2750_v6 }
 0x737   : > { %v1524_v60 = vsub.f32 1.0, %v1523_v50  ;;  %vm1549_vm7 = vmor %vm1547_vm5, %vm1548_vm6 }
 0x738   : > { %v1544_v4 = vsub.f32 1.0, %v1543_v61  ;;  %v1553_v61 = vand.u32 2147483648, %v1541_v2 }
 0x739   : > { %v1525_v57 = vmul.f32 %v2748_v1, %v1524_v60  ;;  %v1551_v60 = vand.u32 2147483647, %v1541_v2  ;;  %v4235_v2 = vld [vmem:[#allocation10_spill] sm:$0xff] }
 0x73a   : > { %v1545_v10 = vmul.f32 %v2750_v6, %v1544_v4 }
 0x73b   : > { %v1526_v3 = vadd.f32 %v2748_v1, %v1525_v57  ;;  %v1554_v57 = vor.u32 1.1754944e-38, %v1553_v61  ;;  %vm1552_vm8 = vcmp.eq.f32.partialorder %v1551_v60, 8.507059e+37  ;;  %v1568_v61 = vld [vmem:[#allocation2 + $0x30] sm:$0xff] }
 0x73c   : > { %v1546_v53 = vadd.f32 %v2750_v6, %v1545_v10 }
 0x73d   : > { %v1530_v62 = vsel %vm1529_vm3, %v2748_v1, %v1526_v3  ;;  %v4237_v3 = vld [vmem:[#allocation9_spill] sm:$0xff] }
 0x73e   : > { %v1535_v55 = vsel %vm1532_vm4, %v1534_v63, %v1530_v62  ;;  %v1550_v4 = vsel %vm1549_vm7, %v2750_v6, %v1546_v53  ;;  %v4236_v6 = vld [vmem:[#allocation11_spill] sm:$0xff]  ;;  %v4239_v63 = vld [vmem:[#allocation8_spill] sm:$0xff]  ;;  %v1569_v62 = vld [vmem:[#allocation2 + $0x58] sm:$0xff] }
 0x73f   : > { %v1558_v50 = vmul.f32 %v1557_v51, %v1535_v55  ;;  %v1555_v59 = vsel %vm1552_vm8, %v1554_v57, %v1550_v4  ;;  %v4238_v51 = vld [vmem:[#allocation7_spill] sm:$0xff] }
 0x740   : > { %v1561_v56 = vsub.f32 1.0, %v1555_v59  ;;  %v1563_v58 = vmul.f32 0.0, %v1555_v59 }
 0x741   : > { %v1559_v7 = vadd.f32 %v1558_v50, %v1456_v54 }
 0x743   : > { %2751 = vtanh.f32 %v1559_v7  ;;  %v4234_v7 = vld [vmem:[#allocation12_spill] sm:$0xff] }
 0x749   : > { %v2752_v5 = vpop.eup %2751 }
 0x74a   : > { %v1562_v1 = vmul.f32 %v2752_v5, %v1561_v56 }
 0x74c   : > { %v3861_v10 = vadd.f32 %v1563_v58, %v1562_v1 }
 0x74e   : > { %2586 = vst [vmem:[%s3245_s27 + $0x38] sm:$0xff] %v3861_v10  ;;  %1587 = vmatmul.f32.vlgmr.msra.gmra.mxu3 %v3861_v10  ;;  %1607 = vmatmul.f32.vlgmr.msrb.gmra.mxu0 %v3861_v10 }
 0x74f   : > { %1627 = vmatmul.f32.vlgmr.msrb.gmra.mxu1 %v3861_v10  ;;  %1839 = vmatpush.msra.mxu3 %v3157_v47 }
 0x750   : > { %1913 = vmatpush.msrb.mxu0 %v3151_v45  ;;  %1933 = vmatpush.msrb.mxu1 %v3154_v46 }
 0x751   : > { %1840 = vmatpush.msra.mxu3 %v3148_v44 }
 0x752   : > { %1914 = vmatpush.msrb.mxu0 %v3142_v42  ;;  %1934 = vmatpush.msrb.mxu1 %v3145_v43 }
 0x753   : > { %1841 = vmatpush.msra.mxu3 %v3132_v41 }
 0x754   : > { %1915 = vmatpush.msrb.mxu0 %v3126_v39  ;;  %1935 = vmatpush.msrb.mxu1 %v3129_v40 }
 0x755   : > { %1842 = vmatpush.msra.mxu3 %v3123_v38 }
 0x756   : > { %1916 = vmatpush.msrb.mxu0 %v3117_v36  ;;  %1936 = vmatpush.msrb.mxu1 %v3120_v37 }
 0x757   : > { %1843 = vmatpush.msra.mxu3 %v3114_v35 }
 0x758   : > { %1917 = vmatpush.msrb.mxu0 %v3108_v33  ;;  %1937 = vmatpush.msrb.mxu1 %v3111_v34 }
 0x759   : > { %1844 = vmatpush.msra.mxu3 %v3105_v32 }
 0x75a   : > { %1918 = vmatpush.msrb.mxu0 %v3099_v30  ;;  %1938 = vmatpush.msrb.mxu1 %v3102_v31 }
 0x75b   : > { %1845 = vmatpush.msra.mxu3 %v3095_v29 }
 0x75c   : > { %1919 = vmatpush.msrb.mxu0 %v3089_v27  ;;  %1939 = vmatpush.msrb.mxu1 %v3092_v28 }
 0x75d   : > { %1846 = vmatpush.msra.mxu3 %v3086_v26 }
 0x75e   : > { %1920 = vmatpush.msrb.mxu0 %v3080_v24  ;;  %1940 = vmatpush.msrb.mxu1 %v3083_v25 }
 0x75f   : > { %1847 = vmatpush.msra.mxu3 %v3077_v23 }
 0x760   : > { %1921 = vmatpush.msrb.mxu0 %v3071_v21  ;;  %1941 = vmatpush.msrb.mxu1 %v3074_v22 }
 0x761   : > { %1848 = vmatpush.msra.mxu3 %v3068_v20 }
 0x762   : > { %1922 = vmatpush.msrb.mxu0 %v3062_v18  ;;  %1942 = vmatpush.msrb.mxu1 %v3065_v19 }
 0x763   : > { %1849 = vmatpush.msra.mxu3 %v3056_v17 }
 0x764   : > { %1923 = vmatpush.msrb.mxu0 %v3050_v15  ;;  %1943 = vmatpush.msrb.mxu1 %v3053_v16 }
 0x765   : > { %1850 = vmatpush.msra.mxu3 %v3047_v14 }
 0x766   : > { %1924 = vmatpush.msrb.mxu0 %v3041_v12  ;;  %1944 = vmatpush.msrb.mxu1 %v3044_v13 }
 0x767   : > { %1851 = vmatpush.msra.mxu3 %v3038_v11 }
 0x768   : > { %1925 = vmatpush.msrb.mxu0 %v3032_v9  ;;  %1945 = vmatpush.msrb.mxu1 %v4225_v52 }
 0x769   : > { %1852 = vmatpush.msra.mxu3 %v3029_v8 }
 0x76a   : > { %1926 = vmatpush.msrb.mxu0 %v4226_v48  ;;  %1946 = vmatpush.msrb.mxu1 %v4227_v0 }
 0x76b   : > { %1853 = vmatpush.msra.mxu3 %v4234_v7  ;;  %v1570_v7 = vld [vmem:[#allocation2 + $0x80] sm:$0xff] }
 0x76c   : > { %1927 = vmatpush.msrb.mxu0 %v4235_v2  ;;  %1947 = vmatpush.msrb.mxu1 %v4236_v6 }
 0x76d   : > { %1854 = vmatpush.msra.mxu3 %v4237_v3 }
 0x76e   : > { %1928 = vmatpush.msrb.mxu0 %v4238_v51  ;;  %1948 = vmatpush.msrb.mxu1 %v4239_v63 }
 0x7cb   : > { %v1608_v53 = vpop.f32.mrf.mxu0 }
 0x7cc   : > { %v1651_v54 = vadd.f32 %v1608_v53, %v1569_v62 }
 0x7ce   : > { %v2588_v55 = vmul.f32 -1.442695, %v1651_v54 }
 0x7d0   : > { %2753 = vpow2.f32 %v2588_v55 }
 0x7d1   : > { %v1588_v50 = vpop.f32.mrf.mxu3 }
 0x7d2   : > { %v1631_v60 = vadd.f32 %v1588_v50, %v1568_v61  ;;  %v1628_v61 = vpop.f32.mrf.mxu1 }
 0x7d4   : > { %v2587_v4 = vmul.f32 -1.442695, %v1631_v60 }
 0x7d6   : > { %v2754_v57 = vpop.eup %2753  ;;  %2755 = vpow2.f32 %v2587_v4  ;;  %v1671_v4 = vadd.f32 %v3159_v49, %v1628_v61 }
 0x7d7   : > { %v1655_v59 = vadd.f32 1.0, %v2754_v57 }
 0x7d9   : > { %2757 = vrcp.f32 %v1655_v59  ;;  %vm1661_vm14 = vweird.f32 %v1655_v59 }
 0x7dc   : > { %v2756_v56 = vpop.eup %2755 }
 0x7dd   : > { %v1635_v5 = vadd.f32 1.0, %v2756_v56 }
 0x7df   : > { %2759 = vrcp.f32 %v1635_v5  ;;  %v2758_v1 = vpop.eup %2757  ;;  %v1647_v62 = vand.u32 2147483648, %v1635_v5  ;;  %v1645_v54 = vand.u32 2147483647, %v1635_v5  ;;  %vm1641_vm10 = vweird.f32 %v1635_v5 }
 0x7e0   : > { %v1657_v58 = vmul.f32 %v2758_v1, %v1655_v59  ;;  %vm1662_vm13 = vweird.f32 %v2758_v1 }
 0x7e1   : > { %v1648_v60 = vor.u32 1.1754944e-38, %v1647_v62  ;;  %vm1646_vm12 = vcmp.eq.f32.partialorder %v1645_v54, 8.507059e+37  ;;  %vm1663_vm15 = vmor %vm1661_vm14, %vm1662_vm13 }
 0x7e2   : > { %v1658_v3 = vsub.f32 1.0, %v1657_v58  ;;  %v1667_v58 = vand.u32 2147483648, %v1655_v59 }
 0x7e4   : > { %v1659_v55 = vmul.f32 %v2758_v1, %v1658_v3 }
 0x7e5   : > { %v2760_v51 = vpop.eup %2759 }
 0x7e6   : > { %v1637_v63 = vmul.f32 %v2760_v51, %v1635_v5  ;;  %vm1642_vm9 = vweird.f32 %v2760_v51  ;;  %v1660_v56 = vadd.f32 %v2758_v1, %v1659_v55 }
 0x7e7   : > { %vm1643_vm11 = vmor %vm1641_vm10, %vm1642_vm9 }
 0x7e8   : > { %v1638_v6 = vsub.f32 1.0, %v1637_v63  ;;  %v1664_v0 = vsel %vm1663_vm15, %v2758_v1, %v1660_v56  ;;  %v4245_v1 = vld [vmem:[#allocation7_spill] sm:$0xff] }
 0x7ea   : > { %v1639_v53 = vmul.f32 %v2760_v51, %v1638_v6  ;;  %v1665_v6 = vand.u32 2147483647, %v1655_v59  ;;  %v4244_v59 = vld [vmem:[#allocation9_spill] sm:$0xff] }
 0x7ec   : > { %v1640_v50 = vadd.f32 %v2760_v51, %v1639_v53  ;;  %v1668_v53 = vor.u32 1.1754944e-38, %v1667_v58  ;;  %vm1666_vm0 = vcmp.eq.f32.partialorder %v1665_v6, 8.507059e+37 }
 0x7ee   : > { %v1644_v57 = vsel %vm1643_vm11, %v2760_v51, %v1640_v50  ;;  %v1669_v5 = vsel %vm1666_vm0, %v1668_v53, %v1664_v0  ;;  %v4240_v0 = vld [vmem:[#allocation14_spill] sm:$0xff]  ;;  %v4246_v50 = vld [vmem:[#allocation8_spill] sm:$0xff] }
 0x7ef   : > { %v1649_v2 = vsel %vm1646_vm12, %v1648_v60, %v1644_v57  ;;  %v1675_v62 = vsub.f32 1.0, %v1669_v5  ;;  %v1677_v54 = vmul.f32 %v1669_v5, %v3861_v10  ;;  %v4241_v10 = vld [vmem:[#allocation12_spill] sm:$0xff]  ;;  %v1682_v60 = vld [vmem:[#allocation2 + $0xa0] sm:$0xff] }
 0x7f0   : > { %v1672_v63 = vmul.f32 %v1671_v4, %v1649_v2  ;;  %v4243_v2 = vld [vmem:[#allocation11_spill] sm:$0xff]  ;;  %v1683_v4 = vld [vmem:[#allocation2 + $0xa8] sm:$0xff] }
 0x7f2   : > { %v1673_v3 = vadd.f32 %v1672_v63, %v1570_v7  ;;  %v4242_v7 = vld [vmem:[#allocation10_spill] sm:$0xff] }
 0x7f4   : > { %2761 = vtanh.f32 %v1673_v3 }
 0x7fa   : > { %v2762_v61 = vpop.eup %2761 }
 0x7fb   : > { %v1676_v51 = vmul.f32 %v2762_v61, %v1675_v62 }
 0x7fd   : > { %v3918_v55 = vadd.f32 %v1677_v54, %v1676_v51 }
 0x7ff   : > { %2589 = vst [vmem:[%s3245_s27 + $0x30] sm:$0xff] %v3918_v55  ;;  %1701 = vmatmul.f32.vlgmr.msrb.gmra.mxu2 %v3918_v55  ;;  %1721 = vmatmul.f32.vlgmr.msrb.gmra.mxu3 %v3918_v55 }
 0x800   : > { %1741 = vmatmul.f32.vlgmr.msra.gmra.mxu0 %v3918_v55  ;;  %1953 = vmatpush.msrb.mxu2 %v3157_v47 }
 0x801   : > { %2027 = vmatpush.msrb.mxu3 %v3151_v45  ;;  %2047 = vmatpush.msra.mxu0 %v3154_v46 }
 0x802   : > { %1954 = vmatpush.msrb.mxu2 %v3148_v44 }
 0x803   : > { %2028 = vmatpush.msrb.mxu3 %v3142_v42  ;;  %2048 = vmatpush.msra.mxu0 %v3145_v43 }
 0x804   : > { %1955 = vmatpush.msrb.mxu2 %v3132_v41 }
 0x805   : > { %2029 = vmatpush.msrb.mxu3 %v3126_v39  ;;  %2049 = vmatpush.msra.mxu0 %v3129_v40 }
 0x806   : > { %1956 = vmatpush.msrb.mxu2 %v3123_v38 }
 0x807   : > { %2030 = vmatpush.msrb.mxu3 %v3117_v36  ;;  %2050 = vmatpush.msra.mxu0 %v3120_v37 }
 0x808   : > { %1957 = vmatpush.msrb.mxu2 %v3114_v35 }
 0x809   : > { %2031 = vmatpush.msrb.mxu3 %v3108_v33  ;;  %2051 = vmatpush.msra.mxu0 %v3111_v34 }
 0x80a   : > { %1958 = vmatpush.msrb.mxu2 %v3105_v32 }
 0x80b   : > { %2032 = vmatpush.msrb.mxu3 %v3099_v30  ;;  %2052 = vmatpush.msra.mxu0 %v3102_v31 }
 0x80c   : > { %1959 = vmatpush.msrb.mxu2 %v3095_v29 }
 0x80d   : > { %2033 = vmatpush.msrb.mxu3 %v3089_v27  ;;  %2053 = vmatpush.msra.mxu0 %v3092_v28 }
 0x80e   : > { %1960 = vmatpush.msrb.mxu2 %v3086_v26 }
 0x80f   : > { %2034 = vmatpush.msrb.mxu3 %v3080_v24  ;;  %2054 = vmatpush.msra.mxu0 %v3083_v25 }
 0x810   : > { %1961 = vmatpush.msrb.mxu2 %v3077_v23 }
 0x811   : > { %2035 = vmatpush.msrb.mxu3 %v3071_v21  ;;  %2055 = vmatpush.msra.mxu0 %v3074_v22 }
 0x812   : > { %1962 = vmatpush.msrb.mxu2 %v3068_v20 }
 0x813   : > { %2036 = vmatpush.msrb.mxu3 %v3062_v18  ;;  %2056 = vmatpush.msra.mxu0 %v3065_v19 }
 0x814   : > { %1963 = vmatpush.msrb.mxu2 %v3056_v17 }
 0x815   : > { %2037 = vmatpush.msrb.mxu3 %v3050_v15  ;;  %2057 = vmatpush.msra.mxu0 %v3053_v16 }
 0x816   : > { %1964 = vmatpush.msrb.mxu2 %v3047_v14 }
 0x817   : > { %2038 = vmatpush.msrb.mxu3 %v3041_v12  ;;  %2058 = vmatpush.msra.mxu0 %v3044_v13 }
 0x818   : > { %1965 = vmatpush.msrb.mxu2 %v3038_v11 }
 0x819   : > { %2039 = vmatpush.msrb.mxu3 %v3032_v9  ;;  %2059 = vmatpush.msra.mxu0 %v4225_v52 }
 0x81a   : > { %1966 = vmatpush.msrb.mxu2 %v3029_v8 }
 0x81b   : > { %2040 = vmatpush.msrb.mxu3 %v4226_v48  ;;  %2060 = vmatpush.msra.mxu0 %v4240_v0 }
 0x81c   : > { %1967 = vmatpush.msrb.mxu2 %v4241_v10 }
 0x81d   : > { %2041 = vmatpush.msrb.mxu3 %v4242_v7  ;;  %2061 = vmatpush.msra.mxu0 %v4243_v2 }
 0x81e   : > { %1968 = vmatpush.msrb.mxu2 %v4244_v59 }
 0x81f   : > { %2042 = vmatpush.msrb.mxu3 %v4245_v1  ;;  %2062 = vmatpush.msra.mxu0 %v4246_v50 }
 0x882   : > { %v1702_v57 = vpop.f32.mrf.mxu2  ;;  %v1722_v56 = vpop.f32.mrf.mxu3 }
 0x883   : > { %v1745_v58 = vadd.f32 %v1702_v57, %v1682_v60  ;;  %v1765_v63 = vadd.f32 %v1722_v56, %v1683_v4  ;;  %v1742_v4 = vpop.f32.mrf.mxu0 }
 0x885   : > { %v2590_v6 = vmul.f32 -1.442695, %v1745_v58  ;;  %v2591_v3 = vmul.f32 -1.442695, %v1765_v63  ;;  %v1785_v63 = vadd.f32 %v3159_v49, %v1742_v4 }
 0x887   : > { %2763 = vpow2.f32 %v2590_v6 }
 0x888   : > { %2765 = vpow2.f32 %v2591_v3 }
 0x88d   : > { %v2764_v53 = vpop.eup %2763 }
 0x88e   : > { %v2766_v5 = vpop.eup %2765  ;;  %v1749_v62 = vadd.f32 1.0, %v2764_v53 }
 0x88f   : > { %v1769_v61 = vadd.f32 1.0, %v2766_v5  ;;  %v1684_v5 = vld [vmem:[#allocation2 + $0x68] sm:$0xff] }
 0x890   : > { %2767 = vrcp.f32 %v1749_v62  ;;  %v1761_v2 = vand.u32 2147483648, %v1749_v62  ;;  %v1759_v60 = vand.u32 2147483647, %v1749_v62  ;;  %vm1755_vm2 = vweird.f32 %v1749_v62 }
 0x891   : > { %2769 = vrcp.f32 %v1769_v61  ;;  %vm1775_vm6 = vweird.f32 %v1769_v61 }
 0x892   : > { %v1762_v58 = vor.u32 1.1754944e-38, %v1761_v2  ;;  %vm1760_vm4 = vcmp.eq.f32.partialorder %v1759_v60, 8.507059e+37 }
 0x896   : > { %v2768_v51 = vpop.eup %2767 }
 0x897   : > { %v2770_v54 = vpop.eup %2769  ;;  %v1751_v1 = vmul.f32 %v2768_v51, %v1749_v62  ;;  %vm1756_vm1 = vweird.f32 %v2768_v51 }
 0x898   : > { %v1771_v50 = vmul.f32 %v2770_v54, %v1769_v61  ;;  %vm1757_vm3 = vmor %vm1755_vm2, %vm1756_vm1  ;;  %vm1776_vm5 = vweird.f32 %v2770_v54 }
 0x899   : > { %v1752_v59 = vsub.f32 1.0, %v1751_v1  ;;  %vm1777_vm7 = vmor %vm1775_vm6, %vm1776_vm5 }
 0x89a   : > { %v1772_v7 = vsub.f32 1.0, %v1771_v50  ;;  %v1781_v50 = vand.u32 2147483648, %v1769_v61 }
 0x89b   : > { %v1753_v10 = vmul.f32 %v2768_v51, %v1752_v59  ;;  %v1779_v59 = vand.u32 2147483647, %v1769_v61  ;;  %v4249_v61 = vld [vmem:[#allocation10_spill] sm:$0xff] }
 0x89c   : > { %v1773_v57 = vmul.f32 %v2770_v54, %v1772_v7 }
 0x89d   : > { %v1754_v56 = vadd.f32 %v2768_v51, %v1753_v10  ;;  %v1782_v10 = vor.u32 1.1754944e-38, %v1781_v50  ;;  %vm1780_vm8 = vcmp.eq.f32.partialorder %v1779_v59, 8.507059e+37 }
 0x89e   : > { %v1774_v53 = vadd.f32 %v2770_v54, %v1773_v57 }
 0x89f   : > { %v1758_v6 = vsel %vm1757_vm3, %v2768_v51, %v1754_v56  ;;  %v4251_v56 = vld [vmem:[#allocation9_spill] sm:$0xff] }
 0x8a0   : > { %v1763_v3 = vsel %vm1760_vm4, %v1762_v58, %v1758_v6  ;;  %v1778_v7 = vsel %vm1777_vm7, %v2770_v54, %v1774_v53  ;;  %v4250_v54 = vld [vmem:[#allocation11_spill] sm:$0xff]  ;;  %v1796_v6 = vld [vmem:[#allocation2 + $0x38] sm:$0xff] }
 0x8a1   : > { %v1786_v1 = vmul.f32 %v1785_v63, %v1763_v3  ;;  %v1783_v2 = vsel %vm1780_vm8, %v1782_v10, %v1778_v7  ;;  %v4252_v58 = vld [vmem:[#allocation7_spill] sm:$0xff]  ;;  %v4253_v63 = vld [vmem:[#allocation8_spill] sm:$0xff] }
 0x8a2   : > { %v1789_v62 = vsub.f32 1.0, %v1783_v2  ;;  %v1791_v60 = vmul.f32 %v1783_v2, %v3918_v55  ;;  %v4247_v55 = vld [vmem:[#allocation14_spill] sm:$0xff] }
 0x8a3   : > { %v1787_v0 = vadd.f32 %v1786_v1, %v1684_v5  ;;  %v1797_v1 = vld [vmem:[#allocation2 + $0x50] sm:$0xff] }
 0x8a5   : > { %2771 = vtanh.f32 %v1787_v0  ;;  %v4248_v0 = vld [vmem:[#allocation12_spill] sm:$0xff] }
 0x8ab   : > { %v2772_v4 = vpop.eup %2771 }
 0x8ac   : > { %v1790_v51 = vmul.f32 %v2772_v4, %v1789_v62 }
 0x8ae   : > { %v3975_v57 = vadd.f32 %v1791_v60, %v1790_v51 }
 0x8b0   : > { %2592 = vst [vmem:[%s3245_s27 + $0x28] sm:$0xff] %v3975_v57  ;;  %1815 = vmatmul.f32.vlgmr.msra.gmra.mxu1 %v3975_v57  ;;  %1835 = vmatmul.f32.vlgmr.msra.gmra.mxu2 %v3975_v57 }
 0x8b1   : > { %1855 = vmatmul.f32.vlgmr.msra.gmra.mxu3 %v3975_v57  ;;  %2067 = vmatpush.msra.mxu1 %v3157_v47 }
 0x8b2   : > { %2141 = vmatpush.msra.mxu2 %v3151_v45  ;;  %2161 = vmatpush.msra.mxu3 %v3154_v46 }
 0x8b3   : > { %2068 = vmatpush.msra.mxu1 %v3148_v44 }
 0x8b4   : > { %2142 = vmatpush.msra.mxu2 %v3142_v42  ;;  %2162 = vmatpush.msra.mxu3 %v3145_v43 }
 0x8b5   : > { %2069 = vmatpush.msra.mxu1 %v3132_v41 }
 0x8b6   : > { %2143 = vmatpush.msra.mxu2 %v3126_v39  ;;  %2163 = vmatpush.msra.mxu3 %v3129_v40 }
 0x8b7   : > { %2070 = vmatpush.msra.mxu1 %v3123_v38 }
 0x8b8   : > { %2144 = vmatpush.msra.mxu2 %v3117_v36  ;;  %2164 = vmatpush.msra.mxu3 %v3120_v37 }
 0x8b9   : > { %2071 = vmatpush.msra.mxu1 %v3114_v35 }
 0x8ba   : > { %2145 = vmatpush.msra.mxu2 %v3108_v33  ;;  %2165 = vmatpush.msra.mxu3 %v3111_v34 }
 0x8bb   : > { %2072 = vmatpush.msra.mxu1 %v3105_v32 }
 0x8bc   : > { %2146 = vmatpush.msra.mxu2 %v3099_v30  ;;  %2166 = vmatpush.msra.mxu3 %v3102_v31 }
 0x8bd   : > { %2073 = vmatpush.msra.mxu1 %v3095_v29 }
 0x8be   : > { %2147 = vmatpush.msra.mxu2 %v3089_v27  ;;  %2167 = vmatpush.msra.mxu3 %v3092_v28 }
 0x8bf   : > { %2074 = vmatpush.msra.mxu1 %v3086_v26 }
 0x8c0   : > { %2148 = vmatpush.msra.mxu2 %v3080_v24  ;;  %2168 = vmatpush.msra.mxu3 %v3083_v25 }
 0x8c1   : > { %2075 = vmatpush.msra.mxu1 %v3077_v23 }
 0x8c2   : > { %2149 = vmatpush.msra.mxu2 %v3071_v21  ;;  %2169 = vmatpush.msra.mxu3 %v3074_v22 }
 0x8c3   : > { %2076 = vmatpush.msra.mxu1 %v3068_v20 }
 0x8c4   : > { %2150 = vmatpush.msra.mxu2 %v3062_v18  ;;  %2170 = vmatpush.msra.mxu3 %v3065_v19 }
 0x8c5   : > { %2077 = vmatpush.msra.mxu1 %v3056_v17 }
 0x8c6   : > { %2151 = vmatpush.msra.mxu2 %v3050_v15  ;;  %2171 = vmatpush.msra.mxu3 %v3053_v16 }
 0x8c7   : > { %2078 = vmatpush.msra.mxu1 %v3047_v14 }
 0x8c8   : > { %2152 = vmatpush.msra.mxu2 %v3041_v12  ;;  %2172 = vmatpush.msra.mxu3 %v3044_v13 }
 0x8c9   : > { %2079 = vmatpush.msra.mxu1 %v3038_v11 }
 0x8ca   : > { %2153 = vmatpush.msra.mxu2 %v3032_v9  ;;  %2173 = vmatpush.msra.mxu3 %v4225_v52 }
 0x8cb   : > { %2080 = vmatpush.msra.mxu1 %v3029_v8 }
 0x8cc   : > { %2154 = vmatpush.msra.mxu2 %v4226_v48  ;;  %2174 = vmatpush.msra.mxu3 %v4247_v55 }
 0x8cd   : > { %2081 = vmatpush.msra.mxu1 %v4248_v0 }
 0x8ce   : > { %2155 = vmatpush.msra.mxu2 %v4249_v61  ;;  %2175 = vmatpush.msra.mxu3 %v4250_v54 }
 0x8cf   : > { %2082 = vmatpush.msra.mxu1 %v4251_v56 }
 0x8d0   : > { %2156 = vmatpush.msra.mxu2 %v4252_v58  ;;  %2176 = vmatpush.msra.mxu3 %v4253_v63 }
 0x92d   : > { %v1816_v3 = vpop.f32.mrf.mxu1 }
 0x92e   : > { %v1859_v53 = vadd.f32 %v1816_v3, %v1796_v6 }
 0x930   : > { %v2593_v5 = vmul.f32 -1.442695, %v1859_v53 }
 0x932   : > { %2773 = vpow2.f32 %v2593_v5 }
 0x933   : > { %v1836_v50 = vpop.f32.mrf.mxu2 }
 0x934   : > { %v1879_v59 = vadd.f32 %v1836_v50, %v1797_v1  ;;  %v1856_v53 = vpop.f32.mrf.mxu3 }
 0x936   : > { %v2594_v7 = vmul.f32 -1.442695, %v1879_v59 }
 0x938   : > { %v2774_v10 = vpop.eup %2773  ;;  %2775 = vpow2.f32 %v2594_v7  ;;  %v1899_v7 = vadd.f32 %v3159_v49, %v1856_v53 }
 0x939   : > { %v1863_v2 = vadd.f32 1.0, %v2774_v10  ;;  %v1798_v10 = vld [vmem:[#allocation2 + $0x70] sm:$0xff] }
 0x93b   : > { %2777 = vrcp.f32 %v1863_v2  ;;  %v1875_v63 = vand.u32 2147483648, %v1863_v2  ;;  %v1873_v6 = vand.u32 2147483647, %v1863_v2  ;;  %vm1869_vm10 = vweird.f32 %v1863_v2 }
 0x93d   : > { %v1876_v1 = vor.u32 1.1754944e-38, %v1875_v63  ;;  %vm1874_vm12 = vcmp.eq.f32.partialorder %v1873_v6, 8.507059e+37 }
 0x93e   : > { %v2776_v62 = vpop.eup %2775 }
 0x93f   : > { %v1883_v4 = vadd.f32 1.0, %v2776_v62 }
 0x941   : > { %v2778_v51 = vpop.eup %2777  ;;  %2779 = vrcp.f32 %v1883_v4  ;;  %v1893_v0 = vand.u32 2147483647, %v1883_v4  ;;  %vm1889_vm14 = vweird.f32 %v1883_v4 }
 0x942   : > { %v1865_v60 = vmul.f32 %v2778_v51, %v1863_v2  ;;  %vm1870_vm9 = vweird.f32 %v2778_v51 }
 0x943   : > { %vm1871_vm11 = vmor %vm1869_vm10, %vm1870_vm9  ;;  %vm1894_vm0 = vcmp.eq.f32.partialorder %v1893_v0, 8.507059e+37 }
 0x944   : > { %v1866_v58 = vsub.f32 1.0, %v1865_v60  ;;  %v1895_v60 = vand.u32 2147483648, %v1883_v4 }
 0x946   : > { %v1867_v56 = vmul.f32 %v2778_v51, %v1866_v58 }
 0x947   : > { %v2780_v3 = vpop.eup %2779 }
 0x948   : > { %v1885_v5 = vmul.f32 %v2780_v3, %v1883_v4  ;;  %v1868_v54 = vadd.f32 %v2778_v51, %v1867_v56  ;;  %vm1890_vm13 = vweird.f32 %v2780_v3  ;;  %v1896_v56 = vor.u32 1.1754944e-38, %v1895_v60 }
 0x949   : > { %vm1891_vm15 = vmor %vm1889_vm14, %vm1890_vm13 }
 0x94a   : > { %v1886_v50 = vsub.f32 1.0, %v1885_v5  ;;  %v1872_v59 = vsel %vm1871_vm11, %v2778_v51, %v1868_v54 }
 0x94b   : > { %v1877_v62 = vsel %vm1874_vm12, %v1876_v1, %v1872_v59 }
 0x94c   : > { %v1887_v61 = vmul.f32 %v2780_v3, %v1886_v50  ;;  %v1900_v58 = vmul.f32 %v1899_v7, %v1877_v62  ;;  %v1912_v7 = vld [vmem:[#allocation2 + $0x98] sm:$0xff] }
 0x94e   : > { %v1888_v55 = vadd.f32 %v2780_v3, %v1887_v61  ;;  %v1901_v48 = vadd.f32 %v1900_v58, %v1798_v10 }
 0x950   : > { %v1892_v2 = vsel %vm1891_vm15, %v2780_v3, %v1888_v55  ;;  %2781 = vtanh.f32 %v1901_v48 }
 0x951   : > { %v1897_v54 = vsel %vm1894_vm0, %v1896_v56, %v1892_v2 }
 0x952   : > { %v1903_v63 = vsub.f32 1.0, %v1897_v54  ;;  %v1905_v53 = vmul.f32 %v1897_v54, %v3975_v57 }
 0x956   : > { %v2782_v51 = vpop.eup %2781 }
 0x957   : > { %v1904_v6 = vmul.f32 %v2782_v51, %v1903_v63 }
 0x959   : > { %v4032_v5 = vadd.f32 %v1905_v53, %v1904_v6 }
 0x95b   : > { %2595 = vst [vmem:[%s3245_s27 + $0x20] sm:$0xff] %v4032_v5  ;;  %1929 = vmatmul.f32.vlgmr.msrb.gmra.mxu0 %v4032_v5  ;;  %1949 = vmatmul.f32.vlgmr.msrb.gmra.mxu1 %v4032_v5 }
 0x95c   : > { %1969 = vmatmul.f32.vlgmr.msrb.gmra.mxu2 %v4032_v5  ;;  %2181 = vmatpush.msrb.mxu0 %v3157_v47 }
 0x95d   : > { %2254 = vmatpush.msrb.mxu1 %v3151_v45  ;;  %2274 = vmatpush.msrb.mxu2 %v3154_v46 }
 0x95e   : > { %2182 = vmatpush.msrb.mxu0 %v3148_v44 }
 0x95f   : > { %2255 = vmatpush.msrb.mxu1 %v3142_v42  ;;  %2275 = vmatpush.msrb.mxu2 %v3145_v43 }
 0x960   : > { %2183 = vmatpush.msrb.mxu0 %v3132_v41 }
 0x961   : > { %2256 = vmatpush.msrb.mxu1 %v3126_v39  ;;  %2276 = vmatpush.msrb.mxu2 %v3129_v40 }
 0x962   : > { %2184 = vmatpush.msrb.mxu0 %v3123_v38 }
 0x963   : > { %2257 = vmatpush.msrb.mxu1 %v3117_v36  ;;  %2277 = vmatpush.msrb.mxu2 %v3120_v37 }
 0x964   : > { %2185 = vmatpush.msrb.mxu0 %v3114_v35 }
 0x965   : > { %2258 = vmatpush.msrb.mxu1 %v3108_v33  ;;  %2278 = vmatpush.msrb.mxu2 %v3111_v34 }
 0x966   : > { %2186 = vmatpush.msrb.mxu0 %v3105_v32 }
 0x967   : > { %2259 = vmatpush.msrb.mxu1 %v3099_v30  ;;  %2279 = vmatpush.msrb.mxu2 %v3102_v31 }
 0x968   : > { %2187 = vmatpush.msrb.mxu0 %v3095_v29 }
 0x969   : > { %2260 = vmatpush.msrb.mxu1 %v3089_v27  ;;  %2280 = vmatpush.msrb.mxu2 %v3092_v28 }
 0x96a   : > { %2188 = vmatpush.msrb.mxu0 %v3086_v26 }
 0x96b   : > { %2261 = vmatpush.msrb.mxu1 %v3080_v24  ;;  %2281 = vmatpush.msrb.mxu2 %v3083_v25  ;;  %v1911_v24 = vld [vmem:[#allocation2 + $0x18] sm:$0xff] }
 0x96c   : > { %2189 = vmatpush.msrb.mxu0 %v3077_v23 }
 0x96d   : > { %2262 = vmatpush.msrb.mxu1 %v3071_v21  ;;  %2282 = vmatpush.msrb.mxu2 %v3074_v22  ;;  %v4258_v21 = vld [vmem:[#allocation11_spill] sm:$0xff]  ;;  %v4261_v22 = vld [vmem:[#allocation8_spill] sm:$0xff] }
 0x96e   : > { %2190 = vmatpush.msrb.mxu0 %v3068_v20 }
 0x96f   : > { %2263 = vmatpush.msrb.mxu1 %v3062_v18  ;;  %2283 = vmatpush.msrb.mxu2 %v3065_v19  ;;  %v4254_v18 = vld [vmem:[#allocation13_spill] sm:$0xff]  ;;  %v4255_v19 = vld [vmem:[#allocation14_spill] sm:$0xff] }
 0x970   : > { %2191 = vmatpush.msrb.mxu0 %v3056_v17 }
 0x971   : > { %2264 = vmatpush.msrb.mxu1 %v3050_v15  ;;  %2284 = vmatpush.msrb.mxu2 %v3053_v16  ;;  %v4256_v15 = vld [vmem:[#allocation12_spill] sm:$0xff]  ;;  %v4257_v16 = vld [vmem:[#allocation10_spill] sm:$0xff] }
 0x972   : > { %2192 = vmatpush.msrb.mxu0 %v3047_v14 }
 0x973   : > { %2265 = vmatpush.msrb.mxu1 %v3041_v12  ;;  %2285 = vmatpush.msrb.mxu2 %v3044_v13  ;;  %v4259_v12 = vld [vmem:[#allocation9_spill] sm:$0xff]  ;;  %v4260_v13 = vld [vmem:[#allocation7_spill] sm:$0xff] }
 0x974   : > { %2193 = vmatpush.msrb.mxu0 %v3038_v11 }
 0x975   : > { %2266 = vmatpush.msrb.mxu1 %v3032_v9  ;;  %2286 = vmatpush.msrb.mxu2 %v4225_v52  ;;  %v1910_v9 = vld [vmem:[#allocation2 + $0x90] sm:$0xff] }
 0x976   : > { %2194 = vmatpush.msrb.mxu0 %v3029_v8 }
 0x977   : > { %2267 = vmatpush.msrb.mxu1 %v4254_v18  ;;  %2287 = vmatpush.msrb.mxu2 %v4255_v19 }
 0x978   : > { %2195 = vmatpush.msrb.mxu0 %v4256_v15 }
 0x979   : > { %2268 = vmatpush.msrb.mxu1 %v4257_v16  ;;  %2288 = vmatpush.msrb.mxu2 %v4258_v21 }
 0x97a   : > { %2196 = vmatpush.msrb.mxu0 %v4259_v12 }
 0x97b   : > { %2269 = vmatpush.msrb.mxu1 %v4260_v13  ;;  %2289 = vmatpush.msrb.mxu2 %v4261_v22 }
 0x9d8   : > { %v1930_v25 = vpop.f32.mrf.mxu0  ;;  %v1950_v27 = vpop.f32.mrf.mxu1 }
 0x9d9   : > { %v1973_v28 = vadd.f32 %v1930_v25, %v1910_v9  ;;  %v1993_v30 = vadd.f32 %v1950_v27, %v1911_v24 }
 0x9db   : > { %v2596_v31 = vmul.f32 -1.442695, %v1973_v28  ;;  %v2597_v33 = vmul.f32 -1.442695, %v1993_v30 }
 0x9dd   : > { %2783 = vpow2.f32 %v2596_v31 }
 0x9de   : > { %2785 = vpow2.f32 %v2597_v33 }
 0x9df   : > { %v1970_v61 = vpop.f32.mrf.mxu2 }
 0x9e0   : > { %v2013_v50 = vadd.f32 %v3159_v49, %v1970_v61  ;;  %v2139_v61 = vld [vmem:[#allocation2 + $0x60] sm:$0xff] }
 0x9e3   : > { %v2784_v34 = vpop.eup %2783 }
 0x9e4   : > { %v2786_v36 = vpop.eup %2785  ;;  %v1977_v37 = vadd.f32 1.0, %v2784_v34  ;;  %v2026_v34 = vld [vmem:[#allocation2 + $0x88] sm:$0xff] }
 0x9e5   : > { %v1997_v39 = vadd.f32 1.0, %v2786_v36 }
 0x9e6   : > { %2787 = vrcp.f32 %v1977_v37  ;;  %v1989_v48 = vand.u32 2147483648, %v1977_v37  ;;  %v1987_v55 = vand.u32 2147483647, %v1977_v37  ;;  %vm1983_vm2 = vweird.f32 %v1977_v37 }
 0x9e7   : > { %2789 = vrcp.f32 %v1997_v39  ;;  %v2009_v62 = vand.u32 2147483648, %v1997_v39  ;;  %vm2003_vm6 = vweird.f32 %v1997_v39  ;;  %v2007_v58 = vand.u32 2147483647, %v1997_v39 }
 0x9e8   : > { %v1990_v3 = vor.u32 1.1754944e-38, %v1989_v48  ;;  %vm1988_vm4 = vcmp.eq.f32.partialorder %v1987_v55, 8.507059e+37 }
 0x9e9   : > { %v2010_v54 = vor.u32 1.1754944e-38, %v2009_v62  ;;  %vm2008_vm8 = vcmp.eq.f32.partialorder %v2007_v58, 8.507059e+37 }
 0x9ec   : > { %v2788_v40 = vpop.eup %2787 }
 0x9ed   : > { %v2790_v42 = vpop.eup %2789  ;;  %v1979_v43 = vmul.f32 %v2788_v40, %v1977_v37  ;;  %vm1984_vm1 = vweird.f32 %v2788_v40 }
 0x9ee   : > { %v1999_v45 = vmul.f32 %v2790_v42, %v1997_v39  ;;  %vm1985_vm3 = vmor %vm1983_vm2, %vm1984_vm1  ;;  %vm2004_vm5 = vweird.f32 %v2790_v42 }
 0x9ef   : > { %v1980_v46 = vsub.f32 1.0, %v1979_v43  ;;  %vm2005_vm7 = vmor %vm2003_vm6, %vm2004_vm5 }
 0x9f0   : > { %v2000_v52 = vsub.f32 1.0, %v1999_v45 }
 0x9f1   : > { %v1981_v57 = vmul.f32 %v2788_v40, %v1980_v46 }
 0x9f2   : > { %v2001_v0 = vmul.f32 %v2790_v42, %v2000_v52 }
 0x9f3   : > { %v1982_v4 = vadd.f32 %v2788_v40, %v1981_v57 }
 0x9f4   : > { %v2002_v59 = vadd.f32 %v2790_v42, %v2001_v0  ;;  %v2138_v0 = vld [vmem:[#allocation2 + $0x48] sm:$0xff] }
 0x9f5   : > { %v1986_v1 = vsel %vm1985_vm3, %v2788_v40, %v1982_v4 }
 0x9f6   : > { %v1991_v10 = vsel %vm1988_vm4, %v1990_v3, %v1986_v1  ;;  %v2006_v2 = vsel %vm2005_vm7, %v2790_v42, %v2002_v59 }
 0x9f7   : > { %v2014_v60 = vmul.f32 %v2013_v50, %v1991_v10  ;;  %v2011_v63 = vsel %vm2008_vm8, %v2010_v54, %v2006_v2 }
 0x9f8   : > { %v2017_v51 = vsub.f32 1.0, %v2011_v63  ;;  %v2019_v18 = vmul.f32 %v2011_v63, %v4032_v5 }
 0x9f9   : > { %v2015_v56 = vadd.f32 %v2014_v60, %v1912_v7 }
 0x9fb   : > { %2791 = vtanh.f32 %v2015_v56 }
 0xa01   : > { %v2792_v6 = vpop.eup %2791 }
 0xa02   : > { %v2018_v53 = vmul.f32 %v2792_v6, %v2017_v51 }
 0xa04   : > { %v4089_v19 = vadd.f32 %v2019_v18, %v2018_v53 }
 0xa06   : > { %2598 = vst [vmem:[%s3245_s27 + $0x18] sm:$0xff] %v4089_v19  ;;  %2043 = vmatmul.f32.vlgmr.msrb.gmra.mxu3 %v4089_v19  ;;  %2063 = vmatmul.f32.vlgmr.msra.gmra.mxu0 %v4089_v19 }
 0xa07   : > { %2083 = vmatmul.f32.vlgmr.msra.gmra.mxu1 %v4089_v19  ;;  %2294 = vmatpush.msrb.mxu3 %v3157_v47 }
 0xa09   : > { %2295 = vmatpush.msrb.mxu3 %v3148_v44 }
 0xa0b   : > { %2296 = vmatpush.msrb.mxu3 %v3132_v41 }
 0xa0d   : > { %2297 = vmatpush.msrb.mxu3 %v3123_v38  ;;  %v2024_v38 = vld [vmem:[#allocation2 + $0x40] sm:$0xff] }
 0xa0f   : > { %2298 = vmatpush.msrb.mxu3 %v3114_v35 }
 0xa11   : > { %2299 = vmatpush.msrb.mxu3 %v3105_v32  ;;  %v2025_v32 = vld [vmem:[#allocation2 + $0x78] sm:$0xff] }
 0xa13   : > { %2300 = vmatpush.msrb.mxu3 %v3095_v29 }
 0xa15   : > { %2301 = vmatpush.msrb.mxu3 %v3086_v26 }
 0xa17   : > { %2302 = vmatpush.msrb.mxu3 %v3077_v23 }
 0xa19   : > { %2303 = vmatpush.msrb.mxu3 %v3068_v20 }
 0xa1b   : > { %2304 = vmatpush.msrb.mxu3 %v3056_v17 }
 0xa1d   : > { %2305 = vmatpush.msrb.mxu3 %v3047_v14 }
 0xa1f   : > { %2306 = vmatpush.msrb.mxu3 %v3038_v11 }
 0xa21   : > { %2307 = vmatpush.msrb.mxu3 %v3029_v8 }
 0xa23   : > { %2308 = vmatpush.msrb.mxu3 %v4256_v15 }
 0xa25   : > { %2309 = vmatpush.msrb.mxu3 %v4259_v12 }
 0xa83   : > { %v2064_v29 = vpop.f32.mrf.mxu0 }
 0xa84   : > { %v2107_v35 = vadd.f32 %v2064_v29, %v2025_v32  ;;  %v2084_v24 = vpop.f32.mrf.mxu1 }
 0xa85   : > { %v2127_v28 = vadd.f32 %v3159_v49, %v2084_v24 }
 0xa86   : > { %v2600_v26 = vmul.f32 -1.442695, %v2107_v35 }
 0xa88   : > { %2793 = vpow2.f32 %v2600_v26 }
 0xa89   : > { %v2044_v23 = vpop.f32.mrf.mxu3 }
 0xa8a   : > { %v2087_v20 = vadd.f32 %v2044_v23, %v2024_v38 }
 0xa8c   : > { %v2599_v41 = vmul.f32 -1.442695, %v2087_v20 }
 0xa8e   : > { %v2794_v17 = vpop.eup %2793  ;;  %2795 = vpow2.f32 %v2599_v41 }
 0xa8f   : > { %v2111_v14 = vadd.f32 1.0, %v2794_v17  ;;  %v2140_v17 = vld [vmem:[#allocation2 + $0x28] sm:$0xff] }
 0xa91   : > { %2797 = vrcp.f32 %v2111_v14  ;;  %v2123_v36 = vand.u32 2147483648, %v2111_v14  ;;  %vm2117_vm14 = vweird.f32 %v2111_v14  ;;  %v2121_v39 = vand.u32 2147483647, %v2111_v14 }
 0xa93   : > { %v2124_v43 = vor.u32 1.1754944e-38, %v2123_v36  ;;  %vm2122_vm0 = vcmp.eq.f32.partialorder %v2121_v39, 8.507059e+37 }
 0xa94   : > { %v2796_v11 = vpop.eup %2795 }
 0xa95   : > { %v2091_v44 = vadd.f32 1.0, %v2796_v11 }
 0xa97   : > { %2799 = vrcp.f32 %v2091_v44  ;;  %v2798_v8 = vpop.eup %2797  ;;  %v2103_v12 = vand.u32 2147483648, %v2091_v44  ;;  %v2101_v22 = vand.u32 2147483647, %v2091_v44  ;;  %vm2097_vm10 = vweird.f32 %v2091_v44 }
 0xa98   : > { %v2113_v47 = vmul.f32 %v2798_v8, %v2111_v14  ;;  %vm2118_vm13 = vweird.f32 %v2798_v8 }
 0xa99   : > { %v2104_v27 = vor.u32 1.1754944e-38, %v2103_v12  ;;  %vm2102_vm12 = vcmp.eq.f32.partialorder %v2101_v22, 8.507059e+37  ;;  %vm2119_vm15 = vmor %vm2117_vm14, %vm2118_vm13 }
 0xa9a   : > { %v2114_v16 = vsub.f32 1.0, %v2113_v47 }
 0xa9c   : > { %v2115_v9 = vmul.f32 %v2798_v8, %v2114_v16 }
 0xa9d   : > { %v2800_v5 = vpop.eup %2799 }
 0xa9e   : > { %v2093_v15 = vmul.f32 %v2800_v5, %v2091_v44  ;;  %vm2098_vm9 = vweird.f32 %v2800_v5  ;;  %v2116_v31 = vadd.f32 %v2798_v8, %v2115_v9  ;;  %v2251_v9 = vld [vmem:[#allocation2 + $0xb0] sm:$0xff] }
 0xa9f   : > { %vm2099_vm11 = vmor %vm2097_vm10, %vm2098_vm9 }
 0xaa0   : > { %v2094_v21 = vsub.f32 1.0, %v2093_v15  ;;  %v2120_v42 = vsel %vm2119_vm15, %v2798_v8, %v2116_v31 }
 0xaa1   : > { %v2125_v45 = vsel %vm2122_vm0, %v2124_v43, %v2120_v42 }
 0xaa2   : > { %v2095_v13 = vmul.f32 %v2800_v5, %v2094_v21  ;;  %v2131_v46 = vsub.f32 1.0, %v2125_v45  ;;  %v2133_v57 = vmul.f32 %v2125_v45, %v4089_v19 }
 0xaa4   : > { %v2096_v25 = vadd.f32 %v2800_v5, %v2095_v13 }
 0xaa6   : > { %v2100_v30 = vsel %vm2099_vm11, %v2800_v5, %v2096_v25 }
 0xaa7   : > { %v2105_v33 = vsel %vm2102_vm12, %v2104_v27, %v2100_v30 }
 0xaa8   : > { %v2128_v37 = vmul.f32 %v2127_v28, %v2105_v33  ;;  %v2252_v28 = vld [vmem:[#allocation2] sm:$0xff] }
 0xaaa   : > { %v2129_v40 = vadd.f32 %v2128_v37, %v2026_v34 }
 0xaac   : > { %2801 = vtanh.f32 %v2129_v40 }
 0xab2   : > { %v2802_v52 = vpop.eup %2801 }
 0xab3   : > { %v2132_v48 = vmul.f32 %v2802_v52, %v2131_v46 }
 0xab5   : > { %v2134_v55 = vadd.f32 %v2133_v57, %v2132_v48 }
 0xab7   : > { %2601 = vst [vmem:[%s3245_s27 + $0x10] sm:$0xff] %v2134_v55  ;;  %2157 = vmatmul.f32.vlgmr.msra.gmra.mxu2 %v2134_v55  ;;  %2177 = vmatmul.f32.vlgmr.msra.gmra.mxu3 %v2134_v55 }
 0xab8   : > { %2197 = vmatmul.f32.vlgmr.msrb.gmra.mxu0 %v2134_v55 }
 0xb35   : > { %v2198_v32 = vpop.f32.mrf.mxu0 }
 0xb36   : > { %v2241_v38 = vadd.f32 %v3159_v49, %v2198_v32 }
 0xb3a   : > { %v2158_v4 = vpop.f32.mrf.mxu2  ;;  %v2178_v3 = vpop.f32.mrf.mxu3 }
 0xb3b   : > { %v2201_v1 = vadd.f32 %v2158_v4, %v2138_v0  ;;  %v2221_v50 = vadd.f32 %v2178_v3, %v2139_v61 }
 0xb3d   : > { %v2602_v59 = vmul.f32 -1.442695, %v2201_v1  ;;  %v2603_v7 = vmul.f32 -1.442695, %v2221_v50  ;;  %v2253_v50 = vld [vmem:[#allocation2 + $0x10] sm:$0xff] }
 0xb3f   : > { %2803 = vpow2.f32 %v2602_v59 }
 0xb40   : > { %2805 = vpow2.f32 %v2603_v7 }
 0xb45   : > { %v2804_v10 = vpop.eup %2803 }
 0xb46   : > { %v2806_v62 = vpop.eup %2805  ;;  %v2205_v60 = vadd.f32 1.0, %v2804_v10 }
 0xb47   : > { %v2225_v58 = vadd.f32 1.0, %v2806_v62 }
 0xb48   : > { %2807 = vrcp.f32 %v2205_v60  ;;  %v2217_v6 = vand.u32 2147483648, %v2205_v60  ;;  %v2215_v19 = vand.u32 2147483647, %v2205_v60  ;;  %vm2211_vm2 = vweird.f32 %v2205_v60 }
 0xb49   : > { %2809 = vrcp.f32 %v2225_v58  ;;  %v2237_v11 = vand.u32 2147483648, %v2225_v58  ;;  %vm2231_vm6 = vweird.f32 %v2225_v58  ;;  %v2235_v44 = vand.u32 2147483647, %v2225_v58 }
 0xb4a   : > { %v2218_v26 = vor.u32 1.1754944e-38, %v2217_v6  ;;  %vm2216_vm4 = vcmp.eq.f32.partialorder %v2215_v19, 8.507059e+37 }
 0xb4b   : > { %v2238_v5 = vor.u32 1.1754944e-38, %v2237_v11  ;;  %vm2236_vm8 = vcmp.eq.f32.partialorder %v2235_v44, 8.507059e+37 }
 0xb4e   : > { %v2808_v56 = vpop.eup %2807 }
 0xb4f   : > { %v2810_v2 = vpop.eup %2809  ;;  %v2207_v54 = vmul.f32 %v2808_v56, %v2205_v60  ;;  %vm2212_vm1 = vweird.f32 %v2808_v56 }
 0xb50   : > { %v2227_v63 = vmul.f32 %v2810_v2, %v2225_v58  ;;  %vm2213_vm3 = vmor %vm2211_vm2, %vm2212_vm1  ;;  %vm2232_vm5 = vweird.f32 %v2810_v2 }
 0xb51   : > { %v2208_v51 = vsub.f32 1.0, %v2207_v54  ;;  %vm2233_vm7 = vmor %vm2231_vm6, %vm2232_vm5 }
 0xb52   : > { %v2228_v53 = vsub.f32 1.0, %v2227_v63 }
 0xb53   : > { %v2209_v18 = vmul.f32 %v2808_v56, %v2208_v51 }
 0xb54   : > { %v2229_v29 = vmul.f32 %v2810_v2, %v2228_v53 }
 0xb55   : > { %v2210_v35 = vadd.f32 %v2808_v56, %v2209_v18 }
 0xb56   : > { %v2230_v41 = vadd.f32 %v2810_v2, %v2229_v29 }
 0xb57   : > { %v2214_v23 = vsel %vm2213_vm3, %v2808_v56, %v2210_v35 }
 0xb58   : > { %v2219_v20 = vsel %vm2216_vm4, %v2218_v26, %v2214_v23  ;;  %v2234_v47 = vsel %vm2233_vm7, %v2810_v2, %v2230_v41 }
 0xb59   : > { %v2242_v14 = vmul.f32 %v2241_v38, %v2219_v20  ;;  %v2239_v15 = vsel %vm2236_vm8, %v2238_v5, %v2234_v47 }
 0xb5a   : > { %v2245_v16 = vsub.f32 1.0, %v2239_v15  ;;  %v2247_v13 = vmul.f32 %v2239_v15, %v2134_v55 }
 0xb5b   : > { %v2243_v8 = vadd.f32 %v2242_v14, %v2140_v17 }
 0xb5d   : > { %2811 = vtanh.f32 %v2243_v8 }
 0xb63   : > { %v2812_v21 = vpop.eup %2811 }
 0xb64   : > { %v2246_v12 = vmul.f32 %v2812_v21, %v2245_v16 }
 0xb66   : > { %v2248_v22 = vadd.f32 %v2247_v13, %v2246_v12 }
 0xb68   : > { %2604 = vst [vmem:[%s3245_s27 + $0x8] sm:$0xff] %v2248_v22  ;;  %2270 = vmatmul.f32.vlgmr.msrb.gmra.mxu1 %v2248_v22  ;;  %2290 = vmatmul.f32.vlgmr.msrb.gmra.mxu2 %v2248_v22 }
 0xb69   : > { %2310 = vmatmul.f32.vlgmr.msrb.gmra.mxu3 %v2248_v22 }
 0xbe5   : > { %v2271_v24 = vpop.f32.mrf.mxu1 }
 0xbe6   : > { %v2314_v25 = vadd.f32 %v2271_v24, %v2251_v9 }
 0xbe8   : > { %v2605_v27 = vmul.f32 -1.442695, %v2314_v25 }
 0xbea   : > { %2813 = vpow2.f32 %v2605_v27 }
 0xbeb   : > { %v2291_v30 = vpop.f32.mrf.mxu2 }
 0xbec   : > { %v2334_v31 = vadd.f32 %v2291_v30, %v2252_v28  ;;  %v2311_v57 = vpop.f32.mrf.mxu3 }
 0xbed   : > { %v2354_v1 = vadd.f32 %v3159_v49, %v2311_v57 }
 0xbee   : > { %v2606_v33 = vmul.f32 -1.442695, %v2334_v31 }
 0xbf0   : > { %v2814_v34 = vpop.eup %2813  ;;  %2815 = vpow2.f32 %v2606_v33 }
 0xbf1   : > { %v2318_v36 = vadd.f32 1.0, %v2814_v34 }
 0xbf3   : > { %2817 = vrcp.f32 %v2318_v36  ;;  %v2330_v45 = vand.u32 2147483648, %v2318_v36  ;;  %v2328_v52 = vand.u32 2147483647, %v2318_v36  ;;  %vm2324_vm10 = vweird.f32 %v2318_v36 }
 0xbf5   : > { %v2331_v61 = vor.u32 1.1754944e-38, %v2330_v45  ;;  %vm2329_vm12 = vcmp.eq.f32.partialorder %v2328_v52, 8.507059e+37 }
 0xbf6   : > { %v2816_v37 = vpop.eup %2815 }
 0xbf7   : > { %v2338_v39 = vadd.f32 1.0, %v2816_v37 }
 0xbf9   : > { %v2818_v40 = vpop.eup %2817  ;;  %2819 = vrcp.f32 %v2338_v39  ;;  %v2350_v10 = vand.u32 2147483648, %v2338_v39  ;;  %v2348_v60 = vand.u32 2147483647, %v2338_v39  ;;  %vm2344_vm14 = vweird.f32 %v2338_v39 }
 0xbfa   : > { %v2320_v42 = vmul.f32 %v2818_v40, %v2318_v36  ;;  %vm2325_vm9 = vweird.f32 %v2818_v40 }
 0xbfb   : > { %vm2326_vm11 = vmor %vm2324_vm10, %vm2325_vm9  ;;  %v2351_v2 = vor.u32 1.1754944e-38, %v2350_v10  ;;  %vm2349_vm0 = vcmp.eq.f32.partialorder %v2348_v60, 8.507059e+37 }
 0xbfc   : > { %v2321_v43 = vsub.f32 1.0, %v2320_v42 }
 0xbfe   : > { %v2322_v46 = vmul.f32 %v2818_v40, %v2321_v43 }
 0xbff   : > { %v2820_v48 = vpop.eup %2819 }
 0xc00   : > { %v2340_v55 = vmul.f32 %v2820_v48, %v2338_v39  ;;  %v2323_v0 = vadd.f32 %v2818_v40, %v2322_v46  ;;  %vm2345_vm13 = vweird.f32 %v2820_v48 }
 0xc01   : > { %vm2346_vm15 = vmor %vm2344_vm14, %vm2345_vm13 }
 0xc02   : > { %v2341_v4 = vsub.f32 1.0, %v2340_v55  ;;  %v2327_v3 = vsel %vm2326_vm11, %v2818_v40, %v2323_v0 }
 0xc03   : > { %v2332_v59 = vsel %vm2329_vm12, %v2331_v61, %v2327_v3 }
 0xc04   : > { %v2342_v7 = vmul.f32 %v2820_v48, %v2341_v4  ;;  %v2355_v62 = vmul.f32 %v2354_v1, %v2332_v59 }
 0xc06   : > { %v2343_v58 = vadd.f32 %v2820_v48, %v2342_v7  ;;  %v2356_v56 = vadd.f32 %v2355_v62, %v2253_v50 }
 0xc08   : > { %v2347_v54 = vsel %vm2346_vm15, %v2820_v48, %v2343_v58  ;;  %2821 = vtanh.f32 %v2356_v56 }
 0xc09   : > { %v2352_v63 = vsel %vm2349_vm0, %v2351_v2, %v2347_v54 }
 0xc0a   : > { %v2358_v51 = vsub.f32 1.0, %v2352_v63  ;;  %v2360_v53 = vmul.f32 %v2352_v63, %v2248_v22 }
 0xc0e   : > { %v2822_v6 = vpop.eup %2821 }
 0xc0f   : > { %v2359_v49 = vmul.f32 %v2822_v6, %v2358_v51 }
 0xc11   : > { %v2361_v18 = vadd.f32 %v2360_v53, %v2359_v49 }
 0xc13   : > { %2362 = vst [vmem:[%s3245_s27] sm:$0xff] %v2361_v18 }
 0xc14 PF: > { %2369 = sbr.rel (!%p2964_p9) target bundleno = 3102 (0xc1e), region = 56  ;;  %s2608_s8 = sshll.u32 (%p2964_p9), %s2942_s22, 3  ;;  %v2416_v32 = vld [vmem:[%s3245_s27 + $0x8] sm:$0xff] (%p2964_p9)  ;;  %v2418_v29 = vld [vmem:[%s3245_s27 + $0x10] sm:$0xff] (%p2964_p9)  ;;  %v2420_v35 = vld [vmem:[%s3245_s27 + $0x18] sm:$0xff] (%p2964_p9) }
 0xc15   : > { %s2371_s6 = scalar_lea.vmem (%p2964_p9), %s4151_s5, %s2608_s8  ;;  %v2422_v26 = vld [vmem:[%s3245_s27 + $0x20] sm:$0xff] (%p2964_p9)  ;;  %v2424_v38 = vld [vmem:[%s3245_s27 + $0x28] sm:$0xff] (%p2964_p9)  ;;  %v2426_v23 = vld [vmem:[%s3245_s27 + $0x30] sm:$0xff] (%p2964_p9) }
 0xc16   : > { %2417 = vst [vmem:[%s2371_s6 + $0x10] sm:$0xff] (%p2964_p9), %v2416_v32  ;;  %v2428_v20 = vld [vmem:[%s3245_s27 + $0x38] sm:$0xff] (%p2964_p9) }
 0xc17   : > { %2419 = vst [vmem:[%s2371_s6 + $0x20] sm:$0xff] (%p2964_p9), %v2418_v29 }
 0xc18   : > { %2421 = vst [vmem:[%s2371_s6 + $0x30] sm:$0xff] (%p2964_p9), %v2420_v35 }
 0xc19   : > { %2423 = vst [vmem:[%s2371_s6 + $0x40] sm:$0xff] %v2422_v26 }
 0xc1a   : > { %v2414_v19 = vld [vmem:[%s3245_s27] sm:$0xff]  ;;  %2425 = vst [vmem:[%s2371_s6 + $0x50] sm:$0xff] %v2424_v38 }
 0xc1b   : > { %2415 = vst [vmem:[%s2371_s6] sm:$0xff] %v2414_v19 }
 0xc1c   : > { %2427 = vst [vmem:[%s2371_s6 + $0x60] sm:$0xff] %v2426_v23 }
 0xc1d   : > { %2429 = vst [vmem:[%s2371_s6 + $0x70] sm:$0xff] %v2428_v20 }
 0xc1e PF: > { %p15_p9 = scmp.ge.s32.totalorder %s2945_s23, 4   ;;  %s4262_s18 = smov %s2879_s19 }
 0xc1f   : > { %s4263_s19 = smov %s2883_s20  ;;  %s4264_s20 = smov %s2955_s26 }
 0xc20   : > { %s4265_s21 = smov %s2945_s23  ;;  %17 = sbr.rel (!%p15_p9) target bundleno = 3 (0x3), region = 163 }
 0xc25   :  { %2445 = vsyncpa [#allocation4], 1 }
 0xc26   :  { %2447 = vsyncpa [#allocation4 + $0x1], 1 }

// kernel: bigru_forward.3
= control target key start
LH: loop header
LB: loop body
LE: loop exit
PB: predicated region body
PF: predicated region fallthrough
CT: control target
= control target key end

     0   :  { %11 = vsyncpa [#allocation4], 0  ;;  %s3804_s0 = inlined_call_operand.vmem [shape: f32[8,8,256], index: 0, kind: input, shape index: {}]   ;;  %s3805_s1 = inlined_call_operand.hbm [shape: f32[2,256,384], index: 1, kind: input, shape index: {}]   ;;  %s3806_s2 = inlined_call_operand.hbm [shape: f32[2,128,384], index: 2, kind: input, shape index: {}]   ;;  %s3807_s3 = inlined_call_operand.vmem [shape: f32[2,1,384], index: 3, kind: input, shape index: {}]   ;;  %s3808_s4 = inlined_call_operand.vmem [shape: f32[2,1,128], index: 4, kind: input, shape index: {}]   ;;  %s3809_s5 = inlined_call_operand.vmem [shape: f32[2,128,1], index: 5, kind: input, shape index: {}]   ;;  %s3810_s6 = inlined_call_operand.vmem [shape: f32[2,8,1], index: 6, kind: output, shape index: {}]  }
   0x1   :  { %13 = vsyncpa [#allocation4 + $0x1], 0 }
   0x2   :  { %14 = vsyncpa [#allocation6], 0 }
   0x3   :  { %16 = vsyncpa [#allocation6 + $0x1], 0  ;;  %s2561_s21 = smov 0   ;;  %s2563_s22 = smov 0  }
   0x4   :  { %s2565_s23 = smov 0   ;;  %s2567_s24 = smov 0  }
   0x5 LB: > { %s2580_s25 = sadd.s32 4294967295, %s2520_s24   ;;  %s2583_s26 = sadd.s32 1, %s2520_s24   ;;  %s2520_s24 = sphi %s2567_s24, %s3969_s24   ;;  %s2516_s23 = sphi %s2565_s23, %s3968_s23   ;;  %s2512_s22 = sphi %s2563_s22, %s3967_s22   ;;  %s2508_s21 = sphi %s2561_s21, %s3966_s21  }
   0x6   : > { %s47_s27 = ssub.s32 %s2520_s24, %s2583_s26  ;;  %s50_s28 = sadd.s32 1, %s2516_s23 }
   0x7   : > { %p48_p0 = scmp.eq.s32.totalorder %s47_s27, 0  ;;  %p57_p1 = scmp.ne.s32.totalorder %s2516_s23, %s2512_s22 }
   0x8   : > { %p58_p2 = scmp.eq.s32.totalorder %s2520_s24, 0  ;;  %p63_p3 = scmp.ne.s32.totalorder %s2512_s22, %s2508_s21 }
   0x9   : > { %s2593_s29 = scalar_select %p48_p0, %s2516_s23, %s50_s28  }
   0xa   : > { %p59_p4 = por %p58_p2, %p57_p1  ;;  %p64_p5 = scmp.eq.s32.totalorder %s2580_s25, 0 }
   0xb   : > { %p2294_p6 = scmp.lt.s32.totalorder %s2520_s24, 2  ;;  %s2602_s7 = sand.u32 1, %s2516_s23  }
   0xc   : > { %p2597_p7 = por %p64_p5, %p63_p3  ;;  %s2276_s8 = smul.u32 768, %s2602_s7 }
   0xd   : > { %s2277_s9 = smul.u32 768, %s2520_s24  ;;  %p2606_p8 = pnand %p2294_p6, %p59_p4 }
   0xe   : > { %s224_s14 = scalar_lea.vmem [#allocation3], %s2276_s8  ;;  %p2247_p9 = scmp.ge.s32.totalorder %s2520_s24, 1 }
   0xf   : > { %s229_s13 = scalar_lea.hbm %s3805_s1, %s2277_s9  ;;  %s232_s15 = sshll.u32 %s224_s14, 4  ;;  %s233_s15 = int_to_ptr.vmem [resolvable:$true] %s232_s15 }
  0x10   : > { %s230_s16 = sshll.u32 %s229_s13, 4  ;;  %s221_s17 = scalar_lea.sflag [#allocation4], %s2602_s7  ;;  %s231_s16 = int_to_ptr.hbm [resolvable:$true] %s230_s16 }
  0x11   : > { %s2422_s18 = sshra.s32 %s231_s16, 4  ;;  %p2426_p11 = pneg %p2606_p8  ;;  %s2423_s18 = int_to_ptr.hbm [resolvable:$true] %s2422_s18 }
  0x12   : > { %s2424_s19 = scalar_lea.hbm %s2423_s18, 768  ;;  %s2429_s27 = scalar_lea.hbm %s3805_s1, 1536 }
  0x13   : > { %p2425_p10 = scmp.ne.s32.totalorder %s2423_s18, %s2424_s19  ;;  %p2430_p0 = scmp.lt.s32.totalorder %s2423_s18, %s3805_s1 }
  0x14   : > { %p2431_p1 = scmp.lt.s32.totalorder %s2429_s27, %s2424_s19 }
  0x15   : > { %p2427_p12 = pnand %p2426_p11, %p2425_p10 }
  0x16   : > { %p2432_p2 = por %p2431_p1, %p2430_p0 }
  0x17   : > { %p2428_p13 = pneg %p2427_p12 }
  0x19   : > { %p2433_p3 = pnand %p2432_p2, %p2428_p13 }
  0x1b   : > { %2436 = shalt.err (!%p2433_p3)
}
  0x1c   : > { %s3811_s9 = smov 384   ;;  %s2523_s11 = smov 24  }
  0x1d   : > { %2290 = dma.hbm_to_vmem [thread:$0]  (!%p2606_p8), %s231_s16, 12288, %s233_s15, %s221_s17, %s3811_s9, %s3811_s9, %s2523_s11  }
  0x1e   : > { %p283_p4 = scmp.lt.s32.totalorder %s2520_s24, 3  ;;  %s2278_s12 = smul.u32 384, %s2602_s7 }
  0x1f   : > { %s2279_s14 = smul.u32 384, %s2520_s24  ;;  %s243_s8 = scalar_lea.sflag [#allocation6], %s2602_s7 }
  0x20   : > { %p2635_p5 = pnand %p2247_p9, %p283_p4  ;;  %s246_s21 = scalar_lea.vmem [#allocation5], %s2278_s12 }
  0x21   : > { %s251_s20 = scalar_lea.hbm %s3806_s2, %s2279_s14  ;;  %s254_s27 = sshll.u32 %s246_s21, 4  ;;  %s255_s27 = int_to_ptr.vmem [resolvable:$true] %s254_s27 }
  0x22   : > { %s252_s28 = sshll.u32 %s251_s20, 4  ;;  %s2459_s9 = scalar_lea.hbm %s3806_s2, 768  ;;  %s253_s28 = int_to_ptr.hbm [resolvable:$true] %s252_s28 }
  0x23   : > { %s2452_s15 = sshra.s32 %s253_s28, 4  ;;  %s2453_s15 = int_to_ptr.hbm [resolvable:$true] %s2452_s15 }
  0x24   : > { %s2454_s16 = scalar_lea.hbm %s2453_s15, 384  ;;  %p2460_p12 = scmp.lt.s32.totalorder %s2453_s15, %s3806_s2 }
  0x25   : > { %p2455_p6 = scmp.ne.s32.totalorder %s2453_s15, %s2454_s16  ;;  %p2461_p13 = scmp.lt.s32.totalorder %s2459_s9, %s2454_s16 }
  0x27   : > { %p2457_p9 = pnand %p2455_p6, %p2426_p11  ;;  %p2462_p0 = por %p2461_p13, %p2460_p12 }
  0x29   : > { %p2458_p10 = pneg %p2457_p9 }
  0x2b   : > { %p2463_p1 = pnand %p2462_p0, %p2458_p10 }
  0x2d   : > { %2466 = shalt.err (!%p2463_p1)
}
  0x2e   : > { %s3845_s7 = smov 384   ;;  %287 = sbr.rel (%p2635_p5) target bundleno = 2074 (0x81a), region = 44 }
  0x2f   : > { %2293 = dma.hbm_to_vmem [thread:$0]  (!%p2606_p8), %s253_s28, 6144, %s255_s27, %s243_s8, %s3845_s7, %s3845_s7, %s2523_s11  }
  0x33   : > { %s289_s12 = sand.u32 1, %s2512_s22  }
  0x34   : > { %s2280_s19 = smul.u32 768, %s289_s12  ;;  %s290_s20 = scalar_lea.sflag [#allocation4], %s289_s12 }
  0x36   : > { %s2661_s21 = scalar_lea.vmem [#allocation3], %s2280_s19 }
  0x37   : > { %2499 = dma.done.wait (%p2597_p7), %s290_s20, 12288  }
  0x38   : > { %2501 = vsyncadd (%p2597_p7), %s290_s20, 4294955008  ;;  %s2281_s10 = smul.u32 384, %s289_s12  ;;  %s300_s9 = scalar_lea.sflag [#allocation6], %s289_s12 }
  0x3a   : > { %s2667_s15 = scalar_lea.vmem [#allocation5], %s2281_s10 }
  0x3b   : > { %2503 = dma.done.wait (%p2597_p7), %s300_s9, 6144  }
  0x3c   : > { %2505 = vsyncadd (%p2597_p7), %s300_s9, 4294961152  ;;  %p349_p8 = scmp.lt.s32.totalorder %s2580_s25, 1  ;;  %v2696_v0 = vld [vmem:[%s2667_s15] sm:$0xff]  ;;  %v2699_v1 = vld [vmem:[%s2667_s15 + $0x8] sm:$0xff]  ;;  %p2251_p7 = scmp.ne.s32.totalorder %s2580_s25, 0 }
  0x3d   : > { %3846 = vst [vmem:[#allocation9_spill] sm:$0xff] %v2696_v0  ;;  %v2702_v2 = vld [vmem:[%s2667_s15 + $0x10] sm:$0xff]  ;;  %v2705_v3 = vld [vmem:[%s2667_s15 + $0x18] sm:$0xff]  ;;  %v2708_v4 = vld [vmem:[%s2667_s15 + $0x20] sm:$0xff] }
  0x3e   : > { %s2675_s11 = scalar_select %p349_p8, %s2580_s25, 1  ;;  %3847 = vst [vmem:[#allocation10_spill] sm:$0xff] %v2699_v1  ;;  %v2711_v5 = vld [vmem:[%s2667_s15 + $0x28] sm:$0xff]  ;;  %v2714_v6 = vld [vmem:[%s2667_s15 + $0x30] sm:$0xff]  ;;  %v2717_v7 = vld [vmem:[%s2667_s15 + $0x38] sm:$0xff] }
  0x3f   : > { %3848 = vst [vmem:[#allocation11_spill] sm:$0xff] %v2702_v2  ;;  %v2720_v8 = vld [vmem:[%s2667_s15 + $0x40] sm:$0xff]  ;;  %v2723_v9 = vld [vmem:[%s2667_s15 + $0x48] sm:$0xff]  ;;  %v2726_v10 = vld [vmem:[%s2667_s15 + $0x50] sm:$0xff] }
  0x40   : > { %s2282_s30 = smul.u32 3, %s2675_s11  ;;  %s2275_s13 = sshll.u32 %s2675_s11, 7  ;;  %3849 = vst [vmem:[#allocation12_spill] sm:$0xff] %v2705_v3  ;;  %v2729_v11 = vld [vmem:[%s2667_s15 + $0x58] sm:$0xff]  ;;  %v2732_v12 = vld [vmem:[%s2667_s15 + $0x60] sm:$0xff]  ;;  %v2735_v13 = vld [vmem:[%s2667_s15 + $0x68] sm:$0xff] }
  0x41   : > { %s2250_s27 = sshll.u32 %s2675_s11, 3  ;;  %s2688_s18 = scalar_lea.vmem %s3809_s5, %s2275_s13  ;;  %3850 = vst [vmem:[#allocation13_spill] sm:$0xff] %v2708_v4  ;;  %v2738_v14 = vld [vmem:[%s2667_s15 + $0x70] sm:$0xff]  ;;  %v2741_v15 = vld [vmem:[%s2667_s15 + $0x78] sm:$0xff]  ;;  %v2744_v16 = vld [vmem:[%s2667_s15 + $0x80] sm:$0xff] }
  0x42   : > { %s2683_s16 = scalar_lea.vmem %s3807_s3, %s2282_s30  ;;  %s2693_s12 = scalar_lea.vmem %s3810_s6, %s2250_s27  ;;  %3851 = vst [vmem:[#allocation14_spill] sm:$0xff] %v2711_v5  ;;  %v2747_v17 = vld [vmem:[%s2667_s15 + $0x88] sm:$0xff]  ;;  %v2750_v18 = vld [vmem:[%s2667_s15 + $0x90] sm:$0xff]  ;;  %v2753_v19 = vld [vmem:[%s2667_s15 + $0x98] sm:$0xff] }
  0x43   : > { %3852 = vst [vmem:[#allocation15_spill] sm:$0xff] %v2714_v6  ;;  %v2756_v20 = vld [vmem:[%s2667_s15 + $0xa0] sm:$0xff]  ;;  %v2759_v21 = vld [vmem:[%s2667_s15 + $0xa8] sm:$0xff]  ;;  %v2762_v22 = vld [vmem:[%s2667_s15 + $0xb0] sm:$0xff]  ;;  %s355_s10 = scalar_lea.vmem %s3808_s4, %s2675_s11 }
  0x44   : > { %3853 = vst [vmem:[#allocation16_spill] sm:$0xff] %v2717_v7  ;;  %v2765_v23 = vld [vmem:[%s2667_s15 + $0xb8] sm:$0xff]  ;;  %v2768_v24 = vld [vmem:[%s2667_s15 + $0xc0] sm:$0xff]  ;;  %v2771_v25 = vld [vmem:[%s2667_s15 + $0xc8] sm:$0xff] }
  0x45   : > { %3854 = vst [vmem:[#allocation17_spill] sm:$0xff] %v2720_v8  ;;  %v2774_v26 = vld [vmem:[%s2667_s15 + $0xd0] sm:$0xff]  ;;  %v2777_v27 = vld [vmem:[%s2667_s15 + $0xd8] sm:$0xff]  ;;  %v2780_v28 = vld [vmem:[%s2667_s15 + $0xe0] sm:$0xff] }
  0x46   : > { %3855 = vst [vmem:[#allocation18_spill] sm:$0xff] %v2723_v9  ;;  %v2783_v29 = vld [vmem:[%s2667_s15 + $0xe8] sm:$0xff]  ;;  %v2786_v30 = vld [vmem:[%s2667_s15 + $0xf0] sm:$0xff]  ;;  %v2789_v31 = vld [vmem:[%s2667_s15 + $0xf8] sm:$0xff] }
  0x47   : > { %3856 = vst [vmem:[#allocation19_spill] sm:$0xff] %v2726_v10  ;;  %v2792_v32 = vld [vmem:[%s2667_s15 + $0x100] sm:$0xff]  ;;  %v2795_v33 = vld [vmem:[%s2667_s15 + $0x108] sm:$0xff]  ;;  %v2798_v34 = vld [vmem:[%s2667_s15 + $0x110] sm:$0xff] }
  0x48   : > { %v2801_v35 = vld [vmem:[%s2667_s15 + $0x118] sm:$0xff]  ;;  %v2804_v36 = vld [vmem:[%s2667_s15 + $0x120] sm:$0xff]  ;;  %v2807_v37 = vld [vmem:[%s2667_s15 + $0x128] sm:$0xff] }
  0x49   : > { %v2810_v38 = vld [vmem:[%s2667_s15 + $0x130] sm:$0xff]  ;;  %v2817_v39 = vld [vmem:[%s2667_s15 + $0x138] sm:$0xff]  ;;  %v2820_v40 = vld [vmem:[%s2667_s15 + $0x140] sm:$0xff]  ;;  %420 = sbr.rel (%p2251_p7) target bundleno = 1699 (0x6a3), region = 56 }
  0x4a   : > { %v2823_v41 = vld [vmem:[%s2667_s15 + $0x148] sm:$0xff]  ;;  %v2826_v42 = vld [vmem:[%s2667_s15 + $0x150] sm:$0xff]  ;;  %v2829_v43 = vld [vmem:[%s2667_s15 + $0x158] sm:$0xff] }
  0x4b   : > { %v2832_v44 = vld [vmem:[%s2667_s15 + $0x160] sm:$0xff]  ;;  %v2835_v45 = vld [vmem:[%s2667_s15 + $0x168] sm:$0xff]  ;;  %v2838_v46 = vld [vmem:[%s2667_s15 + $0x170] sm:$0xff] }
  0x4c   : > { %v2841_v47 = vld [vmem:[%s2667_s15 + $0x178] sm:$0xff]  ;;  %v2843_v48 = vld [vmem:[%s355_s10] ss:$0 sm:$0xff] }
  0x4d   : > { %3857 = vst [vmem:[#allocation20_spill] sm:$0xff] %v2843_v48 }
  0x4e   : > { %v483_v49 = vld [vmem:[%s2661_s21 + $0x170] sm:$0xff]  ;;  %v480_v51 = vld [vmem:[%s2661_s21 + $0x158] sm:$0xff]  ;;  %v477_v53 = vld [vmem:[%s2661_s21 + $0x140] sm:$0xff] }
  0x4f   : > { %v531_v50 = vld [vmem:[%s2661_s21 + $0x2f0] sm:$0xff]  ;;  %623 = vmatpush.msra.mxu2 %v483_v49  ;;  %v528_v52 = vld [vmem:[%s2661_s21 + $0x2d8] sm:$0xff]  ;;  %v525_v54 = vld [vmem:[%s2661_s21 + $0x2c0] sm:$0xff] }
  0x50   : > { %664 = vmatpush.msra.mxu3 %v531_v50  ;;  %v474_v55 = vld [vmem:[%s2661_s21 + $0x128] sm:$0xff]  ;;  %v471_v57 = vld [vmem:[%s2661_s21 + $0x110] sm:$0xff]  ;;  %v468_v59 = vld [vmem:[%s2661_s21 + $0xf8] sm:$0xff] }
  0x51   : > { %624 = vmatpush.msra.mxu2 %v480_v51  ;;  %v522_v56 = vld [vmem:[%s2661_s21 + $0x2a8] sm:$0xff]  ;;  %v519_v58 = vld [vmem:[%s2661_s21 + $0x290] sm:$0xff]  ;;  %v516_v60 = vld [vmem:[%s2661_s21 + $0x278] sm:$0xff] }
  0x52   : > { %665 = vmatpush.msra.mxu3 %v528_v52  ;;  %v465_v61 = vld [vmem:[%s2661_s21 + $0xe0] sm:$0xff]  ;;  %v482_v63 = vld [vmem:[%s2661_s21 + $0x168] sm:$0xff]  ;;  %v479_v49 = vld [vmem:[%s2661_s21 + $0x150] sm:$0xff] }
  0x53   : > { %625 = vmatpush.msra.mxu2 %v477_v53  ;;  %v513_v62 = vld [vmem:[%s2661_s21 + $0x260] sm:$0xff]  ;;  %v462_v50 = vld [vmem:[%s2661_s21 + $0xc8] sm:$0xff]  ;;  %541 = vmatpush.msra.mxu0 %v482_v63  ;;  %v476_v53 = vld [vmem:[%s2661_s21 + $0x138] sm:$0xff] }
  0x54   : > { %666 = vmatpush.msra.mxu3 %v525_v54  ;;  %v510_v51 = vld [vmem:[%s2661_s21 + $0x248] sm:$0xff]  ;;  %v527_v54 = vld [vmem:[%s2661_s21 + $0x2d0] sm:$0xff]  ;;  %v453_v63 = vld [vmem:[%s2661_s21 + $0x80] sm:$0xff] }
  0x55   : > { %626 = vmatpush.msra.mxu2 %v474_v55  ;;  %v530_v52 = vld [vmem:[%s2661_s21 + $0x2e8] sm:$0xff]  ;;  %v459_v55 = vld [vmem:[%s2661_s21 + $0xb0] sm:$0xff]  ;;  %542 = vmatpush.msra.mxu0 %v479_v49  ;;  %v501_v49 = vld [vmem:[%s2661_s21 + $0x200] sm:$0xff] }
  0x56   : > { %667 = vmatpush.msra.mxu3 %v522_v56  ;;  %v507_v56 = vld [vmem:[%s2661_s21 + $0x230] sm:$0xff]  ;;  %582 = vmatpush.msra.mxu1 %v530_v52  ;;  %v450_v52 = vld [vmem:[%s2661_s21 + $0x68] sm:$0xff]  ;;  %v489_v48 = vld [vmem:[%s2661_s21 + $0x1a0] sm:$0xff] }
  0x57   : > { %627 = vmatpush.msra.mxu2 %v471_v57  ;;  %v473_v57 = vld [vmem:[%s2661_s21 + $0x120] sm:$0xff]  ;;  %543 = vmatpush.msra.mxu0 %v476_v53  ;;  %v498_v53 = vld [vmem:[%s2661_s21 + $0x1e8] sm:$0xff] }
  0x58   : > { %668 = vmatpush.msra.mxu3 %v519_v58  ;;  %v524_v58 = vld [vmem:[%s2661_s21 + $0x2b8] sm:$0xff]  ;;  %583 = vmatpush.msra.mxu1 %v527_v54 }
  0x59   : > { %628 = vmatpush.msra.mxu2 %v468_v59  ;;  %v456_v59 = vld [vmem:[%s2661_s21 + $0x98] sm:$0xff]  ;;  %544 = vmatpush.msra.mxu0 %v473_v57  ;;  %v495_v57 = vld [vmem:[%s2661_s21 + $0x1d0] sm:$0xff] }
  0x5a   : > { %669 = vmatpush.msra.mxu3 %v516_v60  ;;  %v504_v60 = vld [vmem:[%s2661_s21 + $0x218] sm:$0xff]  ;;  %584 = vmatpush.msra.mxu1 %v524_v58  ;;  %v461_v58 = vld [vmem:[%s2661_s21 + $0xc0] sm:$0xff] }
  0x5b   : > { %629 = vmatpush.msra.mxu2 %v465_v61  ;;  %v470_v61 = vld [vmem:[%s2661_s21 + $0x108] sm:$0xff]  ;;  %v464_v54 = vld [vmem:[%s2661_s21 + $0xd8] sm:$0xff] }
  0x5c   : > { %670 = vmatpush.msra.mxu3 %v513_v62  ;;  %v521_v62 = vld [vmem:[%s2661_s21 + $0x2a0] sm:$0xff]  ;;  %545 = vmatpush.msra.mxu0 %v470_v61  ;;  %v492_v61 = vld [vmem:[%s2661_s21 + $0x1b8] sm:$0xff] }
  0x5d   : > { %630 = vmatpush.msra.mxu2 %v462_v50  ;;  %v467_v50 = vld [vmem:[%s2661_s21 + $0xf0] sm:$0xff]  ;;  %585 = vmatpush.msra.mxu1 %v521_v62  ;;  %v458_v62 = vld [vmem:[%s2661_s21 + $0xa8] sm:$0xff] }
  0x5e   : > { %671 = vmatpush.msra.mxu3 %v510_v51  ;;  %v518_v51 = vld [vmem:[%s2661_s21 + $0x288] sm:$0xff]  ;;  %546 = vmatpush.msra.mxu0 %v467_v50  ;;  %v455_v50 = vld [vmem:[%s2661_s21 + $0x90] sm:$0xff] }
  0x5f   : > { %631 = vmatpush.msra.mxu2 %v459_v55  ;;  %v515_v55 = vld [vmem:[%s2661_s21 + $0x270] sm:$0xff]  ;;  %586 = vmatpush.msra.mxu1 %v518_v51  ;;  %v506_v51 = vld [vmem:[%s2661_s21 + $0x228] sm:$0xff] }
  0x60   : > { %672 = vmatpush.msra.mxu3 %v507_v56  ;;  %v447_v56 = vld [vmem:[%s2661_s21 + $0x50] sm:$0xff]  ;;  %547 = vmatpush.msra.mxu0 %v464_v54  ;;  %v2900_v54 = vld [vmem:[%s3804_s0] sm:$0xff] }
  0x61   : > { %632 = vmatpush.msra.mxu2 %v456_v59  ;;  %v512_v59 = vld [vmem:[%s2661_s21 + $0x258] sm:$0xff]  ;;  %587 = vmatpush.msra.mxu1 %v515_v55  ;;  %v2905_v55 = vld [vmem:[%s3804_s0 + $0x8] sm:$0xff] }
  0x62   : > { %673 = vmatpush.msra.mxu3 %v504_v60  ;;  %v444_v60 = vld [vmem:[%s2661_s21 + $0x38] sm:$0xff]  ;;  %548 = vmatpush.msra.mxu0 %v461_v58 }
  0x63   : > { %633 = vmatpush.msra.mxu2 %v453_v63  ;;  %v509_v63 = vld [vmem:[%s2661_s21 + $0x240] sm:$0xff]  ;;  %588 = vmatpush.msra.mxu1 %v512_v59  ;;  %v500_v58 = vld [vmem:[%s2661_s21 + $0x1f8] sm:$0xff]  ;;  %v446_v59 = vld [vmem:[%s2661_s21 + $0x48] sm:$0xff] }
  0x64   : > { %674 = vmatpush.msra.mxu3 %v501_v49  ;;  %v441_v49 = vld [vmem:[%s2661_s21 + $0x20] sm:$0xff]  ;;  %549 = vmatpush.msra.mxu0 %v458_v62  ;;  %v2927_v62 = vld [vmem:[%s3804_s0 + $0x18] sm:$0xff] }
  0x65   : > { %634 = vmatpush.msra.mxu2 %v450_v52  ;;  %v438_v52 = vld [vmem:[%s2661_s21 + $0x8] sm:$0xff]  ;;  %589 = vmatpush.msra.mxu1 %v509_v63  ;;  %v443_v63 = vld [vmem:[%s2661_s21 + $0x30] sm:$0xff] }
  0x66   : > { %675 = vmatpush.msra.mxu3 %v498_v53  ;;  %v486_v53 = vld [vmem:[%s2661_s21 + $0x188] sm:$0xff]  ;;  %550 = vmatpush.msra.mxu0 %v455_v50  ;;  %v440_v50 = vld [vmem:[%s2661_s21 + $0x18] sm:$0xff] }
  0x67   : > { %635 = vmatpush.msra.mxu2 %v447_v56  ;;  %590 = vmatpush.msra.mxu1 %v506_v51  ;;  %v452_v56 = vld [vmem:[%s2661_s21 + $0x78] sm:$0xff]  ;;  %v491_v51 = vld [vmem:[%s2661_s21 + $0x1b0] sm:$0xff] }
  0x68   : > { %676 = vmatpush.msra.mxu3 %v495_v57  ;;  %v503_v57 = vld [vmem:[%s2661_s21 + $0x210] sm:$0xff]  ;;  %551 = vmatpush.msra.mxu0 %v452_v56  ;;  %v2948_v56 = vld [vmem:[%s3804_s0 + $0x20] sm:$0xff] }
  0x69   : > { %636 = vmatpush.msra.mxu2 %v444_v60  ;;  %591 = vmatpush.msra.mxu1 %v503_v57  ;;  %v497_v60 = vld [vmem:[%s2661_s21 + $0x1e0] sm:$0xff]  ;;  %3858 = vst [vmem:[#allocation21_spill] sm:$0xff] %v2948_v56  ;;  %v2953_v57 = vld [vmem:[%s3804_s0 + $0x28] sm:$0xff] }
  0x6a   : > { %677 = vmatpush.msra.mxu3 %v492_v61  ;;  %v2922_v61 = vld [vmem:[%s3804_s0 + $0x10] sm:$0xff]  ;;  %3859 = vst [vmem:[#allocation22_spill] sm:$0xff] %v2953_v57 }
  0x6b   : > { %637 = vmatpush.msra.mxu2 %v441_v49  ;;  %592 = vmatpush.msra.mxu1 %v500_v58  ;;  %v494_v49 = vld [vmem:[%s2661_s21 + $0x1c8] sm:$0xff]  ;;  %v485_v58 = vld [vmem:[%s2661_s21 + $0x180] sm:$0xff] }
  0x6c   : > { %678 = vmatpush.msra.mxu3 %v489_v48  ;;  %v449_v48 = vld [vmem:[%s2661_s21 + $0x60] sm:$0xff] }
  0x6d   : > { %638 = vmatpush.msra.mxu2 %v438_v52  ;;  %552 = vmatpush.msra.mxu0 %v449_v48  ;;  %v437_v52 = vld [vmem:[%s2661_s21] sm:$0xff]  ;;  %v484_v48 = vld [vmem:[%s2661_s21 + $0x178] sm:$0xff] }
  0x6e   : > { %679 = vmatpush.msra.mxu3 %v486_v53  ;;  %639 = vmatmul.f32.vlgmr.msra.gmra.mxu2 %v2900_v54  ;;  %v488_v53 = vld [vmem:[%s2661_s21 + $0x198] sm:$0xff] }
  0x6f   : > { %680 = vmatmul.f32.vlgmr.msra.gmra.mxu3 %v2905_v55  ;;  %814 = vmatpush.msrb.mxu2 %v2835_v45 }
  0x70   : > { %834 = vmatpush.msrb.mxu3 %v2838_v46  ;;  %553 = vmatpush.msra.mxu0 %v446_v59  ;;  %v532_v59 = vld [vmem:[%s2661_s21 + $0x2f8] sm:$0xff] }
  0x71   : > { %815 = vmatpush.msrb.mxu2 %v2826_v42  ;;  %593 = vmatpush.msra.mxu1 %v497_v60  ;;  %v481_v60 = vld [vmem:[%s2661_s21 + $0x160] sm:$0xff] }
  0x72   : > { %835 = vmatpush.msrb.mxu3 %v2829_v43  ;;  %554 = vmatpush.msra.mxu0 %v443_v63  ;;  %v529_v63 = vld [vmem:[%s2661_s21 + $0x2e0] sm:$0xff] }
  0x73   : > { %816 = vmatpush.msrb.mxu2 %v2817_v39  ;;  %594 = vmatpush.msra.mxu1 %v494_v49  ;;  %v478_v49 = vld [vmem:[%s2661_s21 + $0x148] sm:$0xff] }
  0x74   : > { %836 = vmatpush.msrb.mxu3 %v2820_v40  ;;  %555 = vmatpush.msra.mxu0 %v440_v50  ;;  %v2974_v50 = vld [vmem:[%s3804_s0 + $0x30] sm:$0xff] }
  0x75   : > { %817 = vmatpush.msrb.mxu2 %v2804_v36  ;;  %595 = vmatpush.msra.mxu1 %v491_v51  ;;  %3860 = vst [vmem:[#allocation23_spill] sm:$0xff] %v2974_v50  ;;  %v2979_v51 = vld [vmem:[%s3804_s0 + $0x38] sm:$0xff] }
  0x76   : > { %837 = vmatpush.msrb.mxu3 %v2807_v37  ;;  %642 = vmatmul.f32.gmra.mxu2 %v2922_v61  ;;  %3861 = vst [vmem:[#allocation24_spill] sm:$0xff] %v2979_v51 }
  0x77   : > { %683 = vmatmul.f32.gmra.mxu3 %v2927_v62  ;;  %818 = vmatpush.msrb.mxu2 %v2795_v33 }
  0x78   : > { %838 = vmatpush.msrb.mxu3 %v2798_v34  ;;  %556 = vmatpush.msra.mxu0 %v437_v52  ;;  %v526_v52 = vld [vmem:[%s2661_s21 + $0x2c8] sm:$0xff] }
  0x79   : > { %819 = vmatpush.msrb.mxu2 %v2786_v30  ;;  %596 = vmatpush.msra.mxu1 %v488_v53  ;;  %v475_v53 = vld [vmem:[%s2661_s21 + $0x130] sm:$0xff] }
  0x7a   : > { %839 = vmatpush.msrb.mxu3 %v2789_v31  ;;  %557 = vmatmul.f32.vlgmr.msra.gmra.mxu0 %v2900_v54 }
  0x7b   : > { %820 = vmatpush.msrb.mxu2 %v2777_v27  ;;  %705 = vmatpush.msrb.mxu0 %v484_v48  ;;  %v523_v48 = vld [vmem:[%s2661_s21 + $0x2b0] sm:$0xff] }
  0x7c   : > { %840 = vmatpush.msrb.mxu3 %v2780_v28  ;;  %597 = vmatpush.msra.mxu1 %v485_v58  ;;  %v472_v58 = vld [vmem:[%s2661_s21 + $0x118] sm:$0xff] }
  0x7d   : > { %821 = vmatpush.msrb.mxu2 %v2768_v24  ;;  %598 = vmatmul.f32.vlgmr.msra.gmra.mxu1 %v2905_v55 }
  0x7e   : > { %645 = vmatmul.f32.gmra.mxu2 %v2948_v56  ;;  %841 = vmatpush.msrb.mxu3 %v2771_v25 }
  0x7f   : > { %686 = vmatmul.f32.gmra.mxu3 %v2953_v57  ;;  %822 = vmatpush.msrb.mxu2 %v2759_v21 }
  0x80   : > { %746 = vmatpush.msrb.mxu1 %v532_v59  ;;  %706 = vmatpush.msrb.mxu0 %v481_v60  ;;  %v520_v59 = vld [vmem:[%s2661_s21 + $0x298] sm:$0xff]  ;;  %v469_v60 = vld [vmem:[%s2661_s21 + $0x100] sm:$0xff] }
  0x81   : > { %823 = vmatpush.msrb.mxu2 %v2750_v18  ;;  %842 = vmatpush.msrb.mxu3 %v2762_v22 }
  0x82   : > { %747 = vmatpush.msrb.mxu1 %v529_v63  ;;  %707 = vmatpush.msrb.mxu0 %v478_v49  ;;  %v3000_v63 = vld [vmem:[%s3804_s0 + $0x40] sm:$0xff]  ;;  %v3005_v49 = vld [vmem:[%s3804_s0 + $0x48] sm:$0xff] }
  0x83   : > { %824 = vmatpush.msrb.mxu2 %v2741_v15  ;;  %560 = vmatmul.f32.gmra.mxu0 %v2922_v61  ;;  %3862 = vst [vmem:[#allocation25_spill] sm:$0xff] %v3000_v63 }
  0x84   : > { %748 = vmatpush.msrb.mxu1 %v526_v52  ;;  %843 = vmatpush.msrb.mxu3 %v2753_v19  ;;  %3863 = vst [vmem:[#allocation26_spill] sm:$0xff] %v3005_v49  ;;  %v517_v52 = vld [vmem:[%s2661_s21 + $0x280] sm:$0xff] }
  0x85   : > { %825 = vmatpush.msrb.mxu2 %v2732_v12  ;;  %708 = vmatpush.msrb.mxu0 %v475_v53  ;;  %v466_v53 = vld [vmem:[%s2661_s21 + $0xe8] sm:$0xff] }
  0x86   : > { %648 = vmatmul.f32.gmra.mxu2 %v2974_v50  ;;  %601 = vmatmul.f32.gmra.mxu1 %v2927_v62 }
  0x87   : > { %689 = vmatmul.f32.gmra.mxu3 %v2979_v51  ;;  %826 = vmatpush.msrb.mxu2 %v2723_v9 }
  0x88   : > { %844 = vmatpush.msrb.mxu3 %v2744_v16  ;;  %749 = vmatpush.msrb.mxu1 %v523_v48  ;;  %v514_v48 = vld [vmem:[%s2661_s21 + $0x268] sm:$0xff] }
  0x89   : > { %709 = vmatpush.msrb.mxu0 %v472_v58  ;;  %827 = vmatpush.msrb.mxu2 %v2714_v6  ;;  %v463_v58 = vld [vmem:[%s2661_s21 + $0xd0] sm:$0xff] }
  0x8a   : > { %845 = vmatpush.msrb.mxu3 %v2735_v13  ;;  %750 = vmatpush.msrb.mxu1 %v520_v59  ;;  %v511_v59 = vld [vmem:[%s2661_s21 + $0x250] sm:$0xff] }
  0x8b   : > { %710 = vmatpush.msrb.mxu0 %v469_v60  ;;  %828 = vmatpush.msrb.mxu2 %v2705_v3  ;;  %v3026_v60 = vld [vmem:[%s3804_s0 + $0x50] sm:$0xff] }
  0x8c   : > { %563 = vmatmul.f32.gmra.mxu0 %v2948_v56  ;;  %751 = vmatpush.msrb.mxu1 %v517_v52  ;;  %v3031_v52 = vld [vmem:[%s3804_s0 + $0x58] sm:$0xff] }
  0x8d   : > { %846 = vmatpush.msrb.mxu3 %v2726_v10  ;;  %711 = vmatpush.msrb.mxu0 %v466_v53  ;;  %v460_v53 = vld [vmem:[%s2661_s21 + $0xb8] sm:$0xff] }
  0x8e   : > { %651 = vmatmul.f32.gmra.mxu2 %v3000_v63  ;;  %604 = vmatmul.f32.gmra.mxu1 %v2953_v57  ;;  %v457_v57 = vld [vmem:[%s2661_s21 + $0xa0] sm:$0xff]  ;;  %v496_v56 = vld [vmem:[%s2661_s21 + $0x1d8] sm:$0xff] }
  0x8f   : > { %692 = vmatmul.f32.gmra.mxu3 %v3005_v49  ;;  %829 = vmatpush.msrb.mxu2 %v2696_v0 }
  0x90   : > { %847 = vmatpush.msrb.mxu3 %v2717_v7  ;;  %752 = vmatpush.msrb.mxu1 %v514_v48  ;;  %v508_v48 = vld [vmem:[%s2661_s21 + $0x238] sm:$0xff] }
  0x91   : > { %854 = vmatpush.msra.mxu2 %v2841_v47  ;;  %712 = vmatpush.msrb.mxu0 %v463_v58  ;;  %v505_v58 = vld [vmem:[%s2661_s21 + $0x220] sm:$0xff] }
  0x92   : > { %848 = vmatpush.msrb.mxu3 %v2708_v4  ;;  %753 = vmatpush.msrb.mxu1 %v511_v59  ;;  %v454_v59 = vld [vmem:[%s2661_s21 + $0x88] sm:$0xff] }
  0x93   : > { %855 = vmatpush.msra.mxu2 %v2832_v44  ;;  %713 = vmatpush.msrb.mxu0 %v460_v53  ;;  %v3052_v53 = vld [vmem:[%s3804_s0 + $0x60] sm:$0xff] }
  0x94   : > { %566 = vmatmul.f32.gmra.mxu0 %v2974_v50  ;;  %849 = vmatpush.msrb.mxu3 %v2699_v1  ;;  %v502_v50 = vld [vmem:[%s2661_s21 + $0x208] sm:$0xff] }
  0x95   : > { %856 = vmatpush.msra.mxu2 %v2823_v41  ;;  %754 = vmatpush.msrb.mxu1 %v508_v48  ;;  %v3057_v48 = vld [vmem:[%s3804_s0 + $0x68] sm:$0xff] }
  0x96   : > { %654 = vmatmul.f32.gmra.mxu2 %v3026_v60  ;;  %926 = vmatpush.msra.mxu3 %v2835_v45 }
  0x97   : > { %695 = vmatmul.f32.gmra.mxu3 %v3031_v52  ;;  %607 = vmatmul.f32.gmra.mxu1 %v2979_v51  ;;  %v448_v51 = vld [vmem:[%s2661_s21 + $0x58] sm:$0xff] }
  0x98   : > { %857 = vmatpush.msra.mxu2 %v2810_v38  ;;  %714 = vmatpush.msrb.mxu0 %v457_v57  ;;  %v451_v57 = vld [vmem:[%s2661_s21 + $0x70] sm:$0xff] }
  0x99   : > { %755 = vmatpush.msrb.mxu1 %v505_v58  ;;  %927 = vmatpush.msra.mxu3 %v2826_v42  ;;  %v499_v58 = vld [vmem:[%s2661_s21 + $0x1f0] sm:$0xff] }
  0x9a   : > { %858 = vmatpush.msra.mxu2 %v2801_v35  ;;  %715 = vmatpush.msrb.mxu0 %v454_v59  ;;  %v493_v59 = vld [vmem:[%s2661_s21 + $0x1c0] sm:$0xff] }
  0x9b   : > { %756 = vmatpush.msrb.mxu1 %v502_v50  ;;  %928 = vmatpush.msra.mxu3 %v2817_v39  ;;  %v445_v50 = vld [vmem:[%s2661_s21 + $0x40] sm:$0xff] }
  0x9c   : > { %569 = vmatmul.f32.gmra.mxu0 %v3000_v63  ;;  %859 = vmatpush.msra.mxu2 %v2792_v32  ;;  %v487_v63 = vld [vmem:[%s2661_s21 + $0x190] sm:$0xff] }
  0x9d   : > { %716 = vmatpush.msrb.mxu0 %v451_v57  ;;  %757 = vmatpush.msrb.mxu1 %v499_v58  ;;  %v3078_v57 = vld [vmem:[%s3804_s0 + $0x70] sm:$0xff]  ;;  %v3083_v58 = vld [vmem:[%s3804_s0 + $0x78] sm:$0xff] }
  0x9e   : > { %657 = vmatmul.f32.gmra.mxu2 %v3052_v53  ;;  %929 = vmatpush.msra.mxu3 %v2804_v36 }
  0x9f   : > { %698 = vmatmul.f32.gmra.mxu3 %v3057_v48  ;;  %860 = vmatpush.msra.mxu2 %v2783_v29 }
  0xa0   : > { %610 = vmatmul.f32.gmra.mxu1 %v3005_v49  ;;  %717 = vmatpush.msrb.mxu0 %v448_v51  ;;  %v442_v51 = vld [vmem:[%s2661_s21 + $0x28] sm:$0xff]  ;;  %v439_v49 = vld [vmem:[%s2661_s21 + $0x10] sm:$0xff] }
  0xa1   : > { %861 = vmatpush.msra.mxu2 %v2774_v26  ;;  %758 = vmatpush.msrb.mxu1 %v496_v56  ;;  %v490_v56 = vld [vmem:[%s2661_s21 + $0x1a8] sm:$0xff] }
  0xa2   : > { %718 = vmatpush.msrb.mxu0 %v445_v50  ;;  %930 = vmatpush.msra.mxu3 %v2795_v33  ;;  %v2524_v50 = vmov 0.0  }
  0xa3   : > { %862 = vmatpush.msra.mxu2 %v2765_v23  ;;  %759 = vmatpush.msrb.mxu1 %v493_v59 }
  0xa4   : > { %572 = vmatmul.f32.gmra.mxu0 %v3026_v60  ;;  %931 = vmatpush.msra.mxu3 %v2786_v30 }
  0xa5   : > { %863 = vmatpush.msra.mxu2 %v2756_v20  ;;  %719 = vmatpush.msrb.mxu0 %v442_v51 }
  0xa6   : > { %660 = vmatmul.f32.gmra.mxu2 %v3078_v57  ;;  %760 = vmatpush.msrb.mxu1 %v490_v56 }
  0xa7   : > { %701 = vmatmul.f32.gmra.mxu3 %v3083_v58  ;;  %864 = vmatpush.msra.mxu2 %v2747_v17 }
  0xa8   : > { %613 = vmatmul.f32.gmra.mxu1 %v3031_v52  ;;  %720 = vmatpush.msrb.mxu0 %v439_v49  ;;  %v3869_v49 = vld [vmem:[#allocation26_spill] sm:$0xff] }
  0xa9   : > { %865 = vmatpush.msra.mxu2 %v2738_v14  ;;  %761 = vmatpush.msrb.mxu1 %v487_v63  ;;  %v3868_v63 = vld [vmem:[#allocation25_spill] sm:$0xff] }
  0xaa   : > { %946 = vmatpush.msra.mxu0 %v2838_v46  ;;  %932 = vmatpush.msra.mxu3 %v2777_v27 }
  0xab   : > { %866 = vmatpush.msra.mxu2 %v2729_v11  ;;  %966 = vmatpush.msra.mxu1 %v2841_v47 }
  0xac   : > { %575 = vmatmul.f32.gmra.mxu0 %v3052_v53  ;;  %933 = vmatpush.msra.mxu3 %v2768_v24 }
  0xad   : > { %867 = vmatpush.msra.mxu2 %v2720_v8  ;;  %947 = vmatpush.msra.mxu0 %v2829_v43 }
  0xae   : > { %830 = vmatmul.f32.vlgmr.msrb.gmra.mxu2 %v2524_v50  ;;  %967 = vmatpush.msra.mxu1 %v2832_v44 }
  0xaf   : > { %850 = vmatmul.f32.vlgmr.msrb.gmra.mxu3 %v2524_v50  ;;  %868 = vmatpush.msra.mxu2 %v2711_v5 }
  0xb0   : > { %616 = vmatmul.f32.gmra.mxu1 %v3057_v48  ;;  %948 = vmatpush.msra.mxu0 %v2820_v40 }
  0xb1   : > { %869 = vmatpush.msra.mxu2 %v2702_v2  ;;  %968 = vmatpush.msra.mxu1 %v2823_v41 }
  0xb2   : > { %949 = vmatpush.msra.mxu0 %v2807_v37  ;;  %934 = vmatpush.msra.mxu3 %v2759_v21 }
  0xb3   : > { %1038 = vmatpush.msrb.mxu2 %v2835_v45  ;;  %969 = vmatpush.msra.mxu1 %v2810_v38 }
  0xb4   : > { %578 = vmatmul.f32.gmra.mxu0 %v3078_v57  ;;  %935 = vmatpush.msra.mxu3 %v2750_v18 }
  0xb5   : > { %950 = vmatpush.msra.mxu0 %v2798_v34  ;;  %970 = vmatpush.msra.mxu1 %v2801_v35 }
  0xb6   : > { %870 = vmatmul.f32.vlgmr.msra.gmra.mxu2 %v2524_v50  ;;  %936 = vmatpush.msra.mxu3 %v2741_v15 }
  0xb7   : > { %951 = vmatpush.msra.mxu0 %v2789_v31  ;;  %1039 = vmatpush.msrb.mxu2 %v2826_v42 }
  0xb8   : > { %619 = vmatmul.f32.gmra.mxu1 %v3083_v58  ;;  %937 = vmatpush.msra.mxu3 %v2732_v12 }
  0xb9   : > { %952 = vmatpush.msra.mxu0 %v2780_v28  ;;  %971 = vmatpush.msra.mxu1 %v2792_v32 }
  0xba   : > { %1040 = vmatpush.msrb.mxu2 %v2817_v39  ;;  %938 = vmatpush.msra.mxu3 %v2723_v9 }
  0xbb   : > { %953 = vmatpush.msra.mxu0 %v2771_v25  ;;  %972 = vmatpush.msra.mxu1 %v2783_v29 }
  0xbc   : > { %721 = vmatmul.f32.vlgmr.msrb.gmra.mxu0 %v2900_v54  ;;  %939 = vmatpush.msra.mxu3 %v2714_v6  ;;  %v3864_v54 = vld [vmem:[#allocation21_spill] sm:$0xff] }
  0xbd   : > { %954 = vmatpush.msra.mxu0 %v2762_v22  ;;  %973 = vmatpush.msra.mxu1 %v2774_v26 }
  0xbe   : > { %1041 = vmatpush.msrb.mxu2 %v2804_v36  ;;  %940 = vmatpush.msra.mxu3 %v2705_v3 }
  0xbf   : > { %974 = vmatpush.msra.mxu1 %v2765_v23  ;;  %955 = vmatpush.msra.mxu0 %v2753_v19 }
  0xc0   : > { %762 = vmatmul.f32.vlgmr.msrb.gmra.mxu1 %v2905_v55  ;;  %941 = vmatpush.msra.mxu3 %v2696_v0  ;;  %v3865_v55 = vld [vmem:[#allocation22_spill] sm:$0xff] }
  0xc1   : > { %975 = vmatpush.msra.mxu1 %v2756_v20  ;;  %956 = vmatpush.msra.mxu0 %v2744_v16 }
  0xc2   : > { %1042 = vmatpush.msrb.mxu2 %v2795_v33  ;;  %1058 = vmatpush.msrb.mxu3 %v2838_v46 }
  0xc3   : > { %976 = vmatpush.msra.mxu1 %v2747_v17  ;;  %957 = vmatpush.msra.mxu0 %v2735_v13 }
  0xc4   : > { %724 = vmatmul.f32.gmra.mxu0 %v2922_v61  ;;  %1059 = vmatpush.msrb.mxu3 %v2829_v43  ;;  %v3866_v61 = vld [vmem:[#allocation23_spill] sm:$0xff] }
  0xc5   : > { %977 = vmatpush.msra.mxu1 %v2738_v14  ;;  %958 = vmatpush.msra.mxu0 %v2726_v10 }
  0xc6   : > { %1043 = vmatpush.msrb.mxu2 %v2786_v30  ;;  %1060 = vmatpush.msrb.mxu3 %v2820_v40 }
  0xc7   : > { %978 = vmatpush.msra.mxu1 %v2729_v11  ;;  %959 = vmatpush.msra.mxu0 %v2717_v7 }
  0xc8   : > { %765 = vmatmul.f32.gmra.mxu1 %v2927_v62  ;;  %1061 = vmatpush.msrb.mxu3 %v2807_v37  ;;  %v3867_v62 = vld [vmem:[#allocation24_spill] sm:$0xff] }
  0xc9   : > { %979 = vmatpush.msra.mxu1 %v2720_v8  ;;  %960 = vmatpush.msra.mxu0 %v2708_v4 }
  0xca   : > { %1044 = vmatpush.msrb.mxu2 %v2777_v27  ;;  %1062 = vmatpush.msrb.mxu3 %v2798_v34 }
  0xcb   : > { %980 = vmatpush.msra.mxu1 %v2711_v5  ;;  %961 = vmatpush.msra.mxu0 %v2699_v1 }
  0xcc   : > { %727 = vmatmul.f32.gmra.mxu0 %v3864_v54  ;;  %1063 = vmatpush.msrb.mxu3 %v2789_v31 }
  0xcd   : > { %981 = vmatpush.msra.mxu1 %v2702_v2  ;;  %1078 = vmatpush.msrb.mxu0 %v2841_v47 }
  0xce   : > { %1045 = vmatpush.msrb.mxu2 %v2768_v24  ;;  %1064 = vmatpush.msrb.mxu3 %v2780_v28 }
  0xcf   : > { %1079 = vmatpush.msrb.mxu0 %v2832_v44  ;;  %1150 = vmatpush.msrb.mxu1 %v2835_v45 }
  0xd0   : > { %768 = vmatmul.f32.gmra.mxu1 %v3865_v55  ;;  %1046 = vmatpush.msrb.mxu2 %v2759_v21 }
  0xd1   : > { %1080 = vmatpush.msrb.mxu0 %v2823_v41  ;;  %1065 = vmatpush.msrb.mxu3 %v2771_v25 }
  0xd2   : > { %1151 = vmatpush.msrb.mxu1 %v2826_v42  ;;  %1047 = vmatpush.msrb.mxu2 %v2750_v18 }
  0xd3   : > { %1081 = vmatpush.msrb.mxu0 %v2810_v38  ;;  %1066 = vmatpush.msrb.mxu3 %v2762_v22 }
  0xd4   : > { %730 = vmatmul.f32.gmra.mxu0 %v3866_v61  ;;  %1048 = vmatpush.msrb.mxu2 %v2741_v15 }
  0xd5   : > { %1082 = vmatpush.msrb.mxu0 %v2801_v35  ;;  %1067 = vmatpush.msrb.mxu3 %v2753_v19 }
  0xd6   : > { %1152 = vmatpush.msrb.mxu1 %v2817_v39  ;;  %1049 = vmatpush.msrb.mxu2 %v2732_v12 }
  0xd7   : > { %1083 = vmatpush.msrb.mxu0 %v2792_v32  ;;  %1068 = vmatpush.msrb.mxu3 %v2744_v16 }
  0xd8   : > { %771 = vmatmul.f32.gmra.mxu1 %v3867_v62  ;;  %1050 = vmatpush.msrb.mxu2 %v2723_v9 }
  0xd9   : > { %1084 = vmatpush.msrb.mxu0 %v2783_v29  ;;  %1069 = vmatpush.msrb.mxu3 %v2735_v13 }
  0xda   : > { %1153 = vmatpush.msrb.mxu1 %v2804_v36  ;;  %1051 = vmatpush.msrb.mxu2 %v2714_v6 }
  0xdb   : > { %1085 = vmatpush.msrb.mxu0 %v2774_v26  ;;  %1070 = vmatpush.msrb.mxu3 %v2726_v10 }
  0xdc   : > { %733 = vmatmul.f32.gmra.mxu0 %v3868_v63  ;;  %1052 = vmatpush.msrb.mxu2 %v2705_v3 }
  0xdd   : > { %1086 = vmatpush.msrb.mxu0 %v2765_v23  ;;  %1071 = vmatpush.msrb.mxu3 %v2717_v7 }
  0xde   : > { %1154 = vmatpush.msrb.mxu1 %v2795_v33  ;;  %1053 = vmatpush.msrb.mxu2 %v2696_v0 }
  0xdf   : > { %1087 = vmatpush.msrb.mxu0 %v2756_v20  ;;  %1072 = vmatpush.msrb.mxu3 %v2708_v4 }
  0xe0   : > { %774 = vmatmul.f32.gmra.mxu1 %v3869_v49  ;;  %1170 = vmatpush.msra.mxu2 %v2838_v46 }
  0xe1   : > { %1088 = vmatpush.msrb.mxu0 %v2747_v17  ;;  %1073 = vmatpush.msrb.mxu3 %v2699_v1 }
  0xe2   : > { %1155 = vmatpush.msrb.mxu1 %v2786_v30  ;;  %1171 = vmatpush.msra.mxu2 %v2829_v43 }
  0xe3   : > { %1089 = vmatpush.msrb.mxu0 %v2738_v14 }
  0xe4   : > { %736 = vmatmul.f32.gmra.mxu0 %v3026_v60  ;;  %1156 = vmatpush.msrb.mxu1 %v2777_v27 }
  0xe5   : > { %1090 = vmatpush.msrb.mxu0 %v2729_v11  ;;  %1172 = vmatpush.msra.mxu2 %v2820_v40 }
  0xe6   : > { %1157 = vmatpush.msrb.mxu1 %v2768_v24 }
  0xe7   : > { %1091 = vmatpush.msrb.mxu0 %v2720_v8  ;;  %1173 = vmatpush.msra.mxu2 %v2807_v37 }
  0xe8   : > { %777 = vmatmul.f32.gmra.mxu1 %v3031_v52 }
  0xe9   : > { %1092 = vmatpush.msrb.mxu0 %v2711_v5  ;;  %1174 = vmatpush.msra.mxu2 %v2798_v34 }
  0xea   : > { %1158 = vmatpush.msrb.mxu1 %v2759_v21 }
  0xeb   : > { %1093 = vmatpush.msrb.mxu0 %v2702_v2  ;;  %1175 = vmatpush.msra.mxu2 %v2789_v31 }
  0xec   : > { %739 = vmatmul.f32.gmra.mxu0 %v3052_v53  ;;  %1159 = vmatpush.msrb.mxu1 %v2750_v18  ;;  %v3240_v53 = vld [vmem:[%s2683_s16] sm:$0x7] }
  0xed   : > { %1176 = vmatpush.msra.mxu2 %v2780_v28  ;;  %v536_v59 = vperm.slane %v3240_v53, 1  ;;  %v535_v62 = vperm.slane %v3240_v53, 0 }
  0xee   : > { %1160 = vmatpush.msrb.mxu1 %v2741_v15 }
  0xef   : > { %1177 = vmatpush.msra.mxu2 %v2771_v25 }
  0xf0   : > { %780 = vmatmul.f32.gmra.mxu1 %v3057_v48 }
  0xf1   : > { %v3230_v60 = vpop.f32.mrf.mxu2  ;;  %1178 = vmatpush.msra.mxu2 %v2762_v22  ;;  %1161 = vmatpush.msrb.mxu1 %v2732_v12 }
  0xf2   : > { %v3232_v52 = vpop.f32.mrf.mxu3 }
  0xf3   : > { %1179 = vmatpush.msra.mxu2 %v2753_v19  ;;  %1162 = vmatpush.msrb.mxu1 %v2723_v9 }
  0xf4   : > { %742 = vmatmul.f32.gmra.mxu0 %v3078_v57 }
  0xf5   : > { %1180 = vmatpush.msra.mxu2 %v2744_v16  ;;  %1163 = vmatpush.msrb.mxu1 %v2714_v6 }
  0xf7   : > { %1181 = vmatpush.msra.mxu2 %v2735_v13  ;;  %1164 = vmatpush.msrb.mxu1 %v2705_v3  ;;  %v558_v50 = vpop.f32.mrf.mxu0 }
  0xf8   : > { %783 = vmatmul.f32.gmra.mxu1 %v3083_v58 }
  0xf9   : > { %v643_v48 = vpop.f32.mrf.mxu2  ;;  %1182 = vmatpush.msra.mxu2 %v2726_v10  ;;  %1165 = vmatpush.msrb.mxu1 %v2696_v0 }
  0xfa   : > { %v684_v51 = vpop.f32.mrf.mxu3  ;;  %v644_v56 = vadd.f32 %v643_v48, %v536_v59  ;;  %v599_v54 = vpop.f32.mrf.mxu1 }
  0xfb   : > { %1183 = vmatpush.msra.mxu2 %v2717_v7 }
  0xfc   : > { %v3251_v57 = vadd.f32 %v684_v51, %v644_v56 }
  0xfd   : > { %1184 = vmatpush.msra.mxu2 %v2708_v4 }
  0xfe   : > { %3870 = vst [vmem:[#allocation21_spill] sm:$0xff] %v3251_v57 }
  0xff   : > { %1185 = vmatpush.msra.mxu2 %v2699_v1 }
 0x100   : > { %v561_v63 = vpop.f32.mrf.mxu0 }
 0x101   : > { %v646_v55 = vpop.f32.mrf.mxu2  ;;  %v562_v49 = vadd.f32 %v561_v63, %v535_v62 }
 0x102   : > { %v687_v61 = vpop.f32.mrf.mxu3  ;;  %v647_v58 = vadd.f32 %v646_v55, %v536_v59 }
 0x103   : > { %v602_v2 = vpop.f32.mrf.mxu1 }
 0x104   : > { %v3257_v48 = vadd.f32 %v687_v61, %v647_v58  ;;  %v3259_v0 = vadd.f32 %v602_v2, %v562_v49 }
 0x106   : > { %3871 = vst [vmem:[#allocation22_spill] sm:$0xff] %v3257_v48 }
 0x107   : > { %3872 = vst [vmem:[#allocation23_spill] sm:$0xff] %v3259_v0 }
 0x109   : > { %v649_v51 = vpop.f32.mrf.mxu2  ;;  %v564_v3 = vpop.f32.mrf.mxu0 }
 0x10a   : > { %v690_v56 = vpop.f32.mrf.mxu3  ;;  %v650_v57 = vadd.f32 %v649_v51, %v536_v59  ;;  %v565_v5 = vadd.f32 %v564_v3, %v535_v62 }
 0x10b   : > { %v605_v1 = vpop.f32.mrf.mxu1 }
 0x10c   : > { %v3261_v4 = vadd.f32 %v690_v56, %v650_v57  ;;  %v3263_v7 = vadd.f32 %v605_v1, %v565_v5 }
 0x10e   : > { %3873 = vst [vmem:[#allocation24_spill] sm:$0xff] %v3261_v4 }
 0x10f   : > { %3874 = vst [vmem:[#allocation25_spill] sm:$0xff] %v3263_v7 }
 0x111   : > { %v652_v6 = vpop.f32.mrf.mxu2  ;;  %v567_v10 = vpop.f32.mrf.mxu0 }
 0x112   : > { %v693_v8 = vpop.f32.mrf.mxu3  ;;  %v653_v55 = vadd.f32 %v652_v6, %v536_v59  ;;  %v568_v63 = vadd.f32 %v567_v10, %v535_v62 }
 0x114   : > { %v3265_v61 = vadd.f32 %v693_v8, %v653_v55  ;;  %v608_v58 = vpop.f32.mrf.mxu1 }
 0x115   : > { %v3267_v2 = vadd.f32 %v608_v58, %v568_v63 }
 0x116   : > { %3875 = vst [vmem:[#allocation26_spill] sm:$0xff] %v3265_v61 }
 0x117   : > { %3876 = vst [vmem:[#allocation27_spill] sm:$0xff] %v3267_v2 }
 0x119   : > { %v655_v49 = vpop.f32.mrf.mxu2  ;;  %v570_v0 = vpop.f32.mrf.mxu0 }
 0x11a   : > { %v696_v48 = vpop.f32.mrf.mxu3  ;;  %v656_v51 = vadd.f32 %v655_v49, %v536_v59  ;;  %v571_v3 = vadd.f32 %v570_v0, %v535_v62 }
 0x11c   : > { %v3269_v57 = vadd.f32 %v696_v48, %v656_v51  ;;  %v641_v48 = vadd.f32 %v3230_v60, %v536_v59  ;;  %v559_v51 = vadd.f32 %v558_v50, %v535_v62 }
 0x11d   : > { %v611_v56 = vpop.f32.mrf.mxu1 }
 0x11e   : > { %3877 = vst [vmem:[#allocation28_spill] sm:$0xff] %v3269_v57  ;;  %v3271_v1 = vadd.f32 %v611_v56, %v571_v3 }
 0x120   : > { %3878 = vst [vmem:[#allocation29_spill] sm:$0xff] %v3271_v1 }
 0x121   : > { %v658_v5 = vpop.f32.mrf.mxu2  ;;  %v573_v7 = vpop.f32.mrf.mxu0 }
 0x122   : > { %v699_v4 = vpop.f32.mrf.mxu3  ;;  %v659_v6 = vadd.f32 %v658_v5, %v536_v59  ;;  %v574_v10 = vadd.f32 %v573_v7, %v535_v62  ;;  %v682_v7 = vadd.f32 %v3232_v52, %v641_v48 }
 0x124   : > { %v3273_v8 = vadd.f32 %v699_v4, %v659_v6  ;;  %v600_v4 = vadd.f32 %v599_v54, %v559_v51  ;;  %v3286_v54 = vperm.slane %v3240_v53, 2 }
 0x125   : > { %v614_v55 = vpop.f32.mrf.mxu1 }
 0x126   : > { %3879 = vst [vmem:[#allocation30_spill] sm:$0xff] %v3273_v8  ;;  %v3275_v63 = vadd.f32 %v614_v55, %v574_v10 }
 0x127   : > { %3884 = vst [vmem:[#allocation35_spill] sm:$0xff] %v3286_v54 }
 0x128   : > { %3880 = vst [vmem:[#allocation31_spill] sm:$0xff] %v3275_v63 }
 0x129   : > { %v661_v58 = vpop.f32.mrf.mxu2  ;;  %v576_v2 = vpop.f32.mrf.mxu0 }
 0x12a   : > { %v702_v61 = vpop.f32.mrf.mxu3  ;;  %v662_v49 = vadd.f32 %v661_v58, %v536_v59  ;;  %v577_v0 = vadd.f32 %v576_v2, %v535_v62 }
 0x12c   : > { %v3278_v3 = vadd.f32 %v702_v61, %v662_v49 }
 0x12d   : > { %v617_v56 = vpop.f32.mrf.mxu1 }
 0x12e   : > { %3881 = vst [vmem:[#allocation32_spill] sm:$0xff] %v3278_v3  ;;  %v3280_v57 = vadd.f32 %v617_v56, %v577_v0 }
 0x130   : > { %3882 = vst [vmem:[#allocation33_spill] sm:$0xff] %v3280_v57 }
 0x131   : > { %v831_v5 = vpop.f32.mrf.mxu2  ;;  %v579_v8 = vpop.f32.mrf.mxu0 }
 0x132   : > { %v851_v6 = vpop.f32.mrf.mxu3  ;;  %v874_v10 = vadd.f32 %v831_v5, %v600_v4  ;;  %v580_v63 = vadd.f32 %v579_v8, %v535_v62 }
 0x133   : > { %v894_v55 = vadd.f32 %v851_v6, %v682_v7 }
 0x134   : > { %v2252_v58 = vmul.f32 -1.442695, %v874_v10 }
 0x135   : > { %v2253_v1 = vmul.f32 -1.442695, %v894_v55  ;;  %v620_v2 = vpop.f32.mrf.mxu1 }
 0x136   : > { %2332 = vpow2.f32 %v2252_v58  ;;  %v3283_v60 = vadd.f32 %v620_v2, %v580_v63 }
 0x137   : > { %2334 = vpow2.f32 %v2253_v1 }
 0x138   : > { %3883 = vst [vmem:[#allocation34_spill] sm:$0xff] %v3283_v60 }
 0x139   : > { %v722_v59 = vpop.f32.mrf.mxu0  ;;  %v871_v5 = vpop.f32.mrf.mxu2 }
 0x13a   : > { %v723_v10 = vadd.f32 %v722_v59, %v3286_v54 }
 0x13c   : > { %v2333_v50 = vpop.eup %2332 }
 0x13d   : > { %v2335_v61 = vpop.eup %2334  ;;  %v878_v49 = vadd.f32 1.0, %v2333_v50  ;;  %v763_v52 = vpop.f32.mrf.mxu1 }
 0x13e   : > { %v898_v0 = vadd.f32 1.0, %v2335_v61 }
 0x13f   : > { %2336 = vrcp.f32 %v878_v49  ;;  %v890_v6 = vand.u32 2147483648, %v878_v49  ;;  %v888_v53 = vand.u32 2147483647, %v878_v49  ;;  %vm884_vm1 = vweird.f32 %v878_v49 }
 0x140   : > { %2338 = vrcp.f32 %v898_v0  ;;  %v910_v9 = vand.u32 2147483648, %v898_v0  ;;  %vm904_vm5 = vweird.f32 %v898_v0 }
 0x141   : > { %v725_v48 = vpop.f32.mrf.mxu0  ;;  %v891_v60 = vor.u32 1.1754944e-38, %v890_v6  ;;  %vm889_vm3 = vcmp.eq.f32.partialorder %v888_v53, 8.507059e+37 }
 0x142   : > { %v3289_v62 = vadd.f32 %v725_v48, %v3286_v54  ;;  %v3887_v48 = vld [vmem:[#allocation20_spill] sm:$0xff] }
 0x143   : > { %v914_v3 = vadd.f32 %v3887_v48, %v871_v5 }
 0x144   : > { %3885 = vst [vmem:[#allocation36_spill] sm:$0xff] %v3289_v62 }
 0x145   : > { %v2337_v8 = vpop.eup %2336  ;;  %v3291_v63 = vpop.f32.mrf.mxu1 }
 0x146   : > { %v2339_v51 = vpop.eup %2338  ;;  %v880_v1 = vmul.f32 %v2337_v8, %v878_v49  ;;  %3886 = vst [vmem:[#allocation37_spill] sm:$0xff] %v3291_v63  ;;  %vm885_vm0 = vweird.f32 %v2337_v8 }
 0x147   : > { %v900_v56 = vmul.f32 %v2339_v51, %v898_v0  ;;  %vm886_vm2 = vmor %vm884_vm1, %vm885_vm0  ;;  %vm905_vm4 = vweird.f32 %v2339_v51 }
 0x148   : > { %v881_v7 = vsub.f32 1.0, %v880_v1  ;;  %v764_v1 = vadd.f32 %v763_v52, %v723_v10  ;;  %vm906_vm6 = vmor %vm904_vm5, %vm905_vm4 }
 0x149   : > { %v901_v4 = vsub.f32 1.0, %v900_v56  ;;  %v728_v58 = vpop.f32.mrf.mxu0 }
 0x14a   : > { %v882_v55 = vmul.f32 %v2337_v8, %v881_v7  ;;  %v729_v50 = vadd.f32 %v728_v58, %v3286_v54 }
 0x14b   : > { %v902_v2 = vmul.f32 %v2339_v51, %v901_v4  ;;  %v908_v4 = vand.u32 2147483647, %v898_v0 }
 0x14c   : > { %v883_v61 = vadd.f32 %v2337_v8, %v882_v55 }
 0x14d   : > { %v769_v56 = vpop.f32.mrf.mxu1  ;;  %v903_v62 = vadd.f32 %v2339_v51, %v902_v2  ;;  %vm909_vm7 = vcmp.eq.f32.partialorder %v908_v4, 8.507059e+37 }
 0x14e   : > { %v887_v57 = vsel %vm886_vm2, %v2337_v8, %v883_v61  ;;  %v3296_v59 = vadd.f32 %v769_v56, %v729_v50  ;;  %v911_v8 = vor.u32 1.1754944e-38, %v910_v9 }
 0x14f   : > { %v892_v63 = vsel %vm889_vm3, %v891_v60, %v887_v57  ;;  %v907_v55 = vsel %vm906_vm6, %v2339_v51, %v903_v62 }
 0x150   : > { %3888 = vst [vmem:[#allocation38_spill] sm:$0xff] %v3296_v59  ;;  %v915_v7 = vmul.f32 %v914_v3, %v892_v63  ;;  %v912_v52 = vsel %vm909_vm7, %v911_v8, %v907_v55  ;;  %v3894_v55 = vld [vmem:[#allocation19_spill] sm:$0xff] }
 0x151   : > { %v731_v49 = vpop.f32.mrf.mxu0  ;;  %v918_v60 = vsub.f32 1.0, %v912_v52  ;;  %v920_v63 = vmul.f32 0.0, %v912_v52  ;;  %v3896_v8 = vld [vmem:[#allocation15_spill] sm:$0xff]  ;;  %v3897_v52 = vld [vmem:[#allocation16_spill] sm:$0xff] }
 0x152   : > { %v916_v58 = vadd.f32 %v915_v7, %v764_v1  ;;  %v732_v5 = vadd.f32 %v731_v49, %v3286_v54  ;;  %v3893_v49 = vld [vmem:[#allocation18_spill] sm:$0xff] }
 0x154   : > { %2340 = vtanh.f32 %v916_v58 }
 0x155   : > { %v772_v6 = vpop.f32.mrf.mxu1 }
 0x156   : > { %v3299_v57 = vadd.f32 %v772_v6, %v732_v5  ;;  %v3895_v5 = vld [vmem:[#allocation17_spill] sm:$0xff]  ;;  %v3898_v6 = vld [vmem:[#allocation14_spill] sm:$0xff] }
 0x158   : > { %3889 = vst [vmem:[#allocation39_spill] sm:$0xff] %v3299_v57 }
 0x159   : > { %v734_v53 = vpop.f32.mrf.mxu0 }
 0x15a   : > { %v2341_v10 = vpop.eup %2340  ;;  %v735_v0 = vadd.f32 %v734_v53, %v3286_v54  ;;  %v3901_v53 = vld [vmem:[#allocation11_spill] sm:$0xff] }
 0x15b   : > { %v919_v3 = vmul.f32 %v2341_v10, %v918_v60  ;;  %v3899_v60 = vld [vmem:[#allocation12_spill] sm:$0xff]  ;;  %v3900_v10 = vld [vmem:[#allocation13_spill] sm:$0xff] }
 0x15d   : > { %v3302_v2 = vadd.f32 %v920_v63, %v919_v3  ;;  %v775_v50 = vpop.f32.mrf.mxu1  ;;  %v3902_v3 = vld [vmem:[#allocation9_spill] sm:$0xff]  ;;  %v3903_v63 = vld [vmem:[#allocation10_spill] sm:$0xff] }
 0x15e   : > { %v3306_v9 = vadd.f32 %v775_v50, %v735_v0 }
 0x15f   : > { %942 = vmatmul.f32.vlgmr.msra.gmra.mxu3 %v3302_v2  ;;  %962 = vmatmul.f32.vlgmr.msra.gmra.mxu0 %v3302_v2 }
 0x160   : > { %3890 = vst [vmem:[#allocation40_spill] sm:$0xff] %v3306_v9  ;;  %982 = vmatmul.f32.vlgmr.msra.gmra.mxu1 %v3302_v2  ;;  %1190 = vmatpush.msra.mxu3 %v2841_v47 }
 0x161   : > { %1262 = vmatpush.msra.mxu0 %v2835_v45  ;;  %1282 = vmatpush.msra.mxu1 %v2838_v46  ;;  %v737_v62 = vpop.f32.mrf.mxu0 }
 0x162   : > { %1191 = vmatpush.msra.mxu3 %v2832_v44  ;;  %v738_v51 = vadd.f32 %v737_v62, %v3286_v54  ;;  %v3905_v62 = vld [vmem:[#allocation21_spill] sm:$0xff] }
 0x163   : > { %1263 = vmatpush.msra.mxu0 %v2826_v42  ;;  %1283 = vmatpush.msra.mxu1 %v2829_v43 }
 0x164   : > { %1192 = vmatpush.msra.mxu3 %v2823_v41 }
 0x165   : > { %1264 = vmatpush.msra.mxu0 %v2817_v39  ;;  %1284 = vmatpush.msra.mxu1 %v2820_v40  ;;  %v778_v61 = vpop.f32.mrf.mxu1 }
 0x166   : > { %1193 = vmatpush.msra.mxu3 %v2810_v38  ;;  %v3320_v1 = vadd.f32 %v778_v61, %v738_v51 }
 0x167   : > { %1265 = vmatpush.msra.mxu0 %v2804_v36  ;;  %1285 = vmatpush.msra.mxu1 %v2807_v37 }
 0x168   : > { %3891 = vst [vmem:[#allocation41_spill] sm:$0xff] %v3320_v1  ;;  %1194 = vmatpush.msra.mxu3 %v2801_v35 }
 0x169   : > { %1266 = vmatpush.msra.mxu0 %v2795_v33  ;;  %1286 = vmatpush.msra.mxu1 %v2798_v34  ;;  %v740_v56 = vpop.f32.mrf.mxu0 }
 0x16a   : > { %1195 = vmatpush.msra.mxu3 %v2792_v32  ;;  %v741_v7 = vadd.f32 %v740_v56, %v3286_v54 }
 0x16b   : > { %1267 = vmatpush.msra.mxu0 %v2786_v30  ;;  %1287 = vmatpush.msra.mxu1 %v2789_v31 }
 0x16c   : > { %1196 = vmatpush.msra.mxu3 %v2783_v29 }
 0x16d   : > { %1268 = vmatpush.msra.mxu0 %v2777_v27  ;;  %1288 = vmatpush.msra.mxu1 %v2780_v28  ;;  %v781_v4 = vpop.f32.mrf.mxu1 }
 0x16e   : > { %1197 = vmatpush.msra.mxu3 %v2774_v26  ;;  %v3335_v58 = vadd.f32 %v781_v4, %v741_v7  ;;  %v3906_v7 = vld [vmem:[#allocation23_spill] sm:$0xff] }
 0x16f   : > { %1269 = vmatpush.msra.mxu0 %v2768_v24  ;;  %1289 = vmatpush.msra.mxu1 %v2771_v25 }
 0x170   : > { %3892 = vst [vmem:[#allocation42_spill] sm:$0xff] %v3335_v58  ;;  %1198 = vmatpush.msra.mxu3 %v2765_v23 }
 0x171   : > { %1270 = vmatpush.msra.mxu0 %v2759_v21  ;;  %1290 = vmatpush.msra.mxu1 %v2762_v22  ;;  %v3363_v0 = vpop.f32.mrf.mxu0 }
 0x172   : > { %1199 = vmatpush.msra.mxu3 %v2756_v20  ;;  %3904 = vst [vmem:[#allocation43_spill] sm:$0xff] %v3363_v0 }
 0x173   : > { %1271 = vmatpush.msra.mxu0 %v2750_v18  ;;  %1291 = vmatpush.msra.mxu1 %v2753_v19 }
 0x174   : > { %1200 = vmatpush.msra.mxu3 %v2747_v17 }
 0x175   : > { %1272 = vmatpush.msra.mxu0 %v2741_v15  ;;  %1292 = vmatpush.msra.mxu1 %v2744_v16 }
 0x176   : > { %1201 = vmatpush.msra.mxu3 %v2738_v14 }
 0x177   : > { %1273 = vmatpush.msra.mxu0 %v2732_v12  ;;  %1293 = vmatpush.msra.mxu1 %v2735_v13 }
 0x178   : > { %1202 = vmatpush.msra.mxu3 %v2729_v11 }
 0x179   : > { %1274 = vmatpush.msra.mxu0 %v3893_v49  ;;  %1294 = vmatpush.msra.mxu1 %v3894_v55 }
 0x17a   : > { %1203 = vmatpush.msra.mxu3 %v3895_v5 }
 0x17b   : > { %1275 = vmatpush.msra.mxu0 %v3896_v8  ;;  %1295 = vmatpush.msra.mxu1 %v3897_v52 }
 0x17c   : > { %1204 = vmatpush.msra.mxu3 %v3898_v6  ;;  %v3908_v6 = vld [vmem:[#allocation36_spill] sm:$0xff] }
 0x17d   : > { %1276 = vmatpush.msra.mxu0 %v3899_v60  ;;  %1296 = vmatpush.msra.mxu1 %v3900_v10 }
 0x17e   : > { %1205 = vmatpush.msra.mxu3 %v3901_v53 }
 0x17f   : > { %1277 = vmatpush.msra.mxu0 %v3902_v3  ;;  %1297 = vmatpush.msra.mxu1 %v3903_v63  ;;  %v3367_v63 = vpop.f32.mrf.mxu1 }
 0x180   : > { %3907 = vst [vmem:[#allocation21_spill] sm:$0xff] %v3367_v63 }
 0x1dc   : > { %v963_v50 = vpop.f32.mrf.mxu0 }
 0x1dd   : > { %v1006_v51 = vadd.f32 %v963_v50, %v3905_v62 }
 0x1df   : > { %v2255_v61 = vmul.f32 -1.442695, %v1006_v51 }
 0x1e1   : > { %2342 = vpow2.f32 %v2255_v61 }
 0x1e2   : > { %v943_v56 = vpop.f32.mrf.mxu3 }
 0x1e3   : > { %v986_v4 = vadd.f32 %v943_v56, %v3906_v7 }
 0x1e5   : > { %v2254_v54 = vmul.f32 -1.442695, %v986_v4  ;;  %v983_v4 = vpop.f32.mrf.mxu1 }
 0x1e7   : > { %v2343_v58 = vpop.eup %2342  ;;  %2344 = vpow2.f32 %v2254_v54 }
 0x1e8   : > { %v1010_v1 = vadd.f32 1.0, %v2343_v58 }
 0x1ea   : > { %2346 = vrcp.f32 %v1010_v1  ;;  %v1022_v52 = vand.u32 2147483648, %v1010_v1  ;;  %vm1016_vm13 = vweird.f32 %v1010_v1  ;;  %v1020_v8 = vand.u32 2147483647, %v1010_v1 }
 0x1ec   : > { %vm1021_vm15 = vcmp.eq.f32.partialorder %v1020_v8, 8.507059e+37  ;;  %v3913_v8 = vld [vmem:[#allocation12_spill] sm:$0xff] }
 0x1ed   : > { %v2345_v9 = vpop.eup %2344 }
 0x1ee   : > { %v990_v57 = vadd.f32 1.0, %v2345_v9  ;;  %v1026_v9 = vadd.f32 %v3887_v48, %v983_v4 }
 0x1f0   : > { %2348 = vrcp.f32 %v990_v57  ;;  %v2347_v59 = vpop.eup %2346  ;;  %v1002_v51 = vand.u32 2147483648, %v990_v57  ;;  %v1000_v56 = vand.u32 2147483647, %v990_v57  ;;  %vm996_vm9 = vweird.f32 %v990_v57 }
 0x1f1   : > { %v1012_v0 = vmul.f32 %v2347_v59, %v1010_v1  ;;  %vm1017_vm12 = vweird.f32 %v2347_v59  ;;  %v3912_v1 = vld [vmem:[#allocation14_spill] sm:$0xff] }
 0x1f2   : > { %v1003_v58 = vor.u32 1.1754944e-38, %v1002_v51  ;;  %vm1001_vm11 = vcmp.eq.f32.partialorder %v1000_v56, 8.507059e+37  ;;  %vm1018_vm14 = vmor %vm1016_vm13, %vm1017_vm12 }
 0x1f3   : > { %v1013_v50 = vsub.f32 1.0, %v1012_v0  ;;  %v3909_v0 = vld [vmem:[#allocation37_spill] sm:$0xff] }
 0x1f5   : > { %v1014_v7 = vmul.f32 %v2347_v59, %v1013_v50 }
 0x1f6   : > { %v2349_v3 = vpop.eup %2348 }
 0x1f7   : > { %v992_v53 = vmul.f32 %v2349_v3, %v990_v57  ;;  %vm997_vm8 = vweird.f32 %v2349_v3  ;;  %v1015_v60 = vadd.f32 %v2347_v59, %v1014_v7  ;;  %v1023_v57 = vor.u32 1.1754944e-38, %v1022_v52  ;;  %v3914_v52 = vld [vmem:[#allocation13_spill] sm:$0xff] }
 0x1f8   : > { %vm998_vm10 = vmor %vm996_vm9, %vm997_vm8 }
 0x1f9   : > { %v993_v62 = vsub.f32 1.0, %v992_v53  ;;  %v767_v53 = vadd.f32 %v3909_v0, %v3908_v6  ;;  %v3915_v6 = vld [vmem:[#allocation11_spill] sm:$0xff] }
 0x1fb   : > { %v994_v61 = vmul.f32 %v2349_v3, %v993_v62 }
 0x1fd   : > { %v995_v54 = vadd.f32 %v2349_v3, %v994_v61  ;;  %v1019_v61 = vsel %vm1018_vm14, %v2347_v59, %v1015_v60  ;;  %v3910_v59 = vld [vmem:[#allocation15_spill] sm:$0xff]  ;;  %v3916_v60 = vld [vmem:[#allocation9_spill] sm:$0xff] }
 0x1fe   : > { %v1024_v51 = vsel %vm1021_vm15, %v1023_v57, %v1019_v61 }
 0x1ff   : > { %v999_v10 = vsel %vm998_vm10, %v2349_v3, %v995_v54  ;;  %v1030_v4 = vsub.f32 1.0, %v1024_v51 }
 0x200   : > { %v1004_v63 = vsel %vm1001_vm11, %v1003_v58, %v999_v10  ;;  %v1032_v10 = vmul.f32 %v1024_v51, %v3302_v2  ;;  %v3911_v2 = vld [vmem:[#allocation16_spill] sm:$0xff] }
 0x201   : > { %v1027_v62 = vmul.f32 %v1026_v9, %v1004_v63  ;;  %v3917_v63 = vld [vmem:[#allocation10_spill] sm:$0xff]  ;;  %v3918_v9 = vld [vmem:[#allocation25_spill] sm:$0xff] }
 0x203   : > { %v1028_v50 = vadd.f32 %v1027_v62, %v767_v53  ;;  %v3919_v53 = vld [vmem:[#allocation22_spill] sm:$0xff] }
 0x205   : > { %2350 = vtanh.f32 %v1028_v50 }
 0x20b   : > { %v2351_v3 = vpop.eup %2350 }
 0x20c   : > { %v1031_v56 = vmul.f32 %v2351_v3, %v1030_v4 }
 0x20e   : > { %v3373_v7 = vadd.f32 %v1032_v10, %v1031_v56 }
 0x210   : > { %1054 = vmatmul.f32.vlgmr.msrb.gmra.mxu2 %v3373_v7  ;;  %1074 = vmatmul.f32.vlgmr.msrb.gmra.mxu3 %v3373_v7 }
 0x211   : > { %1094 = vmatmul.f32.vlgmr.msrb.gmra.mxu0 %v3373_v7  ;;  %1302 = vmatpush.msrb.mxu2 %v2841_v47 }
 0x212   : > { %1374 = vmatpush.msrb.mxu3 %v2835_v45  ;;  %1394 = vmatpush.msrb.mxu0 %v2838_v46 }
 0x213   : > { %1303 = vmatpush.msrb.mxu2 %v2832_v44 }
 0x214   : > { %1375 = vmatpush.msrb.mxu3 %v2826_v42  ;;  %1395 = vmatpush.msrb.mxu0 %v2829_v43 }
 0x215   : > { %1304 = vmatpush.msrb.mxu2 %v2823_v41 }
 0x216   : > { %1376 = vmatpush.msrb.mxu3 %v2817_v39  ;;  %1396 = vmatpush.msrb.mxu0 %v2820_v40 }
 0x217   : > { %1305 = vmatpush.msrb.mxu2 %v2810_v38 }
 0x218   : > { %1377 = vmatpush.msrb.mxu3 %v2804_v36  ;;  %1397 = vmatpush.msrb.mxu0 %v2807_v37 }
 0x219   : > { %1306 = vmatpush.msrb.mxu2 %v2801_v35 }
 0x21a   : > { %1378 = vmatpush.msrb.mxu3 %v2795_v33  ;;  %1398 = vmatpush.msrb.mxu0 %v2798_v34 }
 0x21b   : > { %1307 = vmatpush.msrb.mxu2 %v2792_v32 }
 0x21c   : > { %1379 = vmatpush.msrb.mxu3 %v2786_v30  ;;  %1399 = vmatpush.msrb.mxu0 %v2789_v31 }
 0x21d   : > { %1308 = vmatpush.msrb.mxu2 %v2783_v29 }
 0x21e   : > { %1380 = vmatpush.msrb.mxu3 %v2777_v27  ;;  %1400 = vmatpush.msrb.mxu0 %v2780_v28 }
 0x21f   : > { %1309 = vmatpush.msrb.mxu2 %v2774_v26 }
 0x220   : > { %1381 = vmatpush.msrb.mxu3 %v2768_v24  ;;  %1401 = vmatpush.msrb.mxu0 %v2771_v25 }
 0x221   : > { %1310 = vmatpush.msrb.mxu2 %v2765_v23 }
 0x222   : > { %1382 = vmatpush.msrb.mxu3 %v2759_v21  ;;  %1402 = vmatpush.msrb.mxu0 %v2762_v22 }
 0x223   : > { %1311 = vmatpush.msrb.mxu2 %v2756_v20 }
 0x224   : > { %1383 = vmatpush.msrb.mxu3 %v2750_v18  ;;  %1403 = vmatpush.msrb.mxu0 %v2753_v19 }
 0x225   : > { %1312 = vmatpush.msrb.mxu2 %v2747_v17 }
 0x226   : > { %1384 = vmatpush.msrb.mxu3 %v2741_v15  ;;  %1404 = vmatpush.msrb.mxu0 %v2744_v16 }
 0x227   : > { %1313 = vmatpush.msrb.mxu2 %v2738_v14 }
 0x228   : > { %1385 = vmatpush.msrb.mxu3 %v2732_v12  ;;  %1405 = vmatpush.msrb.mxu0 %v2735_v13 }
 0x229   : > { %1314 = vmatpush.msrb.mxu2 %v2729_v11 }
 0x22a   : > { %1386 = vmatpush.msrb.mxu3 %v3893_v49  ;;  %1406 = vmatpush.msrb.mxu0 %v3894_v55 }
 0x22b   : > { %1315 = vmatpush.msrb.mxu2 %v3895_v5 }
 0x22c   : > { %1387 = vmatpush.msrb.mxu3 %v3910_v59  ;;  %1407 = vmatpush.msrb.mxu0 %v3911_v2 }
 0x22d   : > { %1316 = vmatpush.msrb.mxu2 %v3912_v1 }
 0x22e   : > { %1388 = vmatpush.msrb.mxu3 %v3913_v8  ;;  %1408 = vmatpush.msrb.mxu0 %v3914_v52 }
 0x22f   : > { %1317 = vmatpush.msrb.mxu2 %v3915_v6 }
 0x230   : > { %1389 = vmatpush.msrb.mxu3 %v3916_v60  ;;  %1409 = vmatpush.msrb.mxu0 %v3917_v63 }
 0x293   : > { %v1055_v54 = vpop.f32.mrf.mxu2  ;;  %v1075_v58 = vpop.f32.mrf.mxu3 }
 0x294   : > { %v1098_v0 = vadd.f32 %v1055_v54, %v3918_v9  ;;  %v1118_v62 = vadd.f32 %v1075_v58, %v3919_v53  ;;  %v1095_v9 = vpop.f32.mrf.mxu0 }
 0x296   : > { %v2256_v50 = vmul.f32 -1.442695, %v1098_v0  ;;  %v2257_v61 = vmul.f32 -1.442695, %v1118_v62 }
 0x298   : > { %2352 = vpow2.f32 %v2256_v50  ;;  %v1138_v50 = vadd.f32 %v3887_v48, %v1095_v9 }
 0x299   : > { %2354 = vpow2.f32 %v2257_v61 }
 0x29e   : > { %v2353_v57 = vpop.eup %2352 }
 0x29f   : > { %v2355_v51 = vpop.eup %2354  ;;  %v1102_v4 = vadd.f32 1.0, %v2353_v57 }
 0x2a0   : > { %v1122_v3 = vadd.f32 1.0, %v2355_v51 }
 0x2a1   : > { %2356 = vrcp.f32 %v1102_v4  ;;  %v1114_v52 = vand.u32 2147483648, %v1102_v4  ;;  %v1112_v58 = vand.u32 2147483647, %v1102_v4  ;;  %vm1108_vm1 = vweird.f32 %v1102_v4 }
 0x2a2   : > { %2358 = vrcp.f32 %v1122_v3  ;;  %v1134_v1 = vand.u32 2147483648, %v1122_v3  ;;  %vm1128_vm5 = vweird.f32 %v1122_v3 }
 0x2a3   : > { %v1115_v62 = vor.u32 1.1754944e-38, %v1114_v52  ;;  %vm1113_vm3 = vcmp.eq.f32.partialorder %v1112_v58, 8.507059e+37 }
 0x2a7   : > { %v2357_v56 = vpop.eup %2356 }
 0x2a8   : > { %v2359_v10 = vpop.eup %2358  ;;  %v1104_v60 = vmul.f32 %v2357_v56, %v1102_v4  ;;  %vm1109_vm0 = vweird.f32 %v2357_v56 }
 0x2a9   : > { %v1124_v63 = vmul.f32 %v2359_v10, %v1122_v3  ;;  %vm1110_vm2 = vmor %vm1108_vm1, %vm1109_vm0  ;;  %vm1129_vm4 = vweird.f32 %v2359_v10 }
 0x2aa   : > { %v1105_v6 = vsub.f32 1.0, %v1104_v60  ;;  %vm1130_vm6 = vmor %vm1128_vm5, %vm1129_vm4 }
 0x2ab   : > { %v1125_v8 = vsub.f32 1.0, %v1124_v63  ;;  %v1132_v63 = vand.u32 2147483647, %v1122_v3  ;;  %v3925_v3 = vld [vmem:[#allocation13_spill] sm:$0xff] }
 0x2ac   : > { %v1106_v54 = vmul.f32 %v2357_v56, %v1105_v6  ;;  %v3920_v6 = vld [vmem:[#allocation38_spill] sm:$0xff] }
 0x2ad   : > { %v1126_v0 = vmul.f32 %v2359_v10, %v1125_v8  ;;  %v1135_v8 = vor.u32 1.1754944e-38, %v1134_v1  ;;  %vm1133_vm7 = vcmp.eq.f32.partialorder %v1132_v63, 8.507059e+37  ;;  %v3924_v1 = vld [vmem:[#allocation12_spill] sm:$0xff] }
 0x2ae   : > { %v1107_v53 = vadd.f32 %v2357_v56, %v1106_v54 }
 0x2af   : > { %v1127_v51 = vadd.f32 %v2359_v10, %v1126_v0  ;;  %v3927_v0 = vld [vmem:[#allocation9_spill] sm:$0xff] }
 0x2b0   : > { %v1111_v61 = vsel %vm1110_vm2, %v2357_v56, %v1107_v53  ;;  %v3928_v53 = vld [vmem:[#allocation10_spill] sm:$0xff] }
 0x2b1   : > { %v1116_v57 = vsel %vm1113_vm3, %v1115_v62, %v1111_v61  ;;  %v1131_v59 = vsel %vm1130_vm6, %v2359_v10, %v1127_v51  ;;  %v3926_v10 = vld [vmem:[#allocation11_spill] sm:$0xff] }
 0x2b2   : > { %v1139_v60 = vmul.f32 %v1138_v50, %v1116_v57  ;;  %v1136_v4 = vsel %vm1133_vm7, %v1135_v8, %v1131_v59  ;;  %v3922_v59 = vld [vmem:[#allocation16_spill] sm:$0xff]  ;;  %v3929_v50 = vld [vmem:[#allocation27_spill] sm:$0xff] }
 0x2b3   : > { %v1142_v52 = vsub.f32 1.0, %v1136_v4  ;;  %v1144_v56 = vmul.f32 %v1136_v4, %v3373_v7  ;;  %v3921_v7 = vld [vmem:[#allocation15_spill] sm:$0xff] }
 0x2b4   : > { %v1140_v2 = vadd.f32 %v1139_v60, %v3920_v6  ;;  %v3930_v60 = vld [vmem:[#allocation24_spill] sm:$0xff] }
 0x2b6   : > { %2360 = vtanh.f32 %v1140_v2  ;;  %v3923_v2 = vld [vmem:[#allocation14_spill] sm:$0xff] }
 0x2bc   : > { %v2361_v54 = vpop.eup %2360 }
 0x2bd   : > { %v1143_v9 = vmul.f32 %v2361_v54, %v1142_v52 }
 0x2bf   : > { %v3431_v58 = vadd.f32 %v1144_v56, %v1143_v9 }
 0x2c1   : > { %1166 = vmatmul.f32.vlgmr.msrb.gmra.mxu1 %v3431_v58  ;;  %1186 = vmatmul.f32.vlgmr.msra.gmra.mxu2 %v3431_v58 }
 0x2c2   : > { %1206 = vmatmul.f32.vlgmr.msra.gmra.mxu3 %v3431_v58  ;;  %1414 = vmatpush.msrb.mxu1 %v2841_v47 }
 0x2c3   : > { %1486 = vmatpush.msra.mxu2 %v2835_v45  ;;  %1506 = vmatpush.msra.mxu3 %v2838_v46 }
 0x2c4   : > { %1415 = vmatpush.msrb.mxu1 %v2832_v44 }
 0x2c5   : > { %1487 = vmatpush.msra.mxu2 %v2826_v42  ;;  %1507 = vmatpush.msra.mxu3 %v2829_v43 }
 0x2c6   : > { %1416 = vmatpush.msrb.mxu1 %v2823_v41 }
 0x2c7   : > { %1488 = vmatpush.msra.mxu2 %v2817_v39  ;;  %1508 = vmatpush.msra.mxu3 %v2820_v40 }
 0x2c8   : > { %1417 = vmatpush.msrb.mxu1 %v2810_v38 }
 0x2c9   : > { %1489 = vmatpush.msra.mxu2 %v2804_v36  ;;  %1509 = vmatpush.msra.mxu3 %v2807_v37 }
 0x2ca   : > { %1418 = vmatpush.msrb.mxu1 %v2801_v35 }
 0x2cb   : > { %1490 = vmatpush.msra.mxu2 %v2795_v33  ;;  %1510 = vmatpush.msra.mxu3 %v2798_v34 }
 0x2cc   : > { %1419 = vmatpush.msrb.mxu1 %v2792_v32 }
 0x2cd   : > { %1491 = vmatpush.msra.mxu2 %v2786_v30  ;;  %1511 = vmatpush.msra.mxu3 %v2789_v31 }
 0x2ce   : > { %1420 = vmatpush.msrb.mxu1 %v2783_v29 }
 0x2cf   : > { %1492 = vmatpush.msra.mxu2 %v2777_v27  ;;  %1512 = vmatpush.msra.mxu3 %v2780_v28 }
 0x2d0   : > { %1421 = vmatpush.msrb.mxu1 %v2774_v26 }
 0x2d1   : > { %1493 = vmatpush.msra.mxu2 %v2768_v24  ;;  %1513 = vmatpush.msra.mxu3 %v2771_v25 }
 0x2d2   : > { %1422 = vmatpush.msrb.mxu1 %v2765_v23 }
 0x2d3   : > { %1494 = vmatpush.msra.mxu2 %v2759_v21  ;;  %1514 = vmatpush.msra.mxu3 %v2762_v22 }
 0x2d4   : > { %1423 = vmatpush.msrb.mxu1 %v2756_v20 }
 0x2d5   : > { %1495 = vmatpush.msra.mxu2 %v2750_v18  ;;  %1515 = vmatpush.msra.mxu3 %v2753_v19 }
 0x2d6   : > { %1424 = vmatpush.msrb.mxu1 %v2747_v17 }
 0x2d7   : > { %1496 = vmatpush.msra.mxu2 %v2741_v15  ;;  %1516 = vmatpush.msra.mxu3 %v2744_v16 }
 0x2d8   : > { %1425 = vmatpush.msrb.mxu1 %v2738_v14 }
 0x2d9   : > { %1497 = vmatpush.msra.mxu2 %v2732_v12  ;;  %1517 = vmatpush.msra.mxu3 %v2735_v13 }
 0x2da   : > { %1426 = vmatpush.msrb.mxu1 %v2729_v11 }
 0x2db   : > { %1498 = vmatpush.msra.mxu2 %v3893_v49  ;;  %1518 = vmatpush.msra.mxu3 %v3894_v55 }
 0x2dc   : > { %1427 = vmatpush.msrb.mxu1 %v3895_v5 }
 0x2dd   : > { %1499 = vmatpush.msra.mxu2 %v3921_v7  ;;  %1519 = vmatpush.msra.mxu3 %v3922_v59 }
 0x2de   : > { %1428 = vmatpush.msrb.mxu1 %v3923_v2  ;;  %v3931_v2 = vld [vmem:[#allocation39_spill] sm:$0xff] }
 0x2df   : > { %1500 = vmatpush.msra.mxu2 %v3924_v1  ;;  %1520 = vmatpush.msra.mxu3 %v3925_v3 }
 0x2e0   : > { %1429 = vmatpush.msrb.mxu1 %v3926_v10 }
 0x2e1   : > { %1501 = vmatpush.msra.mxu2 %v3927_v0  ;;  %1521 = vmatpush.msra.mxu3 %v3928_v53 }
 0x33e   : > { %v1167_v62 = vpop.f32.mrf.mxu1 }
 0x33f   : > { %v1210_v61 = vadd.f32 %v1167_v62, %v3929_v50 }
 0x341   : > { %v2258_v57 = vmul.f32 -1.442695, %v1210_v61 }
 0x343   : > { %2362 = vpow2.f32 %v2258_v57 }
 0x344   : > { %v1187_v51 = vpop.f32.mrf.mxu2 }
 0x345   : > { %v1230_v63 = vadd.f32 %v1187_v51, %v3930_v60  ;;  %v1207_v61 = vpop.f32.mrf.mxu3 }
 0x347   : > { %v2259_v6 = vmul.f32 -1.442695, %v1230_v63 }
 0x349   : > { %v2363_v8 = vpop.eup %2362  ;;  %2364 = vpow2.f32 %v2259_v6  ;;  %v1250_v6 = vadd.f32 %v3887_v48, %v1207_v61 }
 0x34a   : > { %v1214_v4 = vadd.f32 1.0, %v2363_v8 }
 0x34c   : > { %2366 = vrcp.f32 %v1214_v4  ;;  %v1226_v53 = vand.u32 2147483648, %v1214_v4  ;;  %v1224_v62 = vand.u32 2147483647, %v1214_v4  ;;  %vm1220_vm9 = vweird.f32 %v1214_v4 }
 0x34e   : > { %v1227_v51 = vor.u32 1.1754944e-38, %v1226_v53  ;;  %vm1225_vm11 = vcmp.eq.f32.partialorder %v1224_v62, 8.507059e+37 }
 0x34f   : > { %v2365_v52 = vpop.eup %2364 }
 0x350   : > { %v1234_v54 = vadd.f32 1.0, %v2365_v52 }
 0x352   : > { %v2367_v9 = vpop.eup %2366  ;;  %2368 = vrcp.f32 %v1234_v54  ;;  %vm1240_vm13 = vweird.f32 %v1234_v54 }
 0x353   : > { %v1216_v56 = vmul.f32 %v2367_v9, %v1214_v4  ;;  %vm1221_vm8 = vweird.f32 %v2367_v9 }
 0x354   : > { %vm1222_vm10 = vmor %vm1220_vm9, %vm1221_vm8 }
 0x355   : > { %v1217_v0 = vsub.f32 1.0, %v1216_v56  ;;  %v1246_v56 = vand.u32 2147483648, %v1234_v54 }
 0x357   : > { %v1218_v10 = vmul.f32 %v2367_v9, %v1217_v0  ;;  %v1244_v0 = vand.u32 2147483647, %v1234_v54  ;;  %v1247_v4 = vor.u32 1.1754944e-38, %v1246_v56 }
 0x358   : > { %v2369_v50 = vpop.eup %2368 }
 0x359   : > { %v1236_v57 = vmul.f32 %v2369_v50, %v1234_v54  ;;  %v1219_v3 = vadd.f32 %v2367_v9, %v1218_v10  ;;  %vm1241_vm12 = vweird.f32 %v2369_v50  ;;  %vm1245_vm15 = vcmp.eq.f32.partialorder %v1244_v0, 8.507059e+37  ;;  %v3937_v54 = vld [vmem:[#allocation11_spill] sm:$0xff] }
 0x35a   : > { %vm1242_vm14 = vmor %vm1240_vm13, %vm1241_vm12 }
 0x35b   : > { %v1237_v60 = vsub.f32 1.0, %v1236_v57  ;;  %v1223_v63 = vsel %vm1222_vm10, %v2367_v9, %v1219_v3 }
 0x35c   : > { %v1228_v8 = vsel %vm1225_vm11, %v1227_v51, %v1223_v63  ;;  %v3939_v51 = vld [vmem:[#allocation10_spill] sm:$0xff] }
 0x35d   : > { %v1238_v52 = vmul.f32 %v2369_v50, %v1237_v60  ;;  %v1251_v1 = vmul.f32 %v1250_v6, %v1228_v8  ;;  %v3940_v60 = vld [vmem:[#allocation29_spill] sm:$0xff]  ;;  %v3941_v6 = vld [vmem:[#allocation26_spill] sm:$0xff] }
 0x35f   : > { %v1252_v59 = vadd.f32 %v1251_v1, %v3931_v2  ;;  %v1239_v7 = vadd.f32 %v2369_v50, %v1238_v52  ;;  %v3935_v2 = vld [vmem:[#allocation12_spill] sm:$0xff]  ;;  %v3936_v1 = vld [vmem:[#allocation13_spill] sm:$0xff] }
 0x361   : > { %2370 = vtanh.f32 %v1252_v59  ;;  %v1243_v10 = vsel %vm1242_vm14, %v2369_v50, %v1239_v7  ;;  %v3933_v7 = vld [vmem:[#allocation16_spill] sm:$0xff]  ;;  %v3934_v59 = vld [vmem:[#allocation14_spill] sm:$0xff]  ;;  %v3938_v50 = vld [vmem:[#allocation9_spill] sm:$0xff] }
 0x362   : > { %v1248_v53 = vsel %vm1245_vm15, %v1247_v4, %v1243_v10 }
 0x363   : > { %v1254_v3 = vsub.f32 1.0, %v1248_v53  ;;  %v1256_v61 = vmul.f32 %v1248_v53, %v3431_v58  ;;  %v3932_v58 = vld [vmem:[#allocation15_spill] sm:$0xff] }
 0x367   : > { %v2371_v9 = vpop.eup %2370 }
 0x368   : > { %v1255_v62 = vmul.f32 %v2371_v9, %v1254_v3 }
 0x36a   : > { %v3489_v57 = vadd.f32 %v1256_v61, %v1255_v62 }
 0x36c   : > { %1278 = vmatmul.f32.vlgmr.msra.gmra.mxu0 %v3489_v57  ;;  %1298 = vmatmul.f32.vlgmr.msra.gmra.mxu1 %v3489_v57 }
 0x36d   : > { %1318 = vmatmul.f32.vlgmr.msrb.gmra.mxu2 %v3489_v57  ;;  %1526 = vmatpush.msra.mxu0 %v2841_v47 }
 0x36e   : > { %1598 = vmatpush.msra.mxu1 %v2835_v45  ;;  %1618 = vmatpush.msrb.mxu2 %v2838_v46 }
 0x36f   : > { %1527 = vmatpush.msra.mxu0 %v2832_v44 }
 0x370   : > { %1599 = vmatpush.msra.mxu1 %v2826_v42  ;;  %1619 = vmatpush.msrb.mxu2 %v2829_v43 }
 0x371   : > { %1528 = vmatpush.msra.mxu0 %v2823_v41 }
 0x372   : > { %1600 = vmatpush.msra.mxu1 %v2817_v39  ;;  %1620 = vmatpush.msrb.mxu2 %v2820_v40 }
 0x373   : > { %1529 = vmatpush.msra.mxu0 %v2810_v38 }
 0x374   : > { %1601 = vmatpush.msra.mxu1 %v2804_v36  ;;  %1621 = vmatpush.msrb.mxu2 %v2807_v37 }
 0x375   : > { %1530 = vmatpush.msra.mxu0 %v2801_v35 }
 0x376   : > { %1602 = vmatpush.msra.mxu1 %v2795_v33  ;;  %1622 = vmatpush.msrb.mxu2 %v2798_v34 }
 0x377   : > { %1531 = vmatpush.msra.mxu0 %v2792_v32 }
 0x378   : > { %1603 = vmatpush.msra.mxu1 %v2786_v30  ;;  %1623 = vmatpush.msrb.mxu2 %v2789_v31 }
 0x379   : > { %1532 = vmatpush.msra.mxu0 %v2783_v29 }
 0x37a   : > { %1604 = vmatpush.msra.mxu1 %v2777_v27  ;;  %1624 = vmatpush.msrb.mxu2 %v2780_v28 }
 0x37b   : > { %1533 = vmatpush.msra.mxu0 %v2774_v26 }
 0x37c   : > { %1605 = vmatpush.msra.mxu1 %v2768_v24  ;;  %1625 = vmatpush.msrb.mxu2 %v2771_v25 }
 0x37d   : > { %1534 = vmatpush.msra.mxu0 %v2765_v23 }
 0x37e   : > { %1606 = vmatpush.msra.mxu1 %v2759_v21  ;;  %1626 = vmatpush.msrb.mxu2 %v2762_v22 }
 0x37f   : > { %1535 = vmatpush.msra.mxu0 %v2756_v20 }
 0x380   : > { %1607 = vmatpush.msra.mxu1 %v2750_v18  ;;  %1627 = vmatpush.msrb.mxu2 %v2753_v19 }
 0x381   : > { %1536 = vmatpush.msra.mxu0 %v2747_v17 }
 0x382   : > { %1608 = vmatpush.msra.mxu1 %v2741_v15  ;;  %1628 = vmatpush.msrb.mxu2 %v2744_v16 }
 0x383   : > { %1537 = vmatpush.msra.mxu0 %v2738_v14 }
 0x384   : > { %1609 = vmatpush.msra.mxu1 %v2732_v12  ;;  %1629 = vmatpush.msrb.mxu2 %v2735_v13 }
 0x385   : > { %1538 = vmatpush.msra.mxu0 %v2729_v11 }
 0x386   : > { %1610 = vmatpush.msra.mxu1 %v3893_v49  ;;  %1630 = vmatpush.msrb.mxu2 %v3894_v55 }
 0x387   : > { %1539 = vmatpush.msra.mxu0 %v3895_v5 }
 0x388   : > { %1611 = vmatpush.msra.mxu1 %v3932_v58  ;;  %1631 = vmatpush.msrb.mxu2 %v3933_v7 }
 0x389   : > { %1540 = vmatpush.msra.mxu0 %v3934_v59 }
 0x38a   : > { %1612 = vmatpush.msra.mxu1 %v3935_v2  ;;  %1632 = vmatpush.msrb.mxu2 %v3936_v1 }
 0x38b   : > { %1541 = vmatpush.msra.mxu0 %v3937_v54 }
 0x38c   : > { %1613 = vmatpush.msra.mxu1 %v3938_v50  ;;  %1633 = vmatpush.msrb.mxu2 %v3939_v51 }
 0x3e9   : > { %v1279_v49 = vpop.f32.mrf.mxu0  ;;  %v1299_v55 = vpop.f32.mrf.mxu1 }
 0x3ea   : > { %v1322_v63 = vadd.f32 %v1279_v49, %v3940_v60  ;;  %v1342_v8 = vadd.f32 %v1299_v55, %v3941_v6 }
 0x3ec   : > { %v2260_v52 = vmul.f32 -1.442695, %v1322_v63  ;;  %v2261_v56 = vmul.f32 -1.442695, %v1342_v8 }
 0x3ee   : > { %2372 = vpow2.f32 %v2260_v52 }
 0x3ef   : > { %2374 = vpow2.f32 %v2261_v56 }
 0x3f0   : > { %v1319_v49 = vpop.f32.mrf.mxu2 }
 0x3f1   : > { %v1362_v6 = vadd.f32 %v3887_v48, %v1319_v49 }
 0x3f4   : > { %v2373_v0 = vpop.eup %2372 }
 0x3f5   : > { %v2375_v10 = vpop.eup %2374  ;;  %v1326_v4 = vadd.f32 1.0, %v2373_v0 }
 0x3f6   : > { %v1346_v53 = vadd.f32 1.0, %v2375_v10 }
 0x3f7   : > { %2376 = vrcp.f32 %v1326_v4  ;;  %v1338_v2 = vand.u32 2147483648, %v1326_v4  ;;  %v1336_v50 = vand.u32 2147483647, %v1326_v4  ;;  %vm1332_vm1 = vweird.f32 %v1326_v4 }
 0x3f8   : > { %2378 = vrcp.f32 %v1346_v53  ;;  %v1358_v0 = vand.u32 2147483648, %v1346_v53  ;;  %vm1352_vm5 = vweird.f32 %v1346_v53  ;;  %v1356_v10 = vand.u32 2147483647, %v1346_v53 }
 0x3f9   : > { %v1339_v60 = vor.u32 1.1754944e-38, %v1338_v2  ;;  %vm1337_vm3 = vcmp.eq.f32.partialorder %v1336_v50, 8.507059e+37 }
 0x3fa   : > { %vm1357_vm7 = vcmp.eq.f32.partialorder %v1356_v10, 8.507059e+37 }
 0x3fd   : > { %v2377_v3 = vpop.eup %2376 }
 0x3fe   : > { %v2379_v9 = vpop.eup %2378  ;;  %v1328_v62 = vmul.f32 %v2377_v3, %v1326_v4  ;;  %vm1333_vm0 = vweird.f32 %v2377_v3 }
 0x3ff   : > { %v1348_v61 = vmul.f32 %v2379_v9, %v1346_v53  ;;  %vm1334_vm2 = vmor %vm1332_vm1, %vm1333_vm0  ;;  %vm1353_vm4 = vweird.f32 %v2379_v9  ;;  %v3943_v53 = vld [vmem:[#allocation28_spill] sm:$0xff] }
 0x400   : > { %v1329_v58 = vsub.f32 1.0, %v1328_v62  ;;  %v3942_v62 = vld [vmem:[#allocation40_spill] sm:$0xff]  ;;  %vm1354_vm6 = vmor %vm1352_vm5, %vm1353_vm4 }
 0x401   : > { %v1349_v7 = vsub.f32 1.0, %v1348_v61 }
 0x402   : > { %v1330_v1 = vmul.f32 %v2377_v3, %v1329_v58 }
 0x403   : > { %v1350_v51 = vmul.f32 %v2379_v9, %v1349_v7  ;;  %v1359_v7 = vor.u32 1.1754944e-38, %v1358_v0 }
 0x404   : > { %v1331_v55 = vadd.f32 %v2377_v3, %v1330_v1 }
 0x405   : > { %v1351_v52 = vadd.f32 %v2379_v9, %v1350_v51 }
 0x406   : > { %v1335_v63 = vsel %vm1334_vm2, %v2377_v3, %v1331_v55 }
 0x407   : > { %v1340_v8 = vsel %vm1337_vm3, %v1339_v60, %v1335_v63  ;;  %v1355_v58 = vsel %vm1354_vm6, %v2379_v9, %v1351_v52  ;;  %v3944_v60 = vld [vmem:[#allocation31_spill] sm:$0xff] }
 0x408   : > { %v1363_v56 = vmul.f32 %v1362_v6, %v1340_v8  ;;  %v1360_v4 = vsel %vm1357_vm7, %v1359_v7, %v1355_v58 }
 0x409   : > { %v1366_v2 = vsub.f32 1.0, %v1360_v4  ;;  %v1368_v50 = vmul.f32 %v1360_v4, %v3489_v57 }
 0x40a   : > { %v1364_v61 = vadd.f32 %v1363_v56, %v3942_v62 }
 0x40c   : > { %2380 = vtanh.f32 %v1364_v61 }
 0x412   : > { %v2381_v3 = vpop.eup %2380 }
 0x413   : > { %v1367_v1 = vmul.f32 %v2381_v3, %v1366_v2 }
 0x415   : > { %v3547_v49 = vadd.f32 %v1368_v50, %v1367_v1 }
 0x417   : > { %1390 = vmatmul.f32.vlgmr.msrb.gmra.mxu3 %v3547_v49  ;;  %1410 = vmatmul.f32.vlgmr.msrb.gmra.mxu0 %v3547_v49 }
 0x418   : > { %1430 = vmatmul.f32.vlgmr.msrb.gmra.mxu1 %v3547_v49  ;;  %1638 = vmatpush.msrb.mxu3 %v2841_v47 }
 0x41a   : > { %1639 = vmatpush.msrb.mxu3 %v2832_v44 }
 0x41c   : > { %1640 = vmatpush.msrb.mxu3 %v2823_v41 }
 0x41e   : > { %1641 = vmatpush.msrb.mxu3 %v2810_v38 }
 0x420   : > { %1642 = vmatpush.msrb.mxu3 %v2801_v35 }
 0x422   : > { %1643 = vmatpush.msrb.mxu3 %v2792_v32 }
 0x424   : > { %1644 = vmatpush.msrb.mxu3 %v2783_v29 }
 0x426   : > { %1645 = vmatpush.msrb.mxu3 %v2774_v26 }
 0x428   : > { %1646 = vmatpush.msrb.mxu3 %v2765_v23 }
 0x42a   : > { %1647 = vmatpush.msrb.mxu3 %v2756_v20 }
 0x42c   : > { %1648 = vmatpush.msrb.mxu3 %v2747_v17 }
 0x42e   : > { %1649 = vmatpush.msrb.mxu3 %v2738_v14 }
 0x430   : > { %1650 = vmatpush.msrb.mxu3 %v2729_v11 }
 0x432   : > { %1651 = vmatpush.msrb.mxu3 %v3895_v5 }
 0x434   : > { %1652 = vmatpush.msrb.mxu3 %v3934_v59 }
 0x436   : > { %1653 = vmatpush.msrb.mxu3 %v3937_v54 }
 0x494   : > { %v1411_v57 = vpop.f32.mrf.mxu0 }
 0x495   : > { %v1454_v9 = vadd.f32 %v1411_v57, %v3943_v53  ;;  %v1431_v3 = vpop.f32.mrf.mxu1 }
 0x496   : > { %v1474_v57 = vadd.f32 %v3887_v48, %v1431_v3  ;;  %v3947_v3 = vld [vmem:[#allocation30_spill] sm:$0xff] }
 0x497   : > { %v2263_v51 = vmul.f32 -1.442695, %v1454_v9 }
 0x499   : > { %2382 = vpow2.f32 %v2263_v51 }
 0x49a   : > { %v1391_v55 = vpop.f32.mrf.mxu3 }
 0x49b   : > { %v1434_v63 = vadd.f32 %v1391_v55, %v3944_v60 }
 0x49d   : > { %v2262_v6 = vmul.f32 -1.442695, %v1434_v63 }
 0x49f   : > { %v2383_v8 = vpop.eup %2382  ;;  %2384 = vpow2.f32 %v2262_v6  ;;  %v3945_v6 = vld [vmem:[#allocation41_spill] sm:$0xff] }
 0x4a0   : > { %v1458_v52 = vadd.f32 1.0, %v2383_v8 }
 0x4a2   : > { %2386 = vrcp.f32 %v1458_v52  ;;  %v1470_v55 = vand.u32 2147483648, %v1458_v52  ;;  %vm1464_vm13 = vweird.f32 %v1458_v52  ;;  %v1468_v63 = vand.u32 2147483647, %v1458_v52 }
 0x4a4   : > { %vm1469_vm15 = vcmp.eq.f32.partialorder %v1468_v63, 8.507059e+37 }
 0x4a5   : > { %v2385_v56 = vpop.eup %2384 }
 0x4a6   : > { %v1438_v0 = vadd.f32 1.0, %v2385_v56 }
 0x4a8   : > { %2388 = vrcp.f32 %v1438_v0  ;;  %v2387_v5 = vpop.eup %2386  ;;  %v1450_v58 = vand.u32 2147483648, %v1438_v0  ;;  %v1448_v4 = vand.u32 2147483647, %v1438_v0  ;;  %vm1444_vm9 = vweird.f32 %v1438_v0 }
 0x4a9   : > { %v1460_v59 = vmul.f32 %v2387_v5, %v1458_v52  ;;  %vm1465_vm12 = vweird.f32 %v2387_v5  ;;  %v3946_v52 = vld [vmem:[#allocation33_spill] sm:$0xff] }
 0x4aa   : > { %v1451_v50 = vor.u32 1.1754944e-38, %v1450_v58  ;;  %vm1449_vm11 = vcmp.eq.f32.partialorder %v1448_v4, 8.507059e+37  ;;  %vm1466_vm14 = vmor %vm1464_vm13, %vm1465_vm12 }
 0x4ab   : > { %v1461_v62 = vsub.f32 1.0, %v1460_v59  ;;  %v1471_v59 = vor.u32 1.1754944e-38, %v1470_v55 }
 0x4ad   : > { %v1462_v2 = vmul.f32 %v2387_v5, %v1461_v62 }
 0x4ae   : > { %v2389_v10 = vpop.eup %2388 }
 0x4af   : > { %v1440_v54 = vmul.f32 %v2389_v10, %v1438_v0  ;;  %vm1445_vm8 = vweird.f32 %v2389_v10  ;;  %v1463_v51 = vadd.f32 %v2387_v5, %v1462_v2 }
 0x4b0   : > { %vm1446_vm10 = vmor %vm1444_vm9, %vm1445_vm8 }
 0x4b1   : > { %v1441_v61 = vsub.f32 1.0, %v1440_v54  ;;  %v1467_v56 = vsel %vm1466_vm14, %v2387_v5, %v1463_v51 }
 0x4b2   : > { %v1472_v0 = vsel %vm1469_vm15, %v1471_v59, %v1467_v56 }
 0x4b3   : > { %v1442_v7 = vmul.f32 %v2389_v10, %v1441_v61  ;;  %v1478_v54 = vsub.f32 1.0, %v1472_v0 }
 0x4b5   : > { %v1443_v1 = vadd.f32 %v2389_v10, %v1442_v7 }
 0x4b7   : > { %v1447_v53 = vsel %vm1446_vm10, %v2389_v10, %v1443_v1  ;;  %v1480_v10 = vmul.f32 %v1472_v0, %v3547_v49 }
 0x4b8   : > { %v1452_v9 = vsel %vm1449_vm11, %v1451_v50, %v1447_v53 }
 0x4b9   : > { %v1475_v60 = vmul.f32 %v1474_v57, %v1452_v9 }
 0x4bb   : > { %v1476_v8 = vadd.f32 %v1475_v60, %v3945_v6 }
 0x4bd   : > { %2390 = vtanh.f32 %v1476_v8 }
 0x4c3   : > { %v2391_v62 = vpop.eup %2390 }
 0x4c4   : > { %v1479_v61 = vmul.f32 %v2391_v62, %v1478_v54 }
 0x4c6   : > { %v1481_v58 = vadd.f32 %v1480_v10, %v1479_v61 }
 0x4c8   : > { %1502 = vmatmul.f32.vlgmr.msra.gmra.mxu2 %v1481_v58  ;;  %1522 = vmatmul.f32.vlgmr.msra.gmra.mxu3 %v1481_v58 }
 0x4c9   : > { %1542 = vmatmul.f32.vlgmr.msra.gmra.mxu0 %v1481_v58 }
 0x546   : > { %v1543_v54 = vpop.f32.mrf.mxu0 }
 0x54b   : > { %v1503_v7 = vpop.f32.mrf.mxu2  ;;  %v1523_v4 = vpop.f32.mrf.mxu3 }
 0x54c   : > { %v1546_v2 = vadd.f32 %v1503_v7, %v3946_v52  ;;  %v1566_v1 = vadd.f32 %v1523_v4, %v3947_v3  ;;  %v1586_v7 = vadd.f32 %v3887_v48, %v1543_v54  ;;  %v1716_v54 = vld [vmem:[%s2688_s18 + $0x50] sm:$0xff] }
 0x54e   : > { %v2264_v5 = vmul.f32 -1.442695, %v1546_v2  ;;  %v2265_v50 = vmul.f32 -1.442695, %v1566_v1 }
 0x550   : > { %2392 = vpow2.f32 %v2264_v5 }
 0x551   : > { %2394 = vpow2.f32 %v2265_v50  ;;  %v3948_v50 = vld [vmem:[#allocation42_spill] sm:$0xff] }
 0x556   : > { %v2393_v57 = vpop.eup %2392 }
 0x557   : > { %v2395_v53 = vpop.eup %2394  ;;  %v1550_v9 = vadd.f32 1.0, %v2393_v57 }
 0x558   : > { %v1570_v51 = vadd.f32 1.0, %v2395_v53 }
 0x559   : > { %2396 = vrcp.f32 %v1550_v9  ;;  %v1562_v8 = vand.u32 2147483648, %v1550_v9  ;;  %v1560_v0 = vand.u32 2147483647, %v1550_v9  ;;  %vm1556_vm1 = vweird.f32 %v1550_v9 }
 0x55a   : > { %2398 = vrcp.f32 %v1570_v51  ;;  %v1582_v3 = vand.u32 2147483648, %v1570_v51  ;;  %vm1576_vm5 = vweird.f32 %v1570_v51  ;;  %v1580_v5 = vand.u32 2147483647, %v1570_v51 }
 0x55b   : > { %v1563_v10 = vor.u32 1.1754944e-38, %v1562_v8  ;;  %vm1561_vm3 = vcmp.eq.f32.partialorder %v1560_v0, 8.507059e+37  ;;  %v1718_v0 = vld [vmem:[%s2688_s18 + $0x60] sm:$0xff] }
 0x55c   : > { %vm1581_vm7 = vcmp.eq.f32.partialorder %v1580_v5, 8.507059e+37  ;;  %v1710_v5 = vld [vmem:[%s2688_s18 + $0x20] sm:$0xff] }
 0x55f   : > { %v2397_v49 = vpop.eup %2396 }
 0x560   : > { %v2399_v55 = vpop.eup %2398  ;;  %v1552_v60 = vmul.f32 %v2397_v49, %v1550_v9  ;;  %vm1557_vm0 = vweird.f32 %v2397_v49  ;;  %v1583_v9 = vor.u32 1.1754944e-38, %v1582_v3 }
 0x561   : > { %v1572_v63 = vmul.f32 %v2399_v55, %v1570_v51  ;;  %vm1558_vm2 = vmor %vm1556_vm1, %vm1557_vm0  ;;  %vm1577_vm4 = vweird.f32 %v2399_v55  ;;  %v1721_v51 = vld [vmem:[%s2688_s18 + $0x78] sm:$0xff]  ;;  %vm1742_vm0 = vcmask 7168  }
 0x562   : > { %v1553_v6 = vsub.f32 1.0, %v1552_v60  ;;  %vm1578_vm6 = vmor %vm1576_vm5, %vm1577_vm4  ;;  %1722 = vmatpush.msrb.mxu0 %v1721_v51  ;;  %v1706_v51 = vld [vmem:[%s2688_s18] sm:$0xff] }
 0x563   : > { %v1573_v56 = vsub.f32 1.0, %v1572_v63 }
 0x564   : > { %v1554_v59 = vmul.f32 %v2397_v49, %v1553_v6 }
 0x565   : > { %v1574_v62 = vmul.f32 %v2399_v55, %v1573_v56 }
 0x566   : > { %v1555_v61 = vadd.f32 %v2397_v49, %v1554_v59  ;;  %v1719_v59 = vld [vmem:[%s2688_s18 + $0x68] sm:$0xff] }
 0x567   : > { %v1575_v2 = vadd.f32 %v2399_v55, %v1574_v62  ;;  %v1715_v62 = vld [vmem:[%s2688_s18 + $0x48] sm:$0xff] }
 0x568   : > { %v1559_v4 = vsel %vm1558_vm2, %v2397_v49, %v1555_v61  ;;  %v1714_v61 = vld [vmem:[%s2688_s18 + $0x40] sm:$0xff] }
 0x569   : > { %v1564_v52 = vsel %vm1561_vm3, %v1563_v10, %v1559_v4  ;;  %v1579_v53 = vsel %vm1578_vm6, %v2399_v55, %v1575_v2  ;;  %v1720_v55 = vld [vmem:[%s2688_s18 + $0x70] sm:$0xff]  ;;  %v3949_v4 = vld [vmem:[#allocation34_spill] sm:$0xff] }
 0x56a   : > { %v1587_v1 = vmul.f32 %v1586_v7, %v1564_v52  ;;  %v1584_v49 = vsel %vm1581_vm7, %v1583_v9, %v1579_v53  ;;  %1723 = vmatpush.msrb.mxu0 %v1720_v55  ;;  %v1713_v7 = vld [vmem:[%s2688_s18 + $0x38] sm:$0xff]  ;;  %v1712_v2 = vld [vmem:[%s2688_s18 + $0x30] sm:$0xff] }
 0x56b   : > { %v1590_v60 = vsub.f32 1.0, %v1584_v49  ;;  %v1592_v8 = vmul.f32 %v1584_v49, %v1481_v58  ;;  %v1717_v58 = vld [vmem:[%s2688_s18 + $0x58] sm:$0xff]  ;;  %v1708_v49 = vld [vmem:[%s2688_s18 + $0x10] sm:$0xff] }
 0x56c   : > { %v1588_v57 = vadd.f32 %v1587_v1, %v3948_v50  ;;  %1724 = vmatpush.msrb.mxu0 %v1719_v59  ;;  %v1711_v1 = vld [vmem:[%s2688_s18 + $0x28] sm:$0xff]  ;;  %v3950_v53 = vld [vmem:[#allocation32_spill] sm:$0xff] }
 0x56e   : > { %2400 = vtanh.f32 %v1588_v57  ;;  %1725 = vmatpush.msrb.mxu0 %v1718_v0  ;;  %v1709_v57 = vld [vmem:[%s2688_s18 + $0x18] sm:$0xff] }
 0x570   : > { %1726 = vmatpush.msrb.mxu0 %v1717_v58 }
 0x572   : > { %1727 = vmatpush.msrb.mxu0 %v1716_v54 }
 0x574   : > { %v2401_v63 = vpop.eup %2400  ;;  %1728 = vmatpush.msrb.mxu0 %v1715_v62 }
 0x575   : > { %v1591_v6 = vmul.f32 %v2401_v63, %v1590_v60  ;;  %v1707_v63 = vld [vmem:[%s2688_s18 + $0x8] sm:$0xff] }
 0x576   : > { %1729 = vmatpush.msrb.mxu0 %v1714_v61 }
 0x577   : > { %v3577_v56 = vadd.f32 %v1592_v8, %v1591_v6 }
 0x578   : > { %1730 = vmatpush.msrb.mxu0 %v1713_v7 }
 0x579   : > { %1614 = vmatmul.f32.vlgmr.msra.gmra.mxu1 %v3577_v56  ;;  %1634 = vmatmul.f32.vlgmr.msrb.gmra.mxu2 %v3577_v56 }
 0x57a   : > { %1654 = vmatmul.f32.vlgmr.msrb.gmra.mxu3 %v3577_v56  ;;  %1731 = vmatpush.msrb.mxu0 %v1712_v2 }
 0x57c   : > { %1732 = vmatpush.msrb.mxu0 %v1711_v1 }
 0x57e   : > { %1733 = vmatpush.msrb.mxu0 %v1710_v5 }
 0x580   : > { %1734 = vmatpush.msrb.mxu0 %v1709_v57 }
 0x582   : > { %1735 = vmatpush.msrb.mxu0 %v1708_v49  ;;  %v3953_v49 = vld [vmem:[#allocation21_spill] sm:$0xff] }
 0x584   : > { %1736 = vmatpush.msrb.mxu0 %v1707_v63 }
 0x586   : > { %1737 = vmatpush.msrb.mxu0 %v1706_v51 }
 0x5f6   : > { %v1615_v10 = vpop.f32.mrf.mxu1 }
 0x5f7   : > { %v1658_v52 = vadd.f32 %v1615_v10, %v3949_v4  ;;  %v3951_v4 = vld [vmem:[#allocation35_spill] sm:$0xff] }
 0x5f9   : > { %v2266_v3 = vmul.f32 -1.442695, %v1658_v52  ;;  %v3952_v52 = vld [vmem:[#allocation43_spill] sm:$0xff] }
 0x5fa   : > { %v744_v2 = vadd.f32 %v3952_v52, %v3951_v4 }
 0x5fb   : > { %2402 = vpow2.f32 %v2266_v3 }
 0x5fc   : > { %v1635_v50 = vpop.f32.mrf.mxu2 }
 0x5fd   : > { %v1678_v9 = vadd.f32 %v1635_v50, %v3950_v53  ;;  %v1655_v3 = vpop.f32.mrf.mxu3 }
 0x5ff   : > { %v2267_v60 = vmul.f32 -1.442695, %v1678_v9  ;;  %v1698_v9 = vadd.f32 %v3887_v48, %v1655_v3 }
 0x601   : > { %v2403_v6 = vpop.eup %2402  ;;  %2404 = vpow2.f32 %v2267_v60  ;;  %v785_v60 = vadd.f32 %v3953_v49, %v744_v2 }
 0x602   : > { %v1662_v8 = vadd.f32 1.0, %v2403_v6 }
 0x604   : > { %2406 = vrcp.f32 %v1662_v8  ;;  %v1674_v62 = vand.u32 2147483648, %v1662_v8  ;;  %v1672_v10 = vand.u32 2147483647, %v1662_v8  ;;  %vm1668_vm9 = vweird.f32 %v1662_v8 }
 0x606   : > { %v1675_v50 = vor.u32 1.1754944e-38, %v1674_v62  ;;  %vm1673_vm11 = vcmp.eq.f32.partialorder %v1672_v10, 8.507059e+37 }
 0x607   : > { %v2405_v55 = vpop.eup %2404 }
 0x608   : > { %v1682_v59 = vadd.f32 1.0, %v2405_v55 }
 0x60a   : > { %v2407_v0 = vpop.eup %2406  ;;  %2408 = vrcp.f32 %v1682_v59  ;;  %v1694_v55 = vand.u32 2147483648, %v1682_v59  ;;  %vm1688_vm13 = vweird.f32 %v1682_v59 }
 0x60b   : > { %v1664_v58 = vmul.f32 %v2407_v0, %v1662_v8  ;;  %vm1669_vm8 = vweird.f32 %v2407_v0 }
 0x60c   : > { %vm1670_vm10 = vmor %vm1668_vm9, %vm1669_vm8  ;;  %v1695_v62 = vor.u32 1.1754944e-38, %v1694_v55 }
 0x60d   : > { %v1665_v54 = vsub.f32 1.0, %v1664_v58  ;;  %v1692_v58 = vand.u32 2147483647, %v1682_v59 }
 0x60f   : > { %v1666_v61 = vmul.f32 %v2407_v0, %v1665_v54  ;;  %vm1693_vm15 = vcmp.eq.f32.partialorder %v1692_v58, 8.507059e+37 }
 0x610   : > { %v2409_v7 = vpop.eup %2408 }
 0x611   : > { %v1684_v1 = vmul.f32 %v2409_v7, %v1682_v59  ;;  %v1667_v5 = vadd.f32 %v2407_v0, %v1666_v61  ;;  %vm1689_vm12 = vweird.f32 %v2409_v7 }
 0x612   : > { %vm1690_vm14 = vmor %vm1688_vm13, %vm1689_vm12 }
 0x613   : > { %v1685_v57 = vsub.f32 1.0, %v1684_v1  ;;  %v1671_v53 = vsel %vm1670_vm10, %v2407_v0, %v1667_v5 }
 0x614   : > { %v1676_v63 = vsel %vm1673_vm11, %v1675_v50, %v1671_v53 }
 0x615   : > { %v1686_v6 = vmul.f32 %v2409_v7, %v1685_v57  ;;  %v1699_v51 = vmul.f32 %v1698_v9, %v1676_v63 }
 0x617   : > { %v1700_v54 = vadd.f32 %v1699_v51, %v785_v60  ;;  %v1687_v61 = vadd.f32 %v2409_v7, %v1686_v6 }
 0x619   : > { %2410 = vtanh.f32 %v1700_v54  ;;  %v1691_v8 = vsel %vm1690_vm14, %v2409_v7, %v1687_v61 }
 0x61a   : > { %v1696_v0 = vsel %vm1693_vm15, %v1695_v62, %v1691_v8 }
 0x61b   : > { %v1702_v10 = vsub.f32 1.0, %v1696_v0  ;;  %v1704_v52 = vmul.f32 %v1696_v0, %v3577_v56 }
 0x61f   : > { %v2411_v48 = vpop.eup %2410 }
 0x620   : > { %v1703_v4 = vmul.f32 %v2411_v48, %v1702_v10 }
 0x622   : > { %v1705_v2 = vadd.f32 %v1704_v52, %v1703_v4 }
 0x624   : > { %1738 = vmatmul.f32.vlgmr.msrb.gmra.mxu0 %v1705_v2 }
 0x6a1   : > { %v1739_v3 = vpop.f32.mrf.mxu0 }
 0x6a2   : > { %1743 = vst.msk [vmem:[%s2693_s12] sm:$0xff] %vm1742_vm0, %v1739_v3 }
 0x6a3 PF: > { %p2268_p11 = scmp.ne.s32.totalorder %s2580_s25, 1 }
 0x6a5   : > { %1747 = sbr.rel (%p2268_p11) target bundleno = 2074 (0x81a), region = 60 }
 0x6aa   : > { %v1797_v56 = vld [vmem:[%s2661_s21 + $0x170] sm:$0xff]  ;;  %v1794_v7 = vld [vmem:[%s2661_s21 + $0x158] sm:$0xff]  ;;  %v1796_v5 = vld [vmem:[%s2661_s21 + $0x168] sm:$0xff]  ;;  %vm2119_vm9 = vcmask 7168  }
 0x6ab   : > { %v1845_v59 = vld [vmem:[%s2661_s21 + $0x2f0] sm:$0xff]  ;;  %1895 = vmatpush.msra.mxu2 %v1797_v56  ;;  %v1842_v1 = vld [vmem:[%s2661_s21 + $0x2d8] sm:$0xff]  ;;  %1855 = vmatpush.msra.mxu0 %v1796_v5  ;;  %v1791_v50 = vld [vmem:[%s2661_s21 + $0x140] sm:$0xff] }
 0x6ac   : > { %1915 = vmatpush.msra.mxu3 %v1845_v59  ;;  %v1839_v57 = vld [vmem:[%s2661_s21 + $0x2c0] sm:$0xff]  ;;  %v1793_v53 = vld [vmem:[%s2661_s21 + $0x150] sm:$0xff]  ;;  %v1790_v9 = vld [vmem:[%s2661_s21 + $0x138] sm:$0xff] }
 0x6ad   : > { %1896 = vmatpush.msra.mxu2 %v1794_v7  ;;  %1856 = vmatpush.msra.mxu0 %v1793_v53  ;;  %v1788_v49 = vld [vmem:[%s2661_s21 + $0x128] sm:$0xff]  ;;  %v1787_v63 = vld [vmem:[%s2661_s21 + $0x120] sm:$0xff]  ;;  %v1785_v6 = vld [vmem:[%s2661_s21 + $0x110] sm:$0xff] }
 0x6ae   : > { %1916 = vmatpush.msra.mxu3 %v1842_v1  ;;  %v1836_v60 = vld [vmem:[%s2661_s21 + $0x2a8] sm:$0xff]  ;;  %v1833_v51 = vld [vmem:[%s2661_s21 + $0x290] sm:$0xff]  ;;  %v1782_v58 = vld [vmem:[%s2661_s21 + $0xf8] sm:$0xff] }
 0x6af   : > { %1897 = vmatpush.msra.mxu2 %v1791_v50  ;;  %1857 = vmatpush.msra.mxu0 %v1790_v9  ;;  %v1784_v55 = vld [vmem:[%s2661_s21 + $0x108] sm:$0xff]  ;;  %v1830_v54 = vld [vmem:[%s2661_s21 + $0x278] sm:$0xff]  ;;  %v1781_v61 = vld [vmem:[%s2661_s21 + $0xf0] sm:$0xff] }
 0x6b0   : > { %1917 = vmatpush.msra.mxu3 %v1839_v57  ;;  %v1779_v8 = vld [vmem:[%s2661_s21 + $0xe0] sm:$0xff]  ;;  %v1778_v0 = vld [vmem:[%s2661_s21 + $0xd8] sm:$0xff]  ;;  %v1776_v10 = vld [vmem:[%s2661_s21 + $0xc8] sm:$0xff] }
 0x6b1   : > { %1898 = vmatpush.msra.mxu2 %v1788_v49  ;;  %1858 = vmatpush.msra.mxu0 %v1787_v63  ;;  %v1827_v62 = vld [vmem:[%s2661_s21 + $0x260] sm:$0xff]  ;;  %v1824_v48 = vld [vmem:[%s2661_s21 + $0x248] sm:$0xff]  ;;  %v1773_v2 = vld [vmem:[%s2661_s21 + $0xb0] sm:$0xff] }
 0x6b2   : > { %1918 = vmatpush.msra.mxu3 %v1836_v60  ;;  %v1775_v4 = vld [vmem:[%s2661_s21 + $0xc0] sm:$0xff]  ;;  %v1844_v52 = vld [vmem:[%s2661_s21 + $0x2e8] sm:$0xff]  ;;  %v1821_v3 = vld [vmem:[%s2661_s21 + $0x230] sm:$0xff] }
 0x6b3   : > { %1899 = vmatpush.msra.mxu2 %v1785_v6  ;;  %1859 = vmatpush.msra.mxu0 %v1784_v55  ;;  %v1772_v56 = vld [vmem:[%s2661_s21 + $0xa8] sm:$0xff]  ;;  %v1841_v59 = vld [vmem:[%s2661_s21 + $0x2d0] sm:$0xff]  ;;  %v1770_v7 = vld [vmem:[%s2661_s21 + $0x98] sm:$0xff] }
 0x6b4   : > { %1919 = vmatpush.msra.mxu3 %v1833_v51  ;;  %1875 = vmatpush.msra.mxu1 %v1844_v52  ;;  %v1818_v1 = vld [vmem:[%s2661_s21 + $0x218] sm:$0xff]  ;;  %v1769_v50 = vld [vmem:[%s2661_s21 + $0x90] sm:$0xff]  ;;  %v1835_v57 = vld [vmem:[%s2661_s21 + $0x2a0] sm:$0xff] }
 0x6b5   : > { %1900 = vmatpush.msra.mxu2 %v1782_v58  ;;  %1860 = vmatpush.msra.mxu0 %v1781_v61  ;;  %v1838_v5 = vld [vmem:[%s2661_s21 + $0x2b8] sm:$0xff]  ;;  %v1767_v53 = vld [vmem:[%s2661_s21 + $0x80] sm:$0xff]  ;;  %v1832_v60 = vld [vmem:[%s2661_s21 + $0x288] sm:$0xff] }
 0x6b6   : > { %1920 = vmatpush.msra.mxu3 %v1830_v54  ;;  %1876 = vmatpush.msra.mxu1 %v1841_v59  ;;  %v1815_v9 = vld [vmem:[%s2661_s21 + $0x200] sm:$0xff]  ;;  %v1766_v49 = vld [vmem:[%s2661_s21 + $0x78] sm:$0xff]  ;;  %v1764_v63 = vld [vmem:[%s2661_s21 + $0x68] sm:$0xff] }
 0x6b7   : > { %1901 = vmatpush.msra.mxu2 %v1779_v8  ;;  %1861 = vmatpush.msra.mxu0 %v1778_v0  ;;  %v1812_v6 = vld [vmem:[%s2661_s21 + $0x1e8] sm:$0xff]  ;;  %v1763_v51 = vld [vmem:[%s2661_s21 + $0x60] sm:$0xff]  ;;  %v1829_v55 = vld [vmem:[%s2661_s21 + $0x270] sm:$0xff] }
 0x6b8   : > { %1921 = vmatpush.msra.mxu3 %v1827_v62  ;;  %1877 = vmatpush.msra.mxu1 %v1838_v5  ;;  %v1761_v58 = vld [vmem:[%s2661_s21 + $0x50] sm:$0xff]  ;;  %v1760_v61 = vld [vmem:[%s2661_s21 + $0x48] sm:$0xff]  ;;  %v1826_v8 = vld [vmem:[%s2661_s21 + $0x258] sm:$0xff] }
 0x6b9   : > { %1902 = vmatpush.msra.mxu2 %v1776_v10  ;;  %1862 = vmatpush.msra.mxu0 %v1775_v4  ;;  %v1809_v54 = vld [vmem:[%s2661_s21 + $0x1d0] sm:$0xff]  ;;  %v1758_v62 = vld [vmem:[%s2661_s21 + $0x38] sm:$0xff]  ;;  %v1755_v4 = vld [vmem:[%s2661_s21 + $0x20] sm:$0xff] }
 0x6ba   : > { %1922 = vmatpush.msra.mxu3 %v1824_v48  ;;  %1878 = vmatpush.msra.mxu1 %v1835_v57  ;;  %v1806_v0 = vld [vmem:[%s2661_s21 + $0x1b8] sm:$0xff]  ;;  %v1757_v10 = vld [vmem:[%s2661_s21 + $0x30] sm:$0xff]  ;;  %v1823_v48 = vld [vmem:[%s2661_s21 + $0x240] sm:$0xff] }
 0x6bb   : > { %1903 = vmatpush.msra.mxu2 %v1773_v2  ;;  %1863 = vmatpush.msra.mxu0 %v1772_v56  ;;  %v1803_v52 = vld [vmem:[%s2661_s21 + $0x1a0] sm:$0xff]  ;;  %v1754_v2 = vld [vmem:[%s2661_s21 + $0x18] sm:$0xff]  ;;  %v1752_v56 = vld [vmem:[%s2661_s21 + $0x8] sm:$0xff] }
 0x6bc   : > { %1923 = vmatpush.msra.mxu3 %v1821_v3  ;;  %1879 = vmatpush.msra.mxu1 %v1832_v60  ;;  %v1820_v3 = vld [vmem:[%s2661_s21 + $0x228] sm:$0xff]  ;;  %v1798_v5 = vld [vmem:[%s2661_s21 + $0x178] sm:$0xff]  ;;  %v1795_v57 = vld [vmem:[%s2661_s21 + $0x160] sm:$0xff] }
 0x6bd   : > { %1904 = vmatpush.msra.mxu2 %v1770_v7  ;;  %1864 = vmatpush.msra.mxu0 %v1769_v50  ;;  %v1800_v59 = vld [vmem:[%s2661_s21 + $0x188] sm:$0xff]  ;;  %v1751_v7 = vld [vmem:[%s2661_s21] sm:$0xff]  ;;  %v1814_v50 = vld [vmem:[%s2661_s21 + $0x1f8] sm:$0xff] }
 0x6be   : > { %1924 = vmatpush.msra.mxu3 %v1818_v1  ;;  %1880 = vmatpush.msra.mxu1 %v1829_v55  ;;  %v1817_v1 = vld [vmem:[%s2661_s21 + $0x210] sm:$0xff]  ;;  %v3957_v60 = vld [vmem:[#allocation16_spill] sm:$0xff]  ;;  %v3960_v55 = vld [vmem:[#allocation9_spill] sm:$0xff] }
 0x6bf   : > { %1905 = vmatpush.msra.mxu2 %v1767_v53  ;;  %1865 = vmatpush.msra.mxu0 %v1766_v49  ;;  %v1811_v53 = vld [vmem:[%s2661_s21 + $0x1e0] sm:$0xff]  ;;  %v3956_v49 = vld [vmem:[#allocation15_spill] sm:$0xff] }
 0x6c0   : > { %1925 = vmatpush.msra.mxu3 %v1815_v9  ;;  %1881 = vmatpush.msra.mxu1 %v1826_v8  ;;  %v3954_v9 = vld [vmem:[#allocation18_spill] sm:$0xff]  ;;  %v2525_v8 = vmov 0.0  }
 0x6c1   : > { %1906 = vmatpush.msra.mxu2 %v1764_v63  ;;  %1866 = vmatpush.msra.mxu0 %v1763_v51  ;;  %v3958_v63 = vld [vmem:[#allocation12_spill] sm:$0xff]  ;;  %v1756_v51 = vld [vmem:[%s2661_s21 + $0x28] sm:$0xff] }
 0x6c2   : > { %1926 = vmatpush.msra.mxu3 %v1812_v6  ;;  %1882 = vmatpush.msra.mxu1 %v1823_v48  ;;  %v3959_v6 = vld [vmem:[#allocation13_spill] sm:$0xff] }
 0x6c3   : > { %1907 = vmatpush.msra.mxu2 %v1761_v58  ;;  %1867 = vmatpush.msra.mxu0 %v1760_v61  ;;  %v3961_v58 = vld [vmem:[#allocation10_spill] sm:$0xff]  ;;  %v1831_v61 = vld [vmem:[%s2661_s21 + $0x280] sm:$0xff] }
 0x6c4   : > { %1927 = vmatpush.msra.mxu3 %v1809_v54  ;;  %1883 = vmatpush.msra.mxu1 %v1820_v3  ;;  %v1753_v54 = vld [vmem:[%s2661_s21 + $0x10] sm:$0xff]  ;;  %v1819_v48 = vld [vmem:[%s2661_s21 + $0x220] sm:$0xff]  ;;  %v2094_v3 = vld [vmem:[%s2688_s18 + $0x58] sm:$0xff] }
 0x6c5   : > { %1908 = vmatpush.msra.mxu2 %v1758_v62  ;;  %1868 = vmatpush.msra.mxu0 %v1757_v10  ;;  %v1828_v62 = vld [vmem:[%s2661_s21 + $0x268] sm:$0xff]  ;;  %v1822_v10 = vld [vmem:[%s2661_s21 + $0x238] sm:$0xff] }
 0x6c6   : > { %1928 = vmatpush.msra.mxu3 %v1806_v0  ;;  %1884 = vmatpush.msra.mxu1 %v1817_v1  ;;  %v1825_v0 = vld [vmem:[%s2661_s21 + $0x250] sm:$0xff]  ;;  %v2092_v1 = vld [vmem:[%s2688_s18 + $0x48] sm:$0xff] }
 0x6c7   : > { %1909 = vmatpush.msra.mxu2 %v1755_v4  ;;  %1869 = vmatpush.msra.mxu0 %v1754_v2  ;;  %v1816_v4 = vld [vmem:[%s2661_s21 + $0x208] sm:$0xff] }
 0x6c8   : > { %1929 = vmatpush.msra.mxu3 %v1803_v52  ;;  %1885 = vmatpush.msra.mxu1 %v1814_v50  ;;  %v1801_v52 = vld [vmem:[%s2661_s21 + $0x190] sm:$0xff] }
 0x6c9   : > { %1910 = vmatpush.msra.mxu2 %v1752_v56  ;;  %1870 = vmatpush.msra.mxu0 %v1751_v7  ;;  %v2093_v7 = vld [vmem:[%s2688_s18 + $0x50] sm:$0xff] }
 0x6ca   : > { %1930 = vmatpush.msra.mxu3 %v1800_v59  ;;  %1886 = vmatpush.msra.mxu1 %v1811_v53 }
 0x6cb   : > { %1975 = vmatpush.msrb.mxu2 %v2835_v45  ;;  %1935 = vmatpush.msrb.mxu0 %v1798_v5  ;;  %v1792_v45 = vld [vmem:[%s2661_s21 + $0x148] sm:$0xff] }
 0x6cc   : > { %1995 = vmatpush.msrb.mxu3 %v2838_v46  ;;  %v1808_v46 = vld [vmem:[%s2661_s21 + $0x1c8] sm:$0xff] }
 0x6cd   : > { %1976 = vmatpush.msrb.mxu2 %v2826_v42  ;;  %1936 = vmatpush.msrb.mxu0 %v1795_v57  ;;  %v1789_v42 = vld [vmem:[%s2661_s21 + $0x130] sm:$0xff] }
 0x6ce   : > { %1996 = vmatpush.msrb.mxu3 %v2829_v43  ;;  %v1805_v43 = vld [vmem:[%s2661_s21 + $0x1b0] sm:$0xff]  ;;  %1887 = vmatpush.msra.mxu1 %v1808_v46 }
 0x6cf   : > { %1977 = vmatpush.msrb.mxu2 %v2817_v39  ;;  %1937 = vmatpush.msrb.mxu0 %v1792_v45  ;;  %v1786_v39 = vld [vmem:[%s2661_s21 + $0x118] sm:$0xff]  ;;  %v2091_v45 = vld [vmem:[%s2688_s18 + $0x40] sm:$0xff] }
 0x6d0   : > { %1997 = vmatpush.msrb.mxu3 %v2820_v40  ;;  %v3687_v40 = vld [vmem:[%s3804_s0 + $0x70] sm:$0xff]  ;;  %1888 = vmatpush.msra.mxu1 %v1805_v43 }
 0x6d1   : > { %1978 = vmatpush.msrb.mxu2 %v2804_v36  ;;  %1938 = vmatpush.msrb.mxu0 %v1789_v42  ;;  %v1783_v36 = vld [vmem:[%s2661_s21 + $0x100] sm:$0xff]  ;;  %v2090_v42 = vld [vmem:[%s2688_s18 + $0x38] sm:$0xff] }
 0x6d2   : > { %1998 = vmatpush.msrb.mxu3 %v2807_v37  ;;  %1911 = vmatmul.f32.vlgmr.msra.gmra.mxu2 %v3687_v40  ;;  %v1802_v37 = vld [vmem:[%s2661_s21 + $0x198] sm:$0xff] }
 0x6d3   : > { %1979 = vmatpush.msrb.mxu2 %v2795_v33  ;;  %v3695_v33 = vld [vmem:[%s3804_s0 + $0x78] sm:$0xff]  ;;  %1939 = vmatpush.msrb.mxu0 %v1786_v39 }
 0x6d4   : > { %1999 = vmatpush.msrb.mxu3 %v2798_v34  ;;  %v1780_v34 = vld [vmem:[%s2661_s21 + $0xe8] sm:$0xff]  ;;  %1889 = vmatpush.msra.mxu1 %v1802_v37 }
 0x6d5   : > { %1980 = vmatpush.msrb.mxu2 %v2786_v30  ;;  %1940 = vmatpush.msrb.mxu0 %v1783_v36  ;;  %v1777_v30 = vld [vmem:[%s2661_s21 + $0xd0] sm:$0xff] }
 0x6d6   : > { %2000 = vmatpush.msrb.mxu3 %v2789_v31  ;;  %v1799_v31 = vld [vmem:[%s2661_s21 + $0x180] sm:$0xff]  ;;  %1871 = vmatmul.f32.vlgmr.msra.gmra.mxu0 %v3687_v40 }
 0x6d7   : > { %1981 = vmatpush.msrb.mxu2 %v2777_v27  ;;  %1931 = vmatmul.f32.vlgmr.msra.gmra.mxu3 %v3695_v33  ;;  %v1774_v27 = vld [vmem:[%s2661_s21 + $0xb8] sm:$0xff] }
 0x6d8   : > { %2001 = vmatpush.msrb.mxu3 %v2780_v28  ;;  %1941 = vmatpush.msrb.mxu0 %v1780_v34  ;;  %v1846_v28 = vld [vmem:[%s2661_s21 + $0x2f8] sm:$0xff] }
 0x6d9   : > { %1982 = vmatpush.msrb.mxu2 %v2768_v24  ;;  %1890 = vmatpush.msra.mxu1 %v1799_v31  ;;  %v1771_v24 = vld [vmem:[%s2661_s21 + $0xa0] sm:$0xff] }
 0x6da   : > { %2002 = vmatpush.msrb.mxu3 %v2771_v25  ;;  %1942 = vmatpush.msrb.mxu0 %v1777_v30  ;;  %v1843_v25 = vld [vmem:[%s2661_s21 + $0x2e0] sm:$0xff]  ;;  %v2088_v30 = vld [vmem:[%s2688_s18 + $0x28] sm:$0xff] }
 0x6db   : > { %1983 = vmatpush.msrb.mxu2 %v2759_v21  ;;  %1955 = vmatpush.msrb.mxu1 %v1846_v28  ;;  %v1768_v21 = vld [vmem:[%s2661_s21 + $0x88] sm:$0xff]  ;;  %v2087_v31 = vld [vmem:[%s2688_s18 + $0x20] sm:$0xff]  ;;  %v2086_v28 = vld [vmem:[%s2688_s18 + $0x18] sm:$0xff] }
 0x6dc   : > { %2003 = vmatpush.msrb.mxu3 %v2762_v22  ;;  %1943 = vmatpush.msrb.mxu0 %v1774_v27  ;;  %v1840_v22 = vld [vmem:[%s2661_s21 + $0x2c8] sm:$0xff] }
 0x6dd   : > { %1984 = vmatpush.msrb.mxu2 %v2750_v18  ;;  %1956 = vmatpush.msrb.mxu1 %v1843_v25  ;;  %v1765_v18 = vld [vmem:[%s2661_s21 + $0x70] sm:$0xff]  ;;  %v2084_v25 = vld [vmem:[%s2688_s18 + $0x8] sm:$0xff] }
 0x6de   : > { %2004 = vmatpush.msrb.mxu3 %v2753_v19  ;;  %1944 = vmatpush.msrb.mxu0 %v1771_v24  ;;  %v1837_v19 = vld [vmem:[%s2661_s21 + $0x2b0] sm:$0xff] }
 0x6df   : > { %1985 = vmatpush.msrb.mxu2 %v2741_v15  ;;  %1957 = vmatpush.msrb.mxu1 %v1840_v22  ;;  %v3955_v15 = vld [vmem:[#allocation19_spill] sm:$0xff]  ;;  %v2083_v22 = vld [vmem:[%s2688_s18] sm:$0xff] }
 0x6e0   : > { %2005 = vmatpush.msrb.mxu3 %v2744_v16  ;;  %1945 = vmatpush.msrb.mxu0 %v1768_v21  ;;  %v1762_v16 = vld [vmem:[%s2661_s21 + $0x58] sm:$0xff]  ;;  %v2085_v24 = vld [vmem:[%s2688_s18 + $0x10] sm:$0xff] }
 0x6e1   : > { %1986 = vmatpush.msrb.mxu2 %v2732_v12  ;;  %1958 = vmatpush.msrb.mxu1 %v1837_v19  ;;  %v1759_v12 = vld [vmem:[%s2661_s21 + $0x40] sm:$0xff] }
 0x6e2   : > { %2006 = vmatpush.msrb.mxu3 %v2735_v13  ;;  %1946 = vmatpush.msrb.mxu0 %v1765_v18  ;;  %v1834_v13 = vld [vmem:[%s2661_s21 + $0x298] sm:$0xff] }
 0x6e3   : > { %1987 = vmatpush.msrb.mxu2 %v3954_v9  ;;  %1891 = vmatmul.f32.vlgmr.msra.gmra.mxu1 %v3695_v33 }
 0x6e4   : > { %2007 = vmatpush.msrb.mxu3 %v3955_v15  ;;  %1947 = vmatpush.msrb.mxu0 %v1762_v16 }
 0x6e5   : > { %1988 = vmatpush.msrb.mxu2 %v3956_v49  ;;  %1959 = vmatpush.msrb.mxu1 %v1834_v13 }
 0x6e6   : > { %2008 = vmatpush.msrb.mxu3 %v3957_v60  ;;  %1948 = vmatpush.msrb.mxu0 %v1759_v12 }
 0x6e7   : > { %1989 = vmatpush.msrb.mxu2 %v3958_v63  ;;  %1960 = vmatpush.msrb.mxu1 %v1831_v61 }
 0x6e8   : > { %2009 = vmatpush.msrb.mxu3 %v3959_v6  ;;  %1949 = vmatpush.msrb.mxu0 %v1756_v51 }
 0x6e9   : > { %1990 = vmatpush.msrb.mxu2 %v3960_v55  ;;  %1961 = vmatpush.msrb.mxu1 %v1828_v62 }
 0x6ea   : > { %2010 = vmatpush.msrb.mxu3 %v3961_v58  ;;  %1991 = vmatmul.f32.vlgmr.msrb.gmra.mxu2 %v2525_v8 }
 0x6eb   : > { %2011 = vmatmul.f32.vlgmr.msrb.gmra.mxu3 %v2525_v8  ;;  %1950 = vmatpush.msrb.mxu0 %v1753_v54 }
 0x6ec   : > { %1962 = vmatpush.msrb.mxu1 %v1825_v0  ;;  %1951 = vmatmul.f32.vlgmr.msrb.gmra.mxu0 %v3687_v40 }
 0x6ed   : > { %2015 = vmatpush.msra.mxu0 %v2841_v47  ;;  %v1813_v47 = vld [vmem:[%s2661_s21 + $0x1f0] sm:$0xff] }
 0x6ee   : > { %1963 = vmatpush.msrb.mxu1 %v1822_v10 }
 0x6ef   : > { %2016 = vmatpush.msra.mxu0 %v2832_v44  ;;  %v1810_v44 = vld [vmem:[%s2661_s21 + $0x1d8] sm:$0xff] }
 0x6f0   : > { %1964 = vmatpush.msrb.mxu1 %v1819_v48 }
 0x6f1   : > { %2017 = vmatpush.msra.mxu0 %v2823_v41  ;;  %v1807_v41 = vld [vmem:[%s2661_s21 + $0x1c0] sm:$0xff] }
 0x6f2   : > { %1965 = vmatpush.msrb.mxu1 %v1816_v4  ;;  %v3965_v4 = vld [vmem:[#allocation20_spill] sm:$0xff] }
 0x6f3   : > { %2018 = vmatpush.msra.mxu0 %v2810_v38  ;;  %v1804_v38 = vld [vmem:[%s2661_s21 + $0x1a8] sm:$0xff] }
 0x6f4   : > { %1966 = vmatpush.msrb.mxu1 %v1813_v47 }
 0x6f5   : > { %2019 = vmatpush.msra.mxu0 %v2801_v35  ;;  %v3771_v35 = vld [vmem:[%s2683_s16] sm:$0x7] }
 0x6f6   : > { %1967 = vmatpush.msrb.mxu1 %v1810_v44  ;;  %v1850_v56 = vperm.slane %v3771_v35, 1  ;;  %v1849_v59 = vperm.slane %v3771_v35, 0  ;;  %v1851_v13 = vperm.slane %v3771_v35, 2 }
 0x6f7   : > { %2020 = vmatpush.msra.mxu0 %v2792_v32  ;;  %v2097_v32 = vld [vmem:[%s2688_s18 + $0x70] sm:$0xff] }
 0x6f8   : > { %1968 = vmatpush.msrb.mxu1 %v1807_v41 }
 0x6f9   : > { %2021 = vmatpush.msra.mxu0 %v2783_v29  ;;  %v3964_v29 = vld [vmem:[#allocation11_spill] sm:$0xff] }
 0x6fa   : > { %1969 = vmatpush.msrb.mxu1 %v1804_v38 }
 0x6fb   : > { %2022 = vmatpush.msra.mxu0 %v2774_v26  ;;  %v3962_v26 = vld [vmem:[#allocation17_spill] sm:$0xff] }
 0x6fc   : > { %1970 = vmatpush.msrb.mxu1 %v1801_v52 }
 0x6fd   : > { %2023 = vmatpush.msra.mxu0 %v2765_v23  ;;  %1971 = vmatmul.f32.vlgmr.msrb.gmra.mxu1 %v3695_v33  ;;  %v3963_v23 = vld [vmem:[#allocation14_spill] sm:$0xff]  ;;  %v2089_v33 = vld [vmem:[%s2688_s18 + $0x30] sm:$0xff] }
 0x6ff   : > { %2024 = vmatpush.msra.mxu0 %v2756_v20  ;;  %v2098_v20 = vld [vmem:[%s2688_s18 + $0x78] sm:$0xff] }
 0x700   : > { %2099 = vmatpush.msra.mxu1 %v2098_v20 }
 0x701   : > { %2025 = vmatpush.msra.mxu0 %v2747_v17  ;;  %v2096_v17 = vld [vmem:[%s2688_s18 + $0x68] sm:$0xff] }
 0x702   : > { %2100 = vmatpush.msra.mxu1 %v2097_v32 }
 0x703   : > { %2026 = vmatpush.msra.mxu0 %v2738_v14  ;;  %v2095_v14 = vld [vmem:[%s2688_s18 + $0x60] sm:$0xff] }
 0x704   : > { %2101 = vmatpush.msra.mxu1 %v2096_v17 }
 0x705   : > { %2027 = vmatpush.msra.mxu0 %v2729_v11 }
 0x706   : > { %2102 = vmatpush.msra.mxu1 %v2095_v14 }
 0x707   : > { %2028 = vmatpush.msra.mxu0 %v3962_v26 }
 0x708   : > { %2103 = vmatpush.msra.mxu1 %v2094_v3 }
 0x709   : > { %2029 = vmatpush.msra.mxu0 %v3963_v23 }
 0x70a   : > { %2104 = vmatpush.msra.mxu1 %v2093_v7 }
 0x70b   : > { %2030 = vmatpush.msra.mxu0 %v3964_v29 }
 0x70c   : > { %2031 = vmatmul.f32.vlgmr.msra.gmra.mxu0 %v2525_v8  ;;  %2105 = vmatpush.msra.mxu1 %v2092_v1 }
 0x70e   : > { %2106 = vmatpush.msra.mxu1 %v2091_v45 }
 0x710   : > { %2107 = vmatpush.msra.mxu1 %v2090_v42 }
 0x712   : > { %2108 = vmatpush.msra.mxu1 %v2089_v33 }
 0x714   : > { %2109 = vmatpush.msra.mxu1 %v2088_v30 }
 0x716   : > { %2110 = vmatpush.msra.mxu1 %v2087_v31 }
 0x718   : > { %2111 = vmatpush.msra.mxu1 %v2086_v28 }
 0x71a   : > { %2112 = vmatpush.msra.mxu1 %v2085_v24 }
 0x71c   : > { %2113 = vmatpush.msra.mxu1 %v2084_v25 }
 0x71e   : > { %2114 = vmatpush.msra.mxu1 %v2083_v22 }
 0x753   : > { %v1872_v5 = vpop.f32.mrf.mxu0 }
 0x754   : > { %v1873_v53 = vadd.f32 %v1872_v5, %v1849_v59 }
 0x755   : > { %v1912_v11 = vpop.f32.mrf.mxu2 }
 0x756   : > { %v1913_v57 = vadd.f32 %v1912_v11, %v1850_v56 }
 0x75a   : > { %v1932_v2 = vpop.f32.mrf.mxu3 }
 0x75b   : > { %v1933_v43 = vadd.f32 %v1932_v2, %v1913_v57 }
 0x760   : > { %v1892_v50 = vpop.f32.mrf.mxu1 }
 0x761   : > { %v1893_v46 = vadd.f32 %v1892_v50, %v1873_v53 }
 0x769   : > { %v1952_v15 = vpop.f32.mrf.mxu0 }
 0x76a   : > { %v1953_v61 = vadd.f32 %v1952_v15, %v1851_v13 }
 0x76d   : > { %v1992_v39 = vpop.f32.mrf.mxu2 }
 0x76e   : > { %v2035_v40 = vadd.f32 %v1992_v39, %v1893_v46  ;;  %v2012_v36 = vpop.f32.mrf.mxu3 }
 0x76f   : > { %v2055_v34 = vadd.f32 %v2012_v36, %v1933_v43 }
 0x770   : > { %v2271_v37 = vmul.f32 -1.442695, %v2035_v40 }
 0x771   : > { %v2272_v27 = vmul.f32 -1.442695, %v2055_v34 }
 0x772   : > { %2412 = vpow2.f32 %v2271_v37 }
 0x773   : > { %2414 = vpow2.f32 %v2272_v27 }
 0x778   : > { %v2413_v21 = vpop.eup %2412 }
 0x779   : > { %v2415_v18 = vpop.eup %2414  ;;  %v2039_v19 = vadd.f32 1.0, %v2413_v21 }
 0x77a   : > { %v2059_v9 = vadd.f32 1.0, %v2415_v18  ;;  %v1972_v62 = vpop.f32.mrf.mxu1 }
 0x77b   : > { %2416 = vrcp.f32 %v2039_v19  ;;  %v2051_v51 = vand.u32 2147483648, %v2039_v19  ;;  %v2049_v58 = vand.u32 2147483647, %v2039_v19  ;;  %vm2045_vm2 = vweird.f32 %v2039_v19 }
 0x77c   : > { %2418 = vrcp.f32 %v2059_v9  ;;  %v1973_v38 = vadd.f32 %v1972_v62, %v1953_v61  ;;  %v2071_v26 = vand.u32 2147483648, %v2059_v9  ;;  %vm2065_vm6 = vweird.f32 %v2059_v9 }
 0x77d   : > { %v2052_v10 = vor.u32 1.1754944e-38, %v2051_v51  ;;  %vm2050_vm4 = vcmp.eq.f32.partialorder %v2049_v58, 8.507059e+37  ;;  %v2069_v23 = vand.u32 2147483647, %v2059_v9 }
 0x77e   : > { %v2072_v32 = vor.u32 1.1754944e-38, %v2071_v26 }
 0x77f   : > { %vm2070_vm8 = vcmp.eq.f32.partialorder %v2069_v23, 8.507059e+37 }
 0x781   : > { %v2417_v16 = vpop.eup %2416 }
 0x782   : > { %v2419_v49 = vpop.eup %2418  ;;  %v2041_v60 = vmul.f32 %v2417_v16, %v2039_v19  ;;  %vm2046_vm1 = vweird.f32 %v2417_v16 }
 0x783   : > { %v2061_v12 = vmul.f32 %v2419_v49, %v2059_v9  ;;  %vm2047_vm3 = vmor %vm2045_vm2, %vm2046_vm1  ;;  %vm2066_vm5 = vweird.f32 %v2419_v49 }
 0x784   : > { %v2042_v63 = vsub.f32 1.0, %v2041_v60  ;;  %vm2067_vm7 = vmor %vm2065_vm6, %vm2066_vm5 }
 0x785   : > { %v2062_v6 = vsub.f32 1.0, %v2061_v12 }
 0x786   : > { %v2043_v55 = vmul.f32 %v2417_v16, %v2042_v63 }
 0x787   : > { %v2063_v54 = vmul.f32 %v2419_v49, %v2062_v6 }
 0x788   : > { %v2044_v8 = vadd.f32 %v2417_v16, %v2043_v55 }
 0x789   : > { %v2032_v0 = vpop.f32.mrf.mxu0  ;;  %v2064_v41 = vadd.f32 %v2419_v49, %v2063_v54 }
 0x78a   : > { %v2048_v48 = vsel %vm2047_vm3, %v2417_v16, %v2044_v8  ;;  %v2075_v47 = vadd.f32 %v3965_v4, %v2032_v0 }
 0x78b   : > { %v2053_v44 = vsel %vm2050_vm4, %v2052_v10, %v2048_v48  ;;  %v2068_v20 = vsel %vm2067_vm7, %v2419_v49, %v2064_v41 }
 0x78c   : > { %v2076_v52 = vmul.f32 %v2075_v47, %v2053_v44  ;;  %v2073_v17 = vsel %vm2070_vm8, %v2072_v32, %v2068_v20 }
 0x78d   : > { %v2079_v35 = vsub.f32 1.0, %v2073_v17  ;;  %v2081_v2 = vmul.f32 0.0, %v2073_v17 }
 0x78e   : > { %v2077_v29 = vadd.f32 %v2076_v52, %v1973_v38 }
 0x790   : > { %2420 = vtanh.f32 %v2077_v29 }
 0x796   : > { %v2421_v14 = vpop.eup %2420 }
 0x797   : > { %v2080_v11 = vmul.f32 %v2421_v14, %v2079_v35 }
 0x799   : > { %v2082_v3 = vadd.f32 %v2081_v2, %v2080_v11 }
 0x79b   : > { %2115 = vmatmul.f32.vlgmr.msra.gmra.mxu1 %v2082_v3 }
 0x818   : > { %v2116_v56 = vpop.f32.mrf.mxu1 }
 0x819   : > { %2120 = vst.msk [vmem:[%s2693_s12] sm:$0xff] %vm2119_vm9, %v2116_v56 }
 0x81a PF: > { %p19_p2 = scmp.ge.s32.totalorder %s2583_s26, 4   ;;  %s3966_s21 = smov %s2512_s22 }
 0x81b   : > { %s3967_s22 = smov %s2516_s23  ;;  %s3968_s23 = smov %s2593_s29 }
 0x81c   : > { %s3969_s24 = smov %s2583_s26  ;;  %21 = sbr.rel (!%p19_p2) target bundleno = 5 (0x5), region = 122 }
 0x821   :  { %2140 = vsyncpa [#allocation4], 1 }
 0x822   :  { %2142 = vsyncpa [#allocation4 + $0x1], 1 }
 0x823   :  { %2143 = vsyncpa [#allocation6], 1 }
 0x824   :  { %2145 = vsyncpa [#allocation6 + $0x1], 1 }

</bundles_post_ra>
